<compile_context>
chip_gen: v6e
topology: v6e:2x2x1
jax: 0.10.0
libtpu: 0.0.40
codegen_flags: <defaults>
</compile_context>

<pallas_src>
import jax
import jax.numpy as jnp
from jax import lax
from jax.experimental import pallas as pl
from jax.experimental.pallas import tpu as pltpu

LRELU_SLOPE = 0.05
BN_EPS = 1e-5

# bf16 MXU operands, f32 accumulation / statistics.
MATMUL_DTYPE = jnp.bfloat16

_TILE_M_CAP = 1024
_TILE_C = 256


def _round_up(x, m):
    return ((x + m - 1) // m) * m


_VMEM_CFG = None


def _vmem_cfg():
    """(vmem_limit_bytes, tile_budget_bytes) chosen from physical VMEM size."""
    global _VMEM_CFG
    if _VMEM_CFG is None:
        cap = 64 * 1024 * 1024
        try:
            cap = int(getattr(pltpu.get_tpu_info(), "vmem_capacity_bytes", cap))
        except Exception:
            pass
        if cap >= 100 * 1024 * 1024:          # v5e / v6e: 128 MiB physical VMEM
            _VMEM_CFG = (64 * 1024 * 1024, 48 * 1024 * 1024)
        else:                                  # v7x: 64 MiB physical VMEM
            _VMEM_CFG = (32 * 1024 * 1024, 24 * 1024 * 1024)
    return _VMEM_CFG


def _compiler_params(n_axes):
    return pltpu.CompilerParams(
        dimension_semantics=("parallel",) * n_axes,
        vmem_limit_bytes=_vmem_cfg()[0],
    )


# ----------------------------- Pallas kernels ------------------------------

def _matmul_stats_kernel(p_ref, w_ref, y_ref, stats_ref):
    """One (M-tile, C-tile) of conv-as-matmul + per-tile BN partial stats.

    p_ref: [tm, K] bf16   w_ref: [K, tc] bf16   y_ref: [tm, tc] f32
    stats_ref: [8, tc] f32, row 0 = per-channel sum, row 1 = sum of squares,
    rows 2..7 zero (sublane-aligned, unmasked store).  Global combine happens
    in JAX so both grid axes stay "parallel" / megacore-shardable.
    """
    y_ref[...] = jnp.dot(p_ref[...], w_ref[...],
                         preferred_element_type=jnp.float32)
    y = y_ref[...]
    s = jnp.sum(y, axis=0, keepdims=True)
    sq = jnp.sum(y * y, axis=0, keepdims=True)
    pad = jnp.zeros((6, s.shape[1]), jnp.float32)
    stats_ref[...] = jnp.concatenate([s, sq, pad], axis=0)


def _bn_lrelu_fc_kernel(y_ref, mean_ref, rstd_ref, w_ref, b_ref, o_ref):
    """conv4 tail: BN (gamma=1, beta=0, batch stats) + leaky_relu fused with
    the tiny 1x1 fc1 matmul.  w_ref / b_ref are zero-padded to 128 output
    columns so the store stays lane-dense; the wrapper slices back to 11."""
    h = (y_ref[...] - mean_ref[...]) * rstd_ref[...]
    h = jnp.maximum(h, LRELU_SLOPE * h)
    o_ref[...] = (
        jnp.dot(h.astype(w_ref.dtype), w_ref[...],
                preferred_element_type=jnp.float32)
        + b_ref[...]
    )


# ------------------------------- JAX glue -----------------------------------

def _im2col(x, k, stride, pad):
    """NHWC -> patches[M, K], column order (kh, kw, c_in) matching the weight
    reshape below."""
    # TODO(synk): move im2col in-kernel (k*k-tap accumulation over a
    # VMEM-resident input row band) to remove the ~k^2/stride^2 HBM inflation
    # of the 5x5/stride-2 layers at large batch sizes.
    N, H, W, C = x.shape
    OH = (H + 2 * pad - k) // stride + 1
    OW = (W + 2 * pad - k) // stride + 1
    if pad == 0 and OH == 1 and OW == 1 and k == H and k == W:
        # (kh, kw, c) column order == NHWC row-major flatten when OH=OW=1,
        # so im2col is a pure reshape (conv4 case).
        return x.reshape(N, k * k * C), (N, 1, 1)
    xp = jnp.pad(x, ((0, 0), (pad, pad), (pad, pad), (0, 0)))
    cols = []
    for kh in range(k):
        for kw in range(k):
            cols.append(
                xp[:, kh:kh + stride * OH:stride, kw:kw + stride * OW:stride, :]
            )
    patches = jnp.concatenate(cols, axis=-1)  # [N, OH, OW, k*k*C]
    return patches.reshape(N * OH * OW, k * k * C), (N, OH, OW)


def _choose_tile_m(M, K, tc):
    """Largest row tile (multiple of 8, <= cap, >= 2 tiles when possible)
    whose double-buffered working set fits the per-generation VMEM budget."""
    _, budget = _vmem_cfg()
    in_bpe = 2 if MATMUL_DTYPE == jnp.bfloat16 else 4
    # TODO(synk): single-buffer the grid-invariant weight block via
    # pipeline_mode=pl.Buffered(1) and drop the 2x below once validated.
    fixed = 2 * K * tc * in_bpe                 # weight, double-buffered
    per_row = 2 * (K * in_bpe + tc * 4)         # patch row + f32 y row, x2 buffers
    avail = max(budget - fixed, 0)
    tm = min(avail // max(per_row, 1), _TILE_M_CAP)
    mp8 = _round_up(M, 8)
    if mp8 >= 16:
        tm = min(tm, mp8 // 2)                  # guarantee >= 2 M tiles
    tm = min(tm, mp8)
    return max(8, (int(tm) // 8) * 8)


def _prep_patches(x_nhwc, w_oihw, k, stride, pad):
    c_out = w_oihw.shape[0]
    # PyTorch conv weight [C_out, C_in, KH, KW] -> [KH, KW, C_in, C_out] -> [K, C_out]
    w2d = (jnp.transpose(w_oihw, (2, 3, 1, 0))
           .reshape(-1, c_out).astype(MATMUL_DTYPE))
    patches, (N, OH, OW) = _im2col(x_nhwc.astype(MATMUL_DTYPE), k, stride, pad)
    M, K = patches.shape
    tc = _TILE_C if (c_out > _TILE_C and c_out % _TILE_C == 0) else c_out
    tm = _choose_tile_m(M, K, tc)
    Mp = _round_up(M, tm)
    if Mp != M:
        # Padded zero rows contribute exactly 0 to sum/sumsq (no bias term),
        # so BN statistics divided by the true M stay exact.
        patches = jnp.pad(patches, ((0, Mp - M), (0, 0)))
    return patches, w2d, (N, OH, OW, M, tm, tc, Mp)


def _tiled_conv_matmul(patches, w2d, tm, tc):
    """(M,C)-tiled patches @ w2d, returning y (f32) and per-tile BN partials."""
    Mp, K = patches.shape
    C = w2d.shape[1]
    nM = Mp // tm
    nC = C // tc
    return pl.pallas_call(
        _matmul_stats_kernel,
        grid=(nM, nC),
        in_specs=[
            pl.BlockSpec((tm, K), lambda i, j: (i, 0)),
            pl.BlockSpec((K, tc), lambda i, j: (0, j)),
        ],
        out_specs=(
            pl.BlockSpec((tm, tc), lambda i, j: (i, j)),
            pl.BlockSpec((8, tc), lambda i, j: (i, j)),
        ),
        out_shape=(
            jax.ShapeDtypeStruct((Mp, C), jnp.float32),
            jax.ShapeDtypeStruct((8 * nM, C), jnp.float32),
        ),
        compiler_params=_compiler_params(2),
    )(patches, w2d)


def _finalize_bn_stats(partial, m_rows, c_out):
    """Combine per-tile [sum; sumsq; 0...] partials into global mean / rstd."""
    p = partial.reshape(-1, 8, c_out)
    tot = jnp.sum(p[:, :2, :], axis=0)                      # [2, C]
    mean = tot[0] / m_rows
    var = jnp.maximum(tot[1] / m_rows - mean * mean, 0.0)   # biased batch var
    rstd = lax.rsqrt(var + BN_EPS)
    return mean.reshape(1, c_out), rstd.reshape(1, c_out)


def conv_bn_lrelu(x_nhwc, w_oihw, k, stride, pad):
    """conv (bias dropped: cancelled by fresh BN) -> BatchNorm -> leaky_relu.

    BN + leaky_relu are applied in plain JAX so XLA fuses them into the next
    layer's im2col gather (saves a full HBM read+write per layer vs a
    standalone elementwise pallas_call)."""
    c_out = w_oihw.shape[0]
    patches, w2d, (N, OH, OW, M, tm, tc, Mp) = _prep_patches(
        x_nhwc, w_oihw, k, stride, pad)
    y, partial = _tiled_conv_matmul(patches, w2d, tm, tc)
    mean, rstd = _finalize_bn_stats(partial, M, c_out)
    h = (y[:M] - mean) * rstd
    h = jnp.maximum(h, LRELU_SLOPE * h)
    return h.reshape(N, OH, OW, c_out)


def conv_bn_lrelu_fc(x_nhwc, w4_oihw, w5_oihw, b5, k, stride, pad):
    """conv4 -> BN -> leaky_relu fused with the final 1x1 conv (fc1) + bias."""
    c_mid = w4_oihw.shape[0]
    n_cls = w5_oihw.shape[0]
    patches, w4, (N, OH, OW, M, tm, tc, Mp) = _prep_patches(
        x_nhwc, w4_oihw, k, stride, pad)
    nM = Mp // tm
    y, partial = _tiled_conv_matmul(patches, w4, tm, tc)
    mean, rstd = _finalize_bn_stats(partial, M, c_mid)
    # Lane-dense fc output: pad 11 -> 128 columns, slice back afterwards.
    c_pad = _round_up(n_cls, 128)
    w5 = jnp.transpose(w5_oihw, (2, 3, 1, 0)).reshape(c_mid, n_cls)
    w5 = jnp.pad(w5, ((0, 0), (0, c_pad - n_cls))).astype(MATMUL_DTYPE)
    b5p = jnp.pad(b5, (0, c_pad - n_cls)).reshape(1, c_pad).astype(jnp.float32)
    out = pl.pallas_call(
        _bn_lrelu_fc_kernel,
        grid=(nM,),
        in_specs=[
            pl.BlockSpec((tm, c_mid), lambda i: (i, 0)),
            pl.BlockSpec((1, c_mid), lambda i: (0, 0)),
            pl.BlockSpec((1, c_mid), lambda i: (0, 0)),
            pl.BlockSpec((c_mid, c_pad), lambda i: (0, 0)),
            pl.BlockSpec((1, c_pad), lambda i: (0, 0)),
        ],
        out_specs=pl.BlockSpec((tm, c_pad), lambda i: (i, 0)),
        out_shape=jax.ShapeDtypeStruct((Mp, c_pad), jnp.float32),
        compiler_params=_compiler_params(1),
    )(y, mean, rstd, w5, b5p)
    out = out[:M, :n_cls].reshape(N, OH, OW, n_cls)
    # torch: fc1(out).squeeze() on an [N, 11, 1, 1] map -> [N, 11]
    # (intentionally keeps the batch dim even when N == 1).
    return jnp.squeeze(out, axis=(1, 2))


def d1_forward(x_nchw, params):
    """D1 forward. Conv biases b1..b4 are accepted in `params` but unused:
    with a freshly-initialized training-mode BatchNorm2d (gamma=1, beta=0,
    batch statistics) they are exactly cancelled by the mean subtraction."""
    x = jnp.transpose(x_nchw, (0, 2, 3, 1)).astype(jnp.float32)  # NCHW -> NHWC
    x = conv_bn_lrelu(x, params["w1"], 5, 2, 2)
    x = conv_bn_lrelu(x, params["w2"], 5, 2, 2)
    x = conv_bn_lrelu(x, params["w3"], 5, 2, 2)
    return conv_bn_lrelu_fc(x, params["w4"], params["w5"], params["b5"], 4, 1, 0)


def init_params(conv_dim=64, key=jax.random.PRNGKey(0)):
    shapes = [
        (conv_dim, 3, 5, 5),
        (conv_dim * 2, conv_dim, 5, 5),
        (conv_dim * 4, conv_dim * 2, 5, 5),
        (conv_dim * 8, conv_dim * 4, 4, 4),
        (11, conv_dim * 8, 1, 1),
    ]
    params = {}
    for i, shp in enumerate(shapes, start=1):
        key, kw, kb = jax.random.split(key, 3)
        fan_in = shp[1] * shp[2] * shp[3]
        scale = 1.0 / jnp.sqrt(jnp.float32(fan_in))
        params[f"w{i}"] = jax.random.uniform(kw, shp, jnp.float32, -scale, scale)
        params[f"b{i}"] = jax.random.uniform(kb, (shp[0],), jnp.float32, -scale, scale)
    return params


if __name__ == "__main__":
    conv_dim = 64
    params = init_params(conv_dim)
    # MNIST-style RGB input: 32x32 so conv4 (k=4, s=1, p=0) reduces to 1x1.
    x = jax.random.normal(jax.random.PRNGKey(0), (2, 3, 32, 32), jnp.float32)
    out = jax.jit(d1_forward)(x, params)
    jax.block_until_ready(out)
    assert out.shape == (2, 11), out.shape
    print("KERNEL_OK")
</pallas_src>

<mosaic_0001>
module attributes {stable_mosaic.version = 11 : i64} {
  func.func @_matmul_stats_kernel(%arg0: i32, %arg1: i32, %arg2: memref<256x75xbf16, #tpu.memory_space<vmem>>, %arg3: memref<75x64xbf16, #tpu.memory_space<vmem>>, %arg4: memref<256x64xf32, #tpu.memory_space<vmem>>, %arg5: memref<8x64xf32, #tpu.memory_space<vmem>>) attributes {dimension_semantics = [#tpu.dimension_semantics<parallel>, #tpu.dimension_semantics<parallel>], iteration_bounds = array<i64: 2, 1>, scalar_prefetch = 0 : i64, scratch_operands = 0 : i64, tpu.core_type = #tpu.core_type<tc>, window_params = [{transform_indices = @transform_0, window_bounds = array<i64: 256, 75>}, {transform_indices = @transform_1, window_bounds = array<i64: 75, 64>}, {transform_indices = @transform_2, window_bounds = array<i64: 256, 64>}, {transform_indices = @transform_3, window_bounds = array<i64: 8, 64>}]} {
    %c0 = arith.constant 0 : index
    %c0_0 = arith.constant 0 : index
    %0 = vector.load %arg2[%c0, %c0_0] : memref<256x75xbf16, #tpu.memory_space<vmem>>, vector<256x75xbf16>
    %c0_1 = arith.constant 0 : index
    %c0_2 = arith.constant 0 : index
    %1 = vector.load %arg3[%c0_1, %c0_2] : memref<75x64xbf16, #tpu.memory_space<vmem>>, vector<75x64xbf16>
    %cst = arith.constant dense<0.000000e+00> : vector<256x64xf32>
    %2 = tpu.matmul %0, %1, %cst {dimension_numbers = #tpu.dot_dimension_numbers<[1], [0], [0], [1], [0, 0, 1, 1], [], []>} : vector<256x75xbf16>, vector<75x64xbf16>, vector<256x64xf32> -> vector<256x64xf32>
    %c0_3 = arith.constant 0 : index
    %c0_4 = arith.constant 0 : index
    %3 = vector.load %arg4[%c0_3, %c0_4] : memref<256x64xf32, #tpu.memory_space<vmem>>, vector<256x64xf32>
    tpu.vector_store %arg4[%c0_3, %c0_4], %2 {strides = array<i32>} : memref<256x64xf32, #tpu.memory_space<vmem>>, vector<256x64xf32>,
    %c0_5 = arith.constant 0 : index
    %c0_6 = arith.constant 0 : index
    %4 = vector.load %arg4[%c0_5, %c0_6] : memref<256x64xf32, #tpu.memory_space<vmem>>, vector<256x64xf32>
    %cst_7 = arith.constant dense<0.000000e+00> : vector<64xf32>
    %5 = vector.multi_reduction <add>, %4, %cst_7 [0] : vector<256x64xf32> to vector<64xf32>
    %6 = vector.shape_cast %5 : vector<64xf32> to vector<1x64xf32>
    %7 = arith.mulf %4, %4 : vector<256x64xf32>
    %cst_8 = arith.constant dense<0.000000e+00> : vector<64xf32>
    %8 = vector.multi_reduction <add>, %7, %cst_8 [0] : vector<256x64xf32> to vector<64xf32>
    %9 = vector.shape_cast %8 : vector<64xf32> to vector<1x64xf32>
    %cst_9 = arith.constant 0.000000e+00 : f32
    %10 = vector.broadcast %cst_9 : f32 to vector<6x64xf32>
    %11 = tpu.concatenate %6, %9, %10 in 0 : vector<1x64xf32>, vector<1x64xf32>, vector<6x64xf32> -> vector<8x64xf32>
    %c0_10 = arith.constant 0 : index
    %c0_11 = arith.constant 0 : index
    %12 = vector.load %arg5[%c0_10, %c0_11] : memref<8x64xf32, #tpu.memory_space<vmem>>, vector<8x64xf32>
    tpu.vector_store %arg5[%c0_10, %c0_11], %11 {strides = array<i32>} : memref<8x64xf32, #tpu.memory_space<vmem>>, vector<8x64xf32>,
    return
  }
  func.func @transform_0(%arg0: i32, %arg1: i32) -> (i32, i32) {
    %c0_i32 = arith.constant 0 : i32
    %c0_i32_0 = arith.constant 0 : i32
    return %arg0, %c0_i32 : i32, i32
  }
  func.func @transform_1(%arg0: i32, %arg1: i32) -> (i32, i32) {
    %c0_i32 = arith.constant 0 : i32
    %c0_i32_0 = arith.constant 0 : i32
    return %c0_i32, %arg1 : i32, i32
  }
  func.func @transform_2(%arg0: i32, %arg1: i32) -> (i32, i32) {
    %c0_i32 = arith.constant 0 : i32
    return %arg0, %arg1 : i32, i32
  }
  func.func @transform_3(%arg0: i32, %arg1: i32) -> (i32, i32) {
    %c0_i32 = arith.constant 0 : i32
    return %arg0, %arg1 : i32, i32
  }
}

module attributes {stable_mosaic.version = 11 : i64} {
  func.func @_matmul_stats_kernel(%arg0: i32, %arg1: i32, %arg2: memref<64x1600xbf16, #tpu.memory_space<vmem>>, %arg3: memref<1600x128xbf16, #tpu.memory_space<vmem>>, %arg4: memref<64x128xf32, #tpu.memory_space<vmem>>, %arg5: memref<8x128xf32, #tpu.memory_space<vmem>>) attributes {dimension_semantics = [#tpu.dimension_semantics<parallel>, #tpu.dimension_semantics<parallel>], iteration_bounds = array<i64: 2, 1>, scalar_prefetch = 0 : i64, scratch_operands = 0 : i64, tpu.core_type = #tpu.core_type<tc>, window_params = [{transform_indices = @transform_0, window_bounds = array<i64: 64, 1600>}, {transform_indices = @transform_1, window_bounds = array<i64: 1600, 128>}, {transform_indices = @transform_2, window_bounds = array<i64: 64, 128>}, {transform_indices = @transform_3, window_bounds = array<i64: 8, 128>}]} {
    %c0 = arith.constant 0 : index
    %c0_0 = arith.constant 0 : index
    %0 = vector.load %arg2[%c0, %c0_0] : memref<64x1600xbf16, #tpu.memory_space<vmem>>, vector<64x1600xbf16>
    %c0_1 = arith.constant 0 : index
    %c0_2 = arith.constant 0 : index
    %1 = vector.load %arg3[%c0_1, %c0_2] : memref<1600x128xbf16, #tpu.memory_space<vmem>>, vector<1600x128xbf16>
    %cst = arith.constant dense<0.000000e+00> : vector<64x128xf32>
    %2 = tpu.matmul %0, %1, %cst {dimension_numbers = #tpu.dot_dimension_numbers<[1], [0], [0], [1], [0, 0, 1, 1], [], []>} : vector<64x1600xbf16>, vector<1600x128xbf16>, vector<64x128xf32> -> vector<64x128xf32>
    %c0_3 = arith.constant 0 : index
    %c0_4 = arith.constant 0 : index
    %3 = vector.load %arg4[%c0_3, %c0_4] : memref<64x128xf32, #tpu.memory_space<vmem>>, vector<64x128xf32>
    tpu.vector_store %arg4[%c0_3, %c0_4], %2 {strides = array<i32>} : memref<64x128xf32, #tpu.memory_space<vmem>>, vector<64x128xf32>,
    %c0_5 = arith.constant 0 : index
    %c0_6 = arith.constant 0 : index
    %4 = vector.load %arg4[%c0_5, %c0_6] : memref<64x128xf32, #tpu.memory_space<vmem>>, vector<64x128xf32>
    %cst_7 = arith.constant dense<0.000000e+00> : vector<128xf32>
    %5 = vector.multi_reduction <add>, %4, %cst_7 [0] : vector<64x128xf32> to vector<128xf32>
    %6 = vector.shape_cast %5 : vector<128xf32> to vector<1x128xf32>
    %7 = arith.mulf %4, %4 : vector<64x128xf32>
    %cst_8 = arith.constant dense<0.000000e+00> : vector<128xf32>
    %8 = vector.multi_reduction <add>, %7, %cst_8 [0] : vector<64x128xf32> to vector<128xf32>
    %9 = vector.shape_cast %8 : vector<128xf32> to vector<1x128xf32>
    %cst_9 = arith.constant 0.000000e+00 : f32
    %10 = vector.broadcast %cst_9 : f32 to vector<6x128xf32>
    %11 = tpu.concatenate %6, %9, %10 in 0 : vector<1x128xf32>, vector<1x128xf32>, vector<6x128xf32> -> vector<8x128xf32>
    %c0_10 = arith.constant 0 : index
    %c0_11 = arith.constant 0 : index
    %12 = vector.load %arg5[%c0_10, %c0_11] : memref<8x128xf32, #tpu.memory_space<vmem>>, vector<8x128xf32>
    tpu.vector_store %arg5[%c0_10, %c0_11], %11 {strides = array<i32>} : memref<8x128xf32, #tpu.memory_space<vmem>>, vector<8x128xf32>,
    return
  }
  func.func @transform_0(%arg0: i32, %arg1: i32) -> (i32, i32) {
    %c0_i32 = arith.constant 0 : i32
    %c0_i32_0 = arith.constant 0 : i32
    return %arg0, %c0_i32 : i32, i32
  }
  func.func @transform_1(%arg0: i32, %arg1: i32) -> (i32, i32) {
    %c0_i32 = arith.constant 0 : i32
    %c0_i32_0 = arith.constant 0 : i32
    return %c0_i32, %arg1 : i32, i32
  }
  func.func @transform_2(%arg0: i32, %arg1: i32) -> (i32, i32) {
    %c0_i32 = arith.constant 0 : i32
    return %arg0, %arg1 : i32, i32
  }
  func.func @transform_3(%arg0: i32, %arg1: i32) -> (i32, i32) {
    %c0_i32 = arith.constant 0 : i32
    return %arg0, %arg1 : i32, i32
  }
}

module attributes {stable_mosaic.version = 11 : i64} {
  func.func @_matmul_stats_kernel(%arg0: i32, %arg1: i32, %arg2: memref<16x3200xbf16, #tpu.memory_space<vmem>>, %arg3: memref<3200x256xbf16, #tpu.memory_space<vmem>>, %arg4: memref<16x256xf32, #tpu.memory_space<vmem>>, %arg5: memref<8x256xf32, #tpu.memory_space<vmem>>) attributes {dimension_semantics = [#tpu.dimension_semantics<parallel>, #tpu.dimension_semantics<parallel>], iteration_bounds = array<i64: 2, 1>, scalar_prefetch = 0 : i64, scratch_operands = 0 : i64, tpu.core_type = #tpu.core_type<tc>, window_params = [{transform_indices = @transform_0, window_bounds = array<i64: 16, 3200>}, {transform_indices = @transform_1, window_bounds = array<i64: 3200, 256>}, {transform_indices = @transform_2, window_bounds = array<i64: 16, 256>}, {transform_indices = @transform_3, window_bounds = array<i64: 8, 256>}]} {
    %c0 = arith.constant 0 : index
    %c0_0 = arith.constant 0 : index
    %0 = vector.load %arg2[%c0, %c0_0] : memref<16x3200xbf16, #tpu.memory_space<vmem>>, vector<16x3200xbf16>
    %c0_1 = arith.constant 0 : index
    %c0_2 = arith.constant 0 : index
    %1 = vector.load %arg3[%c0_1, %c0_2] : memref<3200x256xbf16, #tpu.memory_space<vmem>>, vector<3200x256xbf16>
    %cst = arith.constant dense<0.000000e+00> : vector<16x256xf32>
    %2 = tpu.matmul %0, %1, %cst {dimension_numbers = #tpu.dot_dimension_numbers<[1], [0], [0], [1], [0, 0, 1, 1], [], []>} : vector<16x3200xbf16>, vector<3200x256xbf16>, vector<16x256xf32> -> vector<16x256xf32>
    %c0_3 = arith.constant 0 : index
    %c0_4 = arith.constant 0 : index
    %3 = vector.load %arg4[%c0_3, %c0_4] : memref<16x256xf32, #tpu.memory_space<vmem>>, vector<16x256xf32>
    tpu.vector_store %arg4[%c0_3, %c0_4], %2 {strides = array<i32>} : memref<16x256xf32, #tpu.memory_space<vmem>>, vector<16x256xf32>,
    %c0_5 = arith.constant 0 : index
    %c0_6 = arith.constant 0 : index
    %4 = vector.load %arg4[%c0_5, %c0_6] : memref<16x256xf32, #tpu.memory_space<vmem>>, vector<16x256xf32>
    %cst_7 = arith.constant dense<0.000000e+00> : vector<256xf32>
    %5 = vector.multi_reduction <add>, %4, %cst_7 [0] : vector<16x256xf32> to vector<256xf32>
    %6 = vector.shape_cast %5 : vector<256xf32> to vector<1x256xf32>
    %7 = arith.mulf %4, %4 : vector<16x256xf32>
    %cst_8 = arith.constant dense<0.000000e+00> : vector<256xf32>
    %8 = vector.multi_reduction <add>, %7, %cst_8 [0] : vector<16x256xf32> to vector<256xf32>
    %9 = vector.shape_cast %8 : vector<256xf32> to vector<1x256xf32>
    %cst_9 = arith.constant 0.000000e+00 : f32
    %10 = vector.broadcast %cst_9 : f32 to vector<6x256xf32>
    %11 = tpu.concatenate %6, %9, %10 in 0 : vector<1x256xf32>, vector<1x256xf32>, vector<6x256xf32> -> vector<8x256xf32>
    %c0_10 = arith.constant 0 : index
    %c0_11 = arith.constant 0 : index
    %12 = vector.load %arg5[%c0_10, %c0_11] : memref<8x256xf32, #tpu.memory_space<vmem>>, vector<8x256xf32>
    tpu.vector_store %arg5[%c0_10, %c0_11], %11 {strides = array<i32>} : memref<8x256xf32, #tpu.memory_space<vmem>>, vector<8x256xf32>,
    return
  }
  func.func @transform_0(%arg0: i32, %arg1: i32) -> (i32, i32) {
    %c0_i32 = arith.constant 0 : i32
    %c0_i32_0 = arith.constant 0 : i32
    return %arg0, %c0_i32 : i32, i32
  }
  func.func @transform_1(%arg0: i32, %arg1: i32) -> (i32, i32) {
    %c0_i32 = arith.constant 0 : i32
    %c0_i32_0 = arith.constant 0 : i32
    return %c0_i32, %arg1 : i32, i32
  }
  func.func @transform_2(%arg0: i32, %arg1: i32) -> (i32, i32) {
    %c0_i32 = arith.constant 0 : i32
    return %arg0, %arg1 : i32, i32
  }
  func.func @transform_3(%arg0: i32, %arg1: i32) -> (i32, i32) {
    %c0_i32 = arith.constant 0 : i32
    return %arg0, %arg1 : i32, i32
  }
}

module attributes {stable_mosaic.version = 11 : i64} {
  func.func @_matmul_stats_kernel(%arg0: i32, %arg1: i32, %arg2: memref<8x4096xbf16, #tpu.memory_space<vmem>>, %arg3: memref<4096x256xbf16, #tpu.memory_space<vmem>>, %arg4: memref<8x256xf32, #tpu.memory_space<vmem>>, %arg5: memref<8x256xf32, #tpu.memory_space<vmem>>) attributes {dimension_semantics = [#tpu.dimension_semantics<parallel>, #tpu.dimension_semantics<parallel>], iteration_bounds = array<i64: 1, 2>, scalar_prefetch = 0 : i64, scratch_operands = 0 : i64, tpu.core_type = #tpu.core_type<tc>, window_params = [{transform_indices = @transform_0, window_bounds = array<i64: 8, 4096>}, {transform_indices = @transform_1, window_bounds = array<i64: 4096, 256>}, {transform_indices = @transform_2, window_bounds = array<i64: 8, 256>}, {transform_indices = @transform_3, window_bounds = array<i64: 8, 256>}]} {
    %c0 = arith.constant 0 : index
    %c0_0 = arith.constant 0 : index
    %0 = vector.load %arg2[%c0, %c0_0] : memref<8x4096xbf16, #tpu.memory_space<vmem>>, vector<8x4096xbf16>
    %c0_1 = arith.constant 0 : index
    %c0_2 = arith.constant 0 : index
    %1 = vector.load %arg3[%c0_1, %c0_2] : memref<4096x256xbf16, #tpu.memory_space<vmem>>, vector<4096x256xbf16>
    %cst = arith.constant dense<0.000000e+00> : vector<8x256xf32>
    %2 = tpu.matmul %0, %1, %cst {dimension_numbers = #tpu.dot_dimension_numbers<[1], [0], [0], [1], [0, 0, 1, 1], [], []>} : vector<8x4096xbf16>, vector<4096x256xbf16>, vector<8x256xf32> -> vector<8x256xf32>
    %c0_3 = arith.constant 0 : index
    %c0_4 = arith.constant 0 : index
    %3 = vector.load %arg4[%c0_3, %c0_4] : memref<8x256xf32, #tpu.memory_space<vmem>>, vector<8x256xf32>
    tpu.vector_store %arg4[%c0_3, %c0_4], %2 {strides = array<i32>} : memref<8x256xf32, #tpu.memory_space<vmem>>, vector<8x256xf32>,
    %c0_5 = arith.constant 0 : index
    %c0_6 = arith.constant 0 : index
    %4 = vector.load %arg4[%c0_5, %c0_6] : memref<8x256xf32, #tpu.memory_space<vmem>>, vector<8x256xf32>
    %cst_7 = arith.constant dense<0.000000e+00> : vector<256xf32>
    %5 = vector.multi_reduction <add>, %4, %cst_7 [0] : vector<8x256xf32> to vector<256xf32>
    %6 = vector.shape_cast %5 : vector<256xf32> to vector<1x256xf32>
    %7 = arith.mulf %4, %4 : vector<8x256xf32>
    %cst_8 = arith.constant dense<0.000000e+00> : vector<256xf32>
    %8 = vector.multi_reduction <add>, %7, %cst_8 [0] : vector<8x256xf32> to vector<256xf32>
    %9 = vector.shape_cast %8 : vector<256xf32> to vector<1x256xf32>
    %cst_9 = arith.constant 0.000000e+00 : f32
    %10 = vector.broadcast %cst_9 : f32 to vector<6x256xf32>
    %11 = tpu.concatenate %6, %9, %10 in 0 : vector<1x256xf32>, vector<1x256xf32>, vector<6x256xf32> -> vector<8x256xf32>
    %c0_10 = arith.constant 0 : index
    %c0_11 = arith.constant 0 : index
    %12 = vector.load %arg5[%c0_10, %c0_11] : memref<8x256xf32, #tpu.memory_space<vmem>>, vector<8x256xf32>
    tpu.vector_store %arg5[%c0_10, %c0_11], %11 {strides = array<i32>} : memref<8x256xf32, #tpu.memory_space<vmem>>, vector<8x256xf32>,
    return
  }
  func.func @transform_0(%arg0: i32, %arg1: i32) -> (i32, i32) {
    %c0_i32 = arith.constant 0 : i32
    %c0_i32_0 = arith.constant 0 : i32
    return %arg0, %c0_i32 : i32, i32
  }
  func.func @transform_1(%arg0: i32, %arg1: i32) -> (i32, i32) {
    %c0_i32 = arith.constant 0 : i32
    %c0_i32_0 = arith.constant 0 : i32
    return %c0_i32, %arg1 : i32, i32
  }
  func.func @transform_2(%arg0: i32, %arg1: i32) -> (i32, i32) {
    %c0_i32 = arith.constant 0 : i32
    return %arg0, %arg1 : i32, i32
  }
  func.func @transform_3(%arg0: i32, %arg1: i32) -> (i32, i32) {
    %c0_i32 = arith.constant 0 : i32
    return %arg0, %arg1 : i32, i32
  }
}

module attributes {stable_mosaic.version = 11 : i64} {
  func.func @_bn_lrelu_fc_kernel(%arg0: i32, %arg1: memref<8x512xf32, #tpu.memory_space<vmem>>, %arg2: memref<1x512xf32, #tpu.memory_space<vmem>>, %arg3: memref<1x512xf32, #tpu.memory_space<vmem>>, %arg4: memref<512x128xbf16, #tpu.memory_space<vmem>>, %arg5: memref<1x128xf32, #tpu.memory_space<vmem>>, %arg6: memref<8x128xf32, #tpu.memory_space<vmem>>) attributes {dimension_semantics = [#tpu.dimension_semantics<parallel>], iteration_bounds = array<i64: 1>, scalar_prefetch = 0 : i64, scratch_operands = 0 : i64, tpu.core_type = #tpu.core_type<tc>, window_params = [{transform_indices = @transform_0, window_bounds = array<i64: 8, 512>}, {pipeline_mode = #tpu.pipeline_mode<synchronous>, transform_indices = @transform_1, window_bounds = array<i64: 1, 512>}, {pipeline_mode = #tpu.pipeline_mode<synchronous>, transform_indices = @transform_2, window_bounds = array<i64: 1, 512>}, {pipeline_mode = #tpu.pipeline_mode<synchronous>, transform_indices = @transform_3, window_bounds = array<i64: 512, 128>}, {pipeline_mode = #tpu.pipeline_mode<synchronous>, transform_indices = @transform_4, window_bounds = array<i64: 1, 128>}, {transform_indices = @transform_5, window_bounds = array<i64: 8, 128>}]} {
    %c0 = arith.constant 0 : index
    %c0_0 = arith.constant 0 : index
    %0 = vector.load %arg1[%c0, %c0_0] : memref<8x512xf32, #tpu.memory_space<vmem>>, vector<8x512xf32>
    %c0_1 = arith.constant 0 : index
    %c0_2 = arith.constant 0 : index
    %1 = vector.load %arg2[%c0_1, %c0_2] : memref<1x512xf32, #tpu.memory_space<vmem>>, vector<1x512xf32>
    %2 = vector.broadcast %1 : vector<1x512xf32> to vector<8x512xf32>
    %3 = arith.subf %0, %2 : vector<8x512xf32>
    %c0_3 = arith.constant 0 : index
    %c0_4 = arith.constant 0 : index
    %4 = vector.load %arg3[%c0_3, %c0_4] : memref<1x512xf32, #tpu.memory_space<vmem>>, vector<1x512xf32>
    %5 = vector.broadcast %4 : vector<1x512xf32> to vector<8x512xf32>
    %6 = arith.mulf %3, %5 : vector<8x512xf32>
    %cst = arith.constant 5.000000e-02 : f32
    %7 = vector.broadcast %cst : f32 to vector<8x512xf32>
    %8 = arith.mulf %7, %6 : vector<8x512xf32>
    %9 = arith.maximumf %6, %8 : vector<8x512xf32>
    %10 = arith.truncf %9 : vector<8x512xf32> to vector<8x512xbf16>
    %c0_5 = arith.constant 0 : index
    %c0_6 = arith.constant 0 : index
    %11 = vector.load %arg4[%c0_5, %c0_6] : memref<512x128xbf16, #tpu.memory_space<vmem>>, vector<512x128xbf16>
    %cst_7 = arith.constant dense<0.000000e+00> : vector<8x128xf32>
    %12 = tpu.matmul %10, %11, %cst_7 {dimension_numbers = #tpu.dot_dimension_numbers<[1], [0], [0], [1], [0, 0, 1, 1], [], []>} : vector<8x512xbf16>, vector<512x128xbf16>, vector<8x128xf32> -> vector<8x128xf32>
    %c0_8 = arith.constant 0 : index
    %c0_9 = arith.constant 0 : index
    %13 = vector.load %arg5[%c0_8, %c0_9] : memref<1x128xf32, #tpu.memory_space<vmem>>, vector<1x128xf32>
    %14 = vector.broadcast %13 : vector<1x128xf32> to vector<8x128xf32>
    %15 = arith.addf %12, %14 : vector<8x128xf32>
    %c0_10 = arith.constant 0 : index
    %c0_11 = arith.constant 0 : index
    %16 = vector.load %arg6[%c0_10, %c0_11] : memref<8x128xf32, #tpu.memory_space<vmem>>, vector<8x128xf32>
    tpu.vector_store %arg6[%c0_10, %c0_11], %15 {strides = array<i32>} : memref<8x128xf32, #tpu.memory_space<vmem>>, vector<8x128xf32>,
    return
  }
  func.func @transform_0(%arg0: i32) -> (i32, i32) {
    %c0_i32 = arith.constant 0 : i32
    %c0_i32_0 = arith.constant 0 : i32
    return %arg0, %c0_i32 : i32, i32
  }
  func.func @transform_1(%arg0: i32) -> (i32, i32) {
    %c0_i32 = arith.constant 0 : i32
    %c0_i32_0 = arith.constant 0 : i32
    %c0_i32_1 = arith.constant 0 : i32
    return %c0_i32, %c0_i32_0 : i32, i32
  }
  func.func @transform_2(%arg0: i32) -> (i32, i32) {
    %c0_i32 = arith.constant 0 : i32
    %c0_i32_0 = arith.constant 0 : i32
    %c0_i32_1 = arith.constant 0 : i32
    return %c0_i32, %c0_i32_0 : i32, i32
  }
  func.func @transform_3(%arg0: i32) -> (i32, i32) {
    %c0_i32 = arith.constant 0 : i32
    %c0_i32_0 = arith.constant 0 : i32
    %c0_i32_1 = arith.constant 0 : i32
    return %c0_i32, %c0_i32_0 : i32, i32
  }
  func.func @transform_4(%arg0: i32) -> (i32, i32) {
    %c0_i32 = arith.constant 0 : i32
    %c0_i32_0 = arith.constant 0 : i32
    %c0_i32_1 = arith.constant 0 : i32
    return %c0_i32, %c0_i32_0 : i32, i32
  }
  func.func @transform_5(%arg0: i32) -> (i32, i32) {
    %c0_i32 = arith.constant 0 : i32
    %c0_i32_0 = arith.constant 0 : i32
    return %arg0, %c0_i32 : i32, i32
  }
}

</mosaic_0001>

<bundles_post_ra>
// kernel: d1_forward.5
= control target key start
LH: loop header
LB: loop body
LE: loop exit
PB: predicated region body
PF: predicated region fallthrough
CT: control target
= control target key end

     0   :  { %s1184_s12 = smov 0   ;;  %s1186_s13 = smov 0   ;;  %s1441_s0 = inlined_call_operand.vmem [shape: bf16[512,75], index: 0, kind: input, shape index: {}]   ;;  %s1442_s1 = inlined_call_operand.vmem [shape: bf16[75,64], index: 1, kind: input, shape index: {}]   ;;  %s1443_s2 = inlined_call_operand.vmem [shape: f32[512,64], index: 2, kind: output, shape index: {0}]   ;;  %s1444_s3 = inlined_call_operand.vmem [shape: f32[16,64], index: 3, kind: output, shape index: {1}]  }
   0x1   :  { %s1188_s14 = smov 0  }
   0x2 LB: > { %s26_s15 = sadd.s32 1, %s1157_s13  ;;  %p975_p0 = scmp.ge.s32.totalorder %s1161_s14, 1  ;;  %s1161_s14 = sphi %s1188_s14, %s14_s14   ;;  %s1157_s13 = sphi %s1186_s13, %s1446_s13   ;;  %s1153_s12 = sphi %s1184_s12, %s1445_s12  }
   0x3   : > { %p28_p1 = scmp.ge.s32.totalorder %s26_s15, 2  ;;  %p166_p2 = scmp.lt.s32.totalorder %s1161_s14, 3 }
   0x5   : > { %s1448_s15 = smov (%p28_p1, %s26_s15), 0  ;;  %p167_p3 = pnand %p975_p0, %p166_p2 }
   0x6   : > { %s976_s20 = sshll.u32 (!%p167_p3), %s1153_s12, 5  ;;  %p223_p5 = scmp.lt.s32.totalorder (!%p167_p3), %s1153_s12, 1 }
   0x7   : > { %170 = sbr.rel (%p167_p3) target bundleno = 324 (0x144), region = 28  ;;  %p205_p4 = scmp.lt.s32.totalorder (!%p167_p3), %s976_s20, 63 }
   0xc   : > { %v1118_v0 = vld [vmem:[%s1442_s1 + $0x20] sm:$0x3f]   ;;  %vm431_vm0 = vcmask 1044480   ;;  %vm432_vm1 = vcmask 1045504   ;;  %v1163_v1 = vmov 65535   ;;  %v1119_v4 = vld [vmem:[%s1442_s1 + $0x18] sm:$0xff]  }
   0xd   : > { %v433_v2 = vsel %vm431_vm0, 4294967295, %v1163_v1  ;;  %v1120_v6 = vld [vmem:[%s1442_s1 + $0x10] sm:$0xff]   ;;  %s1450_s20 = smov (!%p205_p4, %s976_s20), 63  ;;  %v1121_v7 = vld [vmem:[%s1442_s1 + $0x8] sm:$0xff]   ;;  %vm382_vm2 = vcmask 613376   ;;  %v1122_v9 = vld [vmem:[%s1442_s1] sm:$0xff]  }
   0xe   : > { %v434_v3 = vsel %vm432_vm1, %v433_v2, 0  ;;  %s977_s23 = sshll.u32 %s1450_s20, 2  ;;  %s979_s4 = sshll.u32 %s1450_s20, 3  ;;  %vm599_vm3 = vcmask 523264   ;;  %vm834_vm4 = vcmask 1040384   ;;  %vm836_vm5 = vcmask 1041408  }
   0xf   : > { %v436_v5 = vand.u32 %v1118_v0, %v434_v3  ;;  %s1223_s28 = scalar_lea.vmem %s1441_s0, %s977_s23  ;;  %s1264_s7 = scalar_lea.vmem %s1443_s2, %s979_s4 }
  0x10   : > { %v1123_v8 = vld [vmem:[%s1223_s28] sm:$0xff]   ;;  %v1124_v10 = vld [vmem:[%s1223_s28 + $0x8] sm:$0xff]   ;;  %v1125_v12 = vld [vmem:[%s1223_s28 + $0x10] sm:$0xff]   ;;  %s1452_s12 = smov (!%p223_p5, %s1153_s12), 1 }
  0x11   : > { %1041 = vmatprep.subr.bf16.mxu0 %v436_v5  ;;  %1083 = vmatprep.subr.bf16.mxu1 %v436_v5  ;;  %v1131_v11 = vld [vmem:[%s1223_s28 + $0x40] sm:$0xff]   ;;  %v1132_v13 = vld [vmem:[%s1223_s28 + $0x48] sm:$0xff]   ;;  %v1133_v14 = vld [vmem:[%s1223_s28 + $0x50] sm:$0xff]   ;;  %s980_s8 = sshll.u32 %s1452_s12, 3 }
  0x12   : > { %1042 = vmatpush3.bf16.msra.mxu0 %v436_v5  ;;  %1088 = vmatpush3.bf16.msra.mxu1 %v436_v5  ;;  %v1126_v15 = vld [vmem:[%s1223_s28 + $0x18] sm:$0xff]   ;;  %v1127_v17 = vld [vmem:[%s1223_s28 + $0x20] sm:$0xff]   ;;  %v1128_v19 = vld [vmem:[%s1223_s28 + $0x28] sm:$0xff]   ;;  %s229_s11 = scalar_lea.vmem %s1444_s3, %s980_s8 }
  0x13   : > { %1043 = vmatprep.subr.bf16.mxu0 %v1119_v4  ;;  %1084 = vmatprep.subr.bf16.mxu1 %v1119_v4  ;;  %v1134_v16 = vld [vmem:[%s1223_s28 + $0x58] sm:$0xff]   ;;  %v1135_v18 = vld [vmem:[%s1223_s28 + $0x60] sm:$0xff]   ;;  %v1136_v20 = vld [vmem:[%s1223_s28 + $0x68] sm:$0xff]  }
  0x14   : > { %1051 = vmatprep.mubr.msk.bf16.mxu0 %vm382_vm2, %v1123_v8  ;;  %1067 = vmatprep.mubr.msk.bf16.mxu1 %vm382_vm2, %v1131_v11  ;;  %v1129_v21 = vld [vmem:[%s1223_s28 + $0x30] sm:$0xff]   ;;  %v1130_v23 = vld [vmem:[%s1223_s28 + $0x38] sm:$0xff]  }
  0x15   : > { %v1137_v22 = vld [vmem:[%s1223_s28 + $0x70] sm:$0xff]   ;;  %v1138_v24 = vld [vmem:[%s1223_s28 + $0x78] sm:$0xff]  }
  0x16   : > { %1044 = vmatpush3.bf16.msra.mxu0 %v1119_v4  ;;  %1089 = vmatpush3.bf16.msra.mxu1 %v1119_v4 }
  0x17   : > { %1045 = vmatprep.subr.bf16.mxu0 %v1120_v6  ;;  %1085 = vmatprep.subr.bf16.mxu1 %v1120_v6 }
  0x1a   : > { %1046 = vmatpush3.bf16.msra.mxu0 %v1120_v6  ;;  %1090 = vmatpush3.bf16.msra.mxu1 %v1120_v6 }
  0x1b   : > { %1047 = vmatprep.subr.bf16.mxu0 %v1121_v7  ;;  %1086 = vmatprep.subr.bf16.mxu1 %v1121_v7 }
  0x1e   : > { %1048 = vmatpush3.bf16.msra.mxu0 %v1121_v7  ;;  %1091 = vmatpush3.bf16.msra.mxu1 %v1121_v7 }
  0x1f   : > { %1049 = vmatprep.subr.bf16.mxu0 %v1122_v9  ;;  %1087 = vmatprep.subr.bf16.mxu1 %v1122_v9 }
  0x22   : > { %1050 = vmatpush3.bf16.msra.mxu0 %v1122_v9  ;;  %1092 = vmatpush3.bf16.msra.mxu1 %v1122_v9 }
  0x25   : > { %1052 = vmatmul.mubr.msk.bf16.vlgmr.msra.gmra.mxu0 %vm382_vm2, %v1124_v10  ;;  %1068 = vmatmul.mubr.msk.bf16.vlgmr.msra.gmra.mxu1 %vm382_vm2, %v1132_v13 }
  0x26   : > { %1055 = vmatprep.mubr.msk.bf16.mxu0 %vm382_vm2, %v1125_v12  ;;  %1071 = vmatprep.mubr.msk.bf16.mxu1 %vm382_vm2, %v1133_v14 }
  0x2d   : > { %1056 = vmatmul.mubr.msk.bf16.gmra.mxu0 %vm382_vm2, %v1126_v15  ;;  %1072 = vmatmul.mubr.msk.bf16.gmra.mxu1 %vm382_vm2, %v1134_v16 }
  0x2e   : > { %1059 = vmatprep.mubr.msk.bf16.mxu0 %vm382_vm2, %v1127_v17  ;;  %1075 = vmatprep.mubr.msk.bf16.mxu1 %vm382_vm2, %v1135_v18 }
  0x35   : > { %1060 = vmatmul.mubr.msk.bf16.gmra.mxu0 %vm382_vm2, %v1128_v19  ;;  %1076 = vmatmul.mubr.msk.bf16.gmra.mxu1 %vm382_vm2, %v1136_v20 }
  0x36   : > { %1063 = vmatprep.mubr.msk.bf16.mxu0 %vm382_vm2, %v1129_v21  ;;  %1079 = vmatprep.mubr.msk.bf16.mxu1 %vm382_vm2, %v1137_v22 }
  0x3d   : > { %1064 = vmatmul.mubr.msk.bf16.gmra.mxu0 %vm382_vm2, %v1130_v23  ;;  %1080 = vmatmul.mubr.msk.bf16.gmra.mxu1 %vm382_vm2, %v1138_v24 }
  0xe5   : > { %v1053_v25 = vpop.f32.mrf.mxu0  ;;  %v1069_v26 = vpop.f32.mrf.mxu1 }
  0xe6   : > { %602 = vst.msk [vmem:[%s1264_s7 + $0x10] sm:$0xff] %vm599_vm3, %v1053_v25  ;;  %618 = vst.msk [vmem:[%s1264_s7 + $0x90] sm:$0xff] %vm599_vm3, %v1069_v26 }
  0xe7   : > { %v472_v27 = vpop.f32.mrf.mxu0  ;;  %v536_v28 = vpop.f32.mrf.mxu1 }
  0xe8   : > { %600 = vst.msk [vmem:[%s1264_s7] sm:$0xff] %vm599_vm3, %v472_v27  ;;  %616 = vst.msk [vmem:[%s1264_s7 + $0x80] sm:$0xff] %vm599_vm3, %v536_v28 }
  0xe9   : > { %v1054_v29 = vpop.f32.mrf.mxu0  ;;  %v1070_v30 = vpop.f32.mrf.mxu1 }
  0xea   : > { %603 = vst.msk [vmem:[%s1264_s7 + $0x18] sm:$0xff] %vm599_vm3, %v1054_v29  ;;  %619 = vst.msk [vmem:[%s1264_s7 + $0x98] sm:$0xff] %vm599_vm3, %v1070_v30 }
  0xeb   : > { %v475_v31 = vpop.f32.mrf.mxu0  ;;  %v539_v32 = vpop.f32.mrf.mxu1 }
  0xec   : > { %601 = vst.msk [vmem:[%s1264_s7 + $0x8] sm:$0xff] %vm599_vm3, %v475_v31  ;;  %617 = vst.msk [vmem:[%s1264_s7 + $0x88] sm:$0xff] %vm599_vm3, %v539_v32 }
  0xed   : > { %v1057_v33 = vpop.f32.mrf.mxu0  ;;  %v1073_v34 = vpop.f32.mrf.mxu1  ;;  %v634_v38 = vld [vmem:[%s1264_s7 + $0x10] sm:$0xff] }
  0xee   : > { %606 = vst.msk [vmem:[%s1264_s7 + $0x30] sm:$0xff] %vm599_vm3, %v1057_v33  ;;  %622 = vst.msk [vmem:[%s1264_s7 + $0xb0] sm:$0xff] %vm599_vm3, %v1073_v34  ;;  %v735_v46 = vmul.f32 %v634_v38, %v634_v38  ;;  %v667_v53 = vsel %vm599_vm3, %v634_v38, 0.0 }
  0xef   : > { %v632_v35 = vld [vmem:[%s1264_s7] sm:$0xff]  ;;  %v488_v36 = vpop.f32.mrf.mxu0  ;;  %v552_v37 = vpop.f32.mrf.mxu1 }
  0xf0   : > { %604 = vst.msk [vmem:[%s1264_s7 + $0x20] sm:$0xff] %vm599_vm3, %v488_v36  ;;  %620 = vst.msk [vmem:[%s1264_s7 + $0xa0] sm:$0xff] %vm599_vm3, %v552_v37  ;;  %v733_v41 = vmul.f32 %v632_v35, %v632_v35  ;;  %v664_v47 = vsel %vm599_vm3, %v632_v35, 0.0  ;;  %v768_v62 = vsel %vm599_vm3, %v735_v46, 0.0 }
  0xf1   : > { %v1058_v39 = vpop.f32.mrf.mxu0  ;;  %v1074_v40 = vpop.f32.mrf.mxu1  ;;  %v635_v42 = vld [vmem:[%s1264_s7 + $0x18] sm:$0xff] }
  0xf2   : > { %607 = vst.msk [vmem:[%s1264_s7 + $0x38] sm:$0xff] %vm599_vm3, %v1058_v39  ;;  %623 = vst.msk [vmem:[%s1264_s7 + $0xb8] sm:$0xff] %vm599_vm3, %v1074_v40  ;;  %v765_v54 = vsel %vm599_vm3, %v733_v41, 0.0  ;;  %v736_v55 = vmul.f32 %v635_v42, %v635_v42  ;;  %v669_v63 = vsel %vm599_vm3, %v635_v42, 0.0 }
  0xf3   : > { %v633_v43 = vld [vmem:[%s1264_s7 + $0x8] sm:$0xff]  ;;  %v491_v44 = vpop.f32.mrf.mxu0  ;;  %v555_v45 = vpop.f32.mrf.mxu1 }
  0xf4   : > { %v665_v48 = vsel %vm599_vm3, %v633_v43, 0.0  ;;  %v734_v49 = vmul.f32 %v633_v43, %v633_v43  ;;  %605 = vst.msk [vmem:[%s1264_s7 + $0x28] sm:$0xff] %vm599_vm3, %v491_v44  ;;  %621 = vst.msk [vmem:[%s1264_s7 + $0xa8] sm:$0xff] %vm599_vm3, %v555_v45  ;;  %v770_v6 = vsel %vm599_vm3, %v736_v55, 0.0 }
  0xf5   : > { %v666_v50 = vadd.f32 %v665_v48, %v664_v47  ;;  %v1061_v51 = vpop.f32.mrf.mxu0  ;;  %v1077_v52 = vpop.f32.mrf.mxu1  ;;  %v638_v2 = vld [vmem:[%s1264_s7 + $0x30] sm:$0xff] }
  0xf6   : > { %v766_v56 = vsel %vm599_vm3, %v734_v49, 0.0  ;;  %610 = vst.msk [vmem:[%s1264_s7 + $0x50] sm:$0xff] %vm599_vm3, %v1061_v51  ;;  %626 = vst.msk [vmem:[%s1264_s7 + $0xd0] sm:$0xff] %vm599_vm3, %v1077_v52  ;;  %v739_v14 = vmul.f32 %v638_v2, %v638_v2  ;;  %v675_v22 = vsel %vm599_vm3, %v638_v2, 0.0 }
  0xf7   : > { %v668_v57 = vadd.f32 %v667_v53, %v666_v50  ;;  %v767_v58 = vadd.f32 %v766_v56, %v765_v54  ;;  %v636_v59 = vld [vmem:[%s1264_s7 + $0x20] sm:$0xff]  ;;  %v504_v60 = vpop.f32.mrf.mxu0  ;;  %v568_v61 = vpop.f32.mrf.mxu1 }
  0xf8   : > { %v737_v0 = vmul.f32 %v636_v59, %v636_v59  ;;  %608 = vst.msk [vmem:[%s1264_s7 + $0x40] sm:$0xff] %vm599_vm3, %v504_v60  ;;  %624 = vst.msk [vmem:[%s1264_s7 + $0xc0] sm:$0xff] %vm599_vm3, %v568_v61  ;;  %v671_v7 = vsel %vm599_vm3, %v636_v59, 0.0  ;;  %v776_v30 = vsel %vm599_vm3, %v739_v14, 0.0 }
  0xf9   : > { %v769_v1 = vadd.f32 %v768_v62, %v767_v58  ;;  %v670_v3 = vadd.f32 %v669_v63, %v668_v57  ;;  %v1062_v4 = vpop.f32.mrf.mxu0  ;;  %v1078_v5 = vpop.f32.mrf.mxu1  ;;  %v639_v10 = vld [vmem:[%s1264_s7 + $0x38] sm:$0xff] }
  0xfa   : > { %611 = vst.msk [vmem:[%s1264_s7 + $0x58] sm:$0xff] %vm599_vm3, %v1062_v4  ;;  %627 = vst.msk [vmem:[%s1264_s7 + $0xd8] sm:$0xff] %vm599_vm3, %v1078_v5  ;;  %v772_v15 = vsel %vm599_vm3, %v737_v0, 0.0  ;;  %v740_v23 = vmul.f32 %v639_v10, %v639_v10  ;;  %v677_v31 = vsel %vm599_vm3, %v639_v10, 0.0 }
  0xfb   : > { %v672_v8 = vadd.f32 %v671_v7, %v670_v3  ;;  %v771_v9 = vadd.f32 %v770_v6, %v769_v1  ;;  %v637_v11 = vld [vmem:[%s1264_s7 + $0x28] sm:$0xff]  ;;  %v507_v12 = vpop.f32.mrf.mxu0  ;;  %v571_v13 = vpop.f32.mrf.mxu1 }
  0xfc   : > { %v673_v16 = vsel %vm599_vm3, %v637_v11, 0.0  ;;  %v738_v17 = vmul.f32 %v637_v11, %v637_v11  ;;  %609 = vst.msk [vmem:[%s1264_s7 + $0x48] sm:$0xff] %vm599_vm3, %v507_v12  ;;  %625 = vst.msk [vmem:[%s1264_s7 + $0xc8] sm:$0xff] %vm599_vm3, %v571_v13  ;;  %v778_v38 = vsel %vm599_vm3, %v740_v23, 0.0  ;;  %v648_v11 = vld [vmem:[%s1264_s7 + $0x80] sm:$0xff] }
  0xfd   : > { %v773_v18 = vadd.f32 %v772_v15, %v771_v9  ;;  %v674_v19 = vadd.f32 %v673_v16, %v672_v8  ;;  %v1065_v20 = vpop.f32.mrf.mxu0  ;;  %v1081_v21 = vpop.f32.mrf.mxu1  ;;  %v642_v34 = vld [vmem:[%s1264_s7 + $0x50] sm:$0xff] }
  0xfe   : > { %v774_v24 = vsel %vm599_vm3, %v738_v17, 0.0  ;;  %614 = vst.msk [vmem:[%s1264_s7 + $0x70] sm:$0xff] %vm599_vm3, %v1065_v20  ;;  %630 = vst.msk [vmem:[%s1264_s7 + $0xf0] sm:$0xff] %vm599_vm3, %v1081_v21  ;;  %v743_v46 = vmul.f32 %v642_v34, %v642_v34  ;;  %v683_v52 = vsel %vm599_vm3, %v642_v34, 0.0  ;;  %v749_v21 = vmul.f32 %v648_v11, %v648_v11 }
  0xff   : > { %v676_v25 = vadd.f32 %v675_v22, %v674_v19  ;;  %v775_v26 = vadd.f32 %v774_v24, %v773_v18  ;;  %v640_v27 = vld [vmem:[%s1264_s7 + $0x40] sm:$0xff]  ;;  %v520_v28 = vpop.f32.mrf.mxu0  ;;  %v584_v29 = vpop.f32.mrf.mxu1  ;;  %v649_v18 = vld [vmem:[%s1264_s7 + $0x88] sm:$0xff]  ;;  %v650_v22 = vld [vmem:[%s1264_s7 + $0x90] sm:$0xff] }
 0x100   : > { %v741_v32 = vmul.f32 %v640_v27, %v640_v27  ;;  %612 = vst.msk [vmem:[%s1264_s7 + $0x60] sm:$0xff] %vm599_vm3, %v520_v28  ;;  %628 = vst.msk [vmem:[%s1264_s7 + $0xe0] sm:$0xff] %vm599_vm3, %v584_v29  ;;  %v679_v39 = vsel %vm599_vm3, %v640_v27, 0.0  ;;  %v784_v58 = vsel %vm599_vm3, %v743_v46, 0.0  ;;  %v750_v27 = vmul.f32 %v649_v18, %v649_v18  ;;  %v651_v28 = vld [vmem:[%s1264_s7 + $0x98] sm:$0xff] }
 0x101   : > { %v777_v33 = vadd.f32 %v776_v30, %v775_v26  ;;  %v678_v35 = vadd.f32 %v677_v31, %v676_v25  ;;  %v1066_v36 = vpop.f32.mrf.mxu0  ;;  %v1082_v37 = vpop.f32.mrf.mxu1  ;;  %v643_v42 = vld [vmem:[%s1264_s7 + $0x58] sm:$0xff]  ;;  %v695_v26 = vsel %vm599_vm3, %v648_v11, 0.0  ;;  %v751_v31 = vmul.f32 %v650_v22, %v650_v22 }
 0x102   : > { %615 = vst.msk [vmem:[%s1264_s7 + $0x78] sm:$0xff] %vm599_vm3, %v1066_v36  ;;  %631 = vst.msk [vmem:[%s1264_s7 + $0xf8] sm:$0xff] %vm599_vm3, %v1082_v37  ;;  %v780_v47 = vsel %vm599_vm3, %v741_v32, 0.0  ;;  %v744_v53 = vmul.f32 %v643_v42, %v643_v42  ;;  %v685_v59 = vsel %vm599_vm3, %v643_v42, 0.0  ;;  %v796_v32 = vsel %vm599_vm3, %v749_v21, 0.0  ;;  %v652_v36 = vld [vmem:[%s1264_s7 + $0xa0] sm:$0xff] }
 0x103   : > { %v680_v40 = vadd.f32 %v679_v39, %v678_v35  ;;  %v779_v41 = vadd.f32 %v778_v38, %v777_v33  ;;  %v641_v43 = vld [vmem:[%s1264_s7 + $0x48] sm:$0xff]  ;;  %v523_v44 = vpop.f32.mrf.mxu0  ;;  %v587_v45 = vpop.f32.mrf.mxu1  ;;  %v697_v33 = vsel %vm599_vm3, %v649_v18, 0.0  ;;  %v699_v37 = vsel %vm599_vm3, %v650_v22, 0.0 }
 0x104   : > { %v681_v48 = vsel %vm599_vm3, %v641_v43, 0.0  ;;  %v742_v49 = vmul.f32 %v641_v43, %v641_v43  ;;  %613 = vst.msk [vmem:[%s1264_s7 + $0x68] sm:$0xff] %vm599_vm3, %v523_v44  ;;  %629 = vst.msk [vmem:[%s1264_s7 + $0xe8] sm:$0xff] %vm599_vm3, %v587_v45  ;;  %v786_v0 = vsel %vm599_vm3, %v744_v53, 0.0  ;;  %v752_v38 = vmul.f32 %v651_v28, %v651_v28  ;;  %v653_v42 = vld [vmem:[%s1264_s7 + $0xa8] sm:$0xff] }
 0x105   : > { %v781_v50 = vadd.f32 %v780_v47, %v779_v41  ;;  %v682_v51 = vadd.f32 %v681_v48, %v680_v40  ;;  %v646_v62 = vld [vmem:[%s1264_s7 + $0x70] sm:$0xff]  ;;  %v798_v39 = vsel %vm599_vm3, %v750_v27, 0.0  ;;  %v800_v43 = vsel %vm599_vm3, %v751_v31, 0.0 }
 0x106   : > { %v782_v54 = vsel %vm599_vm3, %v742_v49, 0.0  ;;  %v747_v6 = vmul.f32 %v646_v62, %v646_v62  ;;  %v691_v13 = vsel %vm599_vm3, %v646_v62, 0.0  ;;  %v701_v44 = vsel %vm599_vm3, %v651_v28, 0.0  ;;  %v654_v47 = vld [vmem:[%s1264_s7 + $0xb0] sm:$0xff] }
 0x107   : > { %v684_v55 = vadd.f32 %v683_v52, %v682_v51  ;;  %v783_v56 = vadd.f32 %v782_v54, %v781_v50  ;;  %v644_v57 = vld [vmem:[%s1264_s7 + $0x60] sm:$0xff]  ;;  %v753_v45 = vmul.f32 %v652_v36, %v652_v36  ;;  %v802_v49 = vsel %vm599_vm3, %v752_v38, 0.0  ;;  %v655_v54 = vld [vmem:[%s1264_s7 + $0xb8] sm:$0xff]  ;;  %v662_v31 = vld [vmem:[%s1264_s7 + $0xf0] sm:$0xff] }
 0x108   : > { %v745_v60 = vmul.f32 %v644_v57, %v644_v57  ;;  %v687_v1 = vsel %vm599_vm3, %v644_v57, 0.0  ;;  %v792_v19 = vsel %vm599_vm3, %v747_v6, 0.0  ;;  %v703_v50 = vsel %vm599_vm3, %v652_v36, 0.0 }
 0x109   : > { %v785_v61 = vadd.f32 %v784_v58, %v783_v56  ;;  %v686_v63 = vadd.f32 %v685_v59, %v684_v55  ;;  %v647_v4 = vld [vmem:[%s1264_s7 + $0x78] sm:$0xff]  ;;  %v754_v51 = vmul.f32 %v653_v42, %v653_v42  ;;  %v755_v55 = vmul.f32 %v654_v47, %v654_v47 }
 0x10a   : > { %v788_v7 = vsel %vm599_vm3, %v745_v60, 0.0  ;;  %v748_v14 = vmul.f32 %v647_v4, %v647_v4  ;;  %v693_v20 = vsel %vm599_vm3, %v647_v4, 0.0  ;;  %v804_v56 = vsel %vm599_vm3, %v753_v45, 0.0  ;;  %v656_v60 = vld [vmem:[%s1264_s7 + $0xc0] sm:$0xff]  ;;  %v663_v38 = vld [vmem:[%s1264_s7 + $0xf8] sm:$0xff] }
 0x10b   : > { %v688_v2 = vadd.f32 %v687_v1, %v686_v63  ;;  %v787_v3 = vadd.f32 %v786_v0, %v785_v61  ;;  %v645_v5 = vld [vmem:[%s1264_s7 + $0x68] sm:$0xff]  ;;  %v705_v57 = vsel %vm599_vm3, %v653_v42, 0.0  ;;  %v707_v61 = vsel %vm599_vm3, %v654_v47, 0.0 }
 0x10c   : > { %v689_v8 = vsel %vm599_vm3, %v645_v5, 0.0  ;;  %v746_v9 = vmul.f32 %v645_v5, %v645_v5  ;;  %v794_v25 = vsel %vm599_vm3, %v748_v14, 0.0  ;;  %v756_v62 = vmul.f32 %v655_v54, %v655_v54  ;;  %v659_v14 = vld [vmem:[%s1264_s7 + $0xd8] sm:$0xff] }
 0x10d   : > { %v789_v10 = vadd.f32 %v788_v7, %v787_v3  ;;  %v690_v12 = vadd.f32 %v689_v8, %v688_v2  ;;  %v806_v63 = vsel %vm599_vm3, %v754_v51, 0.0  ;;  %v657_v2 = vld [vmem:[%s1264_s7 + $0xc8] sm:$0xff]  ;;  %v808_v3 = vsel %vm599_vm3, %v755_v55, 0.0  ;;  %v658_v7 = vld [vmem:[%s1264_s7 + $0xd0] sm:$0xff] }
 0x10e   : > { %v790_v15 = vsel %vm599_vm3, %v746_v9, 0.0  ;;  %v709_v4 = vsel %vm599_vm3, %v655_v54, 0.0  ;;  %v757_v5 = vmul.f32 %v656_v60, %v656_v60  ;;  %v810_v9 = vsel %vm599_vm3, %v756_v62, 0.0 }
 0x10f   : > { %v692_v16 = vadd.f32 %v691_v13, %v690_v12  ;;  %v791_v17 = vadd.f32 %v790_v15, %v789_v10  ;;  %v711_v10 = vsel %vm599_vm3, %v656_v60, 0.0  ;;  %v758_v11 = vmul.f32 %v657_v2, %v657_v2 }
 0x110   : > { %v759_v15 = vmul.f32 %v658_v7, %v658_v7  ;;  %v715_v21 = vsel %vm599_vm3, %v658_v7, 0.0  ;;  %v760_v22 = vmul.f32 %v659_v14, %v659_v14  ;;  %v717_v28 = vsel %vm599_vm3, %v659_v14, 0.0 }
 0x111   : > { %v793_v23 = vadd.f32 %v792_v19, %v791_v17  ;;  %v694_v24 = vadd.f32 %v693_v20, %v692_v16  ;;  %v812_v16 = vsel %vm599_vm3, %v757_v5, 0.0  ;;  %v713_v17 = vsel %vm599_vm3, %v657_v2, 0.0  ;;  %v660_v20 = vld [vmem:[%s1264_s7 + $0xe0] sm:$0xff] }
 0x112   : > { %v816_v27 = vsel %vm599_vm3, %v759_v15, 0.0  ;;  %v764_v45 = vmul.f32 %v663_v38, %v663_v38 }
 0x113   : > { %v696_v29 = vadd.f32 %v695_v26, %v694_v24  ;;  %v795_v30 = vadd.f32 %v794_v25, %v793_v23  ;;  %v814_v23 = vsel %vm599_vm3, %v758_v11, 0.0  ;;  %v661_v26 = vld [vmem:[%s1264_s7 + $0xe8] sm:$0xff] }
 0x115   : > { %v698_v34 = vadd.f32 %v697_v33, %v696_v29  ;;  %v797_v35 = vadd.f32 %v796_v32, %v795_v30  ;;  %v761_v29 = vmul.f32 %v660_v20, %v660_v20  ;;  %v818_v33 = vsel %vm599_vm3, %v760_v22, 0.0 }
 0x117   : > { %v700_v40 = vadd.f32 %v699_v37, %v698_v34  ;;  %v799_v41 = vadd.f32 %v798_v39, %v797_v35  ;;  %v719_v34 = vsel %vm599_vm3, %v660_v20, 0.0  ;;  %v762_v35 = vmul.f32 %v661_v26, %v661_v26 }
 0x118   : > { %v763_v39 = vmul.f32 %v662_v31, %v662_v31 }
 0x119   : > { %v801_v46 = vadd.f32 %v800_v43, %v799_v41  ;;  %v702_v48 = vadd.f32 %v701_v44, %v700_v40  ;;  %v820_v40 = vsel %vm599_vm3, %v761_v29, 0.0  ;;  %v721_v41 = vsel %vm599_vm3, %v661_v26, 0.0 }
 0x11a   : > { %v723_v44 = vsel %vm599_vm3, %v662_v31, 0.0 }
 0x11b   : > { %v704_v52 = vadd.f32 %v703_v50, %v702_v48  ;;  %v803_v53 = vadd.f32 %v802_v49, %v801_v46  ;;  %v822_v46 = vsel %vm599_vm3, %v762_v35, 0.0  ;;  %v824_v49 = vsel %vm599_vm3, %v763_v39, 0.0 }
 0x11c   : > { %v725_v50 = vsel %vm599_vm3, %v663_v38, 0.0 }
 0x11d   : > { %v805_v58 = vadd.f32 %v804_v56, %v803_v53  ;;  %v706_v59 = vadd.f32 %v705_v57, %v704_v52  ;;  %v826_v53 = vsel %vm599_vm3, %v764_v45, 0.0 }
 0x11f   : > { %v708_v0 = vadd.f32 %v707_v61, %v706_v59  ;;  %v807_v1 = vadd.f32 %v806_v63, %v805_v58 }
 0x121   : > { %v809_v6 = vadd.f32 %v808_v3, %v807_v1  ;;  %v710_v8 = vadd.f32 %v709_v4, %v708_v0 }
 0x123   : > { %v712_v12 = vadd.f32 %v711_v10, %v710_v8  ;;  %v811_v13 = vadd.f32 %v810_v9, %v809_v6 }
 0x125   : > { %v813_v18 = vadd.f32 %v812_v16, %v811_v13  ;;  %v714_v19 = vadd.f32 %v713_v17, %v712_v12 }
 0x127   : > { %v716_v24 = vadd.f32 %v715_v21, %v714_v19  ;;  %v815_v25 = vadd.f32 %v814_v23, %v813_v18 }
 0x129   : > { %v817_v30 = vadd.f32 %v816_v27, %v815_v25  ;;  %v718_v32 = vadd.f32 %v717_v28, %v716_v24 }
 0x12b   : > { %v720_v36 = vadd.f32 %v719_v34, %v718_v32  ;;  %v819_v37 = vadd.f32 %v818_v33, %v817_v30 }
 0x12d   : > { %v821_v42 = vadd.f32 %v820_v40, %v819_v37  ;;  %v722_v43 = vadd.f32 %v721_v41, %v720_v36 }
 0x12f   : > { %v724_v47 = vadd.f32 %v723_v44, %v722_v43  ;;  %v823_v48 = vadd.f32 %v822_v46, %v821_v42 }
 0x131   : > { %v726_v51 = vadd.f32 %v725_v50, %v724_v47  ;;  %v825_v52 = vadd.f32 %v824_v49, %v823_v48 }
 0x133   : > { %v727_v54 = vrot.slane %v726_v51, 4  ;;  %v827_v55 = vadd.f32 %v826_v53, %v825_v52 }
 0x135   : > { %v728_v56 = vadd.f32 %v727_v54, %v726_v51  ;;  %v828_v57 = vrot.slane %v827_v55, 4 }
 0x137   : > { %v729_v58 = vrot.slane %v728_v56, 2  ;;  %v829_v59 = vadd.f32 %v828_v57, %v827_v55 }
 0x139   : > { %v730_v60 = vadd.f32 %v729_v58, %v728_v56  ;;  %v830_v61 = vrot.slane %v829_v59, 2 }
 0x13b   : > { %v731_v62 = vrot.slane %v730_v60, 1  ;;  %v831_v63 = vadd.f32 %v830_v61, %v829_v59 }
 0x13d   : > { %v832_v0 = vrot.slane %v831_v63, 1  ;;  %v732_v1 = vadd.f32 %v731_v62, %v730_v60 }
 0x13f   : > { %v833_v2 = vadd.f32 %v832_v0, %v831_v63 }
 0x141   : > { %v835_v3 = vsel %vm834_vm4, %v732_v1, %v833_v2 }
 0x142   : > { %v837_v4 = vsel %vm836_vm5, %v835_v3, 0.0 }
 0x143   : > { %838 = vst.msk [vmem:[%s229_s11] sm:$0xff] %vm599_vm3, %v837_v4 }
 0x144 PF: > { %s14_s14 = sadd.s32 1, %s1161_s14   ;;  %s1445_s12 = smov %s1157_s13 }
 0x145   : > { %p11_p6 = scmp.ge.s32.totalorder %s14_s14, 4   ;;  %s1446_s13 = smov %s1448_s15 }
 0x147   :  { %13 = sbr.rel (!%p11_p6) target bundleno = 2 (0x2), region = 73 }

// kernel: d1_forward.6
= control target key start
LH: loop header
LB: loop body
LE: loop exit
PB: predicated region body
PF: predicated region fallthrough
CT: control target
= control target key end

     0   :  { %s2690_s12 = smov 0   ;;  %s2692_s13 = smov 0   ;;  %s3156_s0 = inlined_call_operand.vmem [shape: bf16[128,1600], index: 0, kind: input, shape index: {}]   ;;  %s3157_s1 = inlined_call_operand.vmem [shape: bf16[1600,128], index: 1, kind: input, shape index: {}]   ;;  %s3158_s2 = inlined_call_operand.vmem [shape: f32[128,128], index: 2, kind: output, shape index: {0}]   ;;  %s3159_s3 = inlined_call_operand.vmem [shape: f32[16,128], index: 3, kind: output, shape index: {1}]  }
   0x1   :  { %s2694_s14 = smov 0  }
   0x2 LB: > { %s26_s15 = sadd.s32 1, %s2664_s13  ;;  %p2009_p0 = scmp.ge.s32.totalorder %s2668_s14, 1  ;;  %s2668_s14 = sphi %s2694_s14, %s14_s14   ;;  %s2664_s13 = sphi %s2692_s13, %s3189_s13   ;;  %s2660_s12 = sphi %s2690_s12, %s3188_s12  }
   0x3   : > { %p28_p1 = scmp.ge.s32.totalorder %s26_s15, 2  ;;  %p167_p2 = scmp.lt.s32.totalorder %s2668_s14, 3 }
   0x5   : > { %s3191_s15 = smov (%p28_p1, %s26_s15), 0  ;;  %p168_p3 = pnand %p2009_p0, %p167_p2 }
   0x7   : > { %171 = sbr.rel (%p168_p3) target bundleno = 374 (0x176), region = 28 }
   0xc   : > { %v2470_v0 = vld [vmem:[%s3157_s1 + $0x78] sm:$0xff]   ;;  %v2474_v4 = vld [vmem:[%s3157_s1 + $0x70] sm:$0xff]   ;;  %v2478_v8 = vld [vmem:[%s3157_s1 + $0x68] sm:$0xff]   ;;  %s2010_s23 = sshll.u32 %s2660_s12, 3  ;;  %vm1350_vm0 = vcmask 523264   ;;  %p226_p5 = scmp.lt.s32.totalorder %s2660_s12, 1 }
   0xd   : > { %v2471_v1 = vld [vmem:[%s3157_s1 + $0xf8] sm:$0xff]   ;;  %2173 = vmatprep.subr.bf16.mxu0 %v2470_v0  ;;  %v2475_v5 = vld [vmem:[%s3157_s1 + $0xf0] sm:$0xff]   ;;  %v2479_v9 = vld [vmem:[%s3157_s1 + $0xe8] sm:$0xff]   ;;  %p207_p4 = scmp.lt.s32.totalorder %s2010_s23, 15  ;;  %vm1868_vm1 = vcmask 1040384   ;;  %vm1870_vm2 = vcmask 1041408  }
   0xe   : > { %v2472_v2 = vld [vmem:[%s3157_s1 + $0x38] sm:$0xff]   ;;  %2213 = vmatprep.subr.bf16.mxu1 %v2471_v1  ;;  %v2476_v6 = vld [vmem:[%s3157_s1 + $0x30] sm:$0xff]   ;;  %v2480_v10 = vld [vmem:[%s3157_s1 + $0x28] sm:$0xff]   ;;  %s3195_s12 = smov (!%p226_p5, %s2660_s12), 1 }
   0xf   : > { %v2473_v3 = vld [vmem:[%s3157_s1 + $0xb8] sm:$0xff]   ;;  %2174 = vmatpush3.bf16.msra.mxu0 %v2472_v2  ;;  %v2477_v7 = vld [vmem:[%s3157_s1 + $0xb0] sm:$0xff]   ;;  %v2481_v11 = vld [vmem:[%s3157_s1 + $0xa8] sm:$0xff]   ;;  %s3193_s23 = smov (!%p207_p4, %s2010_s23), 15 }
  0x10   : > { %2214 = vmatpush3.bf16.msra.mxu1 %v2473_v3  ;;  %2175 = vmatprep.subr.bf16.mxu0 %v2474_v4  ;;  %v2482_v12 = vld [vmem:[%s3157_s1 + $0x60] sm:$0xff]   ;;  %v2486_v16 = vld [vmem:[%s3157_s1 + $0x58] sm:$0xff]   ;;  %v2490_v20 = vld [vmem:[%s3157_s1 + $0x50] sm:$0xff]   ;;  %s2445_s24 = smul.u32 52, %s3193_s23 }
  0x11   : > { %2215 = vmatprep.subr.bf16.mxu1 %v2475_v5  ;;  %v2483_v13 = vld [vmem:[%s3157_s1 + $0xe0] sm:$0xff]   ;;  %v2487_v17 = vld [vmem:[%s3157_s1 + $0xd8] sm:$0xff]   ;;  %v2491_v21 = vld [vmem:[%s3157_s1 + $0xd0] sm:$0xff]  }
  0x12   : > { %v2484_v14 = vld [vmem:[%s3157_s1 + $0x20] sm:$0xff]   ;;  %v2488_v18 = vld [vmem:[%s3157_s1 + $0x18] sm:$0xff]   ;;  %v2492_v22 = vld [vmem:[%s3157_s1 + $0x10] sm:$0xff]   ;;  %s2807_s8 = scalar_lea.vmem %s3156_s0, %s2445_s24 }
  0x13   : > { %2176 = vmatpush3.bf16.msra.mxu0 %v2476_v6  ;;  %v2485_v15 = vld [vmem:[%s3157_s1 + $0xa0] sm:$0xff]   ;;  %v2489_v19 = vld [vmem:[%s3157_s1 + $0x98] sm:$0xff]   ;;  %v2493_v23 = vld [vmem:[%s3157_s1 + $0x90] sm:$0xff]  }
  0x14   : > { %2216 = vmatpush3.bf16.msra.mxu1 %v2477_v7  ;;  %2177 = vmatprep.subr.bf16.mxu0 %v2478_v8  ;;  %v2494_v24 = vld [vmem:[%s3157_s1 + $0x48] sm:$0xff]   ;;  %v2498_v28 = vld [vmem:[%s3157_s1 + $0x40] sm:$0xff]   ;;  %v2508_v36 = vld [vmem:[%s3157_s1 + $0x178] sm:$0xff]  }
  0x15   : > { %2217 = vmatprep.subr.bf16.mxu1 %v2479_v9  ;;  %v2495_v25 = vld [vmem:[%s3157_s1 + $0xc8] sm:$0xff]   ;;  %v2499_v29 = vld [vmem:[%s3157_s1 + $0xc0] sm:$0xff]   ;;  %v2509_v37 = vld [vmem:[%s3157_s1 + $0x1f8] sm:$0xff]  }
  0x16   : > { %v2496_v26 = vld [vmem:[%s3157_s1 + $0x8] sm:$0xff]   ;;  %v2500_v30 = vld [vmem:[%s3157_s1] sm:$0xff]   ;;  %v2510_v38 = vld [vmem:[%s3157_s1 + $0x138] sm:$0xff]  }
  0x17   : > { %2178 = vmatpush3.bf16.msra.mxu0 %v2480_v10  ;;  %v2497_v27 = vld [vmem:[%s3157_s1 + $0x88] sm:$0xff]   ;;  %v2501_v31 = vld [vmem:[%s3157_s1 + $0x80] sm:$0xff]   ;;  %v2511_v39 = vld [vmem:[%s3157_s1 + $0x1b8] sm:$0xff]  }
  0x18   : > { %2218 = vmatpush3.bf16.msra.mxu1 %v2481_v11  ;;  %2179 = vmatprep.subr.bf16.mxu0 %v2482_v12  ;;  %v2502_v32 = vld [vmem:[%s2807_s8] ss:$52 sps:$4 sm:$0xff]   ;;  %v2504_v33 = vld [vmem:[%s2807_s8 + $0x4] ss:$52 sps:$4 sm:$0xff]   ;;  %v2505_v34 = vld [vmem:[%s2807_s8 + $0x8] ss:$52 sps:$4 sm:$0xff]  }
  0x19   : > { %2219 = vmatprep.subr.bf16.mxu1 %v2483_v13  ;;  %v2507_v35 = vld [vmem:[%s2807_s8 + $0xc] ss:$52 sps:$4 sm:$0xff]   ;;  %1395 = vmatprep.mubr.bf16.mxu0 %v2504_v33  ;;  %v2512_v40 = vld [vmem:[%s3157_s1 + $0x170] sm:$0xff]   ;;  %v2520_v46 = vld [vmem:[%s2807_s8 + $0x68] ss:$52 sps:$4 sm:$0xff]  }
  0x1a   : > { %1460 = vmatprep.mubr.bf16.mxu1 %v2507_v35  ;;  %v2513_v41 = vld [vmem:[%s3157_s1 + $0x1f0] sm:$0xff]   ;;  %v2516_v44 = vld [vmem:[%s2807_s8 + $0x6c] ss:$52 sps:$4 sm:$0xff]   ;;  %v2536_v60 = vld [vmem:[%s3157_s1 + $0x158] sm:$0xff]  }
  0x1b   : > { %2180 = vmatpush3.bf16.msra.mxu0 %v2484_v14  ;;  %v2514_v42 = vld [vmem:[%s3157_s1 + $0x130] sm:$0xff]   ;;  %v2522_v48 = vld [vmem:[%s3157_s1 + $0x168] sm:$0xff]   ;;  %v2526_v52 = vld [vmem:[%s3157_s1 + $0x160] sm:$0xff]  }
  0x1c   : > { %2220 = vmatpush3.bf16.msra.mxu1 %v2485_v15  ;;  %2181 = vmatprep.subr.bf16.mxu0 %v2486_v16  ;;  %v2515_v43 = vld [vmem:[%s3157_s1 + $0x1b0] sm:$0xff]   ;;  %v2523_v49 = vld [vmem:[%s3157_s1 + $0x1e8] sm:$0xff]   ;;  %v2527_v53 = vld [vmem:[%s3157_s1 + $0x1e0] sm:$0xff]  }
  0x1d   : > { %2221 = vmatprep.subr.bf16.mxu1 %v2487_v17  ;;  %v2518_v45 = vld [vmem:[%s2807_s8 + $0x74] ss:$52 sps:$4 sm:$0xff]   ;;  %v2521_v47 = vld [vmem:[%s2807_s8 + $0x70] ss:$52 sps:$4 sm:$0xff]   ;;  %v2535_v59 = vld [vmem:[%s2807_s8 + $0xd8] ss:$52 sps:$4 sm:$0xff]  }
  0x1e   : > { %v2524_v50 = vld [vmem:[%s3157_s1 + $0x128] sm:$0xff]   ;;  %v2528_v54 = vld [vmem:[%s3157_s1 + $0x120] sm:$0xff]   ;;  %v2532_v57 = vld [vmem:[%s2807_s8 + $0xdc] ss:$52 sps:$4 sm:$0xff]  }
  0x1f   : > { %2182 = vmatpush3.bf16.msra.mxu0 %v2488_v18  ;;  %v2525_v51 = vld [vmem:[%s3157_s1 + $0x1a8] sm:$0xff]   ;;  %v2529_v55 = vld [vmem:[%s3157_s1 + $0x1a0] sm:$0xff]   ;;  %v2537_v61 = vld [vmem:[%s3157_s1 + $0x1d8] sm:$0xff]  }
  0x20   : > { %2222 = vmatpush3.bf16.msra.mxu1 %v2489_v19  ;;  %2183 = vmatprep.subr.bf16.mxu0 %v2490_v20  ;;  %v2530_v56 = vld [vmem:[%s2807_s8 + $0xd4] ss:$52 sps:$4 sm:$0xff]   ;;  %v2534_v58 = vld [vmem:[%s2807_s8 + $0xd0] ss:$52 sps:$4 sm:$0xff]   ;;  %v2538_v62 = vld [vmem:[%s3157_s1 + $0x118] sm:$0xff]  }
  0x21   : > { %2223 = vmatprep.subr.bf16.mxu1 %v2491_v21  ;;  %v2539_v63 = vld [vmem:[%s3157_s1 + $0x198] sm:$0xff]   ;;  %v2540_v0 = vld [vmem:[%s3157_s1 + $0x150] sm:$0xff]   ;;  %v2550_v8 = vld [vmem:[%s3157_s1 + $0x148] sm:$0xff]  }
  0x22   : > { %v2541_v1 = vld [vmem:[%s3157_s1 + $0x1d0] sm:$0xff]   ;;  %v2546_v5 = vld [vmem:[%s2807_s8 + $0x144] ss:$52 sps:$4 sm:$0xff]   ;;  %v2551_v9 = vld [vmem:[%s3157_s1 + $0x1c8] sm:$0xff]  }
  0x23   : > { %2184 = vmatpush3.bf16.msra.mxu0 %v2492_v22  ;;  %v2542_v2 = vld [vmem:[%s3157_s1 + $0x110] sm:$0xff]   ;;  %v2548_v6 = vld [vmem:[%s2807_s8 + $0x138] ss:$52 sps:$4 sm:$0xff]   ;;  %v2554_v12 = vld [vmem:[%s3157_s1 + $0x140] sm:$0xff]  }
  0x24   : > { %2224 = vmatpush3.bf16.msra.mxu1 %v2493_v23  ;;  %2185 = vmatprep.subr.bf16.mxu0 %v2494_v24  ;;  %v2543_v3 = vld [vmem:[%s3157_s1 + $0x190] sm:$0xff]   ;;  %v2552_v10 = vld [vmem:[%s3157_s1 + $0x108] sm:$0xff]   ;;  %v2555_v13 = vld [vmem:[%s3157_s1 + $0x1c0] sm:$0xff]  }
  0x25   : > { %2225 = vmatprep.subr.bf16.mxu1 %v2495_v25  ;;  %v2544_v4 = vld [vmem:[%s2807_s8 + $0x13c] ss:$52 sps:$4 sm:$0xff]   ;;  %v2549_v7 = vld [vmem:[%s2807_s8 + $0x140] ss:$52 sps:$4 sm:$0xff]   ;;  %v2553_v11 = vld [vmem:[%s3157_s1 + $0x188] sm:$0xff]  }
  0x26   : > { %v2556_v14 = vld [vmem:[%s3157_s1 + $0x100] sm:$0xff]   ;;  %v2560_v17 = vld [vmem:[%s2807_s8 + $0x14] ss:$52 sps:$4 sm:$0xff]   ;;  %v2561_v18 = vld [vmem:[%s2807_s8 + $0x18] ss:$52 sps:$4 sm:$0xff]  }
  0x27   : > { %2186 = vmatpush3.bf16.msra.mxu0 %v2496_v26  ;;  %v2557_v15 = vld [vmem:[%s3157_s1 + $0x180] sm:$0xff]   ;;  %v2563_v19 = vld [vmem:[%s2807_s8 + $0x1c] ss:$52 sps:$4 sm:$0xff]   ;;  %v2579_v33 = vld [vmem:[%s3157_s1 + $0x2e8] sm:$0xff]  }
  0x28   : > { %2226 = vmatpush3.bf16.msra.mxu1 %v2497_v27  ;;  %2187 = vmatprep.subr.bf16.mxu0 %v2498_v28  ;;  %v2558_v16 = vld [vmem:[%s2807_s8 + $0x10] ss:$52 sps:$4 sm:$0xff]   ;;  %v2564_v20 = vld [vmem:[%s3157_s1 + $0x278] sm:$0xff]   ;;  %v2581_v35 = vld [vmem:[%s3157_s1 + $0x2a8] sm:$0xff]  }
  0x29   : > { %2227 = vmatprep.subr.bf16.mxu1 %v2499_v29  ;;  %v2565_v21 = vld [vmem:[%s3157_s1 + $0x2f8] sm:$0xff]   ;;  %v2568_v24 = vld [vmem:[%s3157_s1 + $0x270] sm:$0xff]  }
  0x2a   : > { %v2566_v22 = vld [vmem:[%s3157_s1 + $0x238] sm:$0xff]   ;;  %v2569_v25 = vld [vmem:[%s3157_s1 + $0x2f0] sm:$0xff]  }
  0x2b   : > { %2188 = vmatpush3.bf16.msra.mxu0 %v2500_v30  ;;  %v2567_v23 = vld [vmem:[%s3157_s1 + $0x2b8] sm:$0xff]   ;;  %v2570_v26 = vld [vmem:[%s3157_s1 + $0x230] sm:$0xff]  }
  0x2c   : > { %2228 = vmatpush3.bf16.msra.mxu1 %v2501_v31  ;;  %2253 = vmatprep.subr.bf16.mxu0 %v2508_v36  ;;  %v2571_v27 = vld [vmem:[%s3157_s1 + $0x2b0] sm:$0xff]   ;;  %v2574_v29 = vld [vmem:[%s2807_s8 + $0x84] ss:$52 sps:$4 sm:$0xff]  }
  0x2d   : > { %2293 = vmatprep.subr.bf16.mxu1 %v2509_v37  ;;  %v2572_v28 = vld [vmem:[%s2807_s8 + $0x7c] ss:$52 sps:$4 sm:$0xff]   ;;  %v2576_v30 = vld [vmem:[%s2807_s8 + $0x78] ss:$52 sps:$4 sm:$0xff]   ;;  %v2577_v31 = vld [vmem:[%s2807_s8 + $0x80] ss:$52 sps:$4 sm:$0xff]  }
  0x2e   : > { %1396 = vmatmul.mubr.bf16.vlgmr.msra.gmra.mxu0 %v2502_v32  ;;  %v2578_v32 = vld [vmem:[%s3157_s1 + $0x268] sm:$0xff]   ;;  %v2582_v36 = vld [vmem:[%s3157_s1 + $0x260] sm:$0xff]  }
  0x2f   : > { %1461 = vmatmul.mubr.bf16.vlgmr.msra.gmra.mxu1 %v2505_v34  ;;  %2254 = vmatpush3.bf16.msra.mxu0 %v2510_v38  ;;  %v2580_v34 = vld [vmem:[%s3157_s1 + $0x228] sm:$0xff]   ;;  %v2583_v37 = vld [vmem:[%s3157_s1 + $0x2e0] sm:$0xff]  }
  0x30   : > { %2294 = vmatpush3.bf16.msra.mxu1 %v2511_v39  ;;  %2255 = vmatprep.subr.bf16.mxu0 %v2512_v40  ;;  %v2584_v38 = vld [vmem:[%s3157_s1 + $0x220] sm:$0xff]  }
  0x31   : > { %2295 = vmatprep.subr.bf16.mxu1 %v2513_v41  ;;  %1403 = vmatprep.mubr.bf16.mxu0 %v2516_v44  ;;  %v2585_v39 = vld [vmem:[%s3157_s1 + $0x2a0] sm:$0xff]   ;;  %v2592_v44 = vld [vmem:[%s3157_s1 + $0x258] sm:$0xff]  }
  0x32   : > { %1468 = vmatprep.mubr.bf16.mxu1 %v2518_v45  ;;  %v2586_v40 = vld [vmem:[%s2807_s8 + $0xe4] ss:$52 sps:$4 sm:$0xff]   ;;  %v2588_v41 = vld [vmem:[%s2807_s8 + $0xec] ss:$52 sps:$4 sm:$0xff]  }
  0x33   : > { %2256 = vmatpush3.bf16.msra.mxu0 %v2514_v42  ;;  %v2590_v42 = vld [vmem:[%s2807_s8 + $0xe0] ss:$52 sps:$4 sm:$0xff]   ;;  %v2593_v45 = vld [vmem:[%s3157_s1 + $0x2d8] sm:$0xff]  }
  0x34   : > { %2296 = vmatpush3.bf16.msra.mxu1 %v2515_v43  ;;  %2257 = vmatprep.subr.bf16.mxu0 %v2522_v48  ;;  %v2591_v43 = vld [vmem:[%s2807_s8 + $0xe8] ss:$52 sps:$4 sm:$0xff]   ;;  %v2596_v48 = vld [vmem:[%s3157_s1 + $0x250] sm:$0xff]  }
  0x35   : > { %2297 = vmatprep.subr.bf16.mxu1 %v2523_v49  ;;  %v2597_v49 = vld [vmem:[%s3157_s1 + $0x2d0] sm:$0xff]  }
  0x36   : > { %1404 = vmatmul.mubr.bf16.gmra.mxu0 %v2520_v46  ;;  %v2594_v46 = vld [vmem:[%s3157_s1 + $0x218] sm:$0xff]  }
  0x37   : > { %1469 = vmatmul.mubr.bf16.gmra.mxu1 %v2521_v47  ;;  %2258 = vmatpush3.bf16.msra.mxu0 %v2524_v50  ;;  %v2595_v47 = vld [vmem:[%s3157_s1 + $0x298] sm:$0xff]   ;;  %v2598_v50 = vld [vmem:[%s3157_s1 + $0x210] sm:$0xff]  }
  0x38   : > { %2298 = vmatpush3.bf16.msra.mxu1 %v2525_v51  ;;  %2259 = vmatprep.subr.bf16.mxu0 %v2526_v52  ;;  %v2599_v51 = vld [vmem:[%s3157_s1 + $0x290] sm:$0xff]   ;;  %v2600_v52 = vld [vmem:[%s2807_s8 + $0x14c] ss:$52 sps:$4 sm:$0xff]  }
  0x39   : > { %2299 = vmatprep.subr.bf16.mxu1 %v2527_v53  ;;  %1411 = vmatprep.mubr.bf16.mxu0 %v2530_v56  ;;  %v2602_v53 = vld [vmem:[%s2807_s8 + $0x154] ss:$52 sps:$4 sm:$0xff]  }
  0x3a   : > { %1476 = vmatprep.mubr.bf16.mxu1 %v2532_v57  ;;  %v2606_v56 = vld [vmem:[%s3157_s1 + $0x248] sm:$0xff]  }
  0x3b   : > { %2260 = vmatpush3.bf16.msra.mxu0 %v2528_v54  ;;  %v2604_v54 = vld [vmem:[%s2807_s8 + $0x148] ss:$52 sps:$4 sm:$0xff]  }
  0x3c   : > { %2300 = vmatpush3.bf16.msra.mxu1 %v2529_v55  ;;  %2261 = vmatprep.subr.bf16.mxu0 %v2536_v60  ;;  %v2605_v55 = vld [vmem:[%s2807_s8 + $0x150] ss:$52 sps:$4 sm:$0xff]   ;;  %v2607_v57 = vld [vmem:[%s3157_s1 + $0x2c8] sm:$0xff]  }
  0x3d   : > { %2301 = vmatprep.subr.bf16.mxu1 %v2537_v61  ;;  %v2610_v60 = vld [vmem:[%s3157_s1 + $0x240] sm:$0xff]  }
  0x3e   : > { %1412 = vmatmul.mubr.bf16.gmra.mxu0 %v2534_v58  ;;  %v2608_v58 = vld [vmem:[%s3157_s1 + $0x208] sm:$0xff]   ;;  %v2611_v61 = vld [vmem:[%s3157_s1 + $0x2c0] sm:$0xff]  }
  0x3f   : > { %1477 = vmatmul.mubr.bf16.gmra.mxu1 %v2535_v59  ;;  %2262 = vmatpush3.bf16.msra.mxu0 %v2538_v62  ;;  %v2609_v59 = vld [vmem:[%s3157_s1 + $0x288] sm:$0xff]   ;;  %v2612_v62 = vld [vmem:[%s3157_s1 + $0x200] sm:$0xff]  }
  0x40   : > { %2302 = vmatpush3.bf16.msra.mxu1 %v2539_v63  ;;  %2263 = vmatprep.subr.bf16.mxu0 %v2540_v0  ;;  %v2613_v63 = vld [vmem:[%s3157_s1 + $0x280] sm:$0xff]  }
  0x41   : > { %2303 = vmatprep.subr.bf16.mxu1 %v2541_v1  ;;  %1419 = vmatprep.mubr.bf16.mxu0 %v2544_v4  ;;  %v2614_v0 = vld [vmem:[%s2807_s8 + $0x20] ss:$52 sps:$4 sm:$0xff]   ;;  %v2616_v1 = vld [vmem:[%s2807_s8 + $0x24] ss:$52 sps:$4 sm:$0xff]  }
  0x42   : > { %1484 = vmatprep.mubr.bf16.mxu1 %v2546_v5  ;;  %v2620_v4 = vld [vmem:[%s3157_s1 + $0x318] sm:$0xff]   ;;  %v2621_v5 = vld [vmem:[%s2807_s8 + $0x8c] ss:$52 sps:$4 sm:$0xff]  }
  0x43   : > { %2264 = vmatpush3.bf16.msra.mxu0 %v2542_v2  ;;  %v2617_v2 = vld [vmem:[%s2807_s8 + $0x28] ss:$52 sps:$4 sm:$0xff]  }
  0x44   : > { %2304 = vmatpush3.bf16.msra.mxu1 %v2543_v3  ;;  %2265 = vmatprep.subr.bf16.mxu0 %v2550_v8  ;;  %v2619_v3 = vld [vmem:[%s2807_s8 + $0x2c] ss:$52 sps:$4 sm:$0xff]   ;;  %v2625_v8 = vld [vmem:[%s2807_s8 + $0x88] ss:$52 sps:$4 sm:$0xff]  }
  0x45   : > { %2305 = vmatprep.subr.bf16.mxu1 %v2551_v9  ;;  %v2626_v9 = vld [vmem:[%s2807_s8 + $0x90] ss:$52 sps:$4 sm:$0xff]  }
  0x46   : > { %1420 = vmatmul.mubr.bf16.gmra.mxu0 %v2548_v6  ;;  %v2623_v6 = vld [vmem:[%s2807_s8 + $0x94] ss:$52 sps:$4 sm:$0xff]  }
  0x47   : > { %1485 = vmatmul.mubr.bf16.gmra.mxu1 %v2549_v7  ;;  %2266 = vmatpush3.bf16.msra.mxu0 %v2552_v10  ;;  %v2627_v7 = vld [vmem:[%s3157_s1 + $0x310] sm:$0xff]  }
  0x48   : > { %2306 = vmatpush3.bf16.msra.mxu1 %v2553_v11  ;;  %2267 = vmatprep.subr.bf16.mxu0 %v2554_v12  ;;  %v2628_v10 = vld [vmem:[%s2807_s8 + $0xf4] ss:$52 sps:$4 sm:$0xff]   ;;  %v2630_v11 = vld [vmem:[%s2807_s8 + $0xfc] ss:$52 sps:$4 sm:$0xff]  }
  0x49   : > { %2307 = vmatprep.subr.bf16.mxu1 %v2555_v13  ;;  %1525 = vmatprep.mubr.bf16.mxu0 %v2560_v17  ;;  %v2634_v12 = vld [vmem:[%s3157_s1 + $0x308] sm:$0xff]   ;;  %v2641_v13 = vld [vmem:[%s3157_s1 + $0x300] sm:$0xff]  }
  0x4a   : > { %1590 = vmatprep.mubr.bf16.mxu1 %v2563_v19  ;;  %v2637_v17 = vld [vmem:[%s2807_s8 + $0x164] ss:$52 sps:$4 sm:$0xff]   ;;  %v2640_v19 = vld [vmem:[%s2807_s8 + $0x160] ss:$52 sps:$4 sm:$0xff]  }
  0x4b   : > { %2268 = vmatpush3.bf16.msra.mxu0 %v2556_v14  ;;  %v2632_v14 = vld [vmem:[%s2807_s8 + $0xf0] ss:$52 sps:$4 sm:$0xff]  }
  0x4c   : > { %2308 = vmatpush3.bf16.msra.mxu1 %v2557_v15  ;;  %2333 = vmatprep.subr.bf16.mxu0 %v2564_v20  ;;  %v2633_v15 = vld [vmem:[%s2807_s8 + $0xf8] ss:$52 sps:$4 sm:$0xff]   ;;  %v2642_v20 = vld [vmem:[%s2807_s8 + $0x30] ss:$52 sps:$4 sm:$0xff]  }
  0x4d   : > { %2373 = vmatprep.subr.bf16.mxu1 %v2565_v21  ;;  %v2643_v21 = vld [vmem:[%s2807_s8 + $0x100] ss:$52 sps:$4 sm:$0xff]  }
  0x4e   : > { %1526 = vmatmul.mubr.bf16.vlgmr.msra.gmra.mxu0 %v2558_v16  ;;  %v2635_v16 = vld [vmem:[%s2807_s8 + $0x15c] ss:$52 sps:$4 sm:$0xff]  }
  0x4f   : > { %1591 = vmatmul.mubr.bf16.vlgmr.msra.gmra.mxu1 %v2561_v18  ;;  %2334 = vmatpush3.bf16.msra.mxu0 %v2566_v22  ;;  %v2639_v18 = vld [vmem:[%s2807_s8 + $0x158] ss:$52 sps:$4 sm:$0xff]  }
  0x50   : > { %2374 = vmatpush3.bf16.msra.mxu1 %v2567_v23  ;;  %2335 = vmatprep.subr.bf16.mxu0 %v2568_v24  ;;  %v2644_v22 = vld [vmem:[%s2807_s8 + $0x98] ss:$52 sps:$4 sm:$0xff]   ;;  %v2645_v23 = vld [vmem:[%s2807_s8 + $0x168] ss:$52 sps:$4 sm:$0xff]   ;;  %s2013_s8 = sshll.u32 %s3193_s23, 3  ;;  %s2014_s23 = sshll.u32 %s3195_s12, 3 }
  0x51   : > { %2375 = vmatprep.subr.bf16.mxu1 %v2569_v25  ;;  %1533 = vmatprep.mubr.bf16.mxu0 %v2572_v28  ;;  %s3130_s30 = scalar_lea.vmem %s3158_s2, %s2013_s8  ;;  %s232_s6 = scalar_lea.vmem %s3159_s3, %s2014_s23 }
  0x52   : > { %1598 = vmatprep.mubr.bf16.mxu1 %v2574_v29 }
  0x53   : > { %2336 = vmatpush3.bf16.msra.mxu0 %v2570_v26 }
  0x54   : > { %2376 = vmatpush3.bf16.msra.mxu1 %v2571_v27  ;;  %2337 = vmatprep.subr.bf16.mxu0 %v2578_v32 }
  0x55   : > { %2377 = vmatprep.subr.bf16.mxu1 %v2579_v33 }
  0x56   : > { %1534 = vmatmul.mubr.bf16.gmra.mxu0 %v2576_v30 }
  0x57   : > { %1599 = vmatmul.mubr.bf16.gmra.mxu1 %v2577_v31  ;;  %2338 = vmatpush3.bf16.msra.mxu0 %v2580_v34 }
  0x58   : > { %2378 = vmatpush3.bf16.msra.mxu1 %v2581_v35  ;;  %2339 = vmatprep.subr.bf16.mxu0 %v2582_v36 }
  0x59   : > { %2379 = vmatprep.subr.bf16.mxu1 %v2583_v37  ;;  %1541 = vmatprep.mubr.bf16.mxu0 %v2586_v40 }
  0x5a   : > { %1606 = vmatprep.mubr.bf16.mxu1 %v2588_v41 }
  0x5b   : > { %2340 = vmatpush3.bf16.msra.mxu0 %v2584_v38 }
  0x5c   : > { %2380 = vmatpush3.bf16.msra.mxu1 %v2585_v39  ;;  %2341 = vmatprep.subr.bf16.mxu0 %v2592_v44 }
  0x5d   : > { %2381 = vmatprep.subr.bf16.mxu1 %v2593_v45 }
  0x5e   : > { %1542 = vmatmul.mubr.bf16.gmra.mxu0 %v2590_v42 }
  0x5f   : > { %1607 = vmatmul.mubr.bf16.gmra.mxu1 %v2591_v43  ;;  %2342 = vmatpush3.bf16.msra.mxu0 %v2594_v46 }
  0x60   : > { %2382 = vmatpush3.bf16.msra.mxu1 %v2595_v47  ;;  %2343 = vmatprep.subr.bf16.mxu0 %v2596_v48 }
  0x61   : > { %2383 = vmatprep.subr.bf16.mxu1 %v2597_v49  ;;  %1549 = vmatprep.mubr.bf16.mxu0 %v2600_v52 }
  0x62   : > { %1614 = vmatprep.mubr.bf16.mxu1 %v2602_v53 }
  0x63   : > { %2344 = vmatpush3.bf16.msra.mxu0 %v2598_v50 }
  0x64   : > { %2384 = vmatpush3.bf16.msra.mxu1 %v2599_v51  ;;  %2345 = vmatprep.subr.bf16.mxu0 %v2606_v56 }
  0x65   : > { %2385 = vmatprep.subr.bf16.mxu1 %v2607_v57 }
  0x66   : > { %1550 = vmatmul.mubr.bf16.gmra.mxu0 %v2604_v54 }
  0x67   : > { %1615 = vmatmul.mubr.bf16.gmra.mxu1 %v2605_v55  ;;  %2346 = vmatpush3.bf16.msra.mxu0 %v2608_v58 }
  0x68   : > { %2386 = vmatpush3.bf16.msra.mxu1 %v2609_v59  ;;  %2347 = vmatprep.subr.bf16.mxu0 %v2610_v60 }
  0x69   : > { %2387 = vmatprep.subr.bf16.mxu1 %v2611_v61  ;;  %1655 = vmatprep.mubr.bf16.mxu0 %v2616_v1 }
  0x6a   : > { %1720 = vmatprep.mubr.bf16.mxu1 %v2619_v3 }
  0x6b   : > { %2348 = vmatpush3.bf16.msra.mxu0 %v2612_v62 }
  0x6c   : > { %2388 = vmatpush3.bf16.msra.mxu1 %v2613_v63  ;;  %2421 = vmatprep.subr.bf16.mxu0 %v2620_v4 }
  0x6d   : > { %2437 = vmatprep.subr.bf16.mxu1 %v2620_v4 }
  0x6e   : > { %1656 = vmatmul.mubr.bf16.vlgmr.msra.gmra.mxu0 %v2614_v0 }
  0x6f   : > { %1721 = vmatmul.mubr.bf16.vlgmr.msra.gmra.mxu1 %v2617_v2  ;;  %2422 = vmatpush3.bf16.msra.mxu0 %v2620_v4 }
  0x70   : > { %1663 = vmatprep.mubr.bf16.mxu0 %v2621_v5  ;;  %1728 = vmatprep.mubr.bf16.mxu1 %v2623_v6 }
  0x71   : > { %2441 = vmatpush3.bf16.msra.mxu1 %v2620_v4  ;;  %2423 = vmatprep.subr.bf16.mxu0 %v2627_v7 }
  0x72   : > { %2438 = vmatprep.subr.bf16.mxu1 %v2627_v7 }
  0x73   : > { %2424 = vmatpush3.bf16.msra.mxu0 %v2627_v7 }
  0x74   : > { %2425 = vmatprep.subr.bf16.mxu0 %v2634_v12 }
  0x75   : > { %2442 = vmatpush3.bf16.msra.mxu1 %v2627_v7 }
  0x76   : > { %1664 = vmatmul.mubr.bf16.gmra.mxu0 %v2625_v8  ;;  %2439 = vmatprep.subr.bf16.mxu1 %v2634_v12 }
  0x77   : > { %1729 = vmatmul.mubr.bf16.gmra.mxu1 %v2626_v9  ;;  %1671 = vmatprep.mubr.bf16.mxu0 %v2628_v10 }
  0x78   : > { %1736 = vmatprep.mubr.bf16.mxu1 %v2630_v11  ;;  %2426 = vmatpush3.bf16.msra.mxu0 %v2634_v12 }
  0x79   : > { %2427 = vmatprep.subr.bf16.mxu0 %v2641_v13  ;;  %2443 = vmatpush3.bf16.msra.mxu1 %v2634_v12 }
  0x7a   : > { %2440 = vmatprep.subr.bf16.mxu1 %v2641_v13 }
  0x7c   : > { %2428 = vmatpush3.bf16.msra.mxu0 %v2641_v13 }
  0x7d   : > { %2444 = vmatpush3.bf16.msra.mxu1 %v2641_v13 }
  0x7e   : > { %1672 = vmatmul.mubr.bf16.gmra.mxu0 %v2632_v14 }
  0x7f   : > { %1737 = vmatmul.mubr.bf16.gmra.mxu1 %v2633_v15  ;;  %1679 = vmatprep.mubr.bf16.mxu0 %v2635_v16 }
  0x80   : > { %1744 = vmatprep.mubr.bf16.mxu1 %v2637_v17 }
  0x86   : > { %1680 = vmatmul.mubr.bf16.gmra.mxu0 %v2639_v18 }
  0x87   : > { %1745 = vmatmul.mubr.bf16.gmra.mxu1 %v2640_v19  ;;  %2429 = vmatprep.mubr.msk.bf16.mxu0 %vm1350_vm0, %v2642_v20 }
  0x88   : > { %2433 = vmatprep.mubr.msk.bf16.mxu1 %vm1350_vm0, %v2643_v21 }
  0x8e   : > { %2430 = vmatmul.mubr.msk.bf16.vlgmr.msra.gmra.mxu0 %vm1350_vm0, %v2644_v22 }
  0x8f   : > { %2434 = vmatmul.mubr.msk.bf16.vlgmr.msra.gmra.mxu1 %vm1350_vm0, %v2645_v23 }
  0xee   : > { %v2189_v24 = vpop.f32.mrf.mxu0 }
  0xef   : > { %v2229_v25 = vpop.f32.mrf.mxu1 }
  0xf0   : > { %v2190_v26 = vpop.f32.mrf.mxu0 }
  0xf1   : > { %v2191_v27 = vadd.f32 %v2190_v26, %v2189_v24  ;;  %v2230_v28 = vpop.f32.mrf.mxu1 }
  0xf2   : > { %v2231_v29 = vadd.f32 %v2230_v28, %v2229_v25  ;;  %v2192_v30 = vpop.f32.mrf.mxu0 }
  0xf3   : > { %v2232_v31 = vpop.f32.mrf.mxu1 }
  0xf4   : > { %v3071_v32 = vadd.f32 %v2231_v29, %v2191_v27  ;;  %v2193_v33 = vpop.f32.mrf.mxu0 }
  0xf5   : > { %v2194_v34 = vadd.f32 %v2193_v33, %v2192_v30  ;;  %v2233_v35 = vpop.f32.mrf.mxu1 }
  0xf6   : > { %v2234_v36 = vadd.f32 %v2233_v35, %v2232_v31  ;;  %v2195_v38 = vpop.f32.mrf.mxu0 }
  0xf7   : > { %v2235_v39 = vpop.f32.mrf.mxu1 }
  0xf8   : > { %v3073_v37 = vadd.f32 %v2234_v36, %v2194_v34  ;;  %v2196_v40 = vpop.f32.mrf.mxu0 }
  0xf9   : > { %v2197_v41 = vadd.f32 %v2196_v40, %v2195_v38  ;;  %v2236_v42 = vpop.f32.mrf.mxu1 }
  0xfa   : > { %v2237_v43 = vadd.f32 %v2236_v42, %v2235_v39  ;;  %v2198_v44 = vpop.f32.mrf.mxu0 }
  0xfb   : > { %v2238_v45 = vpop.f32.mrf.mxu1 }
  0xfc   : > { %v3075_v46 = vadd.f32 %v2237_v43, %v2197_v41  ;;  %v2199_v47 = vpop.f32.mrf.mxu0 }
  0xfd   : > { %v2200_v48 = vadd.f32 %v2199_v47, %v2198_v44  ;;  %v2239_v49 = vpop.f32.mrf.mxu1 }
  0xfe   : > { %v2240_v50 = vadd.f32 %v2239_v49, %v2238_v45  ;;  %v2201_v52 = vpop.f32.mrf.mxu0 }
  0xff   : > { %v2241_v53 = vpop.f32.mrf.mxu1 }
 0x100   : > { %v3077_v51 = vadd.f32 %v2240_v50, %v2200_v48  ;;  %v2202_v54 = vpop.f32.mrf.mxu0 }
 0x101   : > { %v2203_v55 = vadd.f32 %v2202_v54, %v2201_v52  ;;  %v2242_v56 = vpop.f32.mrf.mxu1 }
 0x102   : > { %3160 = vst [vmem:[#allocation2_spill] sm:$0xff] %v3077_v51  ;;  %v2243_v57 = vadd.f32 %v2242_v56, %v2241_v53  ;;  %v2204_v58 = vpop.f32.mrf.mxu0 }
 0x103   : > { %v2244_v59 = vpop.f32.mrf.mxu1 }
 0x104   : > { %v3079_v60 = vadd.f32 %v2243_v57, %v2203_v55  ;;  %v2205_v61 = vpop.f32.mrf.mxu0 }
 0x105   : > { %v2206_v62 = vadd.f32 %v2205_v61, %v2204_v58  ;;  %v2245_v63 = vpop.f32.mrf.mxu1 }
 0x106   : > { %v2246_v0 = vadd.f32 %v2245_v63, %v2244_v59  ;;  %v2207_v2 = vpop.f32.mrf.mxu0 }
 0x107   : > { %v2247_v3 = vpop.f32.mrf.mxu1 }
 0x108   : > { %v3081_v1 = vadd.f32 %v2246_v0, %v2206_v62  ;;  %v2208_v4 = vpop.f32.mrf.mxu0 }
 0x109   : > { %v2248_v5 = vpop.f32.mrf.mxu1 }
 0x10a   : > { %3161 = vst [vmem:[#allocation3_spill] sm:$0xff] %v3081_v1  ;;  %v2210_v6 = vpop.f32.mrf.mxu0 }
 0x10b   : > { %v2250_v7 = vpop.f32.mrf.mxu1 }
 0x10c   : > { %v2211_v8 = vpop.f32.mrf.mxu0 }
 0x10d   : > { %v2251_v9 = vpop.f32.mrf.mxu1 }
 0x10e   : > { %v2269_v10 = vpop.f32.mrf.mxu0 }
 0x10f   : > { %v2309_v11 = vpop.f32.mrf.mxu1 }
 0x110   : > { %v2270_v12 = vpop.f32.mrf.mxu0 }
 0x111   : > { %v2310_v13 = vpop.f32.mrf.mxu1  ;;  %v2271_v62 = vadd.f32 %v2270_v12, %v2269_v10 }
 0x112   : > { %v2272_v14 = vpop.f32.mrf.mxu0 }
 0x113   : > { %v2312_v15 = vpop.f32.mrf.mxu1 }
 0x114   : > { %v2273_v16 = vpop.f32.mrf.mxu0 }
 0x115   : > { %v2313_v17 = vpop.f32.mrf.mxu1  ;;  %v2274_v0 = vadd.f32 %v2273_v16, %v2272_v14 }
 0x116   : > { %v2275_v18 = vpop.f32.mrf.mxu0  ;;  %v2314_v10 = vadd.f32 %v2313_v17, %v2312_v15 }
 0x117   : > { %v2315_v19 = vpop.f32.mrf.mxu1 }
 0x118   : > { %v2276_v20 = vpop.f32.mrf.mxu0 }
 0x119   : > { %v2316_v21 = vpop.f32.mrf.mxu1 }
 0x11a   : > { %v2278_v22 = vpop.f32.mrf.mxu0  ;;  %v2317_v14 = vadd.f32 %v2316_v21, %v2315_v19 }
 0x11b   : > { %v3083_v23 = vpop.f32.mrf.mxu1 }
 0x11c   : > { %3162 = vst [vmem:[#allocation4_spill] sm:$0xff] %v3083_v23  ;;  %v2279_v24 = vpop.f32.mrf.mxu0  ;;  %v2311_v23 = vadd.f32 %v2310_v13, %v2309_v11 }
 0x11d   : > { %v3085_v25 = vpop.f32.mrf.mxu1 }
 0x11e   : > { %3163 = vst [vmem:[#allocation5_spill] sm:$0xff] %v3085_v25  ;;  %v2281_v26 = vpop.f32.mrf.mxu0  ;;  %v1528_v25 = vadd.f32 %v2271_v62, %v3071_v32 }
 0x11f   : > { %v2321_v27 = vpop.f32.mrf.mxu1 }
 0x120   : > { %v2282_v28 = vpop.f32.mrf.mxu0 }
 0x121   : > { %v2322_v29 = vpop.f32.mrf.mxu1 }
 0x122   : > { %v3087_v30 = vpop.f32.mrf.mxu0 }
 0x123   : > { %3164 = vst [vmem:[#allocation6_spill] sm:$0xff] %v3087_v30  ;;  %v3089_v31 = vpop.f32.mrf.mxu1 }
 0x124   : > { %3165 = vst [vmem:[#allocation7_spill] sm:$0xff] %v3089_v31  ;;  %v2285_v33 = vpop.f32.mrf.mxu0  ;;  %v2252_v31 = vadd.f32 %v2251_v9, %v2250_v7  ;;  %v1593_v9 = vadd.f32 %v2311_v23, %v1528_v25 }
 0x125   : > { %v3091_v34 = vpop.f32.mrf.mxu1 }
 0x126   : > { %3166 = vst [vmem:[#allocation8_spill] sm:$0xff] %v3091_v34  ;;  %v2287_v35 = vpop.f32.mrf.mxu0  ;;  %v2283_v34 = vadd.f32 %v2282_v28, %v2281_v26  ;;  %v3175_v26 = vld [vmem:[#allocation2_spill] sm:$0xff]  ;;  %v3177_v28 = vld [vmem:[#allocation5_spill] sm:$0xff] }
 0x127   : > { %v2327_v36 = vpop.f32.mrf.mxu1 }
 0x128   : > { %v2288_v38 = vpop.f32.mrf.mxu0 }
 0x129   : > { %v2328_v39 = vpop.f32.mrf.mxu1  ;;  %v2289_v51 = vadd.f32 %v2288_v38, %v2287_v35 }
 0x12a   : > { %v2290_v40 = vpop.f32.mrf.mxu0  ;;  %v2329_v13 = vadd.f32 %v2328_v39, %v2327_v36  ;;  %v3174_v17 = vld [vmem:[#allocation6_spill] sm:$0xff] }
 0x12b   : > { %v2330_v41 = vpop.f32.mrf.mxu1  ;;  %v3178_v36 = vld [vmem:[#allocation7_spill] sm:$0xff] }
 0x12c   : > { %v2291_v42 = vpop.f32.mrf.mxu0 }
 0x12d   : > { %v2331_v43 = vpop.f32.mrf.mxu1  ;;  %v3179_v38 = vld [vmem:[#allocation8_spill] sm:$0xff] }
 0x12e   : > { %v2349_v44 = vpop.f32.mrf.mxu0  ;;  %v2326_v39 = vadd.f32 %v3179_v38, %v3178_v36 }
 0x12f   : > { %v3093_v45 = vpop.f32.mrf.mxu1 }
 0x130   : > { %3167 = vst [vmem:[#allocation9_spill] sm:$0xff] %v3093_v45  ;;  %v2350_v47 = vpop.f32.mrf.mxu0  ;;  %v2209_v45 = vadd.f32 %v2208_v4, %v2207_v2  ;;  %v2280_v2 = vadd.f32 %v2279_v24, %v2278_v22  ;;  %v3176_v24 = vld [vmem:[#allocation4_spill] sm:$0xff] }
 0x131   : > { %v3095_v48 = vpop.f32.mrf.mxu1  ;;  %v2351_v19 = vadd.f32 %v2350_v47, %v2349_v44  ;;  %v2320_v35 = vadd.f32 %v3177_v28, %v3176_v24 }
 0x132   : > { %3168 = vst [vmem:[#allocation10_spill] sm:$0xff] %v3095_v48  ;;  %v3097_v49 = vpop.f32.mrf.mxu0  ;;  %v2277_v48 = vadd.f32 %v2276_v20, %v2275_v18  ;;  %v1539_v22 = vadd.f32 %v2280_v2, %v3175_v26 }
 0x133   : > { %3169 = vst [vmem:[#allocation11_spill] sm:$0xff] %v3097_v49  ;;  %v3099_v50 = vpop.f32.mrf.mxu1 }
 0x134   : > { %3170 = vst [vmem:[#allocation12_spill] sm:$0xff] %v3099_v50  ;;  %v3101_v52 = vpop.f32.mrf.mxu0  ;;  %v2249_v50 = vadd.f32 %v2248_v5, %v2247_v3  ;;  %v1536_v12 = vadd.f32 %v2277_v48, %v3075_v46  ;;  %v2292_v3 = vadd.f32 %v2291_v42, %v2290_v40  ;;  %v1544_v5 = vadd.f32 %v2283_v34, %v3079_v60 }
 0x135   : > { %3171 = vst [vmem:[#allocation13_spill] sm:$0xff] %v3101_v52  ;;  %v3103_v53 = vpop.f32.mrf.mxu1  ;;  %v2212_v52 = vadd.f32 %v2211_v8, %v2210_v6  ;;  %v2323_v6 = vadd.f32 %v2322_v29, %v2321_v27  ;;  %v2286_v46 = vadd.f32 %v2285_v33, %v3174_v17  ;;  %v2332_v27 = vadd.f32 %v2331_v43, %v2330_v41 }
 0x136   : > { %3172 = vst [vmem:[#allocation14_spill] sm:$0xff] %v3103_v53  ;;  %v2355_v54 = vpop.f32.mrf.mxu0  ;;  %v1487_v18 = vadd.f32 %v2249_v50, %v2209_v45  ;;  %v1601_v15 = vadd.f32 %v2317_v14, %v1536_v12  ;;  %v3180_v45 = vld [vmem:[#allocation3_spill] sm:$0xff]  ;;  %v1658_v48 = vadd.f32 %v2351_v19, %v1593_v9 }
 0x137   : > { %v2395_v55 = vpop.f32.mrf.mxu1  ;;  %v1490_v32 = vadd.f32 %v2252_v31, %v2212_v52  ;;  %v1609_v34 = vadd.f32 %v2323_v6, %v1544_v5  ;;  %v1547_v47 = vadd.f32 %v2286_v46, %v3180_v45  ;;  %v3181_v50 = vld [vmem:[#allocation9_spill] sm:$0xff] }
 0x138   : > { %v2356_v56 = vpop.f32.mrf.mxu0  ;;  %v1552_v11 = vadd.f32 %v2289_v51, %v1487_v18 }
 0x139   : > { %v2396_v57 = vpop.f32.mrf.mxu1  ;;  %v2357_v7 = vadd.f32 %v2356_v56, %v2355_v54  ;;  %v1555_v60 = vadd.f32 %v2292_v3, %v1490_v32  ;;  %v3182_v52 = vld [vmem:[#allocation10_spill] sm:$0xff]  ;;  %v1604_v56 = vadd.f32 %v2320_v35, %v1539_v22 }
 0x13a   : > { %v2358_v58 = vpop.f32.mrf.mxu0  ;;  %v2397_v23 = vadd.f32 %v2396_v57, %v2395_v55  ;;  %v1617_v33 = vadd.f32 %v2329_v13, %v1552_v11  ;;  %v2391_v41 = vadd.f32 %v3182_v52, %v3181_v50 }
 0x13b   : > { %v3105_v59 = vpop.f32.mrf.mxu1  ;;  %v1666_v31 = vadd.f32 %v2357_v7, %v1601_v15  ;;  %v1620_v55 = vadd.f32 %v2332_v27, %v1555_v60  ;;  %v1612_v7 = vadd.f32 %v2326_v39, %v1547_v47 }
 0x13c   : > { %3173 = vst [vmem:[#allocation15_spill] sm:$0xff] %v3105_v59  ;;  %v2359_v61 = vpop.f32.mrf.mxu0  ;;  %v1531_v59 = vadd.f32 %v2274_v0, %v3073_v37 }
 0x13d   : > { %v3107_v63 = vpop.f32.mrf.mxu1  ;;  %v2360_v40 = vadd.f32 %v2359_v61, %v2358_v58  ;;  %v1731_v12 = vadd.f32 %v2397_v23, %v1666_v31 }
 0x13e   : > { %v2361_v49 = vpop.f32.mrf.mxu0  ;;  %v1596_v37 = vadd.f32 %v2314_v10, %v1531_v59 }
 0x13f   : > { %v2401_v1 = vpop.f32.mrf.mxu1  ;;  %v1669_v14 = vadd.f32 %v2360_v40, %v1604_v56 }
 0x140   : > { %v2362_v53 = vpop.f32.mrf.mxu0 }
 0x141   : > { %v2402_v30 = vpop.f32.mrf.mxu1  ;;  %v2363_v51 = vadd.f32 %v2362_v53, %v2361_v49  ;;  %v3183_v49 = vld [vmem:[#allocation11_spill] sm:$0xff]  ;;  %v3184_v53 = vld [vmem:[#allocation13_spill] sm:$0xff] }
 0x142   : > { %v2364_v16 = vpop.f32.mrf.mxu0  ;;  %v2354_v57 = vadd.f32 %v3184_v53, %v3183_v49  ;;  %v2403_v58 = vadd.f32 %v2402_v30, %v2401_v1  ;;  %v1723_v1 = vadd.f32 %v2391_v41, %v1658_v48 }
 0x143   : > { %v2404_v4 = vpop.f32.mrf.mxu1  ;;  %v1674_v0 = vadd.f32 %v2363_v51, %v1609_v34  ;;  %v3185_v18 = vld [vmem:[#allocation15_spill] sm:$0xff] }
 0x144   : > { %v2365_v8 = vpop.f32.mrf.mxu0  ;;  %v2400_v2 = vadd.f32 %v3107_v63, %v3185_v18  ;;  %v1661_v30 = vadd.f32 %v2354_v57, %v1596_v37 }
 0x145   : > { %v2405_v20 = vpop.f32.mrf.mxu1  ;;  %v2366_v61 = vadd.f32 %v2365_v8, %v2364_v16  ;;  %v3186_v16 = vld [vmem:[#allocation12_spill] sm:$0xff]  ;;  %v3187_v8 = vld [vmem:[#allocation14_spill] sm:$0xff]  ;;  %v1739_v26 = vadd.f32 %v2403_v58, %v1674_v0 }
 0x146   : > { %v2367_v21 = vpop.f32.mrf.mxu0  ;;  %v2394_v11 = vadd.f32 %v3187_v8, %v3186_v16  ;;  %v2406_v46 = vadd.f32 %v2405_v20, %v2404_v4  ;;  %v1734_v28 = vadd.f32 %v2400_v2, %v1669_v14 }
 0x147   : > { %v2407_v29 = vpop.f32.mrf.mxu1  ;;  %v1677_v17 = vadd.f32 %v2366_v61, %v1612_v7 }
 0x148   : > { %v2368_v25 = vpop.f32.mrf.mxu0  ;;  %v1726_v4 = vadd.f32 %v2394_v11, %v1661_v30 }
 0x149   : > { %v2369_v42 = vadd.f32 %v2368_v25, %v2367_v21  ;;  %v2408_v44 = vpop.f32.mrf.mxu1  ;;  %v1742_v31 = vadd.f32 %v2406_v46, %v1677_v17 }
 0x14a   : > { %v2409_v43 = vadd.f32 %v2408_v44, %v2407_v29  ;;  %v2370_v54 = vpop.f32.mrf.mxu0 }
 0x14b   : > { %v1682_v59 = vadd.f32 %v2369_v42, %v1617_v33  ;;  %v2410_v62 = vpop.f32.mrf.mxu1 }
 0x14c   : > { %v2371_v10 = vpop.f32.mrf.mxu0 }
 0x14d   : > { %v2372_v3 = vadd.f32 %v2371_v10, %v2370_v54  ;;  %v2411_v5 = vpop.f32.mrf.mxu1  ;;  %v1747_v6 = vadd.f32 %v2409_v43, %v1682_v59 }
 0x14e   : > { %v2412_v32 = vadd.f32 %v2411_v5, %v2410_v62  ;;  %v2431_v9 = vpop.f32.mrf.mxu0 }
 0x14f   : > { %v1685_v13 = vadd.f32 %v2372_v3, %v1620_v55  ;;  %v1796_v63 = vadd.f32 %v2431_v9, %v1731_v12  ;;  %v2435_v15 = vpop.f32.mrf.mxu1 }
 0x150   : > { %v1812_v19 = vadd.f32 %v2435_v15, %v1747_v6  ;;  %v1787_v21 = vpop.f32.mrf.mxu0 }
 0x151   : > { %1820 = vst [vmem:[%s3130_s30 + $0x10] sm:$0xff] %v1796_v63  ;;  %v1788_v22 = vadd.f32 %v1787_v21, %v1723_v1  ;;  %v1803_v24 = vpop.f32.mrf.mxu1  ;;  %v1750_v37 = vadd.f32 %v2412_v32, %v1685_v13  ;;  %v1849_v33 = vmul.f32 %v1796_v63, %v1796_v63 }
 0x152   : > { %1824 = vst [vmem:[%s3130_s30 + $0x30] sm:$0xff] %v1812_v19  ;;  %v1804_v35 = vadd.f32 %v1803_v24, %v1739_v26  ;;  %v2432_v60 = vpop.f32.mrf.mxu0  ;;  %v1853_v56 = vmul.f32 %v1812_v19, %v1812_v19 }
 0x153   : > { %1818 = vst [vmem:[%s3130_s30] sm:$0xff] %v1788_v22  ;;  %v1799_v27 = vadd.f32 %v2432_v60, %v1734_v28  ;;  %v2436_v29 = vpop.f32.mrf.mxu1  ;;  %v1847_v36 = vmul.f32 %v1788_v22, %v1788_v22 }
 0x154   : > { %1822 = vst [vmem:[%s3130_s30 + $0x20] sm:$0xff] %v1804_v35  ;;  %v1815_v20 = vadd.f32 %v2436_v29, %v1750_v37  ;;  %v1790_v34 = vpop.f32.mrf.mxu0  ;;  %v1851_v48 = vmul.f32 %v1804_v35, %v1804_v35 }
 0x155   : > { %1821 = vst [vmem:[%s3130_s30 + $0x18] sm:$0xff] %v1799_v27  ;;  %v1791_v23 = vadd.f32 %v1790_v34, %v1726_v4  ;;  %v1806_v51 = vpop.f32.mrf.mxu1  ;;  %v1850_v44 = vmul.f32 %v1799_v27, %v1799_v27 }
 0x156   : > { %1825 = vst [vmem:[%s3130_s30 + $0x38] sm:$0xff] %v1815_v20  ;;  %v1807_v25 = vadd.f32 %v1806_v51, %v1742_v31  ;;  %v1854_v53 = vmul.f32 %v1815_v20, %v1815_v20 }
 0x157   : > { %1819 = vst [vmem:[%s3130_s30 + $0x8] sm:$0xff] %v1791_v23  ;;  %v1834_v38 = vadd.f32 %v1791_v23, %v1788_v22  ;;  %v1848_v39 = vmul.f32 %v1791_v23, %v1791_v23 }
 0x158   : > { %1823 = vst [vmem:[%s3130_s30 + $0x28] sm:$0xff] %v1807_v25  ;;  %v1852_v43 = vmul.f32 %v1807_v25, %v1807_v25 }
 0x159   : > { %v1835_v40 = vadd.f32 %v1834_v38, %v1796_v63  ;;  %v1855_v42 = vadd.f32 %v1848_v39, %v1847_v36 }
 0x15b   : > { %v1856_v45 = vadd.f32 %v1855_v42, %v1849_v33  ;;  %v1836_v47 = vadd.f32 %v1835_v40, %v1799_v27 }
 0x15d   : > { %v1837_v50 = vadd.f32 %v1836_v47, %v1804_v35  ;;  %v1857_v52 = vadd.f32 %v1856_v45, %v1850_v44 }
 0x15f   : > { %v1838_v41 = vadd.f32 %v1837_v50, %v1807_v25  ;;  %v1858_v54 = vadd.f32 %v1857_v52, %v1851_v48 }
 0x161   : > { %v1839_v55 = vadd.f32 %v1838_v41, %v1812_v19  ;;  %v1859_v49 = vadd.f32 %v1858_v54, %v1852_v43 }
 0x163   : > { %v1840_v57 = vadd.f32 %v1839_v55, %v1815_v20  ;;  %v1860_v59 = vadd.f32 %v1859_v49, %v1853_v56 }
 0x165   : > { %v1841_v62 = vrot.slane %v1840_v57, 4  ;;  %v1861_v0 = vadd.f32 %v1860_v59, %v1854_v53 }
 0x167   : > { %v1842_v58 = vadd.f32 %v1841_v62, %v1840_v57  ;;  %v1862_v61 = vrot.slane %v1861_v0, 4 }
 0x169   : > { %v1843_v10 = vrot.slane %v1842_v58, 2  ;;  %v1863_v12 = vadd.f32 %v1862_v61, %v1861_v0 }
 0x16b   : > { %v1844_v14 = vadd.f32 %v1843_v10, %v1842_v58  ;;  %v1864_v18 = vrot.slane %v1863_v12, 2 }
 0x16d   : > { %v1845_v2 = vrot.slane %v1844_v14, 1  ;;  %v1865_v3 = vadd.f32 %v1864_v18, %v1863_v12 }
 0x16f   : > { %v1866_v5 = vrot.slane %v1865_v3, 1  ;;  %v1846_v6 = vadd.f32 %v1845_v2, %v1844_v14 }
 0x171   : > { %v1867_v7 = vadd.f32 %v1866_v5, %v1865_v3 }
 0x173   : > { %v1869_v32 = vsel %vm1868_vm1, %v1846_v6, %v1867_v7 }
 0x174   : > { %v1871_v9 = vsel %vm1870_vm2, %v1869_v32, 0.0 }
 0x175   : > { %1872 = vst [vmem:[%s232_s6] sm:$0xff] %v1871_v9 }
 0x176 PF: > { %s14_s14 = sadd.s32 1, %s2668_s14   ;;  %s3188_s12 = smov %s2664_s13 }
 0x177   : > { %p11_p6 = scmp.ge.s32.totalorder %s14_s14, 4   ;;  %s3189_s13 = smov %s3191_s15 }
 0x179   :  { %13 = sbr.rel (!%p11_p6) target bundleno = 2 (0x2), region = 73 }

// kernel: d1_forward.7
= control target key start
LH: loop header
LB: loop body
LE: loop exit
PB: predicated region body
PF: predicated region fallthrough
CT: control target
= control target key end

     0   :  { %s4707_s12 = smov 0   ;;  %s4709_s13 = smov 0   ;;  %s5979_s0 = inlined_call_operand.vmem [shape: bf16[32,3200], index: 0, kind: input, shape index: {}]   ;;  %s5980_s1 = inlined_call_operand.vmem [shape: bf16[3200,256], index: 1, kind: input, shape index: {}]   ;;  %s5981_s2 = inlined_call_operand.vmem [shape: f32[32,256], index: 2, kind: output, shape index: {0}]   ;;  %s5982_s3 = inlined_call_operand.vmem [shape: f32[16,256], index: 3, kind: output, shape index: {1}]  }
   0x1   :  { %s4711_s14 = smov 0  }
   0x2 LB: > { %s26_s15 = sadd.s32 1, %s4680_s13  ;;  %p3562_p0 = scmp.ge.s32.totalorder %s4684_s14, 1  ;;  %s4684_s14 = sphi %s4711_s14, %s14_s14   ;;  %s4680_s13 = sphi %s4709_s13, %s5984_s13   ;;  %s4676_s12 = sphi %s4707_s12, %s5983_s12  }
   0x3   : > { %p28_p1 = scmp.ge.s32.totalorder %s26_s15, 2  ;;  %p169_p2 = scmp.lt.s32.totalorder %s4684_s14, 3 }
   0x5   : > { %s5986_s15 = smov (%p28_p1, %s26_s15), 0  ;;  %p170_p3 = pnand %p3562_p0, %p169_p2 }
   0x6   : > { %s3563_s30 = sshll.u32 (!%p170_p3), %s4676_s12, 1  ;;  %p239_p5 = scmp.lt.s32.totalorder (!%p170_p3), %s4676_s12, 1 }
   0x7   : > { %173 = sbr.rel (%p170_p3) target bundleno = 653 (0x28d), region = 28  ;;  %p214_p4 = scmp.lt.s32.totalorder (!%p170_p3), %s3563_s30, 3 }
   0xc   : > { %v4025_v0 = vld [vmem:[%s5980_s1 + $0x74] ss:$8 sps:$4 sm:$0xff]   ;;  %v4029_v2 = vld [vmem:[%s5980_s1 + $0x70] ss:$8 sps:$4 sm:$0xff]   ;;  %v4031_v4 = vld [vmem:[%s5980_s1 + $0x64] ss:$8 sps:$4 sm:$0xff]  }
   0xd   : > { %v4027_v1 = vld [vmem:[%s5980_s1 + $0x174] ss:$8 sps:$4 sm:$0xff]   ;;  %2801 = vmatprep.subr.bf16.mxu0 %v4025_v0  ;;  %v4030_v3 = vld [vmem:[%s5980_s1 + $0x170] ss:$8 sps:$4 sm:$0xff]   ;;  %v4033_v5 = vld [vmem:[%s5980_s1 + $0x164] ss:$8 sps:$4 sm:$0xff]  }
   0xe   : > { %2844 = vmatprep.subr.bf16.mxu1 %v4027_v1  ;;  %2802 = vmatpush1.bf16.msra.mxu0 %v4029_v2  ;;  %v4035_v6 = vld [vmem:[%s5980_s1 + $0x60] ss:$8 sps:$4 sm:$0xff]   ;;  %v4037_v8 = vld [vmem:[%s5980_s1 + $0x54] ss:$8 sps:$4 sm:$0xff]   ;;  %v4041_v10 = vld [vmem:[%s5980_s1 + $0x50] ss:$8 sps:$4 sm:$0xff]  }
   0xf   : > { %2845 = vmatpush1.bf16.msra.mxu1 %v4030_v3  ;;  %2803 = vmatprep.subr.bf16.mxu0 %v4031_v4  ;;  %v4036_v7 = vld [vmem:[%s5980_s1 + $0x160] ss:$8 sps:$4 sm:$0xff]   ;;  %v4039_v9 = vld [vmem:[%s5980_s1 + $0x154] ss:$8 sps:$4 sm:$0xff]   ;;  %v4042_v11 = vld [vmem:[%s5980_s1 + $0x150] ss:$8 sps:$4 sm:$0xff]  }
  0x10   : > { %2846 = vmatprep.subr.bf16.mxu1 %v4033_v5  ;;  %v4043_v12 = vld [vmem:[%s5980_s1 + $0x44] ss:$8 sps:$4 sm:$0xff]   ;;  %v4047_v14 = vld [vmem:[%s5980_s1 + $0x40] ss:$8 sps:$4 sm:$0xff]   ;;  %v4049_v16 = vld [vmem:[%s5980_s1 + $0x34] ss:$8 sps:$4 sm:$0xff]  }
  0x11   : > { %v4045_v13 = vld [vmem:[%s5980_s1 + $0x144] ss:$8 sps:$4 sm:$0xff]   ;;  %v4048_v15 = vld [vmem:[%s5980_s1 + $0x140] ss:$8 sps:$4 sm:$0xff]   ;;  %v4051_v17 = vld [vmem:[%s5980_s1 + $0x134] ss:$8 sps:$4 sm:$0xff]  }
  0x12   : > { %2804 = vmatpush1.bf16.msra.mxu0 %v4035_v6  ;;  %v4053_v18 = vld [vmem:[%s5980_s1 + $0x30] ss:$8 sps:$4 sm:$0xff]   ;;  %v4055_v20 = vld [vmem:[%s5980_s1 + $0x24] ss:$8 sps:$4 sm:$0xff]   ;;  %v4059_v22 = vld [vmem:[%s5980_s1 + $0x20] ss:$8 sps:$4 sm:$0xff]  }
  0x13   : > { %2847 = vmatpush1.bf16.msra.mxu1 %v4036_v7  ;;  %2805 = vmatprep.subr.bf16.mxu0 %v4037_v8  ;;  %v4054_v19 = vld [vmem:[%s5980_s1 + $0x130] ss:$8 sps:$4 sm:$0xff]   ;;  %v4057_v21 = vld [vmem:[%s5980_s1 + $0x124] ss:$8 sps:$4 sm:$0xff]   ;;  %v4060_v23 = vld [vmem:[%s5980_s1 + $0x120] ss:$8 sps:$4 sm:$0xff]  }
  0x14   : > { %2848 = vmatprep.subr.bf16.mxu1 %v4039_v9  ;;  %v4061_v24 = vld [vmem:[%s5980_s1 + $0x14] ss:$8 sps:$4 sm:$0xff]   ;;  %v4065_v26 = vld [vmem:[%s5980_s1 + $0x10] ss:$8 sps:$4 sm:$0xff]   ;;  %v4067_v28 = vld [vmem:[%s5980_s1 + $0x4] ss:$8 sps:$4 sm:$0xff]  }
  0x15   : > { %v4063_v25 = vld [vmem:[%s5980_s1 + $0x114] ss:$8 sps:$4 sm:$0xff]   ;;  %v4066_v27 = vld [vmem:[%s5980_s1 + $0x110] ss:$8 sps:$4 sm:$0xff]   ;;  %v4069_v29 = vld [vmem:[%s5980_s1 + $0x104] ss:$8 sps:$4 sm:$0xff]  }
  0x16   : > { %2806 = vmatpush1.bf16.msra.mxu0 %v4041_v10  ;;  %v4071_v30 = vld [vmem:[%s5980_s1] ss:$8 sps:$4 sm:$0xff]   ;;  %v4073_v32 = vld [vmem:[%s5980_s1 + $0xf4] ss:$8 sps:$4 sm:$0xff]   ;;  %v4077_v34 = vld [vmem:[%s5980_s1 + $0xf0] ss:$8 sps:$4 sm:$0xff]  }
  0x17   : > { %2849 = vmatpush1.bf16.msra.mxu1 %v4042_v11  ;;  %2807 = vmatprep.subr.bf16.mxu0 %v4043_v12  ;;  %v4072_v31 = vld [vmem:[%s5980_s1 + $0x100] ss:$8 sps:$4 sm:$0xff]   ;;  %v4075_v33 = vld [vmem:[%s5980_s1 + $0x1f4] ss:$8 sps:$4 sm:$0xff]   ;;  %v4078_v35 = vld [vmem:[%s5980_s1 + $0x1f0] ss:$8 sps:$4 sm:$0xff]  }
  0x18   : > { %2850 = vmatprep.subr.bf16.mxu1 %v4045_v13  ;;  %v4079_v36 = vld [vmem:[%s5980_s1 + $0xe4] ss:$8 sps:$4 sm:$0xff]   ;;  %s5988_s30 = smov (!%p214_p4, %s3563_s30), 3  ;;  %v4083_v38 = vld [vmem:[%s5980_s1 + $0xe0] ss:$8 sps:$4 sm:$0xff]   ;;  %s5990_s12 = smov (!%p239_p5, %s4676_s12), 1 }
  0x19   : > { %v4081_v37 = vld [vmem:[%s5980_s1 + $0x1e4] ss:$8 sps:$4 sm:$0xff]   ;;  %v4084_v39 = vld [vmem:[%s5980_s1 + $0x1e0] ss:$8 sps:$4 sm:$0xff]   ;;  %v4085_v40 = vld [vmem:[%s5980_s1 + $0xd4] ss:$8 sps:$4 sm:$0xff]  }
  0x1a   : > { %2808 = vmatpush1.bf16.msra.mxu0 %v4047_v14  ;;  %s3999_s4 = smul.u32 100, %s5988_s30  ;;  %v4087_v41 = vld [vmem:[%s5980_s1 + $0x1d4] ss:$8 sps:$4 sm:$0xff]   ;;  %v4089_v42 = vld [vmem:[%s5980_s1 + $0xd0] ss:$8 sps:$4 sm:$0xff]   ;;  %vm3400_vm0 = vcmask 1040384  }
  0x1b   : > { %2851 = vmatpush1.bf16.msra.mxu1 %v4048_v15  ;;  %2809 = vmatprep.subr.bf16.mxu0 %v4049_v16  ;;  %v4090_v43 = vld [vmem:[%s5980_s1 + $0x1d0] ss:$8 sps:$4 sm:$0xff]   ;;  %v4091_v44 = vld [vmem:[%s5980_s1 + $0xc4] ss:$8 sps:$4 sm:$0xff]   ;;  %v4095_v46 = vld [vmem:[%s5980_s1 + $0xc0] ss:$8 sps:$4 sm:$0xff]  }
  0x1c   : > { %2852 = vmatprep.subr.bf16.mxu1 %v4051_v17  ;;  %s4869_s19 = scalar_lea.vmem %s5979_s0, %s3999_s4  ;;  %v4093_v45 = vld [vmem:[%s5980_s1 + $0x1c4] ss:$8 sps:$4 sm:$0xff]   ;;  %v4096_v47 = vld [vmem:[%s5980_s1 + $0x1c0] ss:$8 sps:$4 sm:$0xff]   ;;  %v4097_v48 = vld [vmem:[%s5980_s1 + $0xb4] ss:$8 sps:$4 sm:$0xff]  }
  0x1d   : > { %v4123_v49 = vld [vmem:[%s4869_s19 + $0x4] ss:$100 sps:$4 sm:$0xff]   ;;  %v4099_v50 = vld [vmem:[%s5980_s1 + $0x1b4] ss:$8 sps:$4 sm:$0xff]   ;;  %v4126_v51 = vld [vmem:[%s4869_s19 + $0xc] ss:$100 sps:$4 sm:$0xff]  }
  0x1e   : > { %2810 = vmatpush1.bf16.msra.mxu0 %v4053_v18  ;;  %2833 = vmatprep.mubr.bf16.mxu0 %v4123_v49  ;;  %v4101_v52 = vld [vmem:[%s5980_s1 + $0xb0] ss:$8 sps:$4 sm:$0xff]   ;;  %v4103_v54 = vld [vmem:[%s5980_s1 + $0xa4] ss:$8 sps:$4 sm:$0xff]   ;;  %v4107_v56 = vld [vmem:[%s5980_s1 + $0xa0] ss:$8 sps:$4 sm:$0xff]  }
  0x1f   : > { %2853 = vmatpush1.bf16.msra.mxu1 %v4054_v19  ;;  %2811 = vmatprep.subr.bf16.mxu0 %v4055_v20  ;;  %v4102_v53 = vld [vmem:[%s5980_s1 + $0x1b0] ss:$8 sps:$4 sm:$0xff]   ;;  %v4105_v55 = vld [vmem:[%s5980_s1 + $0x1a4] ss:$8 sps:$4 sm:$0xff]   ;;  %v4108_v57 = vld [vmem:[%s5980_s1 + $0x1a0] ss:$8 sps:$4 sm:$0xff]  }
  0x20   : > { %2854 = vmatprep.subr.bf16.mxu1 %v4057_v21  ;;  %2876 = vmatprep.mubr.bf16.mxu1 %v4126_v51  ;;  %v4109_v58 = vld [vmem:[%s5980_s1 + $0x94] ss:$8 sps:$4 sm:$0xff]   ;;  %v4113_v60 = vld [vmem:[%s5980_s1 + $0x90] ss:$8 sps:$4 sm:$0xff]   ;;  %v4115_v62 = vld [vmem:[%s5980_s1 + $0x84] ss:$8 sps:$4 sm:$0xff]  }
  0x21   : > { %v4111_v59 = vld [vmem:[%s5980_s1 + $0x194] ss:$8 sps:$4 sm:$0xff]   ;;  %v4114_v61 = vld [vmem:[%s5980_s1 + $0x190] ss:$8 sps:$4 sm:$0xff]   ;;  %v4117_v63 = vld [vmem:[%s5980_s1 + $0x184] ss:$8 sps:$4 sm:$0xff]  }
  0x22   : > { %2812 = vmatpush1.bf16.msra.mxu0 %v4059_v22  ;;  %v4119_v0 = vld [vmem:[%s5980_s1 + $0x80] ss:$8 sps:$4 sm:$0xff]   ;;  %v4129_v2 = vld [vmem:[%s5980_s1 + $0x274] ss:$8 sps:$4 sm:$0xff]   ;;  %v4127_v6 = vld [vmem:[%s5980_s1 + $0x270] ss:$8 sps:$4 sm:$0xff]  }
  0x23   : > { %2855 = vmatpush1.bf16.msra.mxu1 %v4060_v23  ;;  %2813 = vmatprep.subr.bf16.mxu0 %v4061_v24  ;;  %v4120_v1 = vld [vmem:[%s5980_s1 + $0x180] ss:$8 sps:$4 sm:$0xff]   ;;  %v4132_v3 = vld [vmem:[%s5980_s1 + $0x374] ss:$8 sps:$4 sm:$0xff]   ;;  %v4130_v7 = vld [vmem:[%s5980_s1 + $0x370] ss:$8 sps:$4 sm:$0xff]  }
  0x24   : > { %2856 = vmatprep.subr.bf16.mxu1 %v4063_v25  ;;  %v4121_v4 = vld [vmem:[%s4869_s19] ss:$100 sps:$4 sm:$0xff]   ;;  %v4124_v5 = vld [vmem:[%s4869_s19 + $0x8] ss:$100 sps:$4 sm:$0xff]   ;;  %v4141_v12 = vld [vmem:[%s5980_s1 + $0x254] ss:$8 sps:$4 sm:$0xff]  }
  0x25   : > { %v4135_v8 = vld [vmem:[%s5980_s1 + $0x264] ss:$8 sps:$4 sm:$0xff]   ;;  %v4133_v10 = vld [vmem:[%s5980_s1 + $0x260] ss:$8 sps:$4 sm:$0xff]   ;;  %v4144_v13 = vld [vmem:[%s5980_s1 + $0x354] ss:$8 sps:$4 sm:$0xff]  }
  0x26   : > { %2814 = vmatpush1.bf16.msra.mxu0 %v4065_v26  ;;  %v4138_v9 = vld [vmem:[%s5980_s1 + $0x364] ss:$8 sps:$4 sm:$0xff]   ;;  %v4136_v11 = vld [vmem:[%s5980_s1 + $0x360] ss:$8 sps:$4 sm:$0xff]   ;;  %v4139_v14 = vld [vmem:[%s5980_s1 + $0x250] ss:$8 sps:$4 sm:$0xff]  }
  0x27   : > { %2857 = vmatpush1.bf16.msra.mxu1 %v4066_v27  ;;  %2815 = vmatprep.subr.bf16.mxu0 %v4067_v28  ;;  %v4142_v15 = vld [vmem:[%s5980_s1 + $0x350] ss:$8 sps:$4 sm:$0xff]   ;;  %v4147_v16 = vld [vmem:[%s5980_s1 + $0x244] ss:$8 sps:$4 sm:$0xff]   ;;  %v4145_v18 = vld [vmem:[%s5980_s1 + $0x240] ss:$8 sps:$4 sm:$0xff]  }
  0x28   : > { %2858 = vmatprep.subr.bf16.mxu1 %v4069_v29  ;;  %v4150_v17 = vld [vmem:[%s5980_s1 + $0x344] ss:$8 sps:$4 sm:$0xff]   ;;  %v4148_v19 = vld [vmem:[%s5980_s1 + $0x340] ss:$8 sps:$4 sm:$0xff]   ;;  %v4153_v20 = vld [vmem:[%s5980_s1 + $0x234] ss:$8 sps:$4 sm:$0xff]  }
  0x29   : > { %v4156_v21 = vld [vmem:[%s5980_s1 + $0x334] ss:$8 sps:$4 sm:$0xff]   ;;  %v4151_v22 = vld [vmem:[%s5980_s1 + $0x230] ss:$8 sps:$4 sm:$0xff]   ;;  %v4159_v24 = vld [vmem:[%s5980_s1 + $0x224] ss:$8 sps:$4 sm:$0xff]  }
  0x2a   : > { %2816 = vmatpush1.bf16.msra.mxu0 %v4071_v30  ;;  %v4154_v23 = vld [vmem:[%s5980_s1 + $0x330] ss:$8 sps:$4 sm:$0xff]   ;;  %v4162_v25 = vld [vmem:[%s5980_s1 + $0x324] ss:$8 sps:$4 sm:$0xff]   ;;  %v4157_v26 = vld [vmem:[%s5980_s1 + $0x220] ss:$8 sps:$4 sm:$0xff]  }
  0x2b   : > { %2859 = vmatpush1.bf16.msra.mxu1 %v4072_v31  ;;  %2817 = vmatprep.subr.bf16.mxu0 %v4073_v32  ;;  %v4160_v27 = vld [vmem:[%s5980_s1 + $0x320] ss:$8 sps:$4 sm:$0xff]   ;;  %v4165_v28 = vld [vmem:[%s5980_s1 + $0x214] ss:$8 sps:$4 sm:$0xff]   ;;  %v4163_v30 = vld [vmem:[%s5980_s1 + $0x210] ss:$8 sps:$4 sm:$0xff]  }
  0x2c   : > { %2860 = vmatprep.subr.bf16.mxu1 %v4075_v33  ;;  %v4168_v29 = vld [vmem:[%s5980_s1 + $0x314] ss:$8 sps:$4 sm:$0xff]   ;;  %v4166_v31 = vld [vmem:[%s5980_s1 + $0x310] ss:$8 sps:$4 sm:$0xff]   ;;  %v4171_v32 = vld [vmem:[%s5980_s1 + $0x204] ss:$8 sps:$4 sm:$0xff]  }
  0x2d   : > { %v4174_v33 = vld [vmem:[%s5980_s1 + $0x304] ss:$8 sps:$4 sm:$0xff]   ;;  %v4190_v49 = vld [vmem:[%s5980_s1 + $0x3d0] ss:$8 sps:$4 sm:$0xff]   ;;  %vm3403_vm1 = vcmask 1041408  }
  0x2e   : > { %2818 = vmatpush2.bf16.msra.mxu0 %v4077_v34  ;;  %v4225_v34 = vld [vmem:[%s4869_s19 + $0x14] ss:$100 sps:$4 sm:$0xff]   ;;  %v4198_v51 = vld [vmem:[%s5980_s1 + $0x3c4] ss:$8 sps:$4 sm:$0xff]  }
  0x2f   : > { %2861 = vmatpush2.bf16.msra.mxu1 %v4078_v35  ;;  %2819 = vmatprep.subr.bf16.mxu0 %v4079_v36  ;;  %v4169_v35 = vld [vmem:[%s5980_s1 + $0x200] ss:$8 sps:$4 sm:$0xff]  }
  0x30   : > { %2862 = vmatprep.subr.bf16.mxu1 %v4081_v37  ;;  %v4172_v36 = vld [vmem:[%s5980_s1 + $0x300] ss:$8 sps:$4 sm:$0xff]  }
  0x31   : > { %v4231_v37 = vld [vmem:[%s4869_s19 + $0x1c] ss:$100 sps:$4 sm:$0xff]  }
  0x32   : > { %2820 = vmatpush2.bf16.msra.mxu0 %v4083_v38  ;;  %v4177_v38 = vld [vmem:[%s5980_s1 + $0x2f4] ss:$8 sps:$4 sm:$0xff]  }
  0x33   : > { %2863 = vmatpush2.bf16.msra.mxu1 %v4084_v39  ;;  %2821 = vmatprep.subr.bf16.mxu0 %v4085_v40  ;;  %v4180_v39 = vld [vmem:[%s5980_s1 + $0x3f4] ss:$8 sps:$4 sm:$0xff]   ;;  %v4175_v40 = vld [vmem:[%s5980_s1 + $0x2f0] ss:$8 sps:$4 sm:$0xff]  }
  0x34   : > { %2864 = vmatprep.subr.bf16.mxu1 %v4087_v41  ;;  %v4178_v41 = vld [vmem:[%s5980_s1 + $0x3f0] ss:$8 sps:$4 sm:$0xff]  }
  0x36   : > { %2822 = vmatpush2.bf16.msra.mxu0 %v4089_v42  ;;  %v4183_v42 = vld [vmem:[%s5980_s1 + $0x2e4] ss:$8 sps:$4 sm:$0xff]  }
  0x37   : > { %2865 = vmatpush2.bf16.msra.mxu1 %v4090_v43  ;;  %2823 = vmatprep.subr.bf16.mxu0 %v4091_v44  ;;  %v4186_v43 = vld [vmem:[%s5980_s1 + $0x3e4] ss:$8 sps:$4 sm:$0xff]   ;;  %v4181_v44 = vld [vmem:[%s5980_s1 + $0x2e0] ss:$8 sps:$4 sm:$0xff]  }
  0x38   : > { %2866 = vmatprep.subr.bf16.mxu1 %v4093_v45  ;;  %v4184_v45 = vld [vmem:[%s5980_s1 + $0x3e0] ss:$8 sps:$4 sm:$0xff]  }
  0x3a   : > { %2824 = vmatpush2.bf16.msra.mxu0 %v4095_v46  ;;  %v4189_v46 = vld [vmem:[%s5980_s1 + $0x2d4] ss:$8 sps:$4 sm:$0xff]  }
  0x3b   : > { %2867 = vmatpush2.bf16.msra.mxu1 %v4096_v47  ;;  %2825 = vmatprep.subr.bf16.mxu0 %v4097_v48  ;;  %v4192_v47 = vld [vmem:[%s5980_s1 + $0x3d4] ss:$8 sps:$4 sm:$0xff]   ;;  %v4187_v48 = vld [vmem:[%s5980_s1 + $0x2d0] ss:$8 sps:$4 sm:$0xff]  }
  0x3c   : > { %2868 = vmatprep.subr.bf16.mxu1 %v4099_v50  ;;  %v4195_v50 = vld [vmem:[%s5980_s1 + $0x2c4] ss:$8 sps:$4 sm:$0xff]  }
  0x3e   : > { %2826 = vmatpush2.bf16.msra.mxu0 %v4101_v52  ;;  %v4193_v52 = vld [vmem:[%s5980_s1 + $0x2c0] ss:$8 sps:$4 sm:$0xff]  }
  0x3f   : > { %2869 = vmatpush2.bf16.msra.mxu1 %v4102_v53  ;;  %2827 = vmatprep.subr.bf16.mxu0 %v4103_v54  ;;  %v4196_v53 = vld [vmem:[%s5980_s1 + $0x3c0] ss:$8 sps:$4 sm:$0xff]   ;;  %v4201_v54 = vld [vmem:[%s5980_s1 + $0x2b4] ss:$8 sps:$4 sm:$0xff]  }
  0x40   : > { %2870 = vmatprep.subr.bf16.mxu1 %v4105_v55  ;;  %v4204_v55 = vld [vmem:[%s5980_s1 + $0x3b4] ss:$8 sps:$4 sm:$0xff]  }
  0x42   : > { %2828 = vmatpush2.bf16.msra.mxu0 %v4107_v56  ;;  %v4199_v56 = vld [vmem:[%s5980_s1 + $0x2b0] ss:$8 sps:$4 sm:$0xff]  }
  0x43   : > { %2871 = vmatpush2.bf16.msra.mxu1 %v4108_v57  ;;  %2829 = vmatprep.subr.bf16.mxu0 %v4109_v58  ;;  %v4202_v57 = vld [vmem:[%s5980_s1 + $0x3b0] ss:$8 sps:$4 sm:$0xff]   ;;  %v4207_v58 = vld [vmem:[%s5980_s1 + $0x2a4] ss:$8 sps:$4 sm:$0xff]  }
  0x44   : > { %2872 = vmatprep.subr.bf16.mxu1 %v4111_v59  ;;  %v4210_v59 = vld [vmem:[%s5980_s1 + $0x3a4] ss:$8 sps:$4 sm:$0xff]  }
  0x46   : > { %2830 = vmatpush2.bf16.msra.mxu0 %v4113_v60  ;;  %v4205_v60 = vld [vmem:[%s5980_s1 + $0x2a0] ss:$8 sps:$4 sm:$0xff]  }
  0x47   : > { %2873 = vmatpush2.bf16.msra.mxu1 %v4114_v61  ;;  %2831 = vmatprep.subr.bf16.mxu0 %v4115_v62  ;;  %v4208_v61 = vld [vmem:[%s5980_s1 + $0x3a0] ss:$8 sps:$4 sm:$0xff]   ;;  %v4213_v62 = vld [vmem:[%s5980_s1 + $0x294] ss:$8 sps:$4 sm:$0xff]  }
  0x48   : > { %2874 = vmatprep.subr.bf16.mxu1 %v4117_v63  ;;  %v4216_v63 = vld [vmem:[%s5980_s1 + $0x394] ss:$8 sps:$4 sm:$0xff]  }
  0x4a   : > { %2832 = vmatpush2.bf16.msra.mxu0 %v4119_v0  ;;  %v4211_v0 = vld [vmem:[%s5980_s1 + $0x290] ss:$8 sps:$4 sm:$0xff]  }
  0x4b   : > { %2875 = vmatpush2.bf16.msra.mxu1 %v4120_v1  ;;  %2887 = vmatprep.subr.bf16.mxu0 %v4129_v2  ;;  %v4214_v1 = vld [vmem:[%s5980_s1 + $0x390] ss:$8 sps:$4 sm:$0xff]   ;;  %v4219_v2 = vld [vmem:[%s5980_s1 + $0x284] ss:$8 sps:$4 sm:$0xff]  }
  0x4c   : > { %2930 = vmatprep.subr.bf16.mxu1 %v4132_v3  ;;  %v4222_v3 = vld [vmem:[%s5980_s1 + $0x384] ss:$8 sps:$4 sm:$0xff]  }
  0x4d   : > { %2834 = vmatmul.mubr.bf16.vlgmr.msra.gmra.mxu0 %v4121_v4  ;;  %v4217_v4 = vld [vmem:[%s5980_s1 + $0x280] ss:$8 sps:$4 sm:$0xff]  }
  0x4e   : > { %2877 = vmatmul.mubr.bf16.vlgmr.msra.gmra.mxu1 %v4124_v5  ;;  %2888 = vmatpush1.bf16.msra.mxu0 %v4127_v6  ;;  %v4220_v5 = vld [vmem:[%s5980_s1 + $0x380] ss:$8 sps:$4 sm:$0xff]   ;;  %v4228_v6 = vld [vmem:[%s5980_s1 + $0x474] ss:$8 sps:$4 sm:$0xff]  }
  0x4f   : > { %2931 = vmatpush1.bf16.msra.mxu1 %v4130_v7  ;;  %2889 = vmatprep.subr.bf16.mxu0 %v4135_v8  ;;  %v4234_v7 = vld [vmem:[%s5980_s1 + $0x574] ss:$8 sps:$4 sm:$0xff]  }
  0x50   : > { %2932 = vmatprep.subr.bf16.mxu1 %v4138_v9  ;;  %2919 = vmatprep.mubr.bf16.mxu0 %v4225_v34  ;;  %v4223_v8 = vld [vmem:[%s4869_s19 + $0x10] ss:$100 sps:$4 sm:$0xff]  }
  0x51   : > { %2962 = vmatprep.mubr.bf16.mxu1 %v4231_v37  ;;  %v4226_v9 = vld [vmem:[%s5980_s1 + $0x470] ss:$8 sps:$4 sm:$0xff]   ;;  %v4267_v34 = vld [vmem:[%s5980_s1 + $0x414] ss:$8 sps:$4 sm:$0xff]  }
  0x52   : > { %2890 = vmatpush1.bf16.msra.mxu0 %v4133_v10  ;;  %v4229_v10 = vld [vmem:[%s4869_s19 + $0x18] ss:$100 sps:$4 sm:$0xff]  }
  0x53   : > { %2933 = vmatpush1.bf16.msra.mxu1 %v4136_v11  ;;  %2891 = vmatprep.subr.bf16.mxu0 %v4141_v12  ;;  %v4232_v11 = vld [vmem:[%s5980_s1 + $0x570] ss:$8 sps:$4 sm:$0xff]   ;;  %v4237_v12 = vld [vmem:[%s5980_s1 + $0x464] ss:$8 sps:$4 sm:$0xff]  }
  0x54   : > { %2934 = vmatprep.subr.bf16.mxu1 %v4144_v13  ;;  %v4240_v13 = vld [vmem:[%s5980_s1 + $0x564] ss:$8 sps:$4 sm:$0xff]   ;;  %v4268_v37 = vld [vmem:[%s5980_s1 + $0x510] ss:$8 sps:$4 sm:$0xff]  }
  0x56   : > { %2892 = vmatpush1.bf16.msra.mxu0 %v4139_v14  ;;  %v4235_v14 = vld [vmem:[%s5980_s1 + $0x460] ss:$8 sps:$4 sm:$0xff]  }
  0x57   : > { %2935 = vmatpush1.bf16.msra.mxu1 %v4142_v15  ;;  %2893 = vmatprep.subr.bf16.mxu0 %v4147_v16  ;;  %v4238_v15 = vld [vmem:[%s5980_s1 + $0x560] ss:$8 sps:$4 sm:$0xff]   ;;  %v4243_v16 = vld [vmem:[%s5980_s1 + $0x454] ss:$8 sps:$4 sm:$0xff]  }
  0x58   : > { %2936 = vmatprep.subr.bf16.mxu1 %v4150_v17  ;;  %v4246_v17 = vld [vmem:[%s5980_s1 + $0x554] ss:$8 sps:$4 sm:$0xff]  }
  0x5a   : > { %2894 = vmatpush1.bf16.msra.mxu0 %v4145_v18  ;;  %v4241_v18 = vld [vmem:[%s5980_s1 + $0x450] ss:$8 sps:$4 sm:$0xff]  }
  0x5b   : > { %2937 = vmatpush1.bf16.msra.mxu1 %v4148_v19  ;;  %2895 = vmatprep.subr.bf16.mxu0 %v4153_v20  ;;  %v4327_v19 = vld [vmem:[%s4869_s19 + $0x24] ss:$100 sps:$4 sm:$0xff]   ;;  %v4244_v20 = vld [vmem:[%s5980_s1 + $0x550] ss:$8 sps:$4 sm:$0xff]  }
  0x5c   : > { %2938 = vmatprep.subr.bf16.mxu1 %v4156_v21  ;;  %v4249_v21 = vld [vmem:[%s5980_s1 + $0x444] ss:$8 sps:$4 sm:$0xff]  }
  0x5e   : > { %2896 = vmatpush1.bf16.msra.mxu0 %v4151_v22  ;;  %v4252_v22 = vld [vmem:[%s5980_s1 + $0x544] ss:$8 sps:$4 sm:$0xff]  }
  0x5f   : > { %2939 = vmatpush1.bf16.msra.mxu1 %v4154_v23  ;;  %2897 = vmatprep.subr.bf16.mxu0 %v4159_v24  ;;  %v4333_v23 = vld [vmem:[%s4869_s19 + $0x2c] ss:$100 sps:$4 sm:$0xff]   ;;  %v4247_v24 = vld [vmem:[%s5980_s1 + $0x440] ss:$8 sps:$4 sm:$0xff]  }
  0x60   : > { %2940 = vmatprep.subr.bf16.mxu1 %v4162_v25  ;;  %v4250_v25 = vld [vmem:[%s5980_s1 + $0x540] ss:$8 sps:$4 sm:$0xff]  }
  0x62   : > { %2898 = vmatpush1.bf16.msra.mxu0 %v4157_v26  ;;  %v4255_v26 = vld [vmem:[%s5980_s1 + $0x434] ss:$8 sps:$4 sm:$0xff]  }
  0x63   : > { %2941 = vmatpush1.bf16.msra.mxu1 %v4160_v27  ;;  %2899 = vmatprep.subr.bf16.mxu0 %v4165_v28  ;;  %v4258_v27 = vld [vmem:[%s5980_s1 + $0x534] ss:$8 sps:$4 sm:$0xff]   ;;  %v4253_v28 = vld [vmem:[%s5980_s1 + $0x430] ss:$8 sps:$4 sm:$0xff]  }
  0x64   : > { %2942 = vmatprep.subr.bf16.mxu1 %v4168_v29  ;;  %v4256_v29 = vld [vmem:[%s5980_s1 + $0x530] ss:$8 sps:$4 sm:$0xff]  }
  0x66   : > { %2900 = vmatpush1.bf16.msra.mxu0 %v4163_v30  ;;  %v4261_v30 = vld [vmem:[%s5980_s1 + $0x424] ss:$8 sps:$4 sm:$0xff]  }
  0x67   : > { %2943 = vmatpush1.bf16.msra.mxu1 %v4166_v31  ;;  %2901 = vmatprep.subr.bf16.mxu0 %v4171_v32  ;;  %v4264_v31 = vld [vmem:[%s5980_s1 + $0x524] ss:$8 sps:$4 sm:$0xff]   ;;  %v4259_v32 = vld [vmem:[%s5980_s1 + $0x420] ss:$8 sps:$4 sm:$0xff]  }
  0x68   : > { %2944 = vmatprep.subr.bf16.mxu1 %v4174_v33  ;;  %v4262_v33 = vld [vmem:[%s5980_s1 + $0x520] ss:$8 sps:$4 sm:$0xff]  }
  0x6a   : > { %2902 = vmatpush1.bf16.msra.mxu0 %v4169_v35  ;;  %v4270_v35 = vld [vmem:[%s5980_s1 + $0x514] ss:$8 sps:$4 sm:$0xff]  }
  0x6b   : > { %2945 = vmatpush1.bf16.msra.mxu1 %v4172_v36  ;;  %2903 = vmatprep.subr.bf16.mxu0 %v4177_v38  ;;  %v4265_v36 = vld [vmem:[%s5980_s1 + $0x410] ss:$8 sps:$4 sm:$0xff]   ;;  %v4273_v38 = vld [vmem:[%s5980_s1 + $0x404] ss:$8 sps:$4 sm:$0xff]  }
  0x6c   : > { %2946 = vmatprep.subr.bf16.mxu1 %v4180_v39  ;;  %v4276_v39 = vld [vmem:[%s5980_s1 + $0x504] ss:$8 sps:$4 sm:$0xff]  }
  0x6e   : > { %2904 = vmatpush2.bf16.msra.mxu0 %v4175_v40  ;;  %v4271_v40 = vld [vmem:[%s5980_s1 + $0x400] ss:$8 sps:$4 sm:$0xff]  }
  0x6f   : > { %2947 = vmatpush2.bf16.msra.mxu1 %v4178_v41  ;;  %2905 = vmatprep.subr.bf16.mxu0 %v4183_v42  ;;  %v4274_v41 = vld [vmem:[%s5980_s1 + $0x500] ss:$8 sps:$4 sm:$0xff]   ;;  %v4279_v42 = vld [vmem:[%s5980_s1 + $0x4f4] ss:$8 sps:$4 sm:$0xff]  }
  0x70   : > { %2948 = vmatprep.subr.bf16.mxu1 %v4186_v43  ;;  %v4282_v43 = vld [vmem:[%s5980_s1 + $0x5f4] ss:$8 sps:$4 sm:$0xff]  }
  0x72   : > { %2906 = vmatpush2.bf16.msra.mxu0 %v4181_v44  ;;  %v4277_v44 = vld [vmem:[%s5980_s1 + $0x4f0] ss:$8 sps:$4 sm:$0xff]  }
  0x73   : > { %2949 = vmatpush2.bf16.msra.mxu1 %v4184_v45  ;;  %2907 = vmatprep.subr.bf16.mxu0 %v4189_v46  ;;  %v4280_v45 = vld [vmem:[%s5980_s1 + $0x5f0] ss:$8 sps:$4 sm:$0xff]   ;;  %v4285_v46 = vld [vmem:[%s5980_s1 + $0x4e4] ss:$8 sps:$4 sm:$0xff]  }
  0x74   : > { %2950 = vmatprep.subr.bf16.mxu1 %v4192_v47  ;;  %v4288_v47 = vld [vmem:[%s5980_s1 + $0x5e4] ss:$8 sps:$4 sm:$0xff]  }
  0x76   : > { %2908 = vmatpush2.bf16.msra.mxu0 %v4187_v48  ;;  %v4283_v48 = vld [vmem:[%s5980_s1 + $0x4e0] ss:$8 sps:$4 sm:$0xff]  }
  0x77   : > { %2951 = vmatpush2.bf16.msra.mxu1 %v4190_v49  ;;  %2909 = vmatprep.subr.bf16.mxu0 %v4195_v50  ;;  %v4286_v49 = vld [vmem:[%s5980_s1 + $0x5e0] ss:$8 sps:$4 sm:$0xff]   ;;  %v4291_v50 = vld [vmem:[%s5980_s1 + $0x4d4] ss:$8 sps:$4 sm:$0xff]  }
  0x78   : > { %2952 = vmatprep.subr.bf16.mxu1 %v4198_v51  ;;  %v4294_v51 = vld [vmem:[%s5980_s1 + $0x5d4] ss:$8 sps:$4 sm:$0xff]  }
  0x7a   : > { %2910 = vmatpush2.bf16.msra.mxu0 %v4193_v52  ;;  %v4289_v52 = vld [vmem:[%s5980_s1 + $0x4d0] ss:$8 sps:$4 sm:$0xff]  }
  0x7b   : > { %2953 = vmatpush2.bf16.msra.mxu1 %v4196_v53  ;;  %2911 = vmatprep.subr.bf16.mxu0 %v4201_v54  ;;  %v4292_v53 = vld [vmem:[%s5980_s1 + $0x5d0] ss:$8 sps:$4 sm:$0xff]   ;;  %v4297_v54 = vld [vmem:[%s5980_s1 + $0x4c4] ss:$8 sps:$4 sm:$0xff]  }
  0x7c   : > { %2954 = vmatprep.subr.bf16.mxu1 %v4204_v55  ;;  %v4300_v55 = vld [vmem:[%s5980_s1 + $0x5c4] ss:$8 sps:$4 sm:$0xff]  }
  0x7e   : > { %2912 = vmatpush2.bf16.msra.mxu0 %v4199_v56  ;;  %v4295_v56 = vld [vmem:[%s5980_s1 + $0x4c0] ss:$8 sps:$4 sm:$0xff]  }
  0x7f   : > { %2955 = vmatpush2.bf16.msra.mxu1 %v4202_v57  ;;  %2913 = vmatprep.subr.bf16.mxu0 %v4207_v58  ;;  %v4298_v57 = vld [vmem:[%s5980_s1 + $0x5c0] ss:$8 sps:$4 sm:$0xff]   ;;  %v4303_v58 = vld [vmem:[%s5980_s1 + $0x4b4] ss:$8 sps:$4 sm:$0xff]  }
  0x80   : > { %2956 = vmatprep.subr.bf16.mxu1 %v4210_v59  ;;  %v4306_v59 = vld [vmem:[%s5980_s1 + $0x5b4] ss:$8 sps:$4 sm:$0xff]  }
  0x82   : > { %2914 = vmatpush2.bf16.msra.mxu0 %v4205_v60  ;;  %v4301_v60 = vld [vmem:[%s5980_s1 + $0x4b0] ss:$8 sps:$4 sm:$0xff]  }
  0x83   : > { %2957 = vmatpush2.bf16.msra.mxu1 %v4208_v61  ;;  %2915 = vmatprep.subr.bf16.mxu0 %v4213_v62  ;;  %v4304_v61 = vld [vmem:[%s5980_s1 + $0x5b0] ss:$8 sps:$4 sm:$0xff]   ;;  %v4309_v62 = vld [vmem:[%s5980_s1 + $0x4a4] ss:$8 sps:$4 sm:$0xff]  }
  0x84   : > { %2958 = vmatprep.subr.bf16.mxu1 %v4216_v63  ;;  %v4312_v63 = vld [vmem:[%s5980_s1 + $0x5a4] ss:$8 sps:$4 sm:$0xff]  }
  0x86   : > { %2916 = vmatpush2.bf16.msra.mxu0 %v4211_v0  ;;  %v4307_v0 = vld [vmem:[%s5980_s1 + $0x4a0] ss:$8 sps:$4 sm:$0xff]  }
  0x87   : > { %2959 = vmatpush2.bf16.msra.mxu1 %v4214_v1  ;;  %2917 = vmatprep.subr.bf16.mxu0 %v4219_v2  ;;  %v4310_v1 = vld [vmem:[%s5980_s1 + $0x5a0] ss:$8 sps:$4 sm:$0xff]   ;;  %v4315_v2 = vld [vmem:[%s5980_s1 + $0x494] ss:$8 sps:$4 sm:$0xff]  }
  0x88   : > { %2960 = vmatprep.subr.bf16.mxu1 %v4222_v3  ;;  %v4318_v3 = vld [vmem:[%s5980_s1 + $0x594] ss:$8 sps:$4 sm:$0xff]  }
  0x8a   : > { %2918 = vmatpush2.bf16.msra.mxu0 %v4217_v4  ;;  %v4313_v4 = vld [vmem:[%s5980_s1 + $0x490] ss:$8 sps:$4 sm:$0xff]  }
  0x8b   : > { %2961 = vmatpush2.bf16.msra.mxu1 %v4220_v5  ;;  %2973 = vmatprep.subr.bf16.mxu0 %v4228_v6  ;;  %v4316_v5 = vld [vmem:[%s5980_s1 + $0x590] ss:$8 sps:$4 sm:$0xff]   ;;  %v4321_v6 = vld [vmem:[%s5980_s1 + $0x484] ss:$8 sps:$4 sm:$0xff]  }
  0x8c   : > { %3016 = vmatprep.subr.bf16.mxu1 %v4234_v7  ;;  %v4324_v7 = vld [vmem:[%s5980_s1 + $0x584] ss:$8 sps:$4 sm:$0xff]  }
  0x8d   : > { %2920 = vmatmul.mubr.bf16.vlgmr.msra.gmra.mxu0 %v4223_v8  ;;  %v4319_v8 = vld [vmem:[%s5980_s1 + $0x480] ss:$8 sps:$4 sm:$0xff]  }
  0x8e   : > { %2963 = vmatmul.mubr.bf16.vlgmr.msra.gmra.mxu1 %v4229_v10  ;;  %2974 = vmatpush1.bf16.msra.mxu0 %v4226_v9  ;;  %v4322_v9 = vld [vmem:[%s5980_s1 + $0x580] ss:$8 sps:$4 sm:$0xff]   ;;  %v4330_v10 = vld [vmem:[%s5980_s1 + $0x674] ss:$8 sps:$4 sm:$0xff]  }
  0x8f   : > { %3017 = vmatpush1.bf16.msra.mxu1 %v4232_v11  ;;  %2975 = vmatprep.subr.bf16.mxu0 %v4237_v12  ;;  %v4336_v11 = vld [vmem:[%s5980_s1 + $0x774] ss:$8 sps:$4 sm:$0xff]   ;;  %v4325_v12 = vld [vmem:[%s4869_s19 + $0x20] ss:$100 sps:$4 sm:$0xff]  }
  0x90   : > { %3018 = vmatprep.subr.bf16.mxu1 %v4240_v13  ;;  %3005 = vmatprep.mubr.bf16.mxu0 %v4327_v19  ;;  %v4328_v13 = vld [vmem:[%s5980_s1 + $0x670] ss:$8 sps:$4 sm:$0xff]   ;;  %v4435_v19 = vld [vmem:[%s4869_s19 + $0x3c] ss:$100 sps:$4 sm:$0xff]  }
  0x91   : > { %3048 = vmatprep.mubr.bf16.mxu1 %v4333_v23  ;;  %v4348_v23 = vld [vmem:[%s5980_s1 + $0x754] ss:$8 sps:$4 sm:$0xff]  }
  0x92   : > { %2976 = vmatpush1.bf16.msra.mxu0 %v4235_v14  ;;  %v4331_v14 = vld [vmem:[%s4869_s19 + $0x28] ss:$100 sps:$4 sm:$0xff]  }
  0x93   : > { %3019 = vmatpush1.bf16.msra.mxu1 %v4238_v15  ;;  %2977 = vmatprep.subr.bf16.mxu0 %v4243_v16  ;;  %v4334_v15 = vld [vmem:[%s5980_s1 + $0x770] ss:$8 sps:$4 sm:$0xff]   ;;  %v4339_v16 = vld [vmem:[%s5980_s1 + $0x664] ss:$8 sps:$4 sm:$0xff]  }
  0x94   : > { %3020 = vmatprep.subr.bf16.mxu1 %v4246_v17  ;;  %v4342_v17 = vld [vmem:[%s5980_s1 + $0x764] ss:$8 sps:$4 sm:$0xff]  }
  0x96   : > { %2978 = vmatpush1.bf16.msra.mxu0 %v4241_v18  ;;  %v4429_v18 = vld [vmem:[%s4869_s19 + $0x34] ss:$100 sps:$4 sm:$0xff]  }
  0x97   : > { %3021 = vmatpush1.bf16.msra.mxu1 %v4244_v20  ;;  %2979 = vmatprep.subr.bf16.mxu0 %v4249_v21  ;;  %v4337_v20 = vld [vmem:[%s5980_s1 + $0x660] ss:$8 sps:$4 sm:$0xff]  }
  0x98   : > { %3022 = vmatprep.subr.bf16.mxu1 %v4252_v22  ;;  %v4340_v21 = vld [vmem:[%s5980_s1 + $0x760] ss:$8 sps:$4 sm:$0xff]   ;;  %v4345_v22 = vld [vmem:[%s5980_s1 + $0x654] ss:$8 sps:$4 sm:$0xff]  }
  0x9a   : > { %2980 = vmatpush1.bf16.msra.mxu0 %v4247_v24  ;;  %v4343_v24 = vld [vmem:[%s5980_s1 + $0x650] ss:$8 sps:$4 sm:$0xff]  }
  0x9b   : > { %3023 = vmatpush1.bf16.msra.mxu1 %v4250_v25  ;;  %2981 = vmatprep.subr.bf16.mxu0 %v4255_v26  ;;  %v4346_v25 = vld [vmem:[%s5980_s1 + $0x750] ss:$8 sps:$4 sm:$0xff]   ;;  %v4351_v26 = vld [vmem:[%s5980_s1 + $0x644] ss:$8 sps:$4 sm:$0xff]  }
  0x9c   : > { %3024 = vmatprep.subr.bf16.mxu1 %v4258_v27  ;;  %v4354_v27 = vld [vmem:[%s5980_s1 + $0x744] ss:$8 sps:$4 sm:$0xff]  }
  0x9e   : > { %2982 = vmatpush1.bf16.msra.mxu0 %v4253_v28  ;;  %v4349_v28 = vld [vmem:[%s5980_s1 + $0x640] ss:$8 sps:$4 sm:$0xff]  }
  0x9f   : > { %3025 = vmatpush1.bf16.msra.mxu1 %v4256_v29  ;;  %2983 = vmatprep.subr.bf16.mxu0 %v4261_v30  ;;  %v4352_v29 = vld [vmem:[%s5980_s1 + $0x740] ss:$8 sps:$4 sm:$0xff]   ;;  %v4357_v30 = vld [vmem:[%s5980_s1 + $0x634] ss:$8 sps:$4 sm:$0xff]  }
  0xa0   : > { %3026 = vmatprep.subr.bf16.mxu1 %v4264_v31  ;;  %v4360_v31 = vld [vmem:[%s5980_s1 + $0x734] ss:$8 sps:$4 sm:$0xff]  }
  0xa2   : > { %2984 = vmatpush1.bf16.msra.mxu0 %v4259_v32  ;;  %v4355_v32 = vld [vmem:[%s5980_s1 + $0x630] ss:$8 sps:$4 sm:$0xff]  }
  0xa3   : > { %3027 = vmatpush1.bf16.msra.mxu1 %v4262_v33  ;;  %2985 = vmatprep.subr.bf16.mxu0 %v4267_v34  ;;  %v4358_v33 = vld [vmem:[%s5980_s1 + $0x730] ss:$8 sps:$4 sm:$0xff]   ;;  %v4363_v34 = vld [vmem:[%s5980_s1 + $0x624] ss:$8 sps:$4 sm:$0xff]  }
  0xa4   : > { %3028 = vmatprep.subr.bf16.mxu1 %v4270_v35  ;;  %v4366_v35 = vld [vmem:[%s5980_s1 + $0x724] ss:$8 sps:$4 sm:$0xff]  }
  0xa6   : > { %2986 = vmatpush1.bf16.msra.mxu0 %v4265_v36  ;;  %v4361_v36 = vld [vmem:[%s5980_s1 + $0x620] ss:$8 sps:$4 sm:$0xff]  }
  0xa7   : > { %3029 = vmatpush1.bf16.msra.mxu1 %v4268_v37  ;;  %2987 = vmatprep.subr.bf16.mxu0 %v4273_v38  ;;  %v4364_v37 = vld [vmem:[%s5980_s1 + $0x720] ss:$8 sps:$4 sm:$0xff]   ;;  %v4369_v38 = vld [vmem:[%s5980_s1 + $0x614] ss:$8 sps:$4 sm:$0xff]  }
  0xa8   : > { %3030 = vmatprep.subr.bf16.mxu1 %v4276_v39  ;;  %v4372_v39 = vld [vmem:[%s5980_s1 + $0x714] ss:$8 sps:$4 sm:$0xff]  }
  0xaa   : > { %2988 = vmatpush1.bf16.msra.mxu0 %v4271_v40  ;;  %v4367_v40 = vld [vmem:[%s5980_s1 + $0x610] ss:$8 sps:$4 sm:$0xff]  }
  0xab   : > { %3031 = vmatpush1.bf16.msra.mxu1 %v4274_v41  ;;  %2989 = vmatprep.subr.bf16.mxu0 %v4279_v42  ;;  %v4370_v41 = vld [vmem:[%s5980_s1 + $0x710] ss:$8 sps:$4 sm:$0xff]   ;;  %v4375_v42 = vld [vmem:[%s5980_s1 + $0x604] ss:$8 sps:$4 sm:$0xff]  }
  0xac   : > { %3032 = vmatprep.subr.bf16.mxu1 %v4282_v43  ;;  %v4378_v43 = vld [vmem:[%s5980_s1 + $0x704] ss:$8 sps:$4 sm:$0xff]  }
  0xae   : > { %2990 = vmatpush2.bf16.msra.mxu0 %v4277_v44  ;;  %v4373_v44 = vld [vmem:[%s5980_s1 + $0x600] ss:$8 sps:$4 sm:$0xff]  }
  0xaf   : > { %3033 = vmatpush2.bf16.msra.mxu1 %v4280_v45  ;;  %2991 = vmatprep.subr.bf16.mxu0 %v4285_v46  ;;  %v4376_v45 = vld [vmem:[%s5980_s1 + $0x700] ss:$8 sps:$4 sm:$0xff]   ;;  %v4381_v46 = vld [vmem:[%s5980_s1 + $0x6f4] ss:$8 sps:$4 sm:$0xff]  }
  0xb0   : > { %3034 = vmatprep.subr.bf16.mxu1 %v4288_v47  ;;  %v4384_v47 = vld [vmem:[%s5980_s1 + $0x7f4] ss:$8 sps:$4 sm:$0xff]  }
  0xb2   : > { %2992 = vmatpush2.bf16.msra.mxu0 %v4283_v48  ;;  %v4379_v48 = vld [vmem:[%s5980_s1 + $0x6f0] ss:$8 sps:$4 sm:$0xff]  }
  0xb3   : > { %3035 = vmatpush2.bf16.msra.mxu1 %v4286_v49  ;;  %2993 = vmatprep.subr.bf16.mxu0 %v4291_v50  ;;  %v4382_v49 = vld [vmem:[%s5980_s1 + $0x7f0] ss:$8 sps:$4 sm:$0xff]   ;;  %v4387_v50 = vld [vmem:[%s5980_s1 + $0x6e4] ss:$8 sps:$4 sm:$0xff]  }
  0xb4   : > { %3036 = vmatprep.subr.bf16.mxu1 %v4294_v51  ;;  %v4390_v51 = vld [vmem:[%s5980_s1 + $0x7e4] ss:$8 sps:$4 sm:$0xff]  }
  0xb6   : > { %2994 = vmatpush2.bf16.msra.mxu0 %v4289_v52  ;;  %v4385_v52 = vld [vmem:[%s5980_s1 + $0x6e0] ss:$8 sps:$4 sm:$0xff]  }
  0xb7   : > { %3037 = vmatpush2.bf16.msra.mxu1 %v4292_v53  ;;  %2995 = vmatprep.subr.bf16.mxu0 %v4297_v54  ;;  %v4388_v53 = vld [vmem:[%s5980_s1 + $0x7e0] ss:$8 sps:$4 sm:$0xff]   ;;  %v4393_v54 = vld [vmem:[%s5980_s1 + $0x6d4] ss:$8 sps:$4 sm:$0xff]  }
  0xb8   : > { %3038 = vmatprep.subr.bf16.mxu1 %v4300_v55  ;;  %v4396_v55 = vld [vmem:[%s5980_s1 + $0x7d4] ss:$8 sps:$4 sm:$0xff]  }
  0xba   : > { %2996 = vmatpush2.bf16.msra.mxu0 %v4295_v56  ;;  %v4391_v56 = vld [vmem:[%s5980_s1 + $0x6d0] ss:$8 sps:$4 sm:$0xff]  }
  0xbb   : > { %3039 = vmatpush2.bf16.msra.mxu1 %v4298_v57  ;;  %2997 = vmatprep.subr.bf16.mxu0 %v4303_v58  ;;  %v4394_v57 = vld [vmem:[%s5980_s1 + $0x7d0] ss:$8 sps:$4 sm:$0xff]   ;;  %v4399_v58 = vld [vmem:[%s5980_s1 + $0x6c4] ss:$8 sps:$4 sm:$0xff]  }
  0xbc   : > { %3040 = vmatprep.subr.bf16.mxu1 %v4306_v59  ;;  %v4402_v59 = vld [vmem:[%s5980_s1 + $0x7c4] ss:$8 sps:$4 sm:$0xff]  }
  0xbe   : > { %2998 = vmatpush2.bf16.msra.mxu0 %v4301_v60  ;;  %v4397_v60 = vld [vmem:[%s5980_s1 + $0x6c0] ss:$8 sps:$4 sm:$0xff]  }
  0xbf   : > { %3041 = vmatpush2.bf16.msra.mxu1 %v4304_v61  ;;  %2999 = vmatprep.subr.bf16.mxu0 %v4309_v62  ;;  %v4400_v61 = vld [vmem:[%s5980_s1 + $0x7c0] ss:$8 sps:$4 sm:$0xff]   ;;  %v4405_v62 = vld [vmem:[%s5980_s1 + $0x6b4] ss:$8 sps:$4 sm:$0xff]  }
  0xc0   : > { %3042 = vmatprep.subr.bf16.mxu1 %v4312_v63  ;;  %v4408_v63 = vld [vmem:[%s5980_s1 + $0x7b4] ss:$8 sps:$4 sm:$0xff]  }
  0xc2   : > { %3000 = vmatpush2.bf16.msra.mxu0 %v4307_v0  ;;  %v4403_v0 = vld [vmem:[%s5980_s1 + $0x6b0] ss:$8 sps:$4 sm:$0xff]  }
  0xc3   : > { %3043 = vmatpush2.bf16.msra.mxu1 %v4310_v1  ;;  %3001 = vmatprep.subr.bf16.mxu0 %v4315_v2  ;;  %v4406_v1 = vld [vmem:[%s5980_s1 + $0x7b0] ss:$8 sps:$4 sm:$0xff]   ;;  %v4411_v2 = vld [vmem:[%s5980_s1 + $0x6a4] ss:$8 sps:$4 sm:$0xff]  }
  0xc4   : > { %3044 = vmatprep.subr.bf16.mxu1 %v4318_v3  ;;  %v4414_v3 = vld [vmem:[%s5980_s1 + $0x7a4] ss:$8 sps:$4 sm:$0xff]  }
  0xc6   : > { %3002 = vmatpush2.bf16.msra.mxu0 %v4313_v4  ;;  %v4409_v4 = vld [vmem:[%s5980_s1 + $0x6a0] ss:$8 sps:$4 sm:$0xff]  }
  0xc7   : > { %3045 = vmatpush2.bf16.msra.mxu1 %v4316_v5  ;;  %3003 = vmatprep.subr.bf16.mxu0 %v4321_v6  ;;  %v4412_v5 = vld [vmem:[%s5980_s1 + $0x7a0] ss:$8 sps:$4 sm:$0xff]   ;;  %v4417_v6 = vld [vmem:[%s5980_s1 + $0x694] ss:$8 sps:$4 sm:$0xff]  }
  0xc8   : > { %3046 = vmatprep.subr.bf16.mxu1 %v4324_v7  ;;  %v4420_v7 = vld [vmem:[%s5980_s1 + $0x794] ss:$8 sps:$4 sm:$0xff]  }
  0xca   : > { %3004 = vmatpush2.bf16.msra.mxu0 %v4319_v8  ;;  %v4415_v8 = vld [vmem:[%s5980_s1 + $0x690] ss:$8 sps:$4 sm:$0xff]  }
  0xcb   : > { %3047 = vmatpush2.bf16.msra.mxu1 %v4322_v9  ;;  %3059 = vmatprep.subr.bf16.mxu0 %v4330_v10  ;;  %v4418_v9 = vld [vmem:[%s5980_s1 + $0x790] ss:$8 sps:$4 sm:$0xff]   ;;  %v4423_v10 = vld [vmem:[%s5980_s1 + $0x684] ss:$8 sps:$4 sm:$0xff]  }
  0xcc   : > { %3102 = vmatprep.subr.bf16.mxu1 %v4336_v11  ;;  %v4426_v11 = vld [vmem:[%s5980_s1 + $0x784] ss:$8 sps:$4 sm:$0xff]  }
  0xcd   : > { %3006 = vmatmul.mubr.bf16.vlgmr.msra.gmra.mxu0 %v4325_v12  ;;  %v4421_v12 = vld [vmem:[%s5980_s1 + $0x680] ss:$8 sps:$4 sm:$0xff]  }
  0xce   : > { %3049 = vmatmul.mubr.bf16.vlgmr.msra.gmra.mxu1 %v4331_v14  ;;  %3060 = vmatpush1.bf16.msra.mxu0 %v4328_v13  ;;  %v4424_v13 = vld [vmem:[%s5980_s1 + $0x780] ss:$8 sps:$4 sm:$0xff]   ;;  %v4432_v14 = vld [vmem:[%s5980_s1 + $0x874] ss:$8 sps:$4 sm:$0xff]  }
  0xcf   : > { %3103 = vmatpush1.bf16.msra.mxu1 %v4334_v15  ;;  %3061 = vmatprep.subr.bf16.mxu0 %v4339_v16  ;;  %v4438_v15 = vld [vmem:[%s5980_s1 + $0x974] ss:$8 sps:$4 sm:$0xff]  }
  0xd0   : > { %3104 = vmatprep.subr.bf16.mxu1 %v4342_v17  ;;  %3091 = vmatprep.mubr.bf16.mxu0 %v4429_v18  ;;  %v4427_v16 = vld [vmem:[%s4869_s19 + $0x30] ss:$100 sps:$4 sm:$0xff]   ;;  %v4433_v18 = vld [vmem:[%s4869_s19 + $0x38] ss:$100 sps:$4 sm:$0xff]  }
  0xd1   : > { %3134 = vmatprep.mubr.bf16.mxu1 %v4435_v19  ;;  %v4430_v17 = vld [vmem:[%s5980_s1 + $0x870] ss:$8 sps:$4 sm:$0xff]  }
  0xd2   : > { %3062 = vmatpush1.bf16.msra.mxu0 %v4337_v20  ;;  %v4436_v19 = vld [vmem:[%s5980_s1 + $0x970] ss:$8 sps:$4 sm:$0xff]   ;;  %v4441_v20 = vld [vmem:[%s5980_s1 + $0x864] ss:$8 sps:$4 sm:$0xff]  }
  0xd3   : > { %3105 = vmatpush1.bf16.msra.mxu1 %v4340_v21  ;;  %3063 = vmatprep.subr.bf16.mxu0 %v4345_v22  ;;  %v4444_v21 = vld [vmem:[%s5980_s1 + $0x964] ss:$8 sps:$4 sm:$0xff]  }
  0xd4   : > { %3106 = vmatprep.subr.bf16.mxu1 %v4348_v23  ;;  %v4531_v22 = vld [vmem:[%s4869_s19 + $0x44] ss:$100 sps:$4 sm:$0xff]   ;;  %v4537_v23 = vld [vmem:[%s4869_s19 + $0x4c] ss:$100 sps:$4 sm:$0xff]  }
  0xd6   : > { %3064 = vmatpush1.bf16.msra.mxu0 %v4343_v24  ;;  %v4439_v24 = vld [vmem:[%s5980_s1 + $0x860] ss:$8 sps:$4 sm:$0xff]  }
  0xd7   : > { %3107 = vmatpush1.bf16.msra.mxu1 %v4346_v25  ;;  %3065 = vmatprep.subr.bf16.mxu0 %v4351_v26  ;;  %v4442_v25 = vld [vmem:[%s5980_s1 + $0x960] ss:$8 sps:$4 sm:$0xff]   ;;  %v4447_v26 = vld [vmem:[%s5980_s1 + $0x854] ss:$8 sps:$4 sm:$0xff]  }
  0xd8   : > { %3108 = vmatprep.subr.bf16.mxu1 %v4354_v27  ;;  %v4450_v27 = vld [vmem:[%s5980_s1 + $0x954] ss:$8 sps:$4 sm:$0xff]  }
  0xda   : > { %3066 = vmatpush1.bf16.msra.mxu0 %v4349_v28  ;;  %v4445_v28 = vld [vmem:[%s5980_s1 + $0x850] ss:$8 sps:$4 sm:$0xff]  }
  0xdb   : > { %3109 = vmatpush1.bf16.msra.mxu1 %v4352_v29  ;;  %3067 = vmatprep.subr.bf16.mxu0 %v4357_v30  ;;  %v4448_v29 = vld [vmem:[%s5980_s1 + $0x950] ss:$8 sps:$4 sm:$0xff]   ;;  %v4453_v30 = vld [vmem:[%s5980_s1 + $0x844] ss:$8 sps:$4 sm:$0xff]  }
  0xdc   : > { %3110 = vmatprep.subr.bf16.mxu1 %v4360_v31  ;;  %v4456_v31 = vld [vmem:[%s5980_s1 + $0x944] ss:$8 sps:$4 sm:$0xff]  }
  0xde   : > { %3068 = vmatpush1.bf16.msra.mxu0 %v4355_v32  ;;  %v4451_v32 = vld [vmem:[%s5980_s1 + $0x840] ss:$8 sps:$4 sm:$0xff]  }
  0xdf   : > { %3111 = vmatpush1.bf16.msra.mxu1 %v4358_v33  ;;  %3069 = vmatprep.subr.bf16.mxu0 %v4363_v34  ;;  %v4454_v33 = vld [vmem:[%s5980_s1 + $0x940] ss:$8 sps:$4 sm:$0xff]   ;;  %v4459_v34 = vld [vmem:[%s5980_s1 + $0x834] ss:$8 sps:$4 sm:$0xff]  }
  0xe0   : > { %3112 = vmatprep.subr.bf16.mxu1 %v4366_v35  ;;  %v4462_v35 = vld [vmem:[%s5980_s1 + $0x934] ss:$8 sps:$4 sm:$0xff]  }
  0xe2   : > { %3070 = vmatpush1.bf16.msra.mxu0 %v4361_v36  ;;  %v4457_v36 = vld [vmem:[%s5980_s1 + $0x830] ss:$8 sps:$4 sm:$0xff]  }
  0xe3   : > { %3113 = vmatpush1.bf16.msra.mxu1 %v4364_v37  ;;  %3071 = vmatprep.subr.bf16.mxu0 %v4369_v38  ;;  %v4460_v37 = vld [vmem:[%s5980_s1 + $0x930] ss:$8 sps:$4 sm:$0xff]   ;;  %v4465_v38 = vld [vmem:[%s5980_s1 + $0x824] ss:$8 sps:$4 sm:$0xff]  }
  0xe4   : > { %3114 = vmatprep.subr.bf16.mxu1 %v4372_v39  ;;  %v4468_v39 = vld [vmem:[%s5980_s1 + $0x924] ss:$8 sps:$4 sm:$0xff]  }
  0xe6   : > { %3072 = vmatpush1.bf16.msra.mxu0 %v4367_v40  ;;  %v4463_v40 = vld [vmem:[%s5980_s1 + $0x820] ss:$8 sps:$4 sm:$0xff]  }
  0xe7   : > { %3115 = vmatpush1.bf16.msra.mxu1 %v4370_v41  ;;  %3073 = vmatprep.subr.bf16.mxu0 %v4375_v42  ;;  %v4466_v41 = vld [vmem:[%s5980_s1 + $0x920] ss:$8 sps:$4 sm:$0xff]   ;;  %v4471_v42 = vld [vmem:[%s5980_s1 + $0x814] ss:$8 sps:$4 sm:$0xff]  }
  0xe8   : > { %3116 = vmatprep.subr.bf16.mxu1 %v4378_v43  ;;  %v4474_v43 = vld [vmem:[%s5980_s1 + $0x914] ss:$8 sps:$4 sm:$0xff]  }
  0xea   : > { %3074 = vmatpush1.bf16.msra.mxu0 %v4373_v44  ;;  %v4469_v44 = vld [vmem:[%s5980_s1 + $0x810] ss:$8 sps:$4 sm:$0xff]  }
  0xeb   : > { %3117 = vmatpush1.bf16.msra.mxu1 %v4376_v45  ;;  %3075 = vmatprep.subr.bf16.mxu0 %v4381_v46  ;;  %v4472_v45 = vld [vmem:[%s5980_s1 + $0x910] ss:$8 sps:$4 sm:$0xff]   ;;  %v4477_v46 = vld [vmem:[%s5980_s1 + $0x804] ss:$8 sps:$4 sm:$0xff]  }
  0xec   : > { %3118 = vmatprep.subr.bf16.mxu1 %v4384_v47  ;;  %v4480_v47 = vld [vmem:[%s5980_s1 + $0x904] ss:$8 sps:$4 sm:$0xff]  }
  0xee   : > { %3076 = vmatpush2.bf16.msra.mxu0 %v4379_v48  ;;  %v4475_v48 = vld [vmem:[%s5980_s1 + $0x800] ss:$8 sps:$4 sm:$0xff]  }
  0xef   : > { %3119 = vmatpush2.bf16.msra.mxu1 %v4382_v49  ;;  %3077 = vmatprep.subr.bf16.mxu0 %v4387_v50  ;;  %v4478_v49 = vld [vmem:[%s5980_s1 + $0x900] ss:$8 sps:$4 sm:$0xff]   ;;  %v4483_v50 = vld [vmem:[%s5980_s1 + $0x8f4] ss:$8 sps:$4 sm:$0xff]  }
  0xf0   : > { %3120 = vmatprep.subr.bf16.mxu1 %v4390_v51  ;;  %v4486_v51 = vld [vmem:[%s5980_s1 + $0x9f4] ss:$8 sps:$4 sm:$0xff]  }
  0xf2   : > { %3078 = vmatpush2.bf16.msra.mxu0 %v4385_v52  ;;  %v4481_v52 = vld [vmem:[%s5980_s1 + $0x8f0] ss:$8 sps:$4 sm:$0xff]  }
  0xf3   : > { %3121 = vmatpush2.bf16.msra.mxu1 %v4388_v53  ;;  %3079 = vmatprep.subr.bf16.mxu0 %v4393_v54  ;;  %v4484_v53 = vld [vmem:[%s5980_s1 + $0x9f0] ss:$8 sps:$4 sm:$0xff]   ;;  %v4489_v54 = vld [vmem:[%s5980_s1 + $0x8e4] ss:$8 sps:$4 sm:$0xff]  }
  0xf4   : > { %3122 = vmatprep.subr.bf16.mxu1 %v4396_v55  ;;  %v4492_v55 = vld [vmem:[%s5980_s1 + $0x9e4] ss:$8 sps:$4 sm:$0xff]  }
  0xf6   : > { %3080 = vmatpush2.bf16.msra.mxu0 %v4391_v56  ;;  %v4487_v56 = vld [vmem:[%s5980_s1 + $0x8e0] ss:$8 sps:$4 sm:$0xff]  }
  0xf7   : > { %3123 = vmatpush2.bf16.msra.mxu1 %v4394_v57  ;;  %3081 = vmatprep.subr.bf16.mxu0 %v4399_v58  ;;  %v4490_v57 = vld [vmem:[%s5980_s1 + $0x9e0] ss:$8 sps:$4 sm:$0xff]   ;;  %v4495_v58 = vld [vmem:[%s5980_s1 + $0x8d4] ss:$8 sps:$4 sm:$0xff]  }
  0xf8   : > { %3124 = vmatprep.subr.bf16.mxu1 %v4402_v59  ;;  %v4498_v59 = vld [vmem:[%s5980_s1 + $0x9d4] ss:$8 sps:$4 sm:$0xff]  }
  0xfa   : > { %3082 = vmatpush2.bf16.msra.mxu0 %v4397_v60  ;;  %v4493_v60 = vld [vmem:[%s5980_s1 + $0x8d0] ss:$8 sps:$4 sm:$0xff]  }
  0xfb   : > { %3125 = vmatpush2.bf16.msra.mxu1 %v4400_v61  ;;  %3083 = vmatprep.subr.bf16.mxu0 %v4405_v62  ;;  %v4496_v61 = vld [vmem:[%s5980_s1 + $0x9d0] ss:$8 sps:$4 sm:$0xff]   ;;  %v4501_v62 = vld [vmem:[%s5980_s1 + $0x8c4] ss:$8 sps:$4 sm:$0xff]  }
  0xfc   : > { %3126 = vmatprep.subr.bf16.mxu1 %v4408_v63  ;;  %v4504_v63 = vld [vmem:[%s5980_s1 + $0x9c4] ss:$8 sps:$4 sm:$0xff]  }
  0xfe   : > { %3084 = vmatpush2.bf16.msra.mxu0 %v4403_v0  ;;  %v4499_v0 = vld [vmem:[%s5980_s1 + $0x8c0] ss:$8 sps:$4 sm:$0xff]  }
  0xff   : > { %3127 = vmatpush2.bf16.msra.mxu1 %v4406_v1  ;;  %3085 = vmatprep.subr.bf16.mxu0 %v4411_v2  ;;  %v4502_v1 = vld [vmem:[%s5980_s1 + $0x9c0] ss:$8 sps:$4 sm:$0xff]   ;;  %v4507_v2 = vld [vmem:[%s5980_s1 + $0x8b4] ss:$8 sps:$4 sm:$0xff]  }
 0x100   : > { %3128 = vmatprep.subr.bf16.mxu1 %v4414_v3  ;;  %v4510_v3 = vld [vmem:[%s5980_s1 + $0x9b4] ss:$8 sps:$4 sm:$0xff]  }
 0x102   : > { %3086 = vmatpush2.bf16.msra.mxu0 %v4409_v4  ;;  %v4505_v4 = vld [vmem:[%s5980_s1 + $0x8b0] ss:$8 sps:$4 sm:$0xff]  }
 0x103   : > { %3129 = vmatpush2.bf16.msra.mxu1 %v4412_v5  ;;  %3087 = vmatprep.subr.bf16.mxu0 %v4417_v6  ;;  %v4508_v5 = vld [vmem:[%s5980_s1 + $0x9b0] ss:$8 sps:$4 sm:$0xff]   ;;  %v4513_v6 = vld [vmem:[%s5980_s1 + $0x8a4] ss:$8 sps:$4 sm:$0xff]  }
 0x104   : > { %3130 = vmatprep.subr.bf16.mxu1 %v4420_v7  ;;  %v4516_v7 = vld [vmem:[%s5980_s1 + $0x9a4] ss:$8 sps:$4 sm:$0xff]  }
 0x106   : > { %3088 = vmatpush2.bf16.msra.mxu0 %v4415_v8  ;;  %v4511_v8 = vld [vmem:[%s5980_s1 + $0x8a0] ss:$8 sps:$4 sm:$0xff]  }
 0x107   : > { %3131 = vmatpush2.bf16.msra.mxu1 %v4418_v9  ;;  %3089 = vmatprep.subr.bf16.mxu0 %v4423_v10  ;;  %v4514_v9 = vld [vmem:[%s5980_s1 + $0x9a0] ss:$8 sps:$4 sm:$0xff]   ;;  %v4519_v10 = vld [vmem:[%s5980_s1 + $0x894] ss:$8 sps:$4 sm:$0xff]  }
 0x108   : > { %3132 = vmatprep.subr.bf16.mxu1 %v4426_v11  ;;  %v4522_v11 = vld [vmem:[%s5980_s1 + $0x994] ss:$8 sps:$4 sm:$0xff]  }
 0x10a   : > { %3090 = vmatpush2.bf16.msra.mxu0 %v4421_v12  ;;  %v4517_v12 = vld [vmem:[%s5980_s1 + $0x890] ss:$8 sps:$4 sm:$0xff]  }
 0x10b   : > { %3133 = vmatpush2.bf16.msra.mxu1 %v4424_v13  ;;  %3145 = vmatprep.subr.bf16.mxu0 %v4432_v14  ;;  %v4520_v13 = vld [vmem:[%s5980_s1 + $0x990] ss:$8 sps:$4 sm:$0xff]   ;;  %v4525_v14 = vld [vmem:[%s5980_s1 + $0x884] ss:$8 sps:$4 sm:$0xff]  }
 0x10c   : > { %3188 = vmatprep.subr.bf16.mxu1 %v4438_v15  ;;  %v4528_v15 = vld [vmem:[%s5980_s1 + $0x984] ss:$8 sps:$4 sm:$0xff]  }
 0x10d   : > { %3092 = vmatmul.mubr.bf16.vlgmr.msra.gmra.mxu0 %v4427_v16  ;;  %v4523_v16 = vld [vmem:[%s5980_s1 + $0x880] ss:$8 sps:$4 sm:$0xff]  }
 0x10e   : > { %3135 = vmatmul.mubr.bf16.vlgmr.msra.gmra.mxu1 %v4433_v18  ;;  %3146 = vmatpush1.bf16.msra.mxu0 %v4430_v17  ;;  %v4526_v17 = vld [vmem:[%s5980_s1 + $0x980] ss:$8 sps:$4 sm:$0xff]   ;;  %v4534_v18 = vld [vmem:[%s5980_s1 + $0xa74] ss:$8 sps:$4 sm:$0xff]  }
 0x10f   : > { %3189 = vmatpush1.bf16.msra.mxu1 %v4436_v19  ;;  %3147 = vmatprep.subr.bf16.mxu0 %v4441_v20  ;;  %v4540_v19 = vld [vmem:[%s5980_s1 + $0xb74] ss:$8 sps:$4 sm:$0xff]   ;;  %v4529_v20 = vld [vmem:[%s4869_s19 + $0x40] ss:$100 sps:$4 sm:$0xff]  }
 0x110   : > { %3190 = vmatprep.subr.bf16.mxu1 %v4444_v21  ;;  %3177 = vmatprep.mubr.bf16.mxu0 %v4531_v22  ;;  %v4535_v21 = vld [vmem:[%s4869_s19 + $0x48] ss:$100 sps:$4 sm:$0xff]   ;;  %v4532_v22 = vld [vmem:[%s5980_s1 + $0xa70] ss:$8 sps:$4 sm:$0xff]  }
 0x111   : > { %3220 = vmatprep.mubr.bf16.mxu1 %v4537_v23  ;;  %v4538_v23 = vld [vmem:[%s5980_s1 + $0xb70] ss:$8 sps:$4 sm:$0xff]  }
 0x112   : > { %3148 = vmatpush1.bf16.msra.mxu0 %v4439_v24  ;;  %v4543_v24 = vld [vmem:[%s5980_s1 + $0xa64] ss:$8 sps:$4 sm:$0xff]  }
 0x113   : > { %3191 = vmatpush1.bf16.msra.mxu1 %v4442_v25  ;;  %3149 = vmatprep.subr.bf16.mxu0 %v4447_v26  ;;  %v4546_v25 = vld [vmem:[%s5980_s1 + $0xb64] ss:$8 sps:$4 sm:$0xff]   ;;  %v4633_v26 = vld [vmem:[%s4869_s19 + $0x54] ss:$100 sps:$4 sm:$0xff]  }
 0x114   : > { %3192 = vmatprep.subr.bf16.mxu1 %v4450_v27  ;;  %v4639_v27 = vld [vmem:[%s4869_s19 + $0x5c] ss:$100 sps:$4 sm:$0xff]  }
 0x116   : > { %3150 = vmatpush1.bf16.msra.mxu0 %v4445_v28  ;;  %v4541_v28 = vld [vmem:[%s5980_s1 + $0xa60] ss:$8 sps:$4 sm:$0xff]  }
 0x117   : > { %3193 = vmatpush1.bf16.msra.mxu1 %v4448_v29  ;;  %3151 = vmatprep.subr.bf16.mxu0 %v4453_v30  ;;  %v4544_v29 = vld [vmem:[%s5980_s1 + $0xb60] ss:$8 sps:$4 sm:$0xff]   ;;  %v4549_v30 = vld [vmem:[%s5980_s1 + $0xa54] ss:$8 sps:$4 sm:$0xff]  }
 0x118   : > { %3194 = vmatprep.subr.bf16.mxu1 %v4456_v31  ;;  %v4552_v31 = vld [vmem:[%s5980_s1 + $0xb54] ss:$8 sps:$4 sm:$0xff]  }
 0x11a   : > { %3152 = vmatpush1.bf16.msra.mxu0 %v4451_v32  ;;  %v4547_v32 = vld [vmem:[%s5980_s1 + $0xa50] ss:$8 sps:$4 sm:$0xff]  }
 0x11b   : > { %3195 = vmatpush1.bf16.msra.mxu1 %v4454_v33  ;;  %3153 = vmatprep.subr.bf16.mxu0 %v4459_v34  ;;  %v4550_v33 = vld [vmem:[%s5980_s1 + $0xb50] ss:$8 sps:$4 sm:$0xff]   ;;  %v4555_v34 = vld [vmem:[%s5980_s1 + $0xa44] ss:$8 sps:$4 sm:$0xff]  }
 0x11c   : > { %3196 = vmatprep.subr.bf16.mxu1 %v4462_v35  ;;  %v4558_v35 = vld [vmem:[%s5980_s1 + $0xb44] ss:$8 sps:$4 sm:$0xff]  }
 0x11e   : > { %3154 = vmatpush1.bf16.msra.mxu0 %v4457_v36  ;;  %v4553_v36 = vld [vmem:[%s5980_s1 + $0xa40] ss:$8 sps:$4 sm:$0xff]  }
 0x11f   : > { %3197 = vmatpush1.bf16.msra.mxu1 %v4460_v37  ;;  %3155 = vmatprep.subr.bf16.mxu0 %v4465_v38  ;;  %v4556_v37 = vld [vmem:[%s5980_s1 + $0xb40] ss:$8 sps:$4 sm:$0xff]   ;;  %v4561_v38 = vld [vmem:[%s5980_s1 + $0xa34] ss:$8 sps:$4 sm:$0xff]  }
 0x120   : > { %3198 = vmatprep.subr.bf16.mxu1 %v4468_v39  ;;  %v4564_v39 = vld [vmem:[%s5980_s1 + $0xb34] ss:$8 sps:$4 sm:$0xff]  }
 0x122   : > { %3156 = vmatpush1.bf16.msra.mxu0 %v4463_v40  ;;  %v4559_v40 = vld [vmem:[%s5980_s1 + $0xa30] ss:$8 sps:$4 sm:$0xff]  }
 0x123   : > { %3199 = vmatpush1.bf16.msra.mxu1 %v4466_v41  ;;  %3157 = vmatprep.subr.bf16.mxu0 %v4471_v42  ;;  %v4562_v41 = vld [vmem:[%s5980_s1 + $0xb30] ss:$8 sps:$4 sm:$0xff]   ;;  %v4567_v42 = vld [vmem:[%s5980_s1 + $0xa24] ss:$8 sps:$4 sm:$0xff]  }
 0x124   : > { %3200 = vmatprep.subr.bf16.mxu1 %v4474_v43  ;;  %v4570_v43 = vld [vmem:[%s5980_s1 + $0xb24] ss:$8 sps:$4 sm:$0xff]  }
 0x126   : > { %3158 = vmatpush1.bf16.msra.mxu0 %v4469_v44  ;;  %v4565_v44 = vld [vmem:[%s5980_s1 + $0xa20] ss:$8 sps:$4 sm:$0xff]  }
 0x127   : > { %3201 = vmatpush1.bf16.msra.mxu1 %v4472_v45  ;;  %3159 = vmatprep.subr.bf16.mxu0 %v4477_v46  ;;  %v4568_v45 = vld [vmem:[%s5980_s1 + $0xb20] ss:$8 sps:$4 sm:$0xff]   ;;  %v4573_v46 = vld [vmem:[%s5980_s1 + $0xa14] ss:$8 sps:$4 sm:$0xff]  }
 0x128   : > { %3202 = vmatprep.subr.bf16.mxu1 %v4480_v47  ;;  %v4576_v47 = vld [vmem:[%s5980_s1 + $0xb14] ss:$8 sps:$4 sm:$0xff]  }
 0x12a   : > { %3160 = vmatpush1.bf16.msra.mxu0 %v4475_v48  ;;  %v4571_v48 = vld [vmem:[%s5980_s1 + $0xa10] ss:$8 sps:$4 sm:$0xff]  }
 0x12b   : > { %3203 = vmatpush1.bf16.msra.mxu1 %v4478_v49  ;;  %3161 = vmatprep.subr.bf16.mxu0 %v4483_v50  ;;  %v4574_v49 = vld [vmem:[%s5980_s1 + $0xb10] ss:$8 sps:$4 sm:$0xff]   ;;  %v4579_v50 = vld [vmem:[%s5980_s1 + $0xa04] ss:$8 sps:$4 sm:$0xff]  }
 0x12c   : > { %3204 = vmatprep.subr.bf16.mxu1 %v4486_v51  ;;  %v4582_v51 = vld [vmem:[%s5980_s1 + $0xb04] ss:$8 sps:$4 sm:$0xff]  }
 0x12e   : > { %3162 = vmatpush2.bf16.msra.mxu0 %v4481_v52  ;;  %v4577_v52 = vld [vmem:[%s5980_s1 + $0xa00] ss:$8 sps:$4 sm:$0xff]  }
 0x12f   : > { %3205 = vmatpush2.bf16.msra.mxu1 %v4484_v53  ;;  %3163 = vmatprep.subr.bf16.mxu0 %v4489_v54  ;;  %v4580_v53 = vld [vmem:[%s5980_s1 + $0xb00] ss:$8 sps:$4 sm:$0xff]   ;;  %v4585_v54 = vld [vmem:[%s5980_s1 + $0xaf4] ss:$8 sps:$4 sm:$0xff]  }
 0x130   : > { %3206 = vmatprep.subr.bf16.mxu1 %v4492_v55  ;;  %v4588_v55 = vld [vmem:[%s5980_s1 + $0xbf4] ss:$8 sps:$4 sm:$0xff]  }
 0x132   : > { %3164 = vmatpush2.bf16.msra.mxu0 %v4487_v56  ;;  %v4583_v56 = vld [vmem:[%s5980_s1 + $0xaf0] ss:$8 sps:$4 sm:$0xff]  }
 0x133   : > { %3207 = vmatpush2.bf16.msra.mxu1 %v4490_v57  ;;  %3165 = vmatprep.subr.bf16.mxu0 %v4495_v58  ;;  %v4586_v57 = vld [vmem:[%s5980_s1 + $0xbf0] ss:$8 sps:$4 sm:$0xff]   ;;  %v4591_v58 = vld [vmem:[%s5980_s1 + $0xae4] ss:$8 sps:$4 sm:$0xff]  }
 0x134   : > { %3208 = vmatprep.subr.bf16.mxu1 %v4498_v59  ;;  %v4594_v59 = vld [vmem:[%s5980_s1 + $0xbe4] ss:$8 sps:$4 sm:$0xff]  }
 0x136   : > { %3166 = vmatpush2.bf16.msra.mxu0 %v4493_v60  ;;  %v4589_v60 = vld [vmem:[%s5980_s1 + $0xae0] ss:$8 sps:$4 sm:$0xff]  }
 0x137   : > { %3209 = vmatpush2.bf16.msra.mxu1 %v4496_v61  ;;  %3167 = vmatprep.subr.bf16.mxu0 %v4501_v62  ;;  %v4592_v61 = vld [vmem:[%s5980_s1 + $0xbe0] ss:$8 sps:$4 sm:$0xff]   ;;  %v4597_v62 = vld [vmem:[%s5980_s1 + $0xad4] ss:$8 sps:$4 sm:$0xff]  }
 0x138   : > { %3210 = vmatprep.subr.bf16.mxu1 %v4504_v63  ;;  %v4600_v63 = vld [vmem:[%s5980_s1 + $0xbd4] ss:$8 sps:$4 sm:$0xff]  }
 0x13a   : > { %3168 = vmatpush2.bf16.msra.mxu0 %v4499_v0  ;;  %v4595_v0 = vld [vmem:[%s5980_s1 + $0xad0] ss:$8 sps:$4 sm:$0xff]  }
 0x13b   : > { %3211 = vmatpush2.bf16.msra.mxu1 %v4502_v1  ;;  %3169 = vmatprep.subr.bf16.mxu0 %v4507_v2  ;;  %v4598_v1 = vld [vmem:[%s5980_s1 + $0xbd0] ss:$8 sps:$4 sm:$0xff]   ;;  %v4603_v2 = vld [vmem:[%s5980_s1 + $0xac4] ss:$8 sps:$4 sm:$0xff]  }
 0x13c   : > { %3212 = vmatprep.subr.bf16.mxu1 %v4510_v3  ;;  %v4606_v3 = vld [vmem:[%s5980_s1 + $0xbc4] ss:$8 sps:$4 sm:$0xff]  }
 0x13e   : > { %3170 = vmatpush2.bf16.msra.mxu0 %v4505_v4  ;;  %v4601_v4 = vld [vmem:[%s5980_s1 + $0xac0] ss:$8 sps:$4 sm:$0xff]  }
 0x13f   : > { %3213 = vmatpush2.bf16.msra.mxu1 %v4508_v5  ;;  %3171 = vmatprep.subr.bf16.mxu0 %v4513_v6  ;;  %v4604_v5 = vld [vmem:[%s5980_s1 + $0xbc0] ss:$8 sps:$4 sm:$0xff]   ;;  %v4609_v6 = vld [vmem:[%s5980_s1 + $0xab4] ss:$8 sps:$4 sm:$0xff]  }
 0x140   : > { %3214 = vmatprep.subr.bf16.mxu1 %v4516_v7  ;;  %v4612_v7 = vld [vmem:[%s5980_s1 + $0xbb4] ss:$8 sps:$4 sm:$0xff]  }
 0x142   : > { %3172 = vmatpush2.bf16.msra.mxu0 %v4511_v8  ;;  %v4607_v8 = vld [vmem:[%s5980_s1 + $0xab0] ss:$8 sps:$4 sm:$0xff]  }
 0x143   : > { %3215 = vmatpush2.bf16.msra.mxu1 %v4514_v9  ;;  %3173 = vmatprep.subr.bf16.mxu0 %v4519_v10  ;;  %v4610_v9 = vld [vmem:[%s5980_s1 + $0xbb0] ss:$8 sps:$4 sm:$0xff]   ;;  %v4615_v10 = vld [vmem:[%s5980_s1 + $0xaa4] ss:$8 sps:$4 sm:$0xff]  }
 0x144   : > { %3216 = vmatprep.subr.bf16.mxu1 %v4522_v11  ;;  %v4618_v11 = vld [vmem:[%s5980_s1 + $0xba4] ss:$8 sps:$4 sm:$0xff]  }
 0x146   : > { %3174 = vmatpush2.bf16.msra.mxu0 %v4517_v12  ;;  %v4613_v12 = vld [vmem:[%s5980_s1 + $0xaa0] ss:$8 sps:$4 sm:$0xff]  }
 0x147   : > { %3217 = vmatpush2.bf16.msra.mxu1 %v4520_v13  ;;  %3175 = vmatprep.subr.bf16.mxu0 %v4525_v14  ;;  %v4616_v13 = vld [vmem:[%s5980_s1 + $0xba0] ss:$8 sps:$4 sm:$0xff]   ;;  %v4621_v14 = vld [vmem:[%s5980_s1 + $0xa94] ss:$8 sps:$4 sm:$0xff]  }
 0x148   : > { %3218 = vmatprep.subr.bf16.mxu1 %v4528_v15  ;;  %v4624_v15 = vld [vmem:[%s5980_s1 + $0xb94] ss:$8 sps:$4 sm:$0xff]  }
 0x14a   : > { %3176 = vmatpush2.bf16.msra.mxu0 %v4523_v16  ;;  %v4619_v16 = vld [vmem:[%s5980_s1 + $0xa90] ss:$8 sps:$4 sm:$0xff]  }
 0x14b   : > { %3219 = vmatpush2.bf16.msra.mxu1 %v4526_v17  ;;  %3231 = vmatprep.subr.bf16.mxu0 %v4534_v18  ;;  %v4622_v17 = vld [vmem:[%s5980_s1 + $0xb90] ss:$8 sps:$4 sm:$0xff]   ;;  %v4627_v18 = vld [vmem:[%s5980_s1 + $0xa84] ss:$8 sps:$4 sm:$0xff]  }
 0x14c   : > { %3274 = vmatprep.subr.bf16.mxu1 %v4540_v19  ;;  %v4630_v19 = vld [vmem:[%s5980_s1 + $0xb84] ss:$8 sps:$4 sm:$0xff]  }
 0x14d   : > { %3178 = vmatmul.mubr.bf16.vlgmr.msra.gmra.mxu0 %v4529_v20  ;;  %v4625_v20 = vld [vmem:[%s5980_s1 + $0xa80] ss:$8 sps:$4 sm:$0xff]  }
 0x14e   : > { %3221 = vmatmul.mubr.bf16.vlgmr.msra.gmra.mxu1 %v4535_v21  ;;  %3232 = vmatpush1.bf16.msra.mxu0 %v4532_v22  ;;  %v4628_v21 = vld [vmem:[%s5980_s1 + $0xb80] ss:$8 sps:$4 sm:$0xff]   ;;  %v4636_v22 = vld [vmem:[%s5980_s1 + $0xc74] ss:$8 sps:$4 sm:$0xff]  }
 0x14f   : > { %3275 = vmatpush1.bf16.msra.mxu1 %v4538_v23  ;;  %3233 = vmatprep.subr.bf16.mxu0 %v4543_v24  ;;  %v4631_v23 = vld [vmem:[%s4869_s19 + $0x50] ss:$100 sps:$4 sm:$0xff]   ;;  %v4637_v24 = vld [vmem:[%s4869_s19 + $0x58] ss:$100 sps:$4 sm:$0xff]  }
 0x150   : > { %3276 = vmatprep.subr.bf16.mxu1 %v4546_v25  ;;  %3263 = vmatprep.mubr.bf16.mxu0 %v4633_v26  ;;  %v4634_v25 = vld [vmem:[%s5980_s1 + $0xc70] ss:$8 sps:$4 sm:$0xff]   ;;  %v4642_v26 = vld [vmem:[%s5980_s1 + $0xc64] ss:$8 sps:$4 sm:$0xff]  }
 0x151   : > { %3306 = vmatprep.mubr.bf16.mxu1 %v4639_v27  ;;  %v4640_v27 = vld [vmem:[%s5980_s1 + $0xc60] ss:$8 sps:$4 sm:$0xff]  }
 0x152   : > { %3234 = vmatpush1.bf16.msra.mxu0 %v4541_v28  ;;  %v4686_v28 = vmov 0  }
 0x153   : > { %3277 = vmatpush1.bf16.msra.mxu1 %v4544_v29  ;;  %3235 = vmatprep.subr.bf16.mxu0 %v4549_v30  ;;  %v4645_v29 = vld [vmem:[%s5980_s1 + $0xc54] ss:$8 sps:$4 sm:$0xff]   ;;  %v4643_v30 = vld [vmem:[%s5980_s1 + $0xc50] ss:$8 sps:$4 sm:$0xff]  }
 0x154   : > { %3278 = vmatprep.subr.bf16.mxu1 %v4552_v31  ;;  %v4648_v31 = vld [vmem:[%s5980_s1 + $0xc44] ss:$8 sps:$4 sm:$0xff]  }
 0x156   : > { %3236 = vmatpush1.bf16.msra.mxu0 %v4547_v32  ;;  %v4646_v32 = vld [vmem:[%s5980_s1 + $0xc40] ss:$8 sps:$4 sm:$0xff]  }
 0x157   : > { %3279 = vmatpush1.bf16.msra.mxu1 %v4550_v33  ;;  %3237 = vmatprep.subr.bf16.mxu0 %v4555_v34  ;;  %v4651_v33 = vld [vmem:[%s5980_s1 + $0xc34] ss:$8 sps:$4 sm:$0xff]   ;;  %v4649_v34 = vld [vmem:[%s5980_s1 + $0xc30] ss:$8 sps:$4 sm:$0xff]  }
 0x158   : > { %3280 = vmatprep.subr.bf16.mxu1 %v4558_v35  ;;  %v4654_v35 = vld [vmem:[%s5980_s1 + $0xc24] ss:$8 sps:$4 sm:$0xff]  }
 0x15a   : > { %3238 = vmatpush1.bf16.msra.mxu0 %v4553_v36  ;;  %v4652_v36 = vld [vmem:[%s5980_s1 + $0xc20] ss:$8 sps:$4 sm:$0xff]  }
 0x15b   : > { %3281 = vmatpush1.bf16.msra.mxu1 %v4556_v37  ;;  %3239 = vmatprep.subr.bf16.mxu0 %v4561_v38  ;;  %v4657_v37 = vld [vmem:[%s5980_s1 + $0xc14] ss:$8 sps:$4 sm:$0xff]   ;;  %v4655_v38 = vld [vmem:[%s5980_s1 + $0xc10] ss:$8 sps:$4 sm:$0xff]  }
 0x15c   : > { %3282 = vmatprep.subr.bf16.mxu1 %v4564_v39  ;;  %v4660_v39 = vld [vmem:[%s5980_s1 + $0xc04] ss:$8 sps:$4 sm:$0xff]  }
 0x15e   : > { %3240 = vmatpush1.bf16.msra.mxu0 %v4559_v40  ;;  %v4658_v40 = vld [vmem:[%s5980_s1 + $0xc00] ss:$8 sps:$4 sm:$0xff]  }
 0x15f   : > { %3283 = vmatpush1.bf16.msra.mxu1 %v4562_v41  ;;  %3241 = vmatprep.subr.bf16.mxu0 %v4567_v42  ;;  %v4661_v41 = vld [vmem:[%s4869_s19 + $0x60] ss:$100 sps:$4 sm:$0xff]   ;;  %v2835_v42 = vpop.f32.mrf.mxu0  ;;  %s3997_s19 = sshll.u32 %s5988_s30, 4  ;;  %s3998_s30 = sshll.u32 %s5990_s12, 4 }
 0x160   : > { %3284 = vmatprep.subr.bf16.mxu1 %v4570_v43  ;;  %v2878_v43 = vpop.f32.mrf.mxu1  ;;  %s235_s17 = scalar_lea.vmem %s5981_s2, %s3997_s19  ;;  %s246_s21 = scalar_lea.vmem %s5982_s3, %s3998_s30 }
 0x162   : > { %3242 = vmatpush1.bf16.msra.mxu0 %v4565_v44  ;;  %v2837_v44 = vpop.f32.mrf.mxu0 }
 0x163   : > { %3285 = vmatpush1.bf16.msra.mxu1 %v4568_v45  ;;  %3243 = vmatprep.subr.bf16.mxu0 %v4573_v46  ;;  %v2880_v45 = vpop.f32.mrf.mxu1 }
 0x164   : > { %3286 = vmatprep.subr.bf16.mxu1 %v4576_v47  ;;  %v2839_v46 = vpop.f32.mrf.mxu0 }
 0x165   : > { %v2882_v47 = vpop.f32.mrf.mxu1 }
 0x166   : > { %3244 = vmatpush1.bf16.msra.mxu0 %v4571_v48  ;;  %v2841_v48 = vpop.f32.mrf.mxu0 }
 0x167   : > { %3287 = vmatpush1.bf16.msra.mxu1 %v4574_v49  ;;  %3245 = vmatprep.subr.bf16.mxu0 %v4579_v50  ;;  %v2884_v50 = vpop.f32.mrf.mxu1 }
 0x168   : > { %3288 = vmatprep.subr.bf16.mxu1 %v4582_v51  ;;  %v2921_v49 = vpop.f32.mrf.mxu0 }
 0x16a   : > { %3246 = vmatpush1.bf16.msra.mxu0 %v4577_v52  ;;  %v2923_v51 = vpop.f32.mrf.mxu0  ;;  %v2964_v52 = vpop.f32.mrf.mxu1 }
 0x16b   : > { %3289 = vmatpush1.bf16.msra.mxu1 %v4580_v53  ;;  %3247 = vmatprep.subr.bf16.mxu0 %v4585_v54 }
 0x16c   : > { %3290 = vmatprep.subr.bf16.mxu1 %v4588_v55  ;;  %v2925_v53 = vpop.f32.mrf.mxu0  ;;  %v2966_v54 = vpop.f32.mrf.mxu1 }
 0x16e   : > { %3248 = vmatpush2.bf16.msra.mxu0 %v4583_v56  ;;  %v2927_v55 = vpop.f32.mrf.mxu0  ;;  %v2968_v56 = vpop.f32.mrf.mxu1 }
 0x16f   : > { %3291 = vmatpush2.bf16.msra.mxu1 %v4586_v57  ;;  %3249 = vmatprep.subr.bf16.mxu0 %v4591_v58 }
 0x170   : > { %3292 = vmatprep.subr.bf16.mxu1 %v4594_v59  ;;  %v2970_v58 = vpop.f32.mrf.mxu1 }
 0x172   : > { %3250 = vmatpush2.bf16.msra.mxu0 %v4589_v60 }
 0x173   : > { %3293 = vmatpush2.bf16.msra.mxu1 %v4592_v61  ;;  %3251 = vmatprep.subr.bf16.mxu0 %v4597_v62 }
 0x174   : > { %3294 = vmatprep.subr.bf16.mxu1 %v4600_v63 }
 0x176   : > { %3252 = vmatpush2.bf16.msra.mxu0 %v4595_v0 }
 0x177   : > { %3295 = vmatpush2.bf16.msra.mxu1 %v4598_v1  ;;  %3253 = vmatprep.subr.bf16.mxu0 %v4603_v2 }
 0x178   : > { %3296 = vmatprep.subr.bf16.mxu1 %v4606_v3 }
 0x17a   : > { %3254 = vmatpush2.bf16.msra.mxu0 %v4601_v4 }
 0x17b   : > { %3297 = vmatpush2.bf16.msra.mxu1 %v4604_v5  ;;  %3255 = vmatprep.subr.bf16.mxu0 %v4609_v6 }
 0x17c   : > { %3298 = vmatprep.subr.bf16.mxu1 %v4612_v7  ;;  %v2879_v7 = vadd.f32 %v2878_v43, %v2835_v42 }
 0x17e   : > { %3256 = vmatpush2.bf16.msra.mxu0 %v4607_v8 }
 0x17f   : > { %3299 = vmatpush2.bf16.msra.mxu1 %v4610_v9  ;;  %3257 = vmatprep.subr.bf16.mxu0 %v4615_v10  ;;  %v2881_v10 = vadd.f32 %v2880_v45, %v2837_v44 }
 0x180   : > { %3300 = vmatprep.subr.bf16.mxu1 %v4618_v11  ;;  %v2922_v11 = vadd.f32 %v2921_v49, %v2879_v7 }
 0x182   : > { %3258 = vmatpush2.bf16.msra.mxu0 %v4613_v12 }
 0x183   : > { %3301 = vmatpush2.bf16.msra.mxu1 %v4616_v13  ;;  %3259 = vmatprep.subr.bf16.mxu0 %v4621_v14  ;;  %v2883_v13 = vadd.f32 %v2882_v47, %v2839_v46  ;;  %v2924_v14 = vadd.f32 %v2923_v51, %v2881_v10 }
 0x184   : > { %3302 = vmatprep.subr.bf16.mxu1 %v4624_v15 }
 0x186   : > { %3260 = vmatpush2.bf16.msra.mxu0 %v4619_v16  ;;  %v2885_v16 = vadd.f32 %v2884_v50, %v2841_v48 }
 0x187   : > { %3303 = vmatpush2.bf16.msra.mxu1 %v4622_v17  ;;  %3261 = vmatprep.subr.bf16.mxu0 %v4627_v18  ;;  %v2965_v17 = vadd.f32 %v2964_v52, %v2922_v11  ;;  %v2926_v18 = vadd.f32 %v2925_v53, %v2883_v13 }
 0x188   : > { %3304 = vmatprep.subr.bf16.mxu1 %v4630_v19 }
 0x18a   : > { %3262 = vmatpush2.bf16.msra.mxu0 %v4625_v20 }
 0x18b   : > { %3305 = vmatpush2.bf16.msra.mxu1 %v4628_v21  ;;  %3317 = vmatprep.subr.bf16.mxu0 %v4636_v22  ;;  %v2967_v21 = vadd.f32 %v2966_v54, %v2924_v14  ;;  %v2928_v22 = vadd.f32 %v2927_v55, %v2885_v16 }
 0x18d   : > { %3264 = vmatmul.mubr.bf16.vlgmr.msra.gmra.mxu0 %v4631_v23  ;;  %v3007_v57 = vpop.f32.mrf.mxu0 }
 0x18e   : > { %3307 = vmatmul.mubr.bf16.vlgmr.msra.gmra.mxu1 %v4637_v24  ;;  %3318 = vmatpush1.bf16.msra.mxu0 %v4634_v25  ;;  %v3050_v60 = vpop.f32.mrf.mxu1  ;;  %v3008_v23 = vadd.f32 %v3007_v57, %v2965_v17  ;;  %v2969_v24 = vadd.f32 %v2968_v56, %v2926_v18 }
 0x18f   : > { %3349 = vmatprep.mubr.bf16.mxu0 %v4686_v28  ;;  %3319 = vmatprep.subr.bf16.mxu0 %v4642_v26  ;;  %v3009_v59 = vpop.f32.mrf.mxu0  ;;  %v2971_v28 = vadd.f32 %v2970_v58, %v2928_v22 }
 0x190   : > { %v3052_v62 = vpop.f32.mrf.mxu1  ;;  %v3010_v25 = vadd.f32 %v3009_v59, %v2967_v21 }
 0x191   : > { %v3011_v61 = vpop.f32.mrf.mxu0 }
 0x192   : > { %3320 = vmatpush1.bf16.msra.mxu0 %v4640_v27  ;;  %v3054_v0 = vpop.f32.mrf.mxu1 }
 0x193   : > { %3321 = vmatprep.subr.bf16.mxu0 %v4645_v29  ;;  %v3013_v63 = vpop.f32.mrf.mxu0  ;;  %v3051_v29 = vadd.f32 %v3050_v60, %v3008_v23 }
 0x194   : > { %v3056_v2 = vpop.f32.mrf.mxu1 }
 0x196   : > { %3322 = vmatpush1.bf16.msra.mxu0 %v4643_v30  ;;  %v3012_v30 = vadd.f32 %v3011_v61, %v2969_v24 }
 0x197   : > { %3323 = vmatprep.subr.bf16.mxu0 %v4648_v31  ;;  %v3053_v31 = vadd.f32 %v3052_v62, %v3010_v25 }
 0x19a   : > { %3324 = vmatpush1.bf16.msra.mxu0 %v4646_v32  ;;  %v3014_v32 = vadd.f32 %v3013_v63, %v2971_v28 }
 0x19b   : > { %3325 = vmatprep.subr.bf16.mxu0 %v4651_v33 }
 0x19e   : > { %3326 = vmatpush1.bf16.msra.mxu0 %v4649_v34 }
 0x19f   : > { %3327 = vmatprep.subr.bf16.mxu0 %v4654_v35 }
 0x1a2   : > { %3328 = vmatpush1.bf16.msra.mxu0 %v4652_v36  ;;  %v3055_v36 = vadd.f32 %v3054_v0, %v3012_v30 }
 0x1a3   : > { %3329 = vmatprep.subr.bf16.mxu0 %v4657_v37 }
 0x1a6   : > { %3330 = vmatpush1.bf16.msra.mxu0 %v4655_v38 }
 0x1a7   : > { %3331 = vmatprep.subr.bf16.mxu0 %v4660_v39  ;;  %v3057_v39 = vadd.f32 %v3056_v2, %v3014_v32 }
 0x1aa   : > { %3332 = vmatpush1.bf16.msra.mxu0 %v4658_v40 }
 0x1ad   : > { %3350 = vmatmul.mubr.bf16.vlgmr.msra.gmra.mxu0 %v4661_v41 }
 0x1cd   : > { %v3093_v1 = vpop.f32.mrf.mxu0 }
 0x1ce   : > { %v3136_v4 = vpop.f32.mrf.mxu1  ;;  %v3094_v33 = vadd.f32 %v3093_v1, %v3051_v29 }
 0x1cf   : > { %v3095_v3 = vpop.f32.mrf.mxu0 }
 0x1d0   : > { %v3138_v6 = vpop.f32.mrf.mxu1  ;;  %v3096_v37 = vadd.f32 %v3095_v3, %v3053_v31  ;;  %v3137_v40 = vadd.f32 %v3136_v4, %v3094_v33 }
 0x1d1   : > { %v3097_v5 = vpop.f32.mrf.mxu0 }
 0x1d2   : > { %v3140_v9 = vpop.f32.mrf.mxu1  ;;  %v3098_v41 = vadd.f32 %v3097_v5, %v3055_v36  ;;  %v3139_v43 = vadd.f32 %v3138_v6, %v3096_v37 }
 0x1d3   : > { %v3099_v8 = vpop.f32.mrf.mxu0 }
 0x1d4   : > { %v3142_v15 = vpop.f32.mrf.mxu1  ;;  %v3100_v44 = vadd.f32 %v3099_v8, %v3057_v39  ;;  %v3141_v48 = vadd.f32 %v3140_v9, %v3098_v41 }
 0x1d6   : > { %v3143_v50 = vadd.f32 %v3142_v15, %v3100_v44 }
 0x20d   : > { %v3179_v12 = vpop.f32.mrf.mxu0 }
 0x20e   : > { %v3222_v20 = vpop.f32.mrf.mxu1  ;;  %v3180_v45 = vadd.f32 %v3179_v12, %v3137_v40 }
 0x20f   : > { %v3181_v19 = vpop.f32.mrf.mxu0 }
 0x210   : > { %v3224_v27 = vpop.f32.mrf.mxu1  ;;  %v3182_v49 = vadd.f32 %v3181_v19, %v3139_v43  ;;  %v3223_v51 = vadd.f32 %v3222_v20, %v3180_v45 }
 0x211   : > { %v3183_v26 = vpop.f32.mrf.mxu0 }
 0x212   : > { %v3226_v35 = vpop.f32.mrf.mxu1  ;;  %v3184_v52 = vadd.f32 %v3183_v26, %v3141_v48  ;;  %v3225_v55 = vadd.f32 %v3224_v27, %v3182_v49 }
 0x213   : > { %v3185_v34 = vpop.f32.mrf.mxu0 }
 0x214   : > { %v3228_v42 = vpop.f32.mrf.mxu1  ;;  %v3186_v56 = vadd.f32 %v3185_v34, %v3143_v50  ;;  %v3227_v58 = vadd.f32 %v3226_v35, %v3184_v52 }
 0x216   : > { %v3229_v62 = vadd.f32 %v3228_v42, %v3186_v56 }
 0x24d   : > { %v3265_v38 = vpop.f32.mrf.mxu0 }
 0x24e   : > { %v3308_v47 = vpop.f32.mrf.mxu1  ;;  %v3266_v57 = vadd.f32 %v3265_v38, %v3223_v51 }
 0x24f   : > { %v3267_v46 = vpop.f32.mrf.mxu0 }
 0x250   : > { %v3310_v54 = vpop.f32.mrf.mxu1  ;;  %v3268_v59 = vadd.f32 %v3267_v46, %v3225_v55  ;;  %v3309_v63 = vadd.f32 %v3308_v47, %v3266_v57 }
 0x251   : > { %v3269_v53 = vpop.f32.mrf.mxu0 }
 0x252   : > { %v3312_v61 = vpop.f32.mrf.mxu1  ;;  %v3270_v0 = vadd.f32 %v3269_v53, %v3227_v58  ;;  %v3311_v2 = vadd.f32 %v3310_v54, %v3268_v59 }
 0x253   : > { %v3271_v60 = vpop.f32.mrf.mxu0 }
 0x254   : > { %v3272_v3 = vadd.f32 %v3271_v60, %v3229_v62  ;;  %v3314_v5 = vpop.f32.mrf.mxu1  ;;  %v3313_v7 = vadd.f32 %v3312_v61, %v3270_v0 }
 0x256   : > { %v3315_v10 = vadd.f32 %v3314_v5, %v3272_v3 }
 0x26d   : > { %v3351_v1 = vpop.f32.mrf.mxu0 }
 0x26e   : > { %v3352_v4 = vadd.f32 %v3351_v1, %v3309_v63 }
 0x26f   : > { %v3353_v6 = vpop.f32.mrf.mxu0 }
 0x270   : > { %3360 = vst [vmem:[%s235_s17] sm:$0xff] %v3352_v4  ;;  %v3354_v8 = vadd.f32 %v3353_v6, %v3311_v2 }
 0x271   : > { %v3355_v9 = vpop.f32.mrf.mxu0 }
 0x272   : > { %3361 = vst [vmem:[%s235_s17 + $0x8] sm:$0xff] %v3354_v8  ;;  %v3356_v11 = vadd.f32 %v3355_v9, %v3313_v7 }
 0x273   : > { %v3357_v12 = vpop.f32.mrf.mxu0 }
 0x274   : > { %3362 = vst [vmem:[%s235_s17 + $0x10] sm:$0xff] %v3356_v11  ;;  %v3358_v13 = vadd.f32 %v3357_v12, %v3315_v10  ;;  %v3384_v17 = vmul.f32 %v3356_v11, %v3356_v11 }
 0x276   : > { %3363 = vst [vmem:[%s235_s17 + $0x18] sm:$0xff] %v3358_v13  ;;  %v3385_v19 = vmul.f32 %v3358_v13, %v3358_v13 }
 0x277   : > { %v3364_v14 = vld [vmem:[%s235_s17] sm:$0xff] }
 0x278   : > { %v3368_v15 = vadd.f32 %v3364_v14, %v3356_v11  ;;  %v3382_v16 = vmul.f32 %v3364_v14, %v3364_v14 }
 0x279   : > { %v3365_v18 = vld [vmem:[%s235_s17 + $0x8] sm:$0xff] }
 0x27a   : > { %v3369_v20 = vrot.slane %v3368_v15, 4  ;;  %v3386_v21 = vadd.f32 %v3384_v17, %v3382_v16  ;;  %v3375_v22 = vadd.f32 %v3365_v18, %v3358_v13  ;;  %v3383_v23 = vmul.f32 %v3365_v18, %v3365_v18 }
 0x27c   : > { %v3370_v24 = vadd.f32 %v3369_v20, %v3368_v15  ;;  %v3387_v25 = vrot.slane %v3386_v21, 4  ;;  %v3376_v26 = vrot.slane %v3375_v22, 4  ;;  %v3393_v27 = vadd.f32 %v3385_v19, %v3383_v23 }
 0x27e   : > { %v3371_v28 = vrot.slane %v3370_v24, 2  ;;  %v3388_v29 = vadd.f32 %v3387_v25, %v3386_v21  ;;  %v3377_v30 = vadd.f32 %v3376_v26, %v3375_v22  ;;  %v3394_v31 = vrot.slane %v3393_v27, 4 }
 0x280   : > { %v3372_v32 = vadd.f32 %v3371_v28, %v3370_v24  ;;  %v3389_v33 = vrot.slane %v3388_v29, 2  ;;  %v3378_v34 = vrot.slane %v3377_v30, 2  ;;  %v3395_v35 = vadd.f32 %v3394_v31, %v3393_v27 }
 0x282   : > { %v3373_v36 = vrot.slane %v3372_v32, 1  ;;  %v3390_v37 = vadd.f32 %v3389_v33, %v3388_v29  ;;  %v3379_v38 = vadd.f32 %v3378_v34, %v3377_v30  ;;  %v3396_v39 = vrot.slane %v3395_v35, 2 }
 0x284   : > { %v3391_v40 = vrot.slane %v3390_v37, 1  ;;  %v3380_v41 = vrot.slane %v3379_v38, 1  ;;  %v3397_v42 = vadd.f32 %v3396_v39, %v3395_v35  ;;  %v3374_v43 = vadd.f32 %v3373_v36, %v3372_v32 }
 0x286   : > { %v3392_v44 = vadd.f32 %v3391_v40, %v3390_v37  ;;  %v3398_v45 = vrot.slane %v3397_v42, 1  ;;  %v3381_v47 = vadd.f32 %v3380_v41, %v3379_v38 }
 0x288   : > { %v3401_v46 = vsel %vm3400_vm0, %v3374_v43, %v3392_v44  ;;  %v3399_v48 = vadd.f32 %v3398_v45, %v3397_v42 }
 0x289   : > { %v3404_v49 = vsel %vm3403_vm1, %v3401_v46, 0.0 }
 0x28a   : > { %3406 = vst [vmem:[%s246_s21] sm:$0xff] %v3404_v49  ;;  %v3402_v50 = vsel %vm3400_vm0, %v3381_v47, %v3399_v48 }
 0x28b   : > { %v3405_v51 = vsel %vm3403_vm1, %v3402_v50, 0.0 }
 0x28c   : > { %3407 = vst [vmem:[%s246_s21 + $0x8] sm:$0xff] %v3405_v51 }
 0x28d PF: > { %s14_s14 = sadd.s32 1, %s4684_s14   ;;  %s5983_s12 = smov %s4680_s13 }
 0x28e   : > { %p11_p6 = scmp.ge.s32.totalorder %s14_s14, 4   ;;  %s5984_s13 = smov %s5986_s15 }
 0x290   :  { %13 = sbr.rel (!%p11_p6) target bundleno = 2 (0x2), region = 73 }

// kernel: d1_forward.9
= control target key start
LH: loop header
LB: loop body
LE: loop exit
PB: predicated region body
PF: predicated region fallthrough
CT: control target
= control target key end

     0   :  { %v27_v20 = vlaneseq  ;;  %s696_s3 = inlined_call_operand.vmem [shape: bf16[512,128], index: 3, kind: input, shape index: {}]   ;;  %s697_s0 = inlined_call_operand.vmem [shape: f32[8,512], index: 0, kind: input, shape index: {}]   ;;  %s698_s1 = inlined_call_operand.vmem [shape: f32[1,512], index: 1, kind: input, shape index: {}]   ;;  %s699_s2 = inlined_call_operand.vmem [shape: f32[1,512], index: 2, kind: input, shape index: {}]   ;;  %s700_s4 = inlined_call_operand.vmem [shape: f32[1,128], index: 4, kind: input, shape index: {}]   ;;  %s701_s5 = inlined_call_operand.vmem [shape: f32[8,128], index: 5, kind: output, shape index: {}]  }
   0x1   :  { %v514_v0 = vld [vmem:[%s696_s3 + $0x78] sm:$0xff]   ;;  %v518_v4 = vld [vmem:[%s696_s3 + $0x70] sm:$0xff]   ;;  %v522_v8 = vld [vmem:[%s696_s3 + $0x68] sm:$0xff]  }
   0x2   :  { %v515_v1 = vld [vmem:[%s696_s3 + $0xf8] sm:$0xff]   ;;  %470 = vmatprep.subr.bf16.mxu0 %v514_v0  ;;  %v519_v5 = vld [vmem:[%s696_s3 + $0xf0] sm:$0xff]   ;;  %v523_v9 = vld [vmem:[%s696_s3 + $0xe8] sm:$0xff]   ;;  %v28_v25 = vshrl.u32 %v27_v20, 7 }
   0x3   :  { %v516_v2 = vld [vmem:[%s696_s3 + $0x38] sm:$0xff]   ;;  %492 = vmatprep.subr.bf16.mxu1 %v515_v1  ;;  %v520_v6 = vld [vmem:[%s696_s3 + $0x30] sm:$0xff]   ;;  %v524_v10 = vld [vmem:[%s696_s3 + $0x28] sm:$0xff]  }
   0x4   :  { %v517_v3 = vld [vmem:[%s696_s3 + $0xb8] sm:$0xff]   ;;  %471 = vmatpush3.bf16.msra.mxu0 %v516_v2  ;;  %v521_v7 = vld [vmem:[%s696_s3 + $0xb0] sm:$0xff]   ;;  %v525_v11 = vld [vmem:[%s696_s3 + $0xa8] sm:$0xff]   ;;  %v33_v30 = vsub.s32 1, %v28_v25  ;;  %v41_v32 = vsub.s32 3, %v28_v25  ;;  %v29_v34 = vsub.s32 0, %v28_v25 }
   0x5   :  { %493 = vmatpush3.bf16.msra.mxu1 %v517_v3  ;;  %472 = vmatprep.subr.bf16.mxu0 %v518_v4  ;;  %v526_v12 = vld [vmem:[%s696_s3 + $0x60] sm:$0xff]   ;;  %v530_v16 = vld [vmem:[%s696_s3 + $0x58] sm:$0xff]   ;;  %v534_v21 = vld [vmem:[%s696_s3 + $0x50] sm:$0xff]   ;;  %v37_v36 = vsub.s32 2, %v28_v25 }
   0x6   :  { %494 = vmatprep.subr.bf16.mxu1 %v519_v5  ;;  %v527_v13 = vld [vmem:[%s696_s3 + $0xe0] sm:$0xff]   ;;  %v531_v17 = vld [vmem:[%s696_s3 + $0xd8] sm:$0xff]   ;;  %v535_v22 = vld [vmem:[%s696_s3 + $0xd0] sm:$0xff]  }
   0x7   :  { %v528_v14 = vld [vmem:[%s696_s3 + $0x20] sm:$0xff]   ;;  %v532_v18 = vld [vmem:[%s696_s3 + $0x18] sm:$0xff]   ;;  %v536_v23 = vld [vmem:[%s696_s3 + $0x10] sm:$0xff]  }
   0x8   :  { %473 = vmatpush3.bf16.msra.mxu0 %v520_v6  ;;  %v529_v15 = vld [vmem:[%s696_s3 + $0xa0] sm:$0xff]   ;;  %v533_v19 = vld [vmem:[%s696_s3 + $0x98] sm:$0xff]   ;;  %v537_v24 = vld [vmem:[%s696_s3 + $0x90] sm:$0xff]  }
   0x9   :  { %495 = vmatpush3.bf16.msra.mxu1 %v521_v7  ;;  %474 = vmatprep.subr.bf16.mxu0 %v522_v8  ;;  %v538_v26 = vld [vmem:[%s696_s3 + $0x48] sm:$0xff]   ;;  %v542_v31 = vld [vmem:[%s696_s3 + $0x40] sm:$0xff]   ;;  %v24_v43 = vld [vmem:[%s697_s0 + $0x18] sm:$0xff] }
   0xa   :  { %496 = vmatprep.subr.bf16.mxu1 %v523_v9  ;;  %v539_v27 = vld [vmem:[%s696_s3 + $0xc8] sm:$0xff]   ;;  %v543_v33 = vld [vmem:[%s696_s3 + $0xc0] sm:$0xff]   ;;  %v23_v47 = vld [vmem:[%s697_s0 + $0x10] sm:$0xff] }
   0xb   :  { %v540_v28 = vld [vmem:[%s696_s3 + $0x8] sm:$0xff]   ;;  %v544_v35 = vld [vmem:[%s696_s3] sm:$0xff]  }
   0xc   :  { %475 = vmatpush3.bf16.msra.mxu0 %v524_v10  ;;  %v541_v29 = vld [vmem:[%s696_s3 + $0x88] sm:$0xff]   ;;  %v545_v37 = vld [vmem:[%s696_s3 + $0x80] sm:$0xff]  }
   0xd   :  { %497 = vmatpush3.bf16.msra.mxu1 %v525_v11  ;;  %476 = vmatprep.subr.bf16.mxu0 %v526_v12  ;;  %v22_v38 = vld [vmem:[%s697_s0 + $0x8] sm:$0xff]  ;;  %v25_v39 = vld [vmem:[%s698_s1] sm:$0xf] }
   0xe   :  { %498 = vmatprep.subr.bf16.mxu1 %v527_v13  ;;  %v51_v40 = vld [vmem:[%s699_s2] sm:$0xf]  ;;  %v34_v41 = vrot.slane %v25_v39, %v33_v30  ;;  %v42_v44 = vrot.slane %v25_v39, %v41_v32  ;;  %v30_v48 = vrot.slane %v25_v39, %v29_v34  ;;  %v38_v50 = vrot.slane %v25_v39, %v37_v36 }
   0xf   :  { %v60_v42 = vrot.slane %v51_v40, %v33_v30  ;;  %v68_v45 = vrot.slane %v51_v40, %v41_v32  ;;  %v21_v46 = vld [vmem:[%s697_s0] sm:$0xff]  ;;  %v56_v49 = vrot.slane %v51_v40, %v29_v34  ;;  %v64_v51 = vrot.slane %v51_v40, %v37_v36 }
  0x10   :  { %477 = vmatpush3.bf16.msra.mxu0 %v528_v14  ;;  %v48_v52 = vsub.f32 %v22_v38, %v34_v41  ;;  %v50_v53 = vsub.f32 %v24_v43, %v42_v44  ;;  %v47_v54 = vsub.f32 %v21_v46, %v30_v48  ;;  %v49_v55 = vsub.f32 %v23_v47, %v38_v50  ;;  %v437_v10 = vld [vmem:[%s700_s4] ss:$0 sm:$0xff] }
  0x11   :  { %499 = vmatpush3.bf16.msra.mxu1 %v529_v15  ;;  %478 = vmatprep.subr.bf16.mxu0 %v530_v16 }
  0x12   :  { %500 = vmatprep.subr.bf16.mxu1 %v531_v17  ;;  %v74_v56 = vmul.f32 %v60_v42, %v48_v52  ;;  %v76_v57 = vmul.f32 %v68_v45, %v50_v53  ;;  %v73_v58 = vmul.f32 %v56_v49, %v47_v54  ;;  %v75_v59 = vmul.f32 %v64_v51, %v49_v55 }
  0x14   :  { %479 = vmatpush3.bf16.msra.mxu0 %v532_v18  ;;  %v78_v60 = vmul.f32 0.05, %v74_v56  ;;  %v80_v61 = vmul.f32 0.05, %v76_v57  ;;  %v77_v62 = vmul.f32 0.05, %v73_v58 }
  0x15   :  { %501 = vmatpush3.bf16.msra.mxu1 %v533_v19  ;;  %480 = vmatprep.subr.bf16.mxu0 %v534_v21  ;;  %v79_v63 = vmul.f32 0.05, %v75_v59 }
  0x16   :  { %502 = vmatprep.subr.bf16.mxu1 %v535_v22  ;;  %v82_v0 = vmax.f32 %v74_v56, %v78_v60  ;;  %v84_v1 = vmax.f32 %v76_v57, %v80_v61  ;;  %v81_v2 = vmax.f32 %v73_v58, %v77_v62 }
  0x17   :  { %v83_v3 = vmax.f32 %v75_v59, %v79_v63 }
  0x18   :  { %481 = vmatpush3.bf16.msra.mxu0 %v536_v23  ;;  %v86_v4 = vpack.c.bf16 %v82_v0, %v82_v0  ;;  %v88_v5 = vpack.c.bf16 %v84_v1, %v84_v1  ;;  %v85_v6 = vpack.c.bf16 %v81_v2, %v81_v2 }
  0x19   :  { %503 = vmatpush3.bf16.msra.mxu1 %v537_v24  ;;  %482 = vmatprep.subr.bf16.mxu0 %v538_v26  ;;  %v87_v7 = vpack.c.bf16 %v83_v3, %v83_v3 }
  0x1a   :  { %504 = vmatprep.subr.bf16.mxu1 %v539_v27  ;;  %384 = vmatprep.mubr.bf16.mxu0 %v86_v4 }
  0x1b   :  { %424 = vmatprep.mubr.bf16.mxu1 %v88_v5 }
  0x1c   :  { %483 = vmatpush3.bf16.msra.mxu0 %v540_v28 }
  0x1d   :  { %505 = vmatpush3.bf16.msra.mxu1 %v541_v29  ;;  %484 = vmatprep.subr.bf16.mxu0 %v542_v31 }
  0x1e   :  { %506 = vmatprep.subr.bf16.mxu1 %v543_v33 }
  0x20   :  { %485 = vmatpush3.bf16.msra.mxu0 %v544_v35 }
  0x21   :  { %507 = vmatpush3.bf16.msra.mxu1 %v545_v37 }
  0x23   :  { %385 = vmatmul.mubr.bf16.vlgmr.msra.gmra.mxu0 %v85_v6 }
  0x24   :  { %425 = vmatmul.mubr.bf16.vlgmr.msra.gmra.mxu1 %v87_v7 }
  0xe3   :  { %v486_v8 = vpop.f32.mrf.mxu0 }
  0xe4   :  { %v508_v9 = vpop.f32.mrf.mxu1 }
  0xe5   :  { %v487_v11 = vpop.f32.mrf.mxu0 }
  0xe6   :  { %v509_v12 = vpop.f32.mrf.mxu1  ;;  %v488_v13 = vadd.f32 %v487_v11, %v486_v8 }
  0xe7   :  { %v489_v14 = vpop.f32.mrf.mxu0  ;;  %v510_v17 = vadd.f32 %v509_v12, %v508_v9 }
  0xe8   :  { %v511_v15 = vpop.f32.mrf.mxu1  ;;  %v387_v16 = vadd.f32 %v488_v13, %v437_v10 }
  0xe9   :  { %v490_v18 = vpop.f32.mrf.mxu0 }
  0xea   :  { %v512_v19 = vpop.f32.mrf.mxu1  ;;  %v427_v20 = vadd.f32 %v510_v17, %v387_v16 }
  0xec   :  { %432 = vst [vmem:[%s701_s5] sm:$0xff] %v427_v20 }

// kernel: d1_forward.8
= control target key start
LH: loop header
LB: loop body
LE: loop exit
PB: predicated region body
PF: predicated region fallthrough
CT: control target
= control target key end

     0   :  { %s9923_s12 = smov 0   ;;  %s9925_s13 = smov 0   ;;  %s11708_s0 = inlined_call_operand.vmem [shape: bf16[8,4096], index: 0, kind: input, shape index: {}]   ;;  %s11709_s1 = inlined_call_operand.vmem [shape: bf16[4096,512], index: 1, kind: input, shape index: {}]   ;;  %s11710_s2 = inlined_call_operand.vmem [shape: f32[8,512], index: 2, kind: output, shape index: {0}]   ;;  %s11711_s3 = inlined_call_operand.vmem [shape: f32[8,512], index: 3, kind: output, shape index: {1}]  }
   0x1   :  { %s9927_s14 = smov 0   ;;  %s9929_s15 = smov 0  }
   0x2   :  { %s9931_s16 = smov 0  }
   0x3 LB: > { %s23_s17 = sadd.s32 1, %s9897_s15  ;;  %p66_p1 = scmp.ne.s32.totalorder %s9889_s13, %s9885_s12  ;;  %s9901_s16 = sphi %s9931_s16, %s14_s16   ;;  %s9897_s15 = sphi %s9929_s15, %s11715_s15   ;;  %s9893_s14 = sphi %s9927_s14, %s11714_s14   ;;  %s9889_s13 = sphi %s9925_s13, %s11713_s13   ;;  %s9885_s12 = sphi %s9923_s12, %s11712_s12  }
   0x4   : > { %p24_p0 = scmp.ge.s32.totalorder %s23_s17, 2  ;;  %p67_p2 = scmp.eq.s32.totalorder %s9901_s16, 0 }
   0x5   : > { %s59_s19 = sadd.s32 1, %s9889_s13  ;;  %p8466_p5 = scmp.ge.s32.totalorder %s9901_s16, 2 }
   0x6   : > { %s11717_s17 = smov (%p24_p0, %s23_s17), 0  ;;  %p68_p3 = por %p67_p2, %p66_p1 }
   0x7   : > { %s56_s18 = ssub.s32 %s9897_s15, %s11717_s17  ;;  %156 = sbr.rel (%p8466_p5) target bundleno = 272 (0x110), region = 20 }
   0x8   : > { %p57_p4 = scmp.eq.s32.totalorder %s56_s18, 0 }
   0xa   : > { %s9958_s20 = scalar_select %p57_p4, %s9889_s13, %s59_s19  }
   0xc   : > { %159 = sbr.rel (!%p68_p3) target bundleno = 272 (0x110), region = 24  ;;  %s161_s21 = sand.u32 (%p68_p3), 1, %s9889_s13  }
   0xd   : > { %s9022_s22 = sshll.u32 (%p68_p3), %s9897_s15, 3  ;;  %s8467_s23 = sshll.u32 (%p68_p3), %s161_s21, 12 }
   0xe   : > { %s9966_s26 = scalar_lea.vmem (%p68_p3), %s11709_s1, %s9022_s22  ;;  %s9971_s27 = scalar_lea.vmem (%p68_p3), [#allocation2], %s8467_s23 }
   0xf   : > { %v1220_v0 = vld [vmem:[%s9966_s26] sm:$0xff] (%p68_p3)  ;;  %v1222_v1 = vld [vmem:[%s9966_s26 + $0x10] sm:$0xff] (%p68_p3) }
  0x10   : > { %v1224_v2 = vld [vmem:[%s9966_s26 + $0x20] sm:$0xff] (%p68_p3)  ;;  %1221 = vst [vmem:[%s9971_s27] sm:$0xff] (%p68_p3), %v1220_v0  ;;  %1223 = vst [vmem:[%s9971_s27 + $0x8] sm:$0xff] (%p68_p3), %v1222_v1  ;;  %v1226_v3 = vld [vmem:[%s9966_s26 + $0x30] sm:$0xff] (%p68_p3) }
  0x11   : > { %1225 = vst [vmem:[%s9971_s27 + $0x10] sm:$0xff] %v1224_v2  ;;  %v1228_v4 = vld [vmem:[%s9966_s26 + $0x40] sm:$0xff]  ;;  %v1230_v5 = vld [vmem:[%s9966_s26 + $0x50] sm:$0xff]  ;;  %1227 = vst [vmem:[%s9971_s27 + $0x18] sm:$0xff] %v1226_v3 }
  0x12   : > { %1229 = vst [vmem:[%s9971_s27 + $0x20] sm:$0xff] %v1228_v4  ;;  %1231 = vst [vmem:[%s9971_s27 + $0x28] sm:$0xff] %v1230_v5  ;;  %v1232_v6 = vld [vmem:[%s9966_s26 + $0x60] sm:$0xff]  ;;  %v1234_v7 = vld [vmem:[%s9966_s26 + $0x70] sm:$0xff] }
  0x13   : > { %v1236_v8 = vld [vmem:[%s9966_s26 + $0x80] sm:$0xff]  ;;  %1233 = vst [vmem:[%s9971_s27 + $0x30] sm:$0xff] %v1232_v6  ;;  %1235 = vst [vmem:[%s9971_s27 + $0x38] sm:$0xff] %v1234_v7  ;;  %v1238_v9 = vld [vmem:[%s9966_s26 + $0x90] sm:$0xff] }
  0x14   : > { %1237 = vst [vmem:[%s9971_s27 + $0x40] sm:$0xff] %v1236_v8  ;;  %v1240_v10 = vld [vmem:[%s9966_s26 + $0xa0] sm:$0xff]  ;;  %v1242_v11 = vld [vmem:[%s9966_s26 + $0xb0] sm:$0xff]  ;;  %1239 = vst [vmem:[%s9971_s27 + $0x48] sm:$0xff] %v1238_v9 }
  0x15   : > { %1241 = vst [vmem:[%s9971_s27 + $0x50] sm:$0xff] %v1240_v10  ;;  %1243 = vst [vmem:[%s9971_s27 + $0x58] sm:$0xff] %v1242_v11  ;;  %v1244_v12 = vld [vmem:[%s9966_s26 + $0xc0] sm:$0xff]  ;;  %v1246_v13 = vld [vmem:[%s9966_s26 + $0xd0] sm:$0xff] }
  0x16   : > { %v1248_v14 = vld [vmem:[%s9966_s26 + $0xe0] sm:$0xff]  ;;  %1245 = vst [vmem:[%s9971_s27 + $0x60] sm:$0xff] %v1244_v12  ;;  %1247 = vst [vmem:[%s9971_s27 + $0x68] sm:$0xff] %v1246_v13  ;;  %v1250_v15 = vld [vmem:[%s9966_s26 + $0xf0] sm:$0xff] }
  0x17   : > { %1249 = vst [vmem:[%s9971_s27 + $0x70] sm:$0xff] %v1248_v14  ;;  %v1252_v16 = vld [vmem:[%s9966_s26 + $0x100] sm:$0xff]  ;;  %v1254_v17 = vld [vmem:[%s9966_s26 + $0x110] sm:$0xff]  ;;  %1251 = vst [vmem:[%s9971_s27 + $0x78] sm:$0xff] %v1250_v15 }
  0x18   : > { %1253 = vst [vmem:[%s9971_s27 + $0x80] sm:$0xff] %v1252_v16  ;;  %1255 = vst [vmem:[%s9971_s27 + $0x88] sm:$0xff] %v1254_v17  ;;  %v1256_v18 = vld [vmem:[%s9966_s26 + $0x120] sm:$0xff]  ;;  %v1258_v19 = vld [vmem:[%s9966_s26 + $0x130] sm:$0xff] }
  0x19   : > { %v1260_v20 = vld [vmem:[%s9966_s26 + $0x140] sm:$0xff]  ;;  %1257 = vst [vmem:[%s9971_s27 + $0x90] sm:$0xff] %v1256_v18  ;;  %1259 = vst [vmem:[%s9971_s27 + $0x98] sm:$0xff] %v1258_v19  ;;  %v1262_v21 = vld [vmem:[%s9966_s26 + $0x150] sm:$0xff] }
  0x1a   : > { %1261 = vst [vmem:[%s9971_s27 + $0xa0] sm:$0xff] %v1260_v20  ;;  %v1264_v22 = vld [vmem:[%s9966_s26 + $0x160] sm:$0xff]  ;;  %v1266_v23 = vld [vmem:[%s9966_s26 + $0x170] sm:$0xff]  ;;  %1263 = vst [vmem:[%s9971_s27 + $0xa8] sm:$0xff] %v1262_v21 }
  0x1b   : > { %1265 = vst [vmem:[%s9971_s27 + $0xb0] sm:$0xff] %v1264_v22  ;;  %1267 = vst [vmem:[%s9971_s27 + $0xb8] sm:$0xff] %v1266_v23  ;;  %v1268_v24 = vld [vmem:[%s9966_s26 + $0x180] sm:$0xff]  ;;  %v1270_v25 = vld [vmem:[%s9966_s26 + $0x190] sm:$0xff] }
  0x1c   : > { %v1272_v26 = vld [vmem:[%s9966_s26 + $0x1a0] sm:$0xff]  ;;  %1269 = vst [vmem:[%s9971_s27 + $0xc0] sm:$0xff] %v1268_v24  ;;  %1271 = vst [vmem:[%s9971_s27 + $0xc8] sm:$0xff] %v1270_v25  ;;  %v1274_v27 = vld [vmem:[%s9966_s26 + $0x1b0] sm:$0xff] }
  0x1d   : > { %1273 = vst [vmem:[%s9971_s27 + $0xd0] sm:$0xff] %v1272_v26  ;;  %v1276_v28 = vld [vmem:[%s9966_s26 + $0x1c0] sm:$0xff]  ;;  %v1278_v29 = vld [vmem:[%s9966_s26 + $0x1d0] sm:$0xff]  ;;  %1275 = vst [vmem:[%s9971_s27 + $0xd8] sm:$0xff] %v1274_v27 }
  0x1e   : > { %1277 = vst [vmem:[%s9971_s27 + $0xe0] sm:$0xff] %v1276_v28  ;;  %1279 = vst [vmem:[%s9971_s27 + $0xe8] sm:$0xff] %v1278_v29  ;;  %v1280_v30 = vld [vmem:[%s9966_s26 + $0x1e0] sm:$0xff]  ;;  %v1282_v31 = vld [vmem:[%s9966_s26 + $0x1f0] sm:$0xff] }
  0x1f   : > { %v1284_v32 = vld [vmem:[%s9966_s26 + $0x200] sm:$0xff]  ;;  %1281 = vst [vmem:[%s9971_s27 + $0xf0] sm:$0xff] %v1280_v30  ;;  %1283 = vst [vmem:[%s9971_s27 + $0xf8] sm:$0xff] %v1282_v31  ;;  %v1286_v33 = vld [vmem:[%s9966_s26 + $0x210] sm:$0xff] }
  0x20   : > { %1285 = vst [vmem:[%s9971_s27 + $0x100] sm:$0xff] %v1284_v32  ;;  %v1288_v34 = vld [vmem:[%s9966_s26 + $0x220] sm:$0xff]  ;;  %v1290_v35 = vld [vmem:[%s9966_s26 + $0x230] sm:$0xff]  ;;  %1287 = vst [vmem:[%s9971_s27 + $0x108] sm:$0xff] %v1286_v33 }
  0x21   : > { %1289 = vst [vmem:[%s9971_s27 + $0x110] sm:$0xff] %v1288_v34  ;;  %1291 = vst [vmem:[%s9971_s27 + $0x118] sm:$0xff] %v1290_v35  ;;  %v1292_v36 = vld [vmem:[%s9966_s26 + $0x240] sm:$0xff]  ;;  %v1294_v37 = vld [vmem:[%s9966_s26 + $0x250] sm:$0xff] }
  0x22   : > { %v1296_v38 = vld [vmem:[%s9966_s26 + $0x260] sm:$0xff]  ;;  %1293 = vst [vmem:[%s9971_s27 + $0x120] sm:$0xff] %v1292_v36  ;;  %1295 = vst [vmem:[%s9971_s27 + $0x128] sm:$0xff] %v1294_v37  ;;  %v1298_v39 = vld [vmem:[%s9966_s26 + $0x270] sm:$0xff] }
  0x23   : > { %1297 = vst [vmem:[%s9971_s27 + $0x130] sm:$0xff] %v1296_v38  ;;  %v1300_v40 = vld [vmem:[%s9966_s26 + $0x280] sm:$0xff]  ;;  %v1302_v41 = vld [vmem:[%s9966_s26 + $0x290] sm:$0xff]  ;;  %1299 = vst [vmem:[%s9971_s27 + $0x138] sm:$0xff] %v1298_v39 }
  0x24   : > { %1301 = vst [vmem:[%s9971_s27 + $0x140] sm:$0xff] %v1300_v40  ;;  %1303 = vst [vmem:[%s9971_s27 + $0x148] sm:$0xff] %v1302_v41  ;;  %v1304_v42 = vld [vmem:[%s9966_s26 + $0x2a0] sm:$0xff]  ;;  %v1306_v43 = vld [vmem:[%s9966_s26 + $0x2b0] sm:$0xff] }
  0x25   : > { %v1308_v44 = vld [vmem:[%s9966_s26 + $0x2c0] sm:$0xff]  ;;  %1305 = vst [vmem:[%s9971_s27 + $0x150] sm:$0xff] %v1304_v42  ;;  %1307 = vst [vmem:[%s9971_s27 + $0x158] sm:$0xff] %v1306_v43  ;;  %v1310_v45 = vld [vmem:[%s9966_s26 + $0x2d0] sm:$0xff] }
  0x26   : > { %1309 = vst [vmem:[%s9971_s27 + $0x160] sm:$0xff] %v1308_v44  ;;  %v1312_v46 = vld [vmem:[%s9966_s26 + $0x2e0] sm:$0xff]  ;;  %v1314_v47 = vld [vmem:[%s9966_s26 + $0x2f0] sm:$0xff]  ;;  %1311 = vst [vmem:[%s9971_s27 + $0x168] sm:$0xff] %v1310_v45 }
  0x27   : > { %1313 = vst [vmem:[%s9971_s27 + $0x170] sm:$0xff] %v1312_v46  ;;  %1315 = vst [vmem:[%s9971_s27 + $0x178] sm:$0xff] %v1314_v47  ;;  %v1316_v48 = vld [vmem:[%s9966_s26 + $0x300] sm:$0xff]  ;;  %v1318_v49 = vld [vmem:[%s9966_s26 + $0x310] sm:$0xff] }
  0x28   : > { %v1320_v50 = vld [vmem:[%s9966_s26 + $0x320] sm:$0xff]  ;;  %1317 = vst [vmem:[%s9971_s27 + $0x180] sm:$0xff] %v1316_v48  ;;  %1319 = vst [vmem:[%s9971_s27 + $0x188] sm:$0xff] %v1318_v49  ;;  %v1322_v51 = vld [vmem:[%s9966_s26 + $0x330] sm:$0xff] }
  0x29   : > { %1321 = vst [vmem:[%s9971_s27 + $0x190] sm:$0xff] %v1320_v50  ;;  %v1324_v52 = vld [vmem:[%s9966_s26 + $0x340] sm:$0xff]  ;;  %v1326_v53 = vld [vmem:[%s9966_s26 + $0x350] sm:$0xff]  ;;  %1323 = vst [vmem:[%s9971_s27 + $0x198] sm:$0xff] %v1322_v51 }
  0x2a   : > { %1325 = vst [vmem:[%s9971_s27 + $0x1a0] sm:$0xff] %v1324_v52  ;;  %1327 = vst [vmem:[%s9971_s27 + $0x1a8] sm:$0xff] %v1326_v53  ;;  %v1328_v54 = vld [vmem:[%s9966_s26 + $0x360] sm:$0xff]  ;;  %v1330_v55 = vld [vmem:[%s9966_s26 + $0x370] sm:$0xff] }
  0x2b   : > { %v1332_v56 = vld [vmem:[%s9966_s26 + $0x380] sm:$0xff]  ;;  %1329 = vst [vmem:[%s9971_s27 + $0x1b0] sm:$0xff] %v1328_v54  ;;  %1331 = vst [vmem:[%s9971_s27 + $0x1b8] sm:$0xff] %v1330_v55  ;;  %v1334_v57 = vld [vmem:[%s9966_s26 + $0x390] sm:$0xff] }
  0x2c   : > { %1333 = vst [vmem:[%s9971_s27 + $0x1c0] sm:$0xff] %v1332_v56  ;;  %v1336_v58 = vld [vmem:[%s9966_s26 + $0x3a0] sm:$0xff]  ;;  %v1338_v59 = vld [vmem:[%s9966_s26 + $0x3b0] sm:$0xff]  ;;  %1335 = vst [vmem:[%s9971_s27 + $0x1c8] sm:$0xff] %v1334_v57 }
  0x2d   : > { %1337 = vst [vmem:[%s9971_s27 + $0x1d0] sm:$0xff] %v1336_v58  ;;  %1339 = vst [vmem:[%s9971_s27 + $0x1d8] sm:$0xff] %v1338_v59  ;;  %v1340_v60 = vld [vmem:[%s9966_s26 + $0x3c0] sm:$0xff]  ;;  %v1342_v61 = vld [vmem:[%s9966_s26 + $0x3d0] sm:$0xff] }
  0x2e   : > { %v1344_v62 = vld [vmem:[%s9966_s26 + $0x3e0] sm:$0xff]  ;;  %1341 = vst [vmem:[%s9971_s27 + $0x1e0] sm:$0xff] %v1340_v60  ;;  %1343 = vst [vmem:[%s9971_s27 + $0x1e8] sm:$0xff] %v1342_v61  ;;  %v1346_v63 = vld [vmem:[%s9966_s26 + $0x3f0] sm:$0xff] }
  0x2f   : > { %1345 = vst [vmem:[%s9971_s27 + $0x1f0] sm:$0xff] %v1344_v62  ;;  %v1348_v0 = vld [vmem:[%s9966_s26 + $0x400] sm:$0xff]  ;;  %v1350_v1 = vld [vmem:[%s9966_s26 + $0x410] sm:$0xff]  ;;  %1347 = vst [vmem:[%s9971_s27 + $0x1f8] sm:$0xff] %v1346_v63 }
  0x30   : > { %1349 = vst [vmem:[%s9971_s27 + $0x200] sm:$0xff] %v1348_v0  ;;  %1351 = vst [vmem:[%s9971_s27 + $0x208] sm:$0xff] %v1350_v1  ;;  %v1352_v2 = vld [vmem:[%s9966_s26 + $0x420] sm:$0xff]  ;;  %v1354_v3 = vld [vmem:[%s9966_s26 + $0x430] sm:$0xff] }
  0x31   : > { %v1356_v4 = vld [vmem:[%s9966_s26 + $0x440] sm:$0xff]  ;;  %1353 = vst [vmem:[%s9971_s27 + $0x210] sm:$0xff] %v1352_v2  ;;  %1355 = vst [vmem:[%s9971_s27 + $0x218] sm:$0xff] %v1354_v3  ;;  %v1358_v5 = vld [vmem:[%s9966_s26 + $0x450] sm:$0xff] }
  0x32   : > { %1357 = vst [vmem:[%s9971_s27 + $0x220] sm:$0xff] %v1356_v4  ;;  %v1360_v6 = vld [vmem:[%s9966_s26 + $0x460] sm:$0xff]  ;;  %v1362_v7 = vld [vmem:[%s9966_s26 + $0x470] sm:$0xff]  ;;  %1359 = vst [vmem:[%s9971_s27 + $0x228] sm:$0xff] %v1358_v5 }
  0x33   : > { %1361 = vst [vmem:[%s9971_s27 + $0x230] sm:$0xff] %v1360_v6  ;;  %1363 = vst [vmem:[%s9971_s27 + $0x238] sm:$0xff] %v1362_v7  ;;  %v1364_v8 = vld [vmem:[%s9966_s26 + $0x480] sm:$0xff]  ;;  %v1366_v9 = vld [vmem:[%s9966_s26 + $0x490] sm:$0xff] }
  0x34   : > { %v1368_v10 = vld [vmem:[%s9966_s26 + $0x4a0] sm:$0xff]  ;;  %1365 = vst [vmem:[%s9971_s27 + $0x240] sm:$0xff] %v1364_v8  ;;  %1367 = vst [vmem:[%s9971_s27 + $0x248] sm:$0xff] %v1366_v9  ;;  %v1370_v11 = vld [vmem:[%s9966_s26 + $0x4b0] sm:$0xff] }
  0x35   : > { %1369 = vst [vmem:[%s9971_s27 + $0x250] sm:$0xff] %v1368_v10  ;;  %v1372_v12 = vld [vmem:[%s9966_s26 + $0x4c0] sm:$0xff]  ;;  %v1374_v13 = vld [vmem:[%s9966_s26 + $0x4d0] sm:$0xff]  ;;  %1371 = vst [vmem:[%s9971_s27 + $0x258] sm:$0xff] %v1370_v11 }
  0x36   : > { %1373 = vst [vmem:[%s9971_s27 + $0x260] sm:$0xff] %v1372_v12  ;;  %1375 = vst [vmem:[%s9971_s27 + $0x268] sm:$0xff] %v1374_v13  ;;  %v1376_v14 = vld [vmem:[%s9966_s26 + $0x4e0] sm:$0xff]  ;;  %v1378_v15 = vld [vmem:[%s9966_s26 + $0x4f0] sm:$0xff] }
  0x37   : > { %v1380_v16 = vld [vmem:[%s9966_s26 + $0x500] sm:$0xff]  ;;  %1377 = vst [vmem:[%s9971_s27 + $0x270] sm:$0xff] %v1376_v14  ;;  %1379 = vst [vmem:[%s9971_s27 + $0x278] sm:$0xff] %v1378_v15  ;;  %v1382_v17 = vld [vmem:[%s9966_s26 + $0x510] sm:$0xff] }
  0x38   : > { %1381 = vst [vmem:[%s9971_s27 + $0x280] sm:$0xff] %v1380_v16  ;;  %v1384_v18 = vld [vmem:[%s9966_s26 + $0x520] sm:$0xff]  ;;  %v1386_v19 = vld [vmem:[%s9966_s26 + $0x530] sm:$0xff]  ;;  %1383 = vst [vmem:[%s9971_s27 + $0x288] sm:$0xff] %v1382_v17 }
  0x39   : > { %1385 = vst [vmem:[%s9971_s27 + $0x290] sm:$0xff] %v1384_v18  ;;  %1387 = vst [vmem:[%s9971_s27 + $0x298] sm:$0xff] %v1386_v19  ;;  %v1388_v20 = vld [vmem:[%s9966_s26 + $0x540] sm:$0xff]  ;;  %v1390_v21 = vld [vmem:[%s9966_s26 + $0x550] sm:$0xff] }
  0x3a   : > { %v1392_v22 = vld [vmem:[%s9966_s26 + $0x560] sm:$0xff]  ;;  %1389 = vst [vmem:[%s9971_s27 + $0x2a0] sm:$0xff] %v1388_v20  ;;  %1391 = vst [vmem:[%s9971_s27 + $0x2a8] sm:$0xff] %v1390_v21  ;;  %v1394_v23 = vld [vmem:[%s9966_s26 + $0x570] sm:$0xff] }
  0x3b   : > { %1393 = vst [vmem:[%s9971_s27 + $0x2b0] sm:$0xff] %v1392_v22  ;;  %v1396_v24 = vld [vmem:[%s9966_s26 + $0x580] sm:$0xff]  ;;  %v1398_v25 = vld [vmem:[%s9966_s26 + $0x590] sm:$0xff]  ;;  %1395 = vst [vmem:[%s9971_s27 + $0x2b8] sm:$0xff] %v1394_v23 }
  0x3c   : > { %1397 = vst [vmem:[%s9971_s27 + $0x2c0] sm:$0xff] %v1396_v24  ;;  %1399 = vst [vmem:[%s9971_s27 + $0x2c8] sm:$0xff] %v1398_v25  ;;  %v1400_v26 = vld [vmem:[%s9966_s26 + $0x5a0] sm:$0xff]  ;;  %v1402_v27 = vld [vmem:[%s9966_s26 + $0x5b0] sm:$0xff] }
  0x3d   : > { %v1404_v28 = vld [vmem:[%s9966_s26 + $0x5c0] sm:$0xff]  ;;  %1401 = vst [vmem:[%s9971_s27 + $0x2d0] sm:$0xff] %v1400_v26  ;;  %1403 = vst [vmem:[%s9971_s27 + $0x2d8] sm:$0xff] %v1402_v27  ;;  %v1406_v29 = vld [vmem:[%s9966_s26 + $0x5d0] sm:$0xff] }
  0x3e   : > { %1405 = vst [vmem:[%s9971_s27 + $0x2e0] sm:$0xff] %v1404_v28  ;;  %v1408_v30 = vld [vmem:[%s9966_s26 + $0x5e0] sm:$0xff]  ;;  %v1410_v31 = vld [vmem:[%s9966_s26 + $0x5f0] sm:$0xff]  ;;  %1407 = vst [vmem:[%s9971_s27 + $0x2e8] sm:$0xff] %v1406_v29 }
  0x3f   : > { %1409 = vst [vmem:[%s9971_s27 + $0x2f0] sm:$0xff] %v1408_v30  ;;  %1411 = vst [vmem:[%s9971_s27 + $0x2f8] sm:$0xff] %v1410_v31  ;;  %v1412_v32 = vld [vmem:[%s9966_s26 + $0x600] sm:$0xff]  ;;  %v1414_v33 = vld [vmem:[%s9966_s26 + $0x610] sm:$0xff] }
  0x40   : > { %v1416_v34 = vld [vmem:[%s9966_s26 + $0x620] sm:$0xff]  ;;  %1413 = vst [vmem:[%s9971_s27 + $0x300] sm:$0xff] %v1412_v32  ;;  %1415 = vst [vmem:[%s9971_s27 + $0x308] sm:$0xff] %v1414_v33  ;;  %v1418_v35 = vld [vmem:[%s9966_s26 + $0x630] sm:$0xff] }
  0x41   : > { %1417 = vst [vmem:[%s9971_s27 + $0x310] sm:$0xff] %v1416_v34  ;;  %v1420_v36 = vld [vmem:[%s9966_s26 + $0x640] sm:$0xff]  ;;  %v1422_v37 = vld [vmem:[%s9966_s26 + $0x650] sm:$0xff]  ;;  %1419 = vst [vmem:[%s9971_s27 + $0x318] sm:$0xff] %v1418_v35 }
  0x42   : > { %1421 = vst [vmem:[%s9971_s27 + $0x320] sm:$0xff] %v1420_v36  ;;  %1423 = vst [vmem:[%s9971_s27 + $0x328] sm:$0xff] %v1422_v37  ;;  %v1424_v38 = vld [vmem:[%s9966_s26 + $0x660] sm:$0xff]  ;;  %v1426_v39 = vld [vmem:[%s9966_s26 + $0x670] sm:$0xff] }
  0x43   : > { %v1428_v40 = vld [vmem:[%s9966_s26 + $0x680] sm:$0xff]  ;;  %1425 = vst [vmem:[%s9971_s27 + $0x330] sm:$0xff] %v1424_v38  ;;  %1427 = vst [vmem:[%s9971_s27 + $0x338] sm:$0xff] %v1426_v39  ;;  %v1430_v41 = vld [vmem:[%s9966_s26 + $0x690] sm:$0xff] }
  0x44   : > { %1429 = vst [vmem:[%s9971_s27 + $0x340] sm:$0xff] %v1428_v40  ;;  %v1432_v42 = vld [vmem:[%s9966_s26 + $0x6a0] sm:$0xff]  ;;  %v1434_v43 = vld [vmem:[%s9966_s26 + $0x6b0] sm:$0xff]  ;;  %1431 = vst [vmem:[%s9971_s27 + $0x348] sm:$0xff] %v1430_v41 }
  0x45   : > { %1433 = vst [vmem:[%s9971_s27 + $0x350] sm:$0xff] %v1432_v42  ;;  %1435 = vst [vmem:[%s9971_s27 + $0x358] sm:$0xff] %v1434_v43  ;;  %v1436_v44 = vld [vmem:[%s9966_s26 + $0x6c0] sm:$0xff]  ;;  %v1438_v45 = vld [vmem:[%s9966_s26 + $0x6d0] sm:$0xff] }
  0x46   : > { %v1440_v46 = vld [vmem:[%s9966_s26 + $0x6e0] sm:$0xff]  ;;  %1437 = vst [vmem:[%s9971_s27 + $0x360] sm:$0xff] %v1436_v44  ;;  %1439 = vst [vmem:[%s9971_s27 + $0x368] sm:$0xff] %v1438_v45  ;;  %v1442_v47 = vld [vmem:[%s9966_s26 + $0x6f0] sm:$0xff] }
  0x47   : > { %1441 = vst [vmem:[%s9971_s27 + $0x370] sm:$0xff] %v1440_v46  ;;  %v1444_v48 = vld [vmem:[%s9966_s26 + $0x700] sm:$0xff]  ;;  %v1446_v49 = vld [vmem:[%s9966_s26 + $0x710] sm:$0xff]  ;;  %1443 = vst [vmem:[%s9971_s27 + $0x378] sm:$0xff] %v1442_v47 }
  0x48   : > { %1445 = vst [vmem:[%s9971_s27 + $0x380] sm:$0xff] %v1444_v48  ;;  %1447 = vst [vmem:[%s9971_s27 + $0x388] sm:$0xff] %v1446_v49  ;;  %v1448_v50 = vld [vmem:[%s9966_s26 + $0x720] sm:$0xff]  ;;  %v1450_v51 = vld [vmem:[%s9966_s26 + $0x730] sm:$0xff] }
  0x49   : > { %v1452_v52 = vld [vmem:[%s9966_s26 + $0x740] sm:$0xff]  ;;  %1449 = vst [vmem:[%s9971_s27 + $0x390] sm:$0xff] %v1448_v50  ;;  %1451 = vst [vmem:[%s9971_s27 + $0x398] sm:$0xff] %v1450_v51  ;;  %v1454_v53 = vld [vmem:[%s9966_s26 + $0x750] sm:$0xff] }
  0x4a   : > { %1453 = vst [vmem:[%s9971_s27 + $0x3a0] sm:$0xff] %v1452_v52  ;;  %v1456_v54 = vld [vmem:[%s9966_s26 + $0x760] sm:$0xff]  ;;  %v1458_v55 = vld [vmem:[%s9966_s26 + $0x770] sm:$0xff]  ;;  %1455 = vst [vmem:[%s9971_s27 + $0x3a8] sm:$0xff] %v1454_v53 }
  0x4b   : > { %1457 = vst [vmem:[%s9971_s27 + $0x3b0] sm:$0xff] %v1456_v54  ;;  %1459 = vst [vmem:[%s9971_s27 + $0x3b8] sm:$0xff] %v1458_v55  ;;  %v1460_v56 = vld [vmem:[%s9966_s26 + $0x780] sm:$0xff]  ;;  %v1462_v57 = vld [vmem:[%s9966_s26 + $0x790] sm:$0xff] }
  0x4c   : > { %v1464_v58 = vld [vmem:[%s9966_s26 + $0x7a0] sm:$0xff]  ;;  %1461 = vst [vmem:[%s9971_s27 + $0x3c0] sm:$0xff] %v1460_v56  ;;  %1463 = vst [vmem:[%s9971_s27 + $0x3c8] sm:$0xff] %v1462_v57  ;;  %v1466_v59 = vld [vmem:[%s9966_s26 + $0x7b0] sm:$0xff] }
  0x4d   : > { %1465 = vst [vmem:[%s9971_s27 + $0x3d0] sm:$0xff] %v1464_v58  ;;  %v1468_v60 = vld [vmem:[%s9966_s26 + $0x7c0] sm:$0xff]  ;;  %v1470_v61 = vld [vmem:[%s9966_s26 + $0x7d0] sm:$0xff]  ;;  %1467 = vst [vmem:[%s9971_s27 + $0x3d8] sm:$0xff] %v1466_v59 }
  0x4e   : > { %1469 = vst [vmem:[%s9971_s27 + $0x3e0] sm:$0xff] %v1468_v60  ;;  %1471 = vst [vmem:[%s9971_s27 + $0x3e8] sm:$0xff] %v1470_v61  ;;  %v1472_v62 = vld [vmem:[%s9966_s26 + $0x7e0] sm:$0xff]  ;;  %v1474_v63 = vld [vmem:[%s9966_s26 + $0x7f0] sm:$0xff] }
  0x4f   : > { %v1476_v0 = vld [vmem:[%s9966_s26 + $0x800] sm:$0xff]  ;;  %1473 = vst [vmem:[%s9971_s27 + $0x3f0] sm:$0xff] %v1472_v62  ;;  %1475 = vst [vmem:[%s9971_s27 + $0x3f8] sm:$0xff] %v1474_v63  ;;  %v1478_v1 = vld [vmem:[%s9966_s26 + $0x810] sm:$0xff] }
  0x50   : > { %1477 = vst [vmem:[%s9971_s27 + $0x400] sm:$0xff] %v1476_v0  ;;  %v1480_v2 = vld [vmem:[%s9966_s26 + $0x820] sm:$0xff]  ;;  %v1482_v3 = vld [vmem:[%s9966_s26 + $0x830] sm:$0xff]  ;;  %1479 = vst [vmem:[%s9971_s27 + $0x408] sm:$0xff] %v1478_v1 }
  0x51   : > { %1481 = vst [vmem:[%s9971_s27 + $0x410] sm:$0xff] %v1480_v2  ;;  %1483 = vst [vmem:[%s9971_s27 + $0x418] sm:$0xff] %v1482_v3  ;;  %v1484_v4 = vld [vmem:[%s9966_s26 + $0x840] sm:$0xff]  ;;  %v1486_v5 = vld [vmem:[%s9966_s26 + $0x850] sm:$0xff] }
  0x52   : > { %v1488_v6 = vld [vmem:[%s9966_s26 + $0x860] sm:$0xff]  ;;  %1485 = vst [vmem:[%s9971_s27 + $0x420] sm:$0xff] %v1484_v4  ;;  %1487 = vst [vmem:[%s9971_s27 + $0x428] sm:$0xff] %v1486_v5  ;;  %v1490_v7 = vld [vmem:[%s9966_s26 + $0x870] sm:$0xff] }
  0x53   : > { %1489 = vst [vmem:[%s9971_s27 + $0x430] sm:$0xff] %v1488_v6  ;;  %v1492_v8 = vld [vmem:[%s9966_s26 + $0x880] sm:$0xff]  ;;  %v1494_v9 = vld [vmem:[%s9966_s26 + $0x890] sm:$0xff]  ;;  %1491 = vst [vmem:[%s9971_s27 + $0x438] sm:$0xff] %v1490_v7 }
  0x54   : > { %1493 = vst [vmem:[%s9971_s27 + $0x440] sm:$0xff] %v1492_v8  ;;  %1495 = vst [vmem:[%s9971_s27 + $0x448] sm:$0xff] %v1494_v9  ;;  %v1496_v10 = vld [vmem:[%s9966_s26 + $0x8a0] sm:$0xff]  ;;  %v1498_v11 = vld [vmem:[%s9966_s26 + $0x8b0] sm:$0xff] }
  0x55   : > { %v1500_v12 = vld [vmem:[%s9966_s26 + $0x8c0] sm:$0xff]  ;;  %1497 = vst [vmem:[%s9971_s27 + $0x450] sm:$0xff] %v1496_v10  ;;  %1499 = vst [vmem:[%s9971_s27 + $0x458] sm:$0xff] %v1498_v11  ;;  %v1502_v13 = vld [vmem:[%s9966_s26 + $0x8d0] sm:$0xff] }
  0x56   : > { %1501 = vst [vmem:[%s9971_s27 + $0x460] sm:$0xff] %v1500_v12  ;;  %v1504_v14 = vld [vmem:[%s9966_s26 + $0x8e0] sm:$0xff]  ;;  %v1506_v15 = vld [vmem:[%s9966_s26 + $0x8f0] sm:$0xff]  ;;  %1503 = vst [vmem:[%s9971_s27 + $0x468] sm:$0xff] %v1502_v13 }
  0x57   : > { %1505 = vst [vmem:[%s9971_s27 + $0x470] sm:$0xff] %v1504_v14  ;;  %1507 = vst [vmem:[%s9971_s27 + $0x478] sm:$0xff] %v1506_v15  ;;  %v1508_v16 = vld [vmem:[%s9966_s26 + $0x900] sm:$0xff]  ;;  %v1510_v17 = vld [vmem:[%s9966_s26 + $0x910] sm:$0xff] }
  0x58   : > { %v1512_v18 = vld [vmem:[%s9966_s26 + $0x920] sm:$0xff]  ;;  %1509 = vst [vmem:[%s9971_s27 + $0x480] sm:$0xff] %v1508_v16  ;;  %1511 = vst [vmem:[%s9971_s27 + $0x488] sm:$0xff] %v1510_v17  ;;  %v1514_v19 = vld [vmem:[%s9966_s26 + $0x930] sm:$0xff] }
  0x59   : > { %1513 = vst [vmem:[%s9971_s27 + $0x490] sm:$0xff] %v1512_v18  ;;  %v1516_v20 = vld [vmem:[%s9966_s26 + $0x940] sm:$0xff]  ;;  %v1518_v21 = vld [vmem:[%s9966_s26 + $0x950] sm:$0xff]  ;;  %1515 = vst [vmem:[%s9971_s27 + $0x498] sm:$0xff] %v1514_v19 }
  0x5a   : > { %1517 = vst [vmem:[%s9971_s27 + $0x4a0] sm:$0xff] %v1516_v20  ;;  %1519 = vst [vmem:[%s9971_s27 + $0x4a8] sm:$0xff] %v1518_v21  ;;  %v1520_v22 = vld [vmem:[%s9966_s26 + $0x960] sm:$0xff]  ;;  %v1522_v23 = vld [vmem:[%s9966_s26 + $0x970] sm:$0xff] }
  0x5b   : > { %v1524_v24 = vld [vmem:[%s9966_s26 + $0x980] sm:$0xff]  ;;  %1521 = vst [vmem:[%s9971_s27 + $0x4b0] sm:$0xff] %v1520_v22  ;;  %1523 = vst [vmem:[%s9971_s27 + $0x4b8] sm:$0xff] %v1522_v23  ;;  %v1526_v25 = vld [vmem:[%s9966_s26 + $0x990] sm:$0xff] }
  0x5c   : > { %1525 = vst [vmem:[%s9971_s27 + $0x4c0] sm:$0xff] %v1524_v24  ;;  %v1528_v26 = vld [vmem:[%s9966_s26 + $0x9a0] sm:$0xff]  ;;  %v1530_v27 = vld [vmem:[%s9966_s26 + $0x9b0] sm:$0xff]  ;;  %1527 = vst [vmem:[%s9971_s27 + $0x4c8] sm:$0xff] %v1526_v25 }
  0x5d   : > { %1529 = vst [vmem:[%s9971_s27 + $0x4d0] sm:$0xff] %v1528_v26  ;;  %1531 = vst [vmem:[%s9971_s27 + $0x4d8] sm:$0xff] %v1530_v27  ;;  %v1532_v28 = vld [vmem:[%s9966_s26 + $0x9c0] sm:$0xff]  ;;  %v1534_v29 = vld [vmem:[%s9966_s26 + $0x9d0] sm:$0xff] }
  0x5e   : > { %v1536_v30 = vld [vmem:[%s9966_s26 + $0x9e0] sm:$0xff]  ;;  %1533 = vst [vmem:[%s9971_s27 + $0x4e0] sm:$0xff] %v1532_v28  ;;  %1535 = vst [vmem:[%s9971_s27 + $0x4e8] sm:$0xff] %v1534_v29  ;;  %v1538_v31 = vld [vmem:[%s9966_s26 + $0x9f0] sm:$0xff] }
  0x5f   : > { %1537 = vst [vmem:[%s9971_s27 + $0x4f0] sm:$0xff] %v1536_v30  ;;  %v1540_v32 = vld [vmem:[%s9966_s26 + $0xa00] sm:$0xff]  ;;  %v1542_v33 = vld [vmem:[%s9966_s26 + $0xa10] sm:$0xff]  ;;  %1539 = vst [vmem:[%s9971_s27 + $0x4f8] sm:$0xff] %v1538_v31 }
  0x60   : > { %1541 = vst [vmem:[%s9971_s27 + $0x500] sm:$0xff] %v1540_v32  ;;  %1543 = vst [vmem:[%s9971_s27 + $0x508] sm:$0xff] %v1542_v33  ;;  %v1544_v34 = vld [vmem:[%s9966_s26 + $0xa20] sm:$0xff]  ;;  %v1546_v35 = vld [vmem:[%s9966_s26 + $0xa30] sm:$0xff] }
  0x61   : > { %v1548_v36 = vld [vmem:[%s9966_s26 + $0xa40] sm:$0xff]  ;;  %1545 = vst [vmem:[%s9971_s27 + $0x510] sm:$0xff] %v1544_v34  ;;  %1547 = vst [vmem:[%s9971_s27 + $0x518] sm:$0xff] %v1546_v35  ;;  %v1550_v37 = vld [vmem:[%s9966_s26 + $0xa50] sm:$0xff] }
  0x62   : > { %1549 = vst [vmem:[%s9971_s27 + $0x520] sm:$0xff] %v1548_v36  ;;  %v1552_v38 = vld [vmem:[%s9966_s26 + $0xa60] sm:$0xff]  ;;  %v1554_v39 = vld [vmem:[%s9966_s26 + $0xa70] sm:$0xff]  ;;  %1551 = vst [vmem:[%s9971_s27 + $0x528] sm:$0xff] %v1550_v37 }
  0x63   : > { %1553 = vst [vmem:[%s9971_s27 + $0x530] sm:$0xff] %v1552_v38  ;;  %1555 = vst [vmem:[%s9971_s27 + $0x538] sm:$0xff] %v1554_v39  ;;  %v1556_v40 = vld [vmem:[%s9966_s26 + $0xa80] sm:$0xff]  ;;  %v1558_v41 = vld [vmem:[%s9966_s26 + $0xa90] sm:$0xff] }
  0x64   : > { %v1560_v42 = vld [vmem:[%s9966_s26 + $0xaa0] sm:$0xff]  ;;  %1557 = vst [vmem:[%s9971_s27 + $0x540] sm:$0xff] %v1556_v40  ;;  %1559 = vst [vmem:[%s9971_s27 + $0x548] sm:$0xff] %v1558_v41  ;;  %v1562_v43 = vld [vmem:[%s9966_s26 + $0xab0] sm:$0xff] }
  0x65   : > { %1561 = vst [vmem:[%s9971_s27 + $0x550] sm:$0xff] %v1560_v42  ;;  %v1564_v44 = vld [vmem:[%s9966_s26 + $0xac0] sm:$0xff]  ;;  %v1566_v45 = vld [vmem:[%s9966_s26 + $0xad0] sm:$0xff]  ;;  %1563 = vst [vmem:[%s9971_s27 + $0x558] sm:$0xff] %v1562_v43 }
  0x66   : > { %1565 = vst [vmem:[%s9971_s27 + $0x560] sm:$0xff] %v1564_v44  ;;  %1567 = vst [vmem:[%s9971_s27 + $0x568] sm:$0xff] %v1566_v45  ;;  %v1568_v46 = vld [vmem:[%s9966_s26 + $0xae0] sm:$0xff]  ;;  %v1570_v47 = vld [vmem:[%s9966_s26 + $0xaf0] sm:$0xff] }
  0x67   : > { %v1572_v48 = vld [vmem:[%s9966_s26 + $0xb00] sm:$0xff]  ;;  %1569 = vst [vmem:[%s9971_s27 + $0x570] sm:$0xff] %v1568_v46  ;;  %1571 = vst [vmem:[%s9971_s27 + $0x578] sm:$0xff] %v1570_v47  ;;  %v1574_v49 = vld [vmem:[%s9966_s26 + $0xb10] sm:$0xff] }
  0x68   : > { %1573 = vst [vmem:[%s9971_s27 + $0x580] sm:$0xff] %v1572_v48  ;;  %v1576_v50 = vld [vmem:[%s9966_s26 + $0xb20] sm:$0xff]  ;;  %v1578_v51 = vld [vmem:[%s9966_s26 + $0xb30] sm:$0xff]  ;;  %1575 = vst [vmem:[%s9971_s27 + $0x588] sm:$0xff] %v1574_v49 }
  0x69   : > { %1577 = vst [vmem:[%s9971_s27 + $0x590] sm:$0xff] %v1576_v50  ;;  %1579 = vst [vmem:[%s9971_s27 + $0x598] sm:$0xff] %v1578_v51  ;;  %v1580_v52 = vld [vmem:[%s9966_s26 + $0xb40] sm:$0xff]  ;;  %v1582_v53 = vld [vmem:[%s9966_s26 + $0xb50] sm:$0xff] }
  0x6a   : > { %v1584_v54 = vld [vmem:[%s9966_s26 + $0xb60] sm:$0xff]  ;;  %1581 = vst [vmem:[%s9971_s27 + $0x5a0] sm:$0xff] %v1580_v52  ;;  %1583 = vst [vmem:[%s9971_s27 + $0x5a8] sm:$0xff] %v1582_v53  ;;  %v1586_v55 = vld [vmem:[%s9966_s26 + $0xb70] sm:$0xff] }
  0x6b   : > { %1585 = vst [vmem:[%s9971_s27 + $0x5b0] sm:$0xff] %v1584_v54  ;;  %v1588_v56 = vld [vmem:[%s9966_s26 + $0xb80] sm:$0xff]  ;;  %v1590_v57 = vld [vmem:[%s9966_s26 + $0xb90] sm:$0xff]  ;;  %1587 = vst [vmem:[%s9971_s27 + $0x5b8] sm:$0xff] %v1586_v55 }
  0x6c   : > { %1589 = vst [vmem:[%s9971_s27 + $0x5c0] sm:$0xff] %v1588_v56  ;;  %1591 = vst [vmem:[%s9971_s27 + $0x5c8] sm:$0xff] %v1590_v57  ;;  %v1592_v58 = vld [vmem:[%s9966_s26 + $0xba0] sm:$0xff]  ;;  %v1594_v59 = vld [vmem:[%s9966_s26 + $0xbb0] sm:$0xff] }
  0x6d   : > { %v1596_v60 = vld [vmem:[%s9966_s26 + $0xbc0] sm:$0xff]  ;;  %1593 = vst [vmem:[%s9971_s27 + $0x5d0] sm:$0xff] %v1592_v58  ;;  %1595 = vst [vmem:[%s9971_s27 + $0x5d8] sm:$0xff] %v1594_v59  ;;  %v1598_v61 = vld [vmem:[%s9966_s26 + $0xbd0] sm:$0xff] }
  0x6e   : > { %1597 = vst [vmem:[%s9971_s27 + $0x5e0] sm:$0xff] %v1596_v60  ;;  %v1600_v62 = vld [vmem:[%s9966_s26 + $0xbe0] sm:$0xff]  ;;  %v1602_v63 = vld [vmem:[%s9966_s26 + $0xbf0] sm:$0xff]  ;;  %1599 = vst [vmem:[%s9971_s27 + $0x5e8] sm:$0xff] %v1598_v61 }
  0x6f   : > { %1601 = vst [vmem:[%s9971_s27 + $0x5f0] sm:$0xff] %v1600_v62  ;;  %1603 = vst [vmem:[%s9971_s27 + $0x5f8] sm:$0xff] %v1602_v63  ;;  %v1604_v0 = vld [vmem:[%s9966_s26 + $0xc00] sm:$0xff]  ;;  %v1606_v1 = vld [vmem:[%s9966_s26 + $0xc10] sm:$0xff] }
  0x70   : > { %v1608_v2 = vld [vmem:[%s9966_s26 + $0xc20] sm:$0xff]  ;;  %1605 = vst [vmem:[%s9971_s27 + $0x600] sm:$0xff] %v1604_v0  ;;  %1607 = vst [vmem:[%s9971_s27 + $0x608] sm:$0xff] %v1606_v1  ;;  %v1610_v3 = vld [vmem:[%s9966_s26 + $0xc30] sm:$0xff] }
  0x71   : > { %1609 = vst [vmem:[%s9971_s27 + $0x610] sm:$0xff] %v1608_v2  ;;  %v1612_v4 = vld [vmem:[%s9966_s26 + $0xc40] sm:$0xff]  ;;  %v1614_v5 = vld [vmem:[%s9966_s26 + $0xc50] sm:$0xff]  ;;  %1611 = vst [vmem:[%s9971_s27 + $0x618] sm:$0xff] %v1610_v3 }
  0x72   : > { %1613 = vst [vmem:[%s9971_s27 + $0x620] sm:$0xff] %v1612_v4  ;;  %1615 = vst [vmem:[%s9971_s27 + $0x628] sm:$0xff] %v1614_v5  ;;  %v1616_v6 = vld [vmem:[%s9966_s26 + $0xc60] sm:$0xff]  ;;  %v1618_v7 = vld [vmem:[%s9966_s26 + $0xc70] sm:$0xff] }
  0x73   : > { %v1620_v8 = vld [vmem:[%s9966_s26 + $0xc80] sm:$0xff]  ;;  %1617 = vst [vmem:[%s9971_s27 + $0x630] sm:$0xff] %v1616_v6  ;;  %1619 = vst [vmem:[%s9971_s27 + $0x638] sm:$0xff] %v1618_v7  ;;  %v1622_v9 = vld [vmem:[%s9966_s26 + $0xc90] sm:$0xff] }
  0x74   : > { %1621 = vst [vmem:[%s9971_s27 + $0x640] sm:$0xff] %v1620_v8  ;;  %v1624_v10 = vld [vmem:[%s9966_s26 + $0xca0] sm:$0xff]  ;;  %v1626_v11 = vld [vmem:[%s9966_s26 + $0xcb0] sm:$0xff]  ;;  %1623 = vst [vmem:[%s9971_s27 + $0x648] sm:$0xff] %v1622_v9 }
  0x75   : > { %1625 = vst [vmem:[%s9971_s27 + $0x650] sm:$0xff] %v1624_v10  ;;  %1627 = vst [vmem:[%s9971_s27 + $0x658] sm:$0xff] %v1626_v11  ;;  %v1628_v12 = vld [vmem:[%s9966_s26 + $0xcc0] sm:$0xff]  ;;  %v1630_v13 = vld [vmem:[%s9966_s26 + $0xcd0] sm:$0xff] }
  0x76   : > { %v1632_v14 = vld [vmem:[%s9966_s26 + $0xce0] sm:$0xff]  ;;  %1629 = vst [vmem:[%s9971_s27 + $0x660] sm:$0xff] %v1628_v12  ;;  %1631 = vst [vmem:[%s9971_s27 + $0x668] sm:$0xff] %v1630_v13  ;;  %v1634_v15 = vld [vmem:[%s9966_s26 + $0xcf0] sm:$0xff] }
  0x77   : > { %1633 = vst [vmem:[%s9971_s27 + $0x670] sm:$0xff] %v1632_v14  ;;  %v1636_v16 = vld [vmem:[%s9966_s26 + $0xd00] sm:$0xff]  ;;  %v1638_v17 = vld [vmem:[%s9966_s26 + $0xd10] sm:$0xff]  ;;  %1635 = vst [vmem:[%s9971_s27 + $0x678] sm:$0xff] %v1634_v15 }
  0x78   : > { %1637 = vst [vmem:[%s9971_s27 + $0x680] sm:$0xff] %v1636_v16  ;;  %1639 = vst [vmem:[%s9971_s27 + $0x688] sm:$0xff] %v1638_v17  ;;  %v1640_v18 = vld [vmem:[%s9966_s26 + $0xd20] sm:$0xff]  ;;  %v1642_v19 = vld [vmem:[%s9966_s26 + $0xd30] sm:$0xff] }
  0x79   : > { %v1644_v20 = vld [vmem:[%s9966_s26 + $0xd40] sm:$0xff]  ;;  %1641 = vst [vmem:[%s9971_s27 + $0x690] sm:$0xff] %v1640_v18  ;;  %1643 = vst [vmem:[%s9971_s27 + $0x698] sm:$0xff] %v1642_v19  ;;  %v1646_v21 = vld [vmem:[%s9966_s26 + $0xd50] sm:$0xff] }
  0x7a   : > { %1645 = vst [vmem:[%s9971_s27 + $0x6a0] sm:$0xff] %v1644_v20  ;;  %v1648_v22 = vld [vmem:[%s9966_s26 + $0xd60] sm:$0xff]  ;;  %v1650_v23 = vld [vmem:[%s9966_s26 + $0xd70] sm:$0xff]  ;;  %1647 = vst [vmem:[%s9971_s27 + $0x6a8] sm:$0xff] %v1646_v21 }
  0x7b   : > { %1649 = vst [vmem:[%s9971_s27 + $0x6b0] sm:$0xff] %v1648_v22  ;;  %1651 = vst [vmem:[%s9971_s27 + $0x6b8] sm:$0xff] %v1650_v23  ;;  %v1652_v24 = vld [vmem:[%s9966_s26 + $0xd80] sm:$0xff]  ;;  %v1654_v25 = vld [vmem:[%s9966_s26 + $0xd90] sm:$0xff] }
  0x7c   : > { %v1656_v26 = vld [vmem:[%s9966_s26 + $0xda0] sm:$0xff]  ;;  %1653 = vst [vmem:[%s9971_s27 + $0x6c0] sm:$0xff] %v1652_v24  ;;  %1655 = vst [vmem:[%s9971_s27 + $0x6c8] sm:$0xff] %v1654_v25  ;;  %v1658_v27 = vld [vmem:[%s9966_s26 + $0xdb0] sm:$0xff] }
  0x7d   : > { %1657 = vst [vmem:[%s9971_s27 + $0x6d0] sm:$0xff] %v1656_v26  ;;  %v1660_v28 = vld [vmem:[%s9966_s26 + $0xdc0] sm:$0xff]  ;;  %v1662_v29 = vld [vmem:[%s9966_s26 + $0xdd0] sm:$0xff]  ;;  %1659 = vst [vmem:[%s9971_s27 + $0x6d8] sm:$0xff] %v1658_v27 }
  0x7e   : > { %1661 = vst [vmem:[%s9971_s27 + $0x6e0] sm:$0xff] %v1660_v28  ;;  %1663 = vst [vmem:[%s9971_s27 + $0x6e8] sm:$0xff] %v1662_v29  ;;  %v1664_v30 = vld [vmem:[%s9966_s26 + $0xde0] sm:$0xff]  ;;  %v1666_v31 = vld [vmem:[%s9966_s26 + $0xdf0] sm:$0xff] }
  0x7f   : > { %v1668_v32 = vld [vmem:[%s9966_s26 + $0xe00] sm:$0xff]  ;;  %1665 = vst [vmem:[%s9971_s27 + $0x6f0] sm:$0xff] %v1664_v30  ;;  %1667 = vst [vmem:[%s9971_s27 + $0x6f8] sm:$0xff] %v1666_v31  ;;  %v1670_v33 = vld [vmem:[%s9966_s26 + $0xe10] sm:$0xff] }
  0x80   : > { %1669 = vst [vmem:[%s9971_s27 + $0x700] sm:$0xff] %v1668_v32  ;;  %v1672_v34 = vld [vmem:[%s9966_s26 + $0xe20] sm:$0xff]  ;;  %v1674_v35 = vld [vmem:[%s9966_s26 + $0xe30] sm:$0xff]  ;;  %1671 = vst [vmem:[%s9971_s27 + $0x708] sm:$0xff] %v1670_v33 }
  0x81   : > { %1673 = vst [vmem:[%s9971_s27 + $0x710] sm:$0xff] %v1672_v34  ;;  %1675 = vst [vmem:[%s9971_s27 + $0x718] sm:$0xff] %v1674_v35  ;;  %v1676_v36 = vld [vmem:[%s9966_s26 + $0xe40] sm:$0xff]  ;;  %v1678_v37 = vld [vmem:[%s9966_s26 + $0xe50] sm:$0xff] }
  0x82   : > { %v1680_v38 = vld [vmem:[%s9966_s26 + $0xe60] sm:$0xff]  ;;  %1677 = vst [vmem:[%s9971_s27 + $0x720] sm:$0xff] %v1676_v36  ;;  %1679 = vst [vmem:[%s9971_s27 + $0x728] sm:$0xff] %v1678_v37  ;;  %v1682_v39 = vld [vmem:[%s9966_s26 + $0xe70] sm:$0xff] }
  0x83   : > { %1681 = vst [vmem:[%s9971_s27 + $0x730] sm:$0xff] %v1680_v38  ;;  %v1684_v40 = vld [vmem:[%s9966_s26 + $0xe80] sm:$0xff]  ;;  %v1686_v41 = vld [vmem:[%s9966_s26 + $0xe90] sm:$0xff]  ;;  %1683 = vst [vmem:[%s9971_s27 + $0x738] sm:$0xff] %v1682_v39 }
  0x84   : > { %1685 = vst [vmem:[%s9971_s27 + $0x740] sm:$0xff] %v1684_v40  ;;  %1687 = vst [vmem:[%s9971_s27 + $0x748] sm:$0xff] %v1686_v41  ;;  %v1688_v42 = vld [vmem:[%s9966_s26 + $0xea0] sm:$0xff]  ;;  %v1690_v43 = vld [vmem:[%s9966_s26 + $0xeb0] sm:$0xff] }
  0x85   : > { %v1692_v44 = vld [vmem:[%s9966_s26 + $0xec0] sm:$0xff]  ;;  %1689 = vst [vmem:[%s9971_s27 + $0x750] sm:$0xff] %v1688_v42  ;;  %1691 = vst [vmem:[%s9971_s27 + $0x758] sm:$0xff] %v1690_v43  ;;  %v1694_v45 = vld [vmem:[%s9966_s26 + $0xed0] sm:$0xff] }
  0x86   : > { %1693 = vst [vmem:[%s9971_s27 + $0x760] sm:$0xff] %v1692_v44  ;;  %v1696_v46 = vld [vmem:[%s9966_s26 + $0xee0] sm:$0xff]  ;;  %v1698_v47 = vld [vmem:[%s9966_s26 + $0xef0] sm:$0xff]  ;;  %1695 = vst [vmem:[%s9971_s27 + $0x768] sm:$0xff] %v1694_v45 }
  0x87   : > { %1697 = vst [vmem:[%s9971_s27 + $0x770] sm:$0xff] %v1696_v46  ;;  %1699 = vst [vmem:[%s9971_s27 + $0x778] sm:$0xff] %v1698_v47  ;;  %v1700_v48 = vld [vmem:[%s9966_s26 + $0xf00] sm:$0xff]  ;;  %v1702_v49 = vld [vmem:[%s9966_s26 + $0xf10] sm:$0xff] }
  0x88   : > { %v1704_v50 = vld [vmem:[%s9966_s26 + $0xf20] sm:$0xff]  ;;  %1701 = vst [vmem:[%s9971_s27 + $0x780] sm:$0xff] %v1700_v48  ;;  %1703 = vst [vmem:[%s9971_s27 + $0x788] sm:$0xff] %v1702_v49  ;;  %v1706_v51 = vld [vmem:[%s9966_s26 + $0xf30] sm:$0xff] }
  0x89   : > { %1705 = vst [vmem:[%s9971_s27 + $0x790] sm:$0xff] %v1704_v50  ;;  %v1708_v52 = vld [vmem:[%s9966_s26 + $0xf40] sm:$0xff]  ;;  %v1710_v53 = vld [vmem:[%s9966_s26 + $0xf50] sm:$0xff]  ;;  %1707 = vst [vmem:[%s9971_s27 + $0x798] sm:$0xff] %v1706_v51 }
  0x8a   : > { %1709 = vst [vmem:[%s9971_s27 + $0x7a0] sm:$0xff] %v1708_v52  ;;  %1711 = vst [vmem:[%s9971_s27 + $0x7a8] sm:$0xff] %v1710_v53  ;;  %v1712_v54 = vld [vmem:[%s9966_s26 + $0xf60] sm:$0xff]  ;;  %v1714_v55 = vld [vmem:[%s9966_s26 + $0xf70] sm:$0xff] }
  0x8b   : > { %v1716_v56 = vld [vmem:[%s9966_s26 + $0xf80] sm:$0xff]  ;;  %1713 = vst [vmem:[%s9971_s27 + $0x7b0] sm:$0xff] %v1712_v54  ;;  %1715 = vst [vmem:[%s9971_s27 + $0x7b8] sm:$0xff] %v1714_v55  ;;  %v1718_v57 = vld [vmem:[%s9966_s26 + $0xf90] sm:$0xff] }
  0x8c   : > { %1717 = vst [vmem:[%s9971_s27 + $0x7c0] sm:$0xff] %v1716_v56  ;;  %v1720_v58 = vld [vmem:[%s9966_s26 + $0xfa0] sm:$0xff]  ;;  %v1722_v59 = vld [vmem:[%s9966_s26 + $0xfb0] sm:$0xff]  ;;  %1719 = vst [vmem:[%s9971_s27 + $0x7c8] sm:$0xff] %v1718_v57 }
  0x8d   : > { %1721 = vst [vmem:[%s9971_s27 + $0x7d0] sm:$0xff] %v1720_v58  ;;  %1723 = vst [vmem:[%s9971_s27 + $0x7d8] sm:$0xff] %v1722_v59  ;;  %v1724_v60 = vld [vmem:[%s9966_s26 + $0xfc0] sm:$0xff]  ;;  %v1726_v61 = vld [vmem:[%s9966_s26 + $0xfd0] sm:$0xff] }
  0x8e   : > { %v1728_v62 = vld [vmem:[%s9966_s26 + $0xfe0] sm:$0xff]  ;;  %1725 = vst [vmem:[%s9971_s27 + $0x7e0] sm:$0xff] %v1724_v60  ;;  %1727 = vst [vmem:[%s9971_s27 + $0x7e8] sm:$0xff] %v1726_v61  ;;  %v1730_v63 = vld [vmem:[%s9966_s26 + $0xff0] sm:$0xff] }
  0x8f   : > { %1729 = vst [vmem:[%s9971_s27 + $0x7f0] sm:$0xff] %v1728_v62  ;;  %v1732_v0 = vld [vmem:[%s9966_s26 + $0x1000] sm:$0xff]  ;;  %v1734_v1 = vld [vmem:[%s9966_s26 + $0x1010] sm:$0xff]  ;;  %1731 = vst [vmem:[%s9971_s27 + $0x7f8] sm:$0xff] %v1730_v63 }
  0x90   : > { %1733 = vst [vmem:[%s9971_s27 + $0x800] sm:$0xff] %v1732_v0  ;;  %1735 = vst [vmem:[%s9971_s27 + $0x808] sm:$0xff] %v1734_v1  ;;  %v1736_v2 = vld [vmem:[%s9966_s26 + $0x1020] sm:$0xff]  ;;  %v1738_v3 = vld [vmem:[%s9966_s26 + $0x1030] sm:$0xff] }
  0x91   : > { %v1740_v4 = vld [vmem:[%s9966_s26 + $0x1040] sm:$0xff]  ;;  %1737 = vst [vmem:[%s9971_s27 + $0x810] sm:$0xff] %v1736_v2  ;;  %1739 = vst [vmem:[%s9971_s27 + $0x818] sm:$0xff] %v1738_v3  ;;  %v1742_v5 = vld [vmem:[%s9966_s26 + $0x1050] sm:$0xff] }
  0x92   : > { %1741 = vst [vmem:[%s9971_s27 + $0x820] sm:$0xff] %v1740_v4  ;;  %v1744_v6 = vld [vmem:[%s9966_s26 + $0x1060] sm:$0xff]  ;;  %v1746_v7 = vld [vmem:[%s9966_s26 + $0x1070] sm:$0xff]  ;;  %1743 = vst [vmem:[%s9971_s27 + $0x828] sm:$0xff] %v1742_v5 }
  0x93   : > { %1745 = vst [vmem:[%s9971_s27 + $0x830] sm:$0xff] %v1744_v6  ;;  %1747 = vst [vmem:[%s9971_s27 + $0x838] sm:$0xff] %v1746_v7  ;;  %v1748_v8 = vld [vmem:[%s9966_s26 + $0x1080] sm:$0xff]  ;;  %v1750_v9 = vld [vmem:[%s9966_s26 + $0x1090] sm:$0xff] }
  0x94   : > { %v1752_v10 = vld [vmem:[%s9966_s26 + $0x10a0] sm:$0xff]  ;;  %1749 = vst [vmem:[%s9971_s27 + $0x840] sm:$0xff] %v1748_v8  ;;  %1751 = vst [vmem:[%s9971_s27 + $0x848] sm:$0xff] %v1750_v9  ;;  %v1754_v11 = vld [vmem:[%s9966_s26 + $0x10b0] sm:$0xff] }
  0x95   : > { %1753 = vst [vmem:[%s9971_s27 + $0x850] sm:$0xff] %v1752_v10  ;;  %v1756_v12 = vld [vmem:[%s9966_s26 + $0x10c0] sm:$0xff]  ;;  %v1758_v13 = vld [vmem:[%s9966_s26 + $0x10d0] sm:$0xff]  ;;  %1755 = vst [vmem:[%s9971_s27 + $0x858] sm:$0xff] %v1754_v11 }
  0x96   : > { %1757 = vst [vmem:[%s9971_s27 + $0x860] sm:$0xff] %v1756_v12  ;;  %1759 = vst [vmem:[%s9971_s27 + $0x868] sm:$0xff] %v1758_v13  ;;  %v1760_v14 = vld [vmem:[%s9966_s26 + $0x10e0] sm:$0xff]  ;;  %v1762_v15 = vld [vmem:[%s9966_s26 + $0x10f0] sm:$0xff] }
  0x97   : > { %v1764_v16 = vld [vmem:[%s9966_s26 + $0x1100] sm:$0xff]  ;;  %1761 = vst [vmem:[%s9971_s27 + $0x870] sm:$0xff] %v1760_v14  ;;  %1763 = vst [vmem:[%s9971_s27 + $0x878] sm:$0xff] %v1762_v15  ;;  %v1766_v17 = vld [vmem:[%s9966_s26 + $0x1110] sm:$0xff] }
  0x98   : > { %1765 = vst [vmem:[%s9971_s27 + $0x880] sm:$0xff] %v1764_v16  ;;  %v1768_v18 = vld [vmem:[%s9966_s26 + $0x1120] sm:$0xff]  ;;  %v1770_v19 = vld [vmem:[%s9966_s26 + $0x1130] sm:$0xff]  ;;  %1767 = vst [vmem:[%s9971_s27 + $0x888] sm:$0xff] %v1766_v17 }
  0x99   : > { %1769 = vst [vmem:[%s9971_s27 + $0x890] sm:$0xff] %v1768_v18  ;;  %1771 = vst [vmem:[%s9971_s27 + $0x898] sm:$0xff] %v1770_v19  ;;  %v1772_v20 = vld [vmem:[%s9966_s26 + $0x1140] sm:$0xff]  ;;  %v1774_v21 = vld [vmem:[%s9966_s26 + $0x1150] sm:$0xff] }
  0x9a   : > { %v1776_v22 = vld [vmem:[%s9966_s26 + $0x1160] sm:$0xff]  ;;  %1773 = vst [vmem:[%s9971_s27 + $0x8a0] sm:$0xff] %v1772_v20  ;;  %1775 = vst [vmem:[%s9971_s27 + $0x8a8] sm:$0xff] %v1774_v21  ;;  %v1778_v23 = vld [vmem:[%s9966_s26 + $0x1170] sm:$0xff] }
  0x9b   : > { %1777 = vst [vmem:[%s9971_s27 + $0x8b0] sm:$0xff] %v1776_v22  ;;  %v1780_v24 = vld [vmem:[%s9966_s26 + $0x1180] sm:$0xff]  ;;  %v1782_v25 = vld [vmem:[%s9966_s26 + $0x1190] sm:$0xff]  ;;  %1779 = vst [vmem:[%s9971_s27 + $0x8b8] sm:$0xff] %v1778_v23 }
  0x9c   : > { %1781 = vst [vmem:[%s9971_s27 + $0x8c0] sm:$0xff] %v1780_v24  ;;  %1783 = vst [vmem:[%s9971_s27 + $0x8c8] sm:$0xff] %v1782_v25  ;;  %v1784_v26 = vld [vmem:[%s9966_s26 + $0x11a0] sm:$0xff]  ;;  %v1786_v27 = vld [vmem:[%s9966_s26 + $0x11b0] sm:$0xff] }
  0x9d   : > { %v1788_v28 = vld [vmem:[%s9966_s26 + $0x11c0] sm:$0xff]  ;;  %1785 = vst [vmem:[%s9971_s27 + $0x8d0] sm:$0xff] %v1784_v26  ;;  %1787 = vst [vmem:[%s9971_s27 + $0x8d8] sm:$0xff] %v1786_v27  ;;  %v1790_v29 = vld [vmem:[%s9966_s26 + $0x11d0] sm:$0xff] }
  0x9e   : > { %1789 = vst [vmem:[%s9971_s27 + $0x8e0] sm:$0xff] %v1788_v28  ;;  %v1792_v30 = vld [vmem:[%s9966_s26 + $0x11e0] sm:$0xff]  ;;  %v1794_v31 = vld [vmem:[%s9966_s26 + $0x11f0] sm:$0xff]  ;;  %1791 = vst [vmem:[%s9971_s27 + $0x8e8] sm:$0xff] %v1790_v29 }
  0x9f   : > { %1793 = vst [vmem:[%s9971_s27 + $0x8f0] sm:$0xff] %v1792_v30  ;;  %1795 = vst [vmem:[%s9971_s27 + $0x8f8] sm:$0xff] %v1794_v31  ;;  %v1796_v32 = vld [vmem:[%s9966_s26 + $0x1200] sm:$0xff]  ;;  %v1798_v33 = vld [vmem:[%s9966_s26 + $0x1210] sm:$0xff] }
  0xa0   : > { %v1800_v34 = vld [vmem:[%s9966_s26 + $0x1220] sm:$0xff]  ;;  %1797 = vst [vmem:[%s9971_s27 + $0x900] sm:$0xff] %v1796_v32  ;;  %1799 = vst [vmem:[%s9971_s27 + $0x908] sm:$0xff] %v1798_v33  ;;  %v1802_v35 = vld [vmem:[%s9966_s26 + $0x1230] sm:$0xff] }
  0xa1   : > { %1801 = vst [vmem:[%s9971_s27 + $0x910] sm:$0xff] %v1800_v34  ;;  %v1804_v36 = vld [vmem:[%s9966_s26 + $0x1240] sm:$0xff]  ;;  %v1806_v37 = vld [vmem:[%s9966_s26 + $0x1250] sm:$0xff]  ;;  %1803 = vst [vmem:[%s9971_s27 + $0x918] sm:$0xff] %v1802_v35 }
  0xa2   : > { %1805 = vst [vmem:[%s9971_s27 + $0x920] sm:$0xff] %v1804_v36  ;;  %1807 = vst [vmem:[%s9971_s27 + $0x928] sm:$0xff] %v1806_v37  ;;  %v1808_v38 = vld [vmem:[%s9966_s26 + $0x1260] sm:$0xff]  ;;  %v1810_v39 = vld [vmem:[%s9966_s26 + $0x1270] sm:$0xff] }
  0xa3   : > { %v1812_v40 = vld [vmem:[%s9966_s26 + $0x1280] sm:$0xff]  ;;  %1809 = vst [vmem:[%s9971_s27 + $0x930] sm:$0xff] %v1808_v38  ;;  %1811 = vst [vmem:[%s9971_s27 + $0x938] sm:$0xff] %v1810_v39  ;;  %v1814_v41 = vld [vmem:[%s9966_s26 + $0x1290] sm:$0xff] }
  0xa4   : > { %1813 = vst [vmem:[%s9971_s27 + $0x940] sm:$0xff] %v1812_v40  ;;  %v1816_v42 = vld [vmem:[%s9966_s26 + $0x12a0] sm:$0xff]  ;;  %v1818_v43 = vld [vmem:[%s9966_s26 + $0x12b0] sm:$0xff]  ;;  %1815 = vst [vmem:[%s9971_s27 + $0x948] sm:$0xff] %v1814_v41 }
  0xa5   : > { %1817 = vst [vmem:[%s9971_s27 + $0x950] sm:$0xff] %v1816_v42  ;;  %1819 = vst [vmem:[%s9971_s27 + $0x958] sm:$0xff] %v1818_v43  ;;  %v1820_v44 = vld [vmem:[%s9966_s26 + $0x12c0] sm:$0xff]  ;;  %v1822_v45 = vld [vmem:[%s9966_s26 + $0x12d0] sm:$0xff] }
  0xa6   : > { %v1824_v46 = vld [vmem:[%s9966_s26 + $0x12e0] sm:$0xff]  ;;  %1821 = vst [vmem:[%s9971_s27 + $0x960] sm:$0xff] %v1820_v44  ;;  %1823 = vst [vmem:[%s9971_s27 + $0x968] sm:$0xff] %v1822_v45  ;;  %v1826_v47 = vld [vmem:[%s9966_s26 + $0x12f0] sm:$0xff] }
  0xa7   : > { %1825 = vst [vmem:[%s9971_s27 + $0x970] sm:$0xff] %v1824_v46  ;;  %v1828_v48 = vld [vmem:[%s9966_s26 + $0x1300] sm:$0xff]  ;;  %v1830_v49 = vld [vmem:[%s9966_s26 + $0x1310] sm:$0xff]  ;;  %1827 = vst [vmem:[%s9971_s27 + $0x978] sm:$0xff] %v1826_v47 }
  0xa8   : > { %1829 = vst [vmem:[%s9971_s27 + $0x980] sm:$0xff] %v1828_v48  ;;  %1831 = vst [vmem:[%s9971_s27 + $0x988] sm:$0xff] %v1830_v49  ;;  %v1832_v50 = vld [vmem:[%s9966_s26 + $0x1320] sm:$0xff]  ;;  %v1834_v51 = vld [vmem:[%s9966_s26 + $0x1330] sm:$0xff] }
  0xa9   : > { %v1836_v52 = vld [vmem:[%s9966_s26 + $0x1340] sm:$0xff]  ;;  %1833 = vst [vmem:[%s9971_s27 + $0x990] sm:$0xff] %v1832_v50  ;;  %1835 = vst [vmem:[%s9971_s27 + $0x998] sm:$0xff] %v1834_v51  ;;  %v1838_v53 = vld [vmem:[%s9966_s26 + $0x1350] sm:$0xff] }
  0xaa   : > { %1837 = vst [vmem:[%s9971_s27 + $0x9a0] sm:$0xff] %v1836_v52  ;;  %v1840_v54 = vld [vmem:[%s9966_s26 + $0x1360] sm:$0xff]  ;;  %v1842_v55 = vld [vmem:[%s9966_s26 + $0x1370] sm:$0xff]  ;;  %1839 = vst [vmem:[%s9971_s27 + $0x9a8] sm:$0xff] %v1838_v53 }
  0xab   : > { %1841 = vst [vmem:[%s9971_s27 + $0x9b0] sm:$0xff] %v1840_v54  ;;  %1843 = vst [vmem:[%s9971_s27 + $0x9b8] sm:$0xff] %v1842_v55  ;;  %v1844_v56 = vld [vmem:[%s9966_s26 + $0x1380] sm:$0xff]  ;;  %v1846_v57 = vld [vmem:[%s9966_s26 + $0x1390] sm:$0xff] }
  0xac   : > { %v1848_v58 = vld [vmem:[%s9966_s26 + $0x13a0] sm:$0xff]  ;;  %1845 = vst [vmem:[%s9971_s27 + $0x9c0] sm:$0xff] %v1844_v56  ;;  %1847 = vst [vmem:[%s9971_s27 + $0x9c8] sm:$0xff] %v1846_v57  ;;  %v1850_v59 = vld [vmem:[%s9966_s26 + $0x13b0] sm:$0xff] }
  0xad   : > { %1849 = vst [vmem:[%s9971_s27 + $0x9d0] sm:$0xff] %v1848_v58  ;;  %v1852_v60 = vld [vmem:[%s9966_s26 + $0x13c0] sm:$0xff]  ;;  %v1854_v61 = vld [vmem:[%s9966_s26 + $0x13d0] sm:$0xff]  ;;  %1851 = vst [vmem:[%s9971_s27 + $0x9d8] sm:$0xff] %v1850_v59 }
  0xae   : > { %1853 = vst [vmem:[%s9971_s27 + $0x9e0] sm:$0xff] %v1852_v60  ;;  %1855 = vst [vmem:[%s9971_s27 + $0x9e8] sm:$0xff] %v1854_v61  ;;  %v1856_v62 = vld [vmem:[%s9966_s26 + $0x13e0] sm:$0xff]  ;;  %v1858_v63 = vld [vmem:[%s9966_s26 + $0x13f0] sm:$0xff] }
  0xaf   : > { %v1860_v0 = vld [vmem:[%s9966_s26 + $0x1400] sm:$0xff]  ;;  %1857 = vst [vmem:[%s9971_s27 + $0x9f0] sm:$0xff] %v1856_v62  ;;  %1859 = vst [vmem:[%s9971_s27 + $0x9f8] sm:$0xff] %v1858_v63  ;;  %v1862_v1 = vld [vmem:[%s9966_s26 + $0x1410] sm:$0xff] }
  0xb0   : > { %1861 = vst [vmem:[%s9971_s27 + $0xa00] sm:$0xff] %v1860_v0  ;;  %v1864_v2 = vld [vmem:[%s9966_s26 + $0x1420] sm:$0xff]  ;;  %v1866_v3 = vld [vmem:[%s9966_s26 + $0x1430] sm:$0xff]  ;;  %1863 = vst [vmem:[%s9971_s27 + $0xa08] sm:$0xff] %v1862_v1 }
  0xb1   : > { %1865 = vst [vmem:[%s9971_s27 + $0xa10] sm:$0xff] %v1864_v2  ;;  %1867 = vst [vmem:[%s9971_s27 + $0xa18] sm:$0xff] %v1866_v3  ;;  %v1868_v4 = vld [vmem:[%s9966_s26 + $0x1440] sm:$0xff]  ;;  %v1870_v5 = vld [vmem:[%s9966_s26 + $0x1450] sm:$0xff] }
  0xb2   : > { %v1872_v6 = vld [vmem:[%s9966_s26 + $0x1460] sm:$0xff]  ;;  %1869 = vst [vmem:[%s9971_s27 + $0xa20] sm:$0xff] %v1868_v4  ;;  %1871 = vst [vmem:[%s9971_s27 + $0xa28] sm:$0xff] %v1870_v5  ;;  %v1874_v7 = vld [vmem:[%s9966_s26 + $0x1470] sm:$0xff] }
  0xb3   : > { %1873 = vst [vmem:[%s9971_s27 + $0xa30] sm:$0xff] %v1872_v6  ;;  %v1876_v8 = vld [vmem:[%s9966_s26 + $0x1480] sm:$0xff]  ;;  %v1878_v9 = vld [vmem:[%s9966_s26 + $0x1490] sm:$0xff]  ;;  %1875 = vst [vmem:[%s9971_s27 + $0xa38] sm:$0xff] %v1874_v7 }
  0xb4   : > { %1877 = vst [vmem:[%s9971_s27 + $0xa40] sm:$0xff] %v1876_v8  ;;  %1879 = vst [vmem:[%s9971_s27 + $0xa48] sm:$0xff] %v1878_v9  ;;  %v1880_v10 = vld [vmem:[%s9966_s26 + $0x14a0] sm:$0xff]  ;;  %v1882_v11 = vld [vmem:[%s9966_s26 + $0x14b0] sm:$0xff] }
  0xb5   : > { %v1884_v12 = vld [vmem:[%s9966_s26 + $0x14c0] sm:$0xff]  ;;  %1881 = vst [vmem:[%s9971_s27 + $0xa50] sm:$0xff] %v1880_v10  ;;  %1883 = vst [vmem:[%s9971_s27 + $0xa58] sm:$0xff] %v1882_v11  ;;  %v1886_v13 = vld [vmem:[%s9966_s26 + $0x14d0] sm:$0xff] }
  0xb6   : > { %1885 = vst [vmem:[%s9971_s27 + $0xa60] sm:$0xff] %v1884_v12  ;;  %v1888_v14 = vld [vmem:[%s9966_s26 + $0x14e0] sm:$0xff]  ;;  %v1890_v15 = vld [vmem:[%s9966_s26 + $0x14f0] sm:$0xff]  ;;  %1887 = vst [vmem:[%s9971_s27 + $0xa68] sm:$0xff] %v1886_v13 }
  0xb7   : > { %1889 = vst [vmem:[%s9971_s27 + $0xa70] sm:$0xff] %v1888_v14  ;;  %1891 = vst [vmem:[%s9971_s27 + $0xa78] sm:$0xff] %v1890_v15  ;;  %v1892_v16 = vld [vmem:[%s9966_s26 + $0x1500] sm:$0xff]  ;;  %v1894_v17 = vld [vmem:[%s9966_s26 + $0x1510] sm:$0xff] }
  0xb8   : > { %v1896_v18 = vld [vmem:[%s9966_s26 + $0x1520] sm:$0xff]  ;;  %1893 = vst [vmem:[%s9971_s27 + $0xa80] sm:$0xff] %v1892_v16  ;;  %1895 = vst [vmem:[%s9971_s27 + $0xa88] sm:$0xff] %v1894_v17  ;;  %v1898_v19 = vld [vmem:[%s9966_s26 + $0x1530] sm:$0xff] }
  0xb9   : > { %1897 = vst [vmem:[%s9971_s27 + $0xa90] sm:$0xff] %v1896_v18  ;;  %v1900_v20 = vld [vmem:[%s9966_s26 + $0x1540] sm:$0xff]  ;;  %v1902_v21 = vld [vmem:[%s9966_s26 + $0x1550] sm:$0xff]  ;;  %1899 = vst [vmem:[%s9971_s27 + $0xa98] sm:$0xff] %v1898_v19 }
  0xba   : > { %1901 = vst [vmem:[%s9971_s27 + $0xaa0] sm:$0xff] %v1900_v20  ;;  %1903 = vst [vmem:[%s9971_s27 + $0xaa8] sm:$0xff] %v1902_v21  ;;  %v1904_v22 = vld [vmem:[%s9966_s26 + $0x1560] sm:$0xff]  ;;  %v1906_v23 = vld [vmem:[%s9966_s26 + $0x1570] sm:$0xff] }
  0xbb   : > { %v1908_v24 = vld [vmem:[%s9966_s26 + $0x1580] sm:$0xff]  ;;  %1905 = vst [vmem:[%s9971_s27 + $0xab0] sm:$0xff] %v1904_v22  ;;  %1907 = vst [vmem:[%s9971_s27 + $0xab8] sm:$0xff] %v1906_v23  ;;  %v1910_v25 = vld [vmem:[%s9966_s26 + $0x1590] sm:$0xff] }
  0xbc   : > { %1909 = vst [vmem:[%s9971_s27 + $0xac0] sm:$0xff] %v1908_v24  ;;  %v1912_v26 = vld [vmem:[%s9966_s26 + $0x15a0] sm:$0xff]  ;;  %v1914_v27 = vld [vmem:[%s9966_s26 + $0x15b0] sm:$0xff]  ;;  %1911 = vst [vmem:[%s9971_s27 + $0xac8] sm:$0xff] %v1910_v25 }
  0xbd   : > { %1913 = vst [vmem:[%s9971_s27 + $0xad0] sm:$0xff] %v1912_v26  ;;  %1915 = vst [vmem:[%s9971_s27 + $0xad8] sm:$0xff] %v1914_v27  ;;  %v1916_v28 = vld [vmem:[%s9966_s26 + $0x15c0] sm:$0xff]  ;;  %v1918_v29 = vld [vmem:[%s9966_s26 + $0x15d0] sm:$0xff] }
  0xbe   : > { %v1920_v30 = vld [vmem:[%s9966_s26 + $0x15e0] sm:$0xff]  ;;  %1917 = vst [vmem:[%s9971_s27 + $0xae0] sm:$0xff] %v1916_v28  ;;  %1919 = vst [vmem:[%s9971_s27 + $0xae8] sm:$0xff] %v1918_v29  ;;  %v1922_v31 = vld [vmem:[%s9966_s26 + $0x15f0] sm:$0xff] }
  0xbf   : > { %1921 = vst [vmem:[%s9971_s27 + $0xaf0] sm:$0xff] %v1920_v30  ;;  %v1924_v32 = vld [vmem:[%s9966_s26 + $0x1600] sm:$0xff]  ;;  %v1926_v33 = vld [vmem:[%s9966_s26 + $0x1610] sm:$0xff]  ;;  %1923 = vst [vmem:[%s9971_s27 + $0xaf8] sm:$0xff] %v1922_v31 }
  0xc0   : > { %1925 = vst [vmem:[%s9971_s27 + $0xb00] sm:$0xff] %v1924_v32  ;;  %1927 = vst [vmem:[%s9971_s27 + $0xb08] sm:$0xff] %v1926_v33  ;;  %v1928_v34 = vld [vmem:[%s9966_s26 + $0x1620] sm:$0xff]  ;;  %v1930_v35 = vld [vmem:[%s9966_s26 + $0x1630] sm:$0xff] }
  0xc1   : > { %v1932_v36 = vld [vmem:[%s9966_s26 + $0x1640] sm:$0xff]  ;;  %1929 = vst [vmem:[%s9971_s27 + $0xb10] sm:$0xff] %v1928_v34  ;;  %1931 = vst [vmem:[%s9971_s27 + $0xb18] sm:$0xff] %v1930_v35  ;;  %v1934_v37 = vld [vmem:[%s9966_s26 + $0x1650] sm:$0xff] }
  0xc2   : > { %1933 = vst [vmem:[%s9971_s27 + $0xb20] sm:$0xff] %v1932_v36  ;;  %v1936_v38 = vld [vmem:[%s9966_s26 + $0x1660] sm:$0xff]  ;;  %v1938_v39 = vld [vmem:[%s9966_s26 + $0x1670] sm:$0xff]  ;;  %1935 = vst [vmem:[%s9971_s27 + $0xb28] sm:$0xff] %v1934_v37 }
  0xc3   : > { %1937 = vst [vmem:[%s9971_s27 + $0xb30] sm:$0xff] %v1936_v38  ;;  %1939 = vst [vmem:[%s9971_s27 + $0xb38] sm:$0xff] %v1938_v39  ;;  %v1940_v40 = vld [vmem:[%s9966_s26 + $0x1680] sm:$0xff]  ;;  %v1942_v41 = vld [vmem:[%s9966_s26 + $0x1690] sm:$0xff] }
  0xc4   : > { %v1944_v42 = vld [vmem:[%s9966_s26 + $0x16a0] sm:$0xff]  ;;  %1941 = vst [vmem:[%s9971_s27 + $0xb40] sm:$0xff] %v1940_v40  ;;  %1943 = vst [vmem:[%s9971_s27 + $0xb48] sm:$0xff] %v1942_v41  ;;  %v1946_v43 = vld [vmem:[%s9966_s26 + $0x16b0] sm:$0xff] }
  0xc5   : > { %1945 = vst [vmem:[%s9971_s27 + $0xb50] sm:$0xff] %v1944_v42  ;;  %v1948_v44 = vld [vmem:[%s9966_s26 + $0x16c0] sm:$0xff]  ;;  %v1950_v45 = vld [vmem:[%s9966_s26 + $0x16d0] sm:$0xff]  ;;  %1947 = vst [vmem:[%s9971_s27 + $0xb58] sm:$0xff] %v1946_v43 }
  0xc6   : > { %1949 = vst [vmem:[%s9971_s27 + $0xb60] sm:$0xff] %v1948_v44  ;;  %1951 = vst [vmem:[%s9971_s27 + $0xb68] sm:$0xff] %v1950_v45  ;;  %v1952_v46 = vld [vmem:[%s9966_s26 + $0x16e0] sm:$0xff]  ;;  %v1954_v47 = vld [vmem:[%s9966_s26 + $0x16f0] sm:$0xff] }
  0xc7   : > { %v1956_v48 = vld [vmem:[%s9966_s26 + $0x1700] sm:$0xff]  ;;  %1953 = vst [vmem:[%s9971_s27 + $0xb70] sm:$0xff] %v1952_v46  ;;  %1955 = vst [vmem:[%s9971_s27 + $0xb78] sm:$0xff] %v1954_v47  ;;  %v1958_v49 = vld [vmem:[%s9966_s26 + $0x1710] sm:$0xff] }
  0xc8   : > { %1957 = vst [vmem:[%s9971_s27 + $0xb80] sm:$0xff] %v1956_v48  ;;  %v1960_v50 = vld [vmem:[%s9966_s26 + $0x1720] sm:$0xff]  ;;  %v1962_v51 = vld [vmem:[%s9966_s26 + $0x1730] sm:$0xff]  ;;  %1959 = vst [vmem:[%s9971_s27 + $0xb88] sm:$0xff] %v1958_v49 }
  0xc9   : > { %1961 = vst [vmem:[%s9971_s27 + $0xb90] sm:$0xff] %v1960_v50  ;;  %1963 = vst [vmem:[%s9971_s27 + $0xb98] sm:$0xff] %v1962_v51  ;;  %v1964_v52 = vld [vmem:[%s9966_s26 + $0x1740] sm:$0xff]  ;;  %v1966_v53 = vld [vmem:[%s9966_s26 + $0x1750] sm:$0xff] }
  0xca   : > { %v1968_v54 = vld [vmem:[%s9966_s26 + $0x1760] sm:$0xff]  ;;  %1965 = vst [vmem:[%s9971_s27 + $0xba0] sm:$0xff] %v1964_v52  ;;  %1967 = vst [vmem:[%s9971_s27 + $0xba8] sm:$0xff] %v1966_v53  ;;  %v1970_v55 = vld [vmem:[%s9966_s26 + $0x1770] sm:$0xff] }
  0xcb   : > { %1969 = vst [vmem:[%s9971_s27 + $0xbb0] sm:$0xff] %v1968_v54  ;;  %v1972_v56 = vld [vmem:[%s9966_s26 + $0x1780] sm:$0xff]  ;;  %v1974_v57 = vld [vmem:[%s9966_s26 + $0x1790] sm:$0xff]  ;;  %1971 = vst [vmem:[%s9971_s27 + $0xbb8] sm:$0xff] %v1970_v55 }
  0xcc   : > { %1973 = vst [vmem:[%s9971_s27 + $0xbc0] sm:$0xff] %v1972_v56  ;;  %1975 = vst [vmem:[%s9971_s27 + $0xbc8] sm:$0xff] %v1974_v57  ;;  %v1976_v58 = vld [vmem:[%s9966_s26 + $0x17a0] sm:$0xff]  ;;  %v1978_v59 = vld [vmem:[%s9966_s26 + $0x17b0] sm:$0xff] }
  0xcd   : > { %v1980_v60 = vld [vmem:[%s9966_s26 + $0x17c0] sm:$0xff]  ;;  %1977 = vst [vmem:[%s9971_s27 + $0xbd0] sm:$0xff] %v1976_v58  ;;  %1979 = vst [vmem:[%s9971_s27 + $0xbd8] sm:$0xff] %v1978_v59  ;;  %v1982_v61 = vld [vmem:[%s9966_s26 + $0x17d0] sm:$0xff] }
  0xce   : > { %1981 = vst [vmem:[%s9971_s27 + $0xbe0] sm:$0xff] %v1980_v60  ;;  %v1984_v62 = vld [vmem:[%s9966_s26 + $0x17e0] sm:$0xff]  ;;  %v1986_v63 = vld [vmem:[%s9966_s26 + $0x17f0] sm:$0xff]  ;;  %1983 = vst [vmem:[%s9971_s27 + $0xbe8] sm:$0xff] %v1982_v61 }
  0xcf   : > { %1985 = vst [vmem:[%s9971_s27 + $0xbf0] sm:$0xff] %v1984_v62  ;;  %1987 = vst [vmem:[%s9971_s27 + $0xbf8] sm:$0xff] %v1986_v63  ;;  %v1988_v0 = vld [vmem:[%s9966_s26 + $0x1800] sm:$0xff]  ;;  %v1990_v1 = vld [vmem:[%s9966_s26 + $0x1810] sm:$0xff] }
  0xd0   : > { %v1992_v2 = vld [vmem:[%s9966_s26 + $0x1820] sm:$0xff]  ;;  %1989 = vst [vmem:[%s9971_s27 + $0xc00] sm:$0xff] %v1988_v0  ;;  %1991 = vst [vmem:[%s9971_s27 + $0xc08] sm:$0xff] %v1990_v1  ;;  %v1994_v3 = vld [vmem:[%s9966_s26 + $0x1830] sm:$0xff] }
  0xd1   : > { %1993 = vst [vmem:[%s9971_s27 + $0xc10] sm:$0xff] %v1992_v2  ;;  %v1996_v4 = vld [vmem:[%s9966_s26 + $0x1840] sm:$0xff]  ;;  %v1998_v5 = vld [vmem:[%s9966_s26 + $0x1850] sm:$0xff]  ;;  %1995 = vst [vmem:[%s9971_s27 + $0xc18] sm:$0xff] %v1994_v3 }
  0xd2   : > { %1997 = vst [vmem:[%s9971_s27 + $0xc20] sm:$0xff] %v1996_v4  ;;  %1999 = vst [vmem:[%s9971_s27 + $0xc28] sm:$0xff] %v1998_v5  ;;  %v2000_v6 = vld [vmem:[%s9966_s26 + $0x1860] sm:$0xff]  ;;  %v2002_v7 = vld [vmem:[%s9966_s26 + $0x1870] sm:$0xff] }
  0xd3   : > { %v2004_v8 = vld [vmem:[%s9966_s26 + $0x1880] sm:$0xff]  ;;  %2001 = vst [vmem:[%s9971_s27 + $0xc30] sm:$0xff] %v2000_v6  ;;  %2003 = vst [vmem:[%s9971_s27 + $0xc38] sm:$0xff] %v2002_v7  ;;  %v2006_v9 = vld [vmem:[%s9966_s26 + $0x1890] sm:$0xff] }
  0xd4   : > { %2005 = vst [vmem:[%s9971_s27 + $0xc40] sm:$0xff] %v2004_v8  ;;  %v2008_v10 = vld [vmem:[%s9966_s26 + $0x18a0] sm:$0xff]  ;;  %v2010_v11 = vld [vmem:[%s9966_s26 + $0x18b0] sm:$0xff]  ;;  %2007 = vst [vmem:[%s9971_s27 + $0xc48] sm:$0xff] %v2006_v9 }
  0xd5   : > { %2009 = vst [vmem:[%s9971_s27 + $0xc50] sm:$0xff] %v2008_v10  ;;  %2011 = vst [vmem:[%s9971_s27 + $0xc58] sm:$0xff] %v2010_v11  ;;  %v2012_v12 = vld [vmem:[%s9966_s26 + $0x18c0] sm:$0xff]  ;;  %v2014_v13 = vld [vmem:[%s9966_s26 + $0x18d0] sm:$0xff] }
  0xd6   : > { %v2016_v14 = vld [vmem:[%s9966_s26 + $0x18e0] sm:$0xff]  ;;  %2013 = vst [vmem:[%s9971_s27 + $0xc60] sm:$0xff] %v2012_v12  ;;  %2015 = vst [vmem:[%s9971_s27 + $0xc68] sm:$0xff] %v2014_v13  ;;  %v2018_v15 = vld [vmem:[%s9966_s26 + $0x18f0] sm:$0xff] }
  0xd7   : > { %2017 = vst [vmem:[%s9971_s27 + $0xc70] sm:$0xff] %v2016_v14  ;;  %v2020_v16 = vld [vmem:[%s9966_s26 + $0x1900] sm:$0xff]  ;;  %v2022_v17 = vld [vmem:[%s9966_s26 + $0x1910] sm:$0xff]  ;;  %2019 = vst [vmem:[%s9971_s27 + $0xc78] sm:$0xff] %v2018_v15 }
  0xd8   : > { %2021 = vst [vmem:[%s9971_s27 + $0xc80] sm:$0xff] %v2020_v16  ;;  %2023 = vst [vmem:[%s9971_s27 + $0xc88] sm:$0xff] %v2022_v17  ;;  %v2024_v18 = vld [vmem:[%s9966_s26 + $0x1920] sm:$0xff]  ;;  %v2026_v19 = vld [vmem:[%s9966_s26 + $0x1930] sm:$0xff] }
  0xd9   : > { %v2028_v20 = vld [vmem:[%s9966_s26 + $0x1940] sm:$0xff]  ;;  %2025 = vst [vmem:[%s9971_s27 + $0xc90] sm:$0xff] %v2024_v18  ;;  %2027 = vst [vmem:[%s9971_s27 + $0xc98] sm:$0xff] %v2026_v19  ;;  %v2030_v21 = vld [vmem:[%s9966_s26 + $0x1950] sm:$0xff] }
  0xda   : > { %2029 = vst [vmem:[%s9971_s27 + $0xca0] sm:$0xff] %v2028_v20  ;;  %v2032_v22 = vld [vmem:[%s9966_s26 + $0x1960] sm:$0xff]  ;;  %v2034_v23 = vld [vmem:[%s9966_s26 + $0x1970] sm:$0xff]  ;;  %2031 = vst [vmem:[%s9971_s27 + $0xca8] sm:$0xff] %v2030_v21 }
  0xdb   : > { %2033 = vst [vmem:[%s9971_s27 + $0xcb0] sm:$0xff] %v2032_v22  ;;  %2035 = vst [vmem:[%s9971_s27 + $0xcb8] sm:$0xff] %v2034_v23  ;;  %v2036_v24 = vld [vmem:[%s9966_s26 + $0x1980] sm:$0xff]  ;;  %v2038_v25 = vld [vmem:[%s9966_s26 + $0x1990] sm:$0xff] }
  0xdc   : > { %v2040_v26 = vld [vmem:[%s9966_s26 + $0x19a0] sm:$0xff]  ;;  %2037 = vst [vmem:[%s9971_s27 + $0xcc0] sm:$0xff] %v2036_v24  ;;  %2039 = vst [vmem:[%s9971_s27 + $0xcc8] sm:$0xff] %v2038_v25  ;;  %v2042_v27 = vld [vmem:[%s9966_s26 + $0x19b0] sm:$0xff] }
  0xdd   : > { %2041 = vst [vmem:[%s9971_s27 + $0xcd0] sm:$0xff] %v2040_v26  ;;  %v2044_v28 = vld [vmem:[%s9966_s26 + $0x19c0] sm:$0xff]  ;;  %v2046_v29 = vld [vmem:[%s9966_s26 + $0x19d0] sm:$0xff]  ;;  %2043 = vst [vmem:[%s9971_s27 + $0xcd8] sm:$0xff] %v2042_v27 }
  0xde   : > { %2045 = vst [vmem:[%s9971_s27 + $0xce0] sm:$0xff] %v2044_v28  ;;  %2047 = vst [vmem:[%s9971_s27 + $0xce8] sm:$0xff] %v2046_v29  ;;  %v2048_v30 = vld [vmem:[%s9966_s26 + $0x19e0] sm:$0xff]  ;;  %v2050_v31 = vld [vmem:[%s9966_s26 + $0x19f0] sm:$0xff] }
  0xdf   : > { %v2052_v32 = vld [vmem:[%s9966_s26 + $0x1a00] sm:$0xff]  ;;  %2049 = vst [vmem:[%s9971_s27 + $0xcf0] sm:$0xff] %v2048_v30  ;;  %2051 = vst [vmem:[%s9971_s27 + $0xcf8] sm:$0xff] %v2050_v31  ;;  %v2054_v33 = vld [vmem:[%s9966_s26 + $0x1a10] sm:$0xff] }
  0xe0   : > { %2053 = vst [vmem:[%s9971_s27 + $0xd00] sm:$0xff] %v2052_v32  ;;  %v2056_v34 = vld [vmem:[%s9966_s26 + $0x1a20] sm:$0xff]  ;;  %v2058_v35 = vld [vmem:[%s9966_s26 + $0x1a30] sm:$0xff]  ;;  %2055 = vst [vmem:[%s9971_s27 + $0xd08] sm:$0xff] %v2054_v33 }
  0xe1   : > { %2057 = vst [vmem:[%s9971_s27 + $0xd10] sm:$0xff] %v2056_v34  ;;  %2059 = vst [vmem:[%s9971_s27 + $0xd18] sm:$0xff] %v2058_v35  ;;  %v2060_v36 = vld [vmem:[%s9966_s26 + $0x1a40] sm:$0xff]  ;;  %v2062_v37 = vld [vmem:[%s9966_s26 + $0x1a50] sm:$0xff] }
  0xe2   : > { %v2064_v38 = vld [vmem:[%s9966_s26 + $0x1a60] sm:$0xff]  ;;  %2061 = vst [vmem:[%s9971_s27 + $0xd20] sm:$0xff] %v2060_v36  ;;  %2063 = vst [vmem:[%s9971_s27 + $0xd28] sm:$0xff] %v2062_v37  ;;  %v2066_v39 = vld [vmem:[%s9966_s26 + $0x1a70] sm:$0xff] }
  0xe3   : > { %2065 = vst [vmem:[%s9971_s27 + $0xd30] sm:$0xff] %v2064_v38  ;;  %v2068_v40 = vld [vmem:[%s9966_s26 + $0x1a80] sm:$0xff]  ;;  %v2070_v41 = vld [vmem:[%s9966_s26 + $0x1a90] sm:$0xff]  ;;  %2067 = vst [vmem:[%s9971_s27 + $0xd38] sm:$0xff] %v2066_v39 }
  0xe4   : > { %2069 = vst [vmem:[%s9971_s27 + $0xd40] sm:$0xff] %v2068_v40  ;;  %2071 = vst [vmem:[%s9971_s27 + $0xd48] sm:$0xff] %v2070_v41  ;;  %v2072_v42 = vld [vmem:[%s9966_s26 + $0x1aa0] sm:$0xff]  ;;  %v2074_v43 = vld [vmem:[%s9966_s26 + $0x1ab0] sm:$0xff] }
  0xe5   : > { %v2076_v44 = vld [vmem:[%s9966_s26 + $0x1ac0] sm:$0xff]  ;;  %2073 = vst [vmem:[%s9971_s27 + $0xd50] sm:$0xff] %v2072_v42  ;;  %2075 = vst [vmem:[%s9971_s27 + $0xd58] sm:$0xff] %v2074_v43  ;;  %v2078_v45 = vld [vmem:[%s9966_s26 + $0x1ad0] sm:$0xff] }
  0xe6   : > { %2077 = vst [vmem:[%s9971_s27 + $0xd60] sm:$0xff] %v2076_v44  ;;  %v2080_v46 = vld [vmem:[%s9966_s26 + $0x1ae0] sm:$0xff]  ;;  %v2082_v47 = vld [vmem:[%s9966_s26 + $0x1af0] sm:$0xff]  ;;  %2079 = vst [vmem:[%s9971_s27 + $0xd68] sm:$0xff] %v2078_v45 }
  0xe7   : > { %2081 = vst [vmem:[%s9971_s27 + $0xd70] sm:$0xff] %v2080_v46  ;;  %2083 = vst [vmem:[%s9971_s27 + $0xd78] sm:$0xff] %v2082_v47  ;;  %v2084_v48 = vld [vmem:[%s9966_s26 + $0x1b00] sm:$0xff]  ;;  %v2086_v49 = vld [vmem:[%s9966_s26 + $0x1b10] sm:$0xff] }
  0xe8   : > { %v2088_v50 = vld [vmem:[%s9966_s26 + $0x1b20] sm:$0xff]  ;;  %2085 = vst [vmem:[%s9971_s27 + $0xd80] sm:$0xff] %v2084_v48  ;;  %2087 = vst [vmem:[%s9971_s27 + $0xd88] sm:$0xff] %v2086_v49  ;;  %v2090_v51 = vld [vmem:[%s9966_s26 + $0x1b30] sm:$0xff] }
  0xe9   : > { %2089 = vst [vmem:[%s9971_s27 + $0xd90] sm:$0xff] %v2088_v50  ;;  %v2092_v52 = vld [vmem:[%s9966_s26 + $0x1b40] sm:$0xff]  ;;  %v2094_v53 = vld [vmem:[%s9966_s26 + $0x1b50] sm:$0xff]  ;;  %2091 = vst [vmem:[%s9971_s27 + $0xd98] sm:$0xff] %v2090_v51 }
  0xea   : > { %2093 = vst [vmem:[%s9971_s27 + $0xda0] sm:$0xff] %v2092_v52  ;;  %2095 = vst [vmem:[%s9971_s27 + $0xda8] sm:$0xff] %v2094_v53  ;;  %v2096_v54 = vld [vmem:[%s9966_s26 + $0x1b60] sm:$0xff]  ;;  %v2098_v55 = vld [vmem:[%s9966_s26 + $0x1b70] sm:$0xff] }
  0xeb   : > { %v2100_v56 = vld [vmem:[%s9966_s26 + $0x1b80] sm:$0xff]  ;;  %2097 = vst [vmem:[%s9971_s27 + $0xdb0] sm:$0xff] %v2096_v54  ;;  %2099 = vst [vmem:[%s9971_s27 + $0xdb8] sm:$0xff] %v2098_v55  ;;  %v2102_v57 = vld [vmem:[%s9966_s26 + $0x1b90] sm:$0xff] }
  0xec   : > { %2101 = vst [vmem:[%s9971_s27 + $0xdc0] sm:$0xff] %v2100_v56  ;;  %v2104_v58 = vld [vmem:[%s9966_s26 + $0x1ba0] sm:$0xff]  ;;  %v2106_v59 = vld [vmem:[%s9966_s26 + $0x1bb0] sm:$0xff]  ;;  %2103 = vst [vmem:[%s9971_s27 + $0xdc8] sm:$0xff] %v2102_v57 }
  0xed   : > { %2105 = vst [vmem:[%s9971_s27 + $0xdd0] sm:$0xff] %v2104_v58  ;;  %2107 = vst [vmem:[%s9971_s27 + $0xdd8] sm:$0xff] %v2106_v59  ;;  %v2108_v60 = vld [vmem:[%s9966_s26 + $0x1bc0] sm:$0xff]  ;;  %v2110_v61 = vld [vmem:[%s9966_s26 + $0x1bd0] sm:$0xff] }
  0xee   : > { %v2112_v62 = vld [vmem:[%s9966_s26 + $0x1be0] sm:$0xff]  ;;  %2109 = vst [vmem:[%s9971_s27 + $0xde0] sm:$0xff] %v2108_v60  ;;  %2111 = vst [vmem:[%s9971_s27 + $0xde8] sm:$0xff] %v2110_v61  ;;  %v2114_v63 = vld [vmem:[%s9966_s26 + $0x1bf0] sm:$0xff] }
  0xef   : > { %2113 = vst [vmem:[%s9971_s27 + $0xdf0] sm:$0xff] %v2112_v62  ;;  %v2116_v0 = vld [vmem:[%s9966_s26 + $0x1c00] sm:$0xff]  ;;  %v2118_v1 = vld [vmem:[%s9966_s26 + $0x1c10] sm:$0xff]  ;;  %2115 = vst [vmem:[%s9971_s27 + $0xdf8] sm:$0xff] %v2114_v63 }
  0xf0   : > { %2117 = vst [vmem:[%s9971_s27 + $0xe00] sm:$0xff] %v2116_v0  ;;  %2119 = vst [vmem:[%s9971_s27 + $0xe08] sm:$0xff] %v2118_v1  ;;  %v2120_v2 = vld [vmem:[%s9966_s26 + $0x1c20] sm:$0xff]  ;;  %v2122_v3 = vld [vmem:[%s9966_s26 + $0x1c30] sm:$0xff] }
  0xf1   : > { %v2124_v4 = vld [vmem:[%s9966_s26 + $0x1c40] sm:$0xff]  ;;  %2121 = vst [vmem:[%s9971_s27 + $0xe10] sm:$0xff] %v2120_v2  ;;  %2123 = vst [vmem:[%s9971_s27 + $0xe18] sm:$0xff] %v2122_v3  ;;  %v2126_v5 = vld [vmem:[%s9966_s26 + $0x1c50] sm:$0xff] }
  0xf2   : > { %2125 = vst [vmem:[%s9971_s27 + $0xe20] sm:$0xff] %v2124_v4  ;;  %v2128_v6 = vld [vmem:[%s9966_s26 + $0x1c60] sm:$0xff]  ;;  %v2130_v7 = vld [vmem:[%s9966_s26 + $0x1c70] sm:$0xff]  ;;  %2127 = vst [vmem:[%s9971_s27 + $0xe28] sm:$0xff] %v2126_v5 }
  0xf3   : > { %2129 = vst [vmem:[%s9971_s27 + $0xe30] sm:$0xff] %v2128_v6  ;;  %2131 = vst [vmem:[%s9971_s27 + $0xe38] sm:$0xff] %v2130_v7  ;;  %v2132_v8 = vld [vmem:[%s9966_s26 + $0x1c80] sm:$0xff]  ;;  %v2134_v9 = vld [vmem:[%s9966_s26 + $0x1c90] sm:$0xff] }
  0xf4   : > { %v2136_v10 = vld [vmem:[%s9966_s26 + $0x1ca0] sm:$0xff]  ;;  %2133 = vst [vmem:[%s9971_s27 + $0xe40] sm:$0xff] %v2132_v8  ;;  %2135 = vst [vmem:[%s9971_s27 + $0xe48] sm:$0xff] %v2134_v9  ;;  %v2138_v11 = vld [vmem:[%s9966_s26 + $0x1cb0] sm:$0xff] }
  0xf5   : > { %2137 = vst [vmem:[%s9971_s27 + $0xe50] sm:$0xff] %v2136_v10  ;;  %v2140_v12 = vld [vmem:[%s9966_s26 + $0x1cc0] sm:$0xff]  ;;  %v2142_v13 = vld [vmem:[%s9966_s26 + $0x1cd0] sm:$0xff]  ;;  %2139 = vst [vmem:[%s9971_s27 + $0xe58] sm:$0xff] %v2138_v11 }
  0xf6   : > { %2141 = vst [vmem:[%s9971_s27 + $0xe60] sm:$0xff] %v2140_v12  ;;  %2143 = vst [vmem:[%s9971_s27 + $0xe68] sm:$0xff] %v2142_v13  ;;  %v2144_v14 = vld [vmem:[%s9966_s26 + $0x1ce0] sm:$0xff]  ;;  %v2146_v15 = vld [vmem:[%s9966_s26 + $0x1cf0] sm:$0xff] }
  0xf7   : > { %v2148_v16 = vld [vmem:[%s9966_s26 + $0x1d00] sm:$0xff]  ;;  %2145 = vst [vmem:[%s9971_s27 + $0xe70] sm:$0xff] %v2144_v14  ;;  %2147 = vst [vmem:[%s9971_s27 + $0xe78] sm:$0xff] %v2146_v15  ;;  %v2150_v17 = vld [vmem:[%s9966_s26 + $0x1d10] sm:$0xff] }
  0xf8   : > { %2149 = vst [vmem:[%s9971_s27 + $0xe80] sm:$0xff] %v2148_v16  ;;  %v2152_v18 = vld [vmem:[%s9966_s26 + $0x1d20] sm:$0xff]  ;;  %v2154_v19 = vld [vmem:[%s9966_s26 + $0x1d30] sm:$0xff]  ;;  %2151 = vst [vmem:[%s9971_s27 + $0xe88] sm:$0xff] %v2150_v17 }
  0xf9   : > { %2153 = vst [vmem:[%s9971_s27 + $0xe90] sm:$0xff] %v2152_v18  ;;  %2155 = vst [vmem:[%s9971_s27 + $0xe98] sm:$0xff] %v2154_v19  ;;  %v2156_v20 = vld [vmem:[%s9966_s26 + $0x1d40] sm:$0xff]  ;;  %v2158_v21 = vld [vmem:[%s9966_s26 + $0x1d50] sm:$0xff] }
  0xfa   : > { %v2160_v22 = vld [vmem:[%s9966_s26 + $0x1d60] sm:$0xff]  ;;  %2157 = vst [vmem:[%s9971_s27 + $0xea0] sm:$0xff] %v2156_v20  ;;  %2159 = vst [vmem:[%s9971_s27 + $0xea8] sm:$0xff] %v2158_v21  ;;  %v2162_v23 = vld [vmem:[%s9966_s26 + $0x1d70] sm:$0xff] }
  0xfb   : > { %2161 = vst [vmem:[%s9971_s27 + $0xeb0] sm:$0xff] %v2160_v22  ;;  %v2164_v24 = vld [vmem:[%s9966_s26 + $0x1d80] sm:$0xff]  ;;  %v2166_v25 = vld [vmem:[%s9966_s26 + $0x1d90] sm:$0xff]  ;;  %2163 = vst [vmem:[%s9971_s27 + $0xeb8] sm:$0xff] %v2162_v23 }
  0xfc   : > { %2165 = vst [vmem:[%s9971_s27 + $0xec0] sm:$0xff] %v2164_v24  ;;  %2167 = vst [vmem:[%s9971_s27 + $0xec8] sm:$0xff] %v2166_v25  ;;  %v2168_v26 = vld [vmem:[%s9966_s26 + $0x1da0] sm:$0xff]  ;;  %v2170_v27 = vld [vmem:[%s9966_s26 + $0x1db0] sm:$0xff] }
  0xfd   : > { %v2172_v28 = vld [vmem:[%s9966_s26 + $0x1dc0] sm:$0xff]  ;;  %2169 = vst [vmem:[%s9971_s27 + $0xed0] sm:$0xff] %v2168_v26  ;;  %2171 = vst [vmem:[%s9971_s27 + $0xed8] sm:$0xff] %v2170_v27  ;;  %v2174_v29 = vld [vmem:[%s9966_s26 + $0x1dd0] sm:$0xff] }
  0xfe   : > { %2173 = vst [vmem:[%s9971_s27 + $0xee0] sm:$0xff] %v2172_v28  ;;  %v2176_v30 = vld [vmem:[%s9966_s26 + $0x1de0] sm:$0xff]  ;;  %v2178_v31 = vld [vmem:[%s9966_s26 + $0x1df0] sm:$0xff]  ;;  %2175 = vst [vmem:[%s9971_s27 + $0xee8] sm:$0xff] %v2174_v29 }
  0xff   : > { %2177 = vst [vmem:[%s9971_s27 + $0xef0] sm:$0xff] %v2176_v30  ;;  %2179 = vst [vmem:[%s9971_s27 + $0xef8] sm:$0xff] %v2178_v31  ;;  %v2180_v32 = vld [vmem:[%s9966_s26 + $0x1e00] sm:$0xff]  ;;  %v2182_v33 = vld [vmem:[%s9966_s26 + $0x1e10] sm:$0xff] }
 0x100   : > { %v2184_v34 = vld [vmem:[%s9966_s26 + $0x1e20] sm:$0xff]  ;;  %2181 = vst [vmem:[%s9971_s27 + $0xf00] sm:$0xff] %v2180_v32  ;;  %2183 = vst [vmem:[%s9971_s27 + $0xf08] sm:$0xff] %v2182_v33  ;;  %v2186_v35 = vld [vmem:[%s9966_s26 + $0x1e30] sm:$0xff] }
 0x101   : > { %2185 = vst [vmem:[%s9971_s27 + $0xf10] sm:$0xff] %v2184_v34  ;;  %v2188_v36 = vld [vmem:[%s9966_s26 + $0x1e40] sm:$0xff]  ;;  %v2190_v37 = vld [vmem:[%s9966_s26 + $0x1e50] sm:$0xff]  ;;  %2187 = vst [vmem:[%s9971_s27 + $0xf18] sm:$0xff] %v2186_v35 }
 0x102   : > { %2189 = vst [vmem:[%s9971_s27 + $0xf20] sm:$0xff] %v2188_v36  ;;  %2191 = vst [vmem:[%s9971_s27 + $0xf28] sm:$0xff] %v2190_v37  ;;  %v2192_v38 = vld [vmem:[%s9966_s26 + $0x1e60] sm:$0xff]  ;;  %v2194_v39 = vld [vmem:[%s9966_s26 + $0x1e70] sm:$0xff] }
 0x103   : > { %v2196_v40 = vld [vmem:[%s9966_s26 + $0x1e80] sm:$0xff]  ;;  %2193 = vst [vmem:[%s9971_s27 + $0xf30] sm:$0xff] %v2192_v38  ;;  %2195 = vst [vmem:[%s9971_s27 + $0xf38] sm:$0xff] %v2194_v39  ;;  %v2198_v41 = vld [vmem:[%s9966_s26 + $0x1e90] sm:$0xff] }
 0x104   : > { %2197 = vst [vmem:[%s9971_s27 + $0xf40] sm:$0xff] %v2196_v40  ;;  %v2200_v42 = vld [vmem:[%s9966_s26 + $0x1ea0] sm:$0xff]  ;;  %v2202_v43 = vld [vmem:[%s9966_s26 + $0x1eb0] sm:$0xff]  ;;  %2199 = vst [vmem:[%s9971_s27 + $0xf48] sm:$0xff] %v2198_v41 }
 0x105   : > { %2201 = vst [vmem:[%s9971_s27 + $0xf50] sm:$0xff] %v2200_v42  ;;  %2203 = vst [vmem:[%s9971_s27 + $0xf58] sm:$0xff] %v2202_v43  ;;  %v2204_v44 = vld [vmem:[%s9966_s26 + $0x1ec0] sm:$0xff]  ;;  %v2206_v45 = vld [vmem:[%s9966_s26 + $0x1ed0] sm:$0xff] }
 0x106   : > { %v2208_v46 = vld [vmem:[%s9966_s26 + $0x1ee0] sm:$0xff]  ;;  %2205 = vst [vmem:[%s9971_s27 + $0xf60] sm:$0xff] %v2204_v44  ;;  %2207 = vst [vmem:[%s9971_s27 + $0xf68] sm:$0xff] %v2206_v45  ;;  %v2210_v47 = vld [vmem:[%s9966_s26 + $0x1ef0] sm:$0xff] }
 0x107   : > { %2209 = vst [vmem:[%s9971_s27 + $0xf70] sm:$0xff] %v2208_v46  ;;  %v2212_v48 = vld [vmem:[%s9966_s26 + $0x1f00] sm:$0xff]  ;;  %v2214_v49 = vld [vmem:[%s9966_s26 + $0x1f10] sm:$0xff]  ;;  %2211 = vst [vmem:[%s9971_s27 + $0xf78] sm:$0xff] %v2210_v47 }
 0x108   : > { %2213 = vst [vmem:[%s9971_s27 + $0xf80] sm:$0xff] %v2212_v48  ;;  %2215 = vst [vmem:[%s9971_s27 + $0xf88] sm:$0xff] %v2214_v49  ;;  %v2216_v50 = vld [vmem:[%s9966_s26 + $0x1f20] sm:$0xff]  ;;  %v2218_v51 = vld [vmem:[%s9966_s26 + $0x1f30] sm:$0xff] }
 0x109   : > { %v2220_v52 = vld [vmem:[%s9966_s26 + $0x1f40] sm:$0xff]  ;;  %2217 = vst [vmem:[%s9971_s27 + $0xf90] sm:$0xff] %v2216_v50  ;;  %2219 = vst [vmem:[%s9971_s27 + $0xf98] sm:$0xff] %v2218_v51  ;;  %v2222_v53 = vld [vmem:[%s9966_s26 + $0x1f50] sm:$0xff] }
 0x10a   : > { %2221 = vst [vmem:[%s9971_s27 + $0xfa0] sm:$0xff] %v2220_v52  ;;  %v2224_v54 = vld [vmem:[%s9966_s26 + $0x1f60] sm:$0xff]  ;;  %v2226_v55 = vld [vmem:[%s9966_s26 + $0x1f70] sm:$0xff]  ;;  %2223 = vst [vmem:[%s9971_s27 + $0xfa8] sm:$0xff] %v2222_v53 }
 0x10b   : > { %2225 = vst [vmem:[%s9971_s27 + $0xfb0] sm:$0xff] %v2224_v54  ;;  %2227 = vst [vmem:[%s9971_s27 + $0xfb8] sm:$0xff] %v2226_v55  ;;  %v2228_v56 = vld [vmem:[%s9966_s26 + $0x1f80] sm:$0xff]  ;;  %v2230_v57 = vld [vmem:[%s9966_s26 + $0x1f90] sm:$0xff] }
 0x10c   : > { %v2232_v58 = vld [vmem:[%s9966_s26 + $0x1fa0] sm:$0xff]  ;;  %2229 = vst [vmem:[%s9971_s27 + $0xfc0] sm:$0xff] %v2228_v56  ;;  %2231 = vst [vmem:[%s9971_s27 + $0xfc8] sm:$0xff] %v2230_v57  ;;  %v2234_v59 = vld [vmem:[%s9966_s26 + $0x1fb0] sm:$0xff] }
 0x10d   : > { %2233 = vst [vmem:[%s9971_s27 + $0xfd0] sm:$0xff] %v2232_v58  ;;  %v2236_v60 = vld [vmem:[%s9966_s26 + $0x1fc0] sm:$0xff]  ;;  %v2238_v61 = vld [vmem:[%s9966_s26 + $0x1fd0] sm:$0xff]  ;;  %2235 = vst [vmem:[%s9971_s27 + $0xfd8] sm:$0xff] %v2234_v59 }
 0x10e   : > { %2237 = vst [vmem:[%s9971_s27 + $0xfe0] sm:$0xff] %v2236_v60  ;;  %2239 = vst [vmem:[%s9971_s27 + $0xfe8] sm:$0xff] %v2238_v61  ;;  %v2240_v62 = vld [vmem:[%s9966_s26 + $0x1fe0] sm:$0xff]  ;;  %v2242_v63 = vld [vmem:[%s9966_s26 + $0x1ff0] sm:$0xff] }
 0x10f   : > { %2241 = vst [vmem:[%s9971_s27 + $0xff0] sm:$0xff] %v2240_v62  ;;  %2243 = vst [vmem:[%s9971_s27 + $0xff8] sm:$0xff] %v2242_v63 }
 0x110 PF: > { %p8470_p6 = scmp.ge.s32.totalorder %s9901_s16, 1  ;;  %p4333_p7 = scmp.lt.s32.totalorder %s9901_s16, 3 }
 0x112   : > { %p4334_p8 = pnand %p8470_p6, %p4333_p7 }
 0x113   : > { %s4340_s28 = sand.u32 (!%p4334_p8), 1, %s9885_s12  }
 0x114   : > { %4337 = sbr.rel (%p4334_p8) target bundleno = 1016 (0x3f8), region = 76  ;;  %s8471_s6 = sshll.u32 (!%p4334_p8), %s4340_s28, 12 }
 0x115   : > { %s11011_s7 = scalar_lea.vmem (!%p4334_p8), [#allocation2], %s8471_s6 }
 0x119   : > { %v11000_v0 = vld [vmem:[%s11708_s0] sm:$0xff]  ;;  %v11005_v1 = vld [vmem:[%s11708_s0 + $0x8] sm:$0xff]  ;;  %v9063_v4 = vld [vmem:[%s11011_s7 + $0x74] ss:$8 sps:$4 sm:$0xff]   ;;  %vm8293_vm0 = vcmask 1040384   ;;  %vm8296_vm1 = vcmask 1041408  }
 0x11a   : > { %v8477_v2 = vcombine.high %v11000_v0, %v11000_v0  ;;  %v8479_v3 = vcombine.high %v11005_v1, %v11005_v1  ;;  %v9065_v5 = vld [vmem:[%s11011_s7 + $0x174] ss:$8 sps:$4 sm:$0xff]   ;;  %7607 = vmatprep.subr.bf16.mxu0 %v9063_v4  ;;  %v9067_v6 = vld [vmem:[%s11011_s7 + $0x70] ss:$8 sps:$4 sm:$0xff]   ;;  %v9069_v8 = vld [vmem:[%s11011_s7 + $0x64] ss:$8 sps:$4 sm:$0xff]  }
 0x11b   : > { %v9068_v7 = vld [vmem:[%s11011_s7 + $0x170] ss:$8 sps:$4 sm:$0xff]   ;;  %7648 = vmatprep.subr.bf16.mxu1 %v9065_v5  ;;  %7608 = vmatpush1.bf16.msra.mxu0 %v9067_v6  ;;  %v9071_v9 = vld [vmem:[%s11011_s7 + $0x164] ss:$8 sps:$4 sm:$0xff]   ;;  %v9073_v10 = vld [vmem:[%s11011_s7 + $0x60] ss:$8 sps:$4 sm:$0xff]  }
 0x11c   : > { %7639 = vmatprep.mubr.bf16.mxu0 %v8477_v2  ;;  %7680 = vmatprep.mubr.bf16.mxu1 %v8479_v3  ;;  %v9074_v11 = vld [vmem:[%s11011_s7 + $0x160] ss:$8 sps:$4 sm:$0xff]   ;;  %v9075_v12 = vld [vmem:[%s11011_s7 + $0x54] ss:$8 sps:$4 sm:$0xff]   ;;  %v9079_v14 = vld [vmem:[%s11011_s7 + $0x50] ss:$8 sps:$4 sm:$0xff]  }
 0x11d   : > { %7649 = vmatpush1.bf16.msra.mxu1 %v9068_v7  ;;  %7609 = vmatprep.subr.bf16.mxu0 %v9069_v8  ;;  %v9077_v13 = vld [vmem:[%s11011_s7 + $0x154] ss:$8 sps:$4 sm:$0xff]   ;;  %v9080_v15 = vld [vmem:[%s11011_s7 + $0x150] ss:$8 sps:$4 sm:$0xff]   ;;  %v9081_v16 = vld [vmem:[%s11011_s7 + $0x44] ss:$8 sps:$4 sm:$0xff]  }
 0x11e   : > { %7650 = vmatprep.subr.bf16.mxu1 %v9071_v9  ;;  %v9083_v17 = vld [vmem:[%s11011_s7 + $0x144] ss:$8 sps:$4 sm:$0xff]   ;;  %v9085_v18 = vld [vmem:[%s11011_s7 + $0x40] ss:$8 sps:$4 sm:$0xff]   ;;  %v9087_v20 = vld [vmem:[%s11011_s7 + $0x34] ss:$8 sps:$4 sm:$0xff]  }
 0x11f   : > { %7610 = vmatpush1.bf16.msra.mxu0 %v9073_v10  ;;  %v9086_v19 = vld [vmem:[%s11011_s7 + $0x140] ss:$8 sps:$4 sm:$0xff]   ;;  %v9089_v21 = vld [vmem:[%s11011_s7 + $0x134] ss:$8 sps:$4 sm:$0xff]   ;;  %v9091_v22 = vld [vmem:[%s11011_s7 + $0x30] ss:$8 sps:$4 sm:$0xff]   ;;  %v8476_v10 = vcombine.low %v11000_v0, %v11000_v0 }
 0x120   : > { %7611 = vmatprep.subr.bf16.mxu0 %v9075_v12  ;;  %v9092_v23 = vld [vmem:[%s11011_s7 + $0x130] ss:$8 sps:$4 sm:$0xff]   ;;  %v9093_v24 = vld [vmem:[%s11011_s7 + $0x24] ss:$8 sps:$4 sm:$0xff]   ;;  %v9097_v26 = vld [vmem:[%s11011_s7 + $0x20] ss:$8 sps:$4 sm:$0xff]  }
 0x121   : > { %7651 = vmatpush1.bf16.msra.mxu1 %v9074_v11  ;;  %v9095_v25 = vld [vmem:[%s11011_s7 + $0x124] ss:$8 sps:$4 sm:$0xff]   ;;  %v9098_v27 = vld [vmem:[%s11011_s7 + $0x120] ss:$8 sps:$4 sm:$0xff]   ;;  %v9099_v28 = vld [vmem:[%s11011_s7 + $0x14] ss:$8 sps:$4 sm:$0xff]   ;;  %v8478_v11 = vcombine.low %v11005_v1, %v11005_v1 }
 0x122   : > { %7652 = vmatprep.subr.bf16.mxu1 %v9077_v13  ;;  %v9101_v29 = vld [vmem:[%s11011_s7 + $0x114] ss:$8 sps:$4 sm:$0xff]   ;;  %v9103_v30 = vld [vmem:[%s11011_s7 + $0x10] ss:$8 sps:$4 sm:$0xff]   ;;  %v9105_v32 = vld [vmem:[%s11011_s7 + $0x4] ss:$8 sps:$4 sm:$0xff]  }
 0x123   : > { %7612 = vmatpush1.bf16.msra.mxu0 %v9079_v14  ;;  %v9104_v31 = vld [vmem:[%s11011_s7 + $0x110] ss:$8 sps:$4 sm:$0xff]   ;;  %v9107_v33 = vld [vmem:[%s11011_s7 + $0x104] ss:$8 sps:$4 sm:$0xff]   ;;  %v9109_v34 = vld [vmem:[%s11011_s7] ss:$8 sps:$4 sm:$0xff]  }
 0x124   : > { %7613 = vmatprep.subr.bf16.mxu0 %v9081_v16  ;;  %v9110_v35 = vld [vmem:[%s11011_s7 + $0x100] ss:$8 sps:$4 sm:$0xff]   ;;  %v9111_v36 = vld [vmem:[%s11011_s7 + $0xf4] ss:$8 sps:$4 sm:$0xff]   ;;  %v9115_v38 = vld [vmem:[%s11011_s7 + $0xf0] ss:$8 sps:$4 sm:$0xff]  }
 0x125   : > { %7653 = vmatpush1.bf16.msra.mxu1 %v9080_v15  ;;  %v9113_v37 = vld [vmem:[%s11011_s7 + $0x1f4] ss:$8 sps:$4 sm:$0xff]   ;;  %v9116_v39 = vld [vmem:[%s11011_s7 + $0x1f0] ss:$8 sps:$4 sm:$0xff]   ;;  %v9117_v40 = vld [vmem:[%s11011_s7 + $0xe4] ss:$8 sps:$4 sm:$0xff]  }
 0x126   : > { %7654 = vmatprep.subr.bf16.mxu1 %v9083_v17  ;;  %v9119_v41 = vld [vmem:[%s11011_s7 + $0x1e4] ss:$8 sps:$4 sm:$0xff]   ;;  %v9121_v42 = vld [vmem:[%s11011_s7 + $0xe0] ss:$8 sps:$4 sm:$0xff]   ;;  %v9123_v44 = vld [vmem:[%s11011_s7 + $0xd4] ss:$8 sps:$4 sm:$0xff]  }
 0x127   : > { %7614 = vmatpush1.bf16.msra.mxu0 %v9085_v18  ;;  %v9122_v43 = vld [vmem:[%s11011_s7 + $0x1e0] ss:$8 sps:$4 sm:$0xff]   ;;  %v9125_v45 = vld [vmem:[%s11011_s7 + $0x1d4] ss:$8 sps:$4 sm:$0xff]   ;;  %v9127_v46 = vld [vmem:[%s11011_s7 + $0xd0] ss:$8 sps:$4 sm:$0xff]  }
 0x128   : > { %7615 = vmatprep.subr.bf16.mxu0 %v9087_v20  ;;  %v9128_v47 = vld [vmem:[%s11011_s7 + $0x1d0] ss:$8 sps:$4 sm:$0xff]   ;;  %v9129_v48 = vld [vmem:[%s11011_s7 + $0xc4] ss:$8 sps:$4 sm:$0xff]   ;;  %v9133_v50 = vld [vmem:[%s11011_s7 + $0xc0] ss:$8 sps:$4 sm:$0xff]  }
 0x129   : > { %7655 = vmatpush1.bf16.msra.mxu1 %v9086_v19  ;;  %v9131_v49 = vld [vmem:[%s11011_s7 + $0x1c4] ss:$8 sps:$4 sm:$0xff]   ;;  %v9134_v51 = vld [vmem:[%s11011_s7 + $0x1c0] ss:$8 sps:$4 sm:$0xff]   ;;  %v9135_v52 = vld [vmem:[%s11011_s7 + $0xb4] ss:$8 sps:$4 sm:$0xff]  }
 0x12a   : > { %7656 = vmatprep.subr.bf16.mxu1 %v9089_v21  ;;  %v9137_v53 = vld [vmem:[%s11011_s7 + $0x1b4] ss:$8 sps:$4 sm:$0xff]   ;;  %v9139_v54 = vld [vmem:[%s11011_s7 + $0xb0] ss:$8 sps:$4 sm:$0xff]   ;;  %v9141_v56 = vld [vmem:[%s11011_s7 + $0xa4] ss:$8 sps:$4 sm:$0xff]  }
 0x12b   : > { %7616 = vmatpush1.bf16.msra.mxu0 %v9091_v22  ;;  %v9140_v55 = vld [vmem:[%s11011_s7 + $0x1b0] ss:$8 sps:$4 sm:$0xff]   ;;  %v9143_v57 = vld [vmem:[%s11011_s7 + $0x1a4] ss:$8 sps:$4 sm:$0xff]   ;;  %v9145_v58 = vld [vmem:[%s11011_s7 + $0xa0] ss:$8 sps:$4 sm:$0xff]  }
 0x12c   : > { %7617 = vmatprep.subr.bf16.mxu0 %v9093_v24  ;;  %v9146_v59 = vld [vmem:[%s11011_s7 + $0x1a0] ss:$8 sps:$4 sm:$0xff]   ;;  %v9147_v60 = vld [vmem:[%s11011_s7 + $0x94] ss:$8 sps:$4 sm:$0xff]   ;;  %v9151_v62 = vld [vmem:[%s11011_s7 + $0x90] ss:$8 sps:$4 sm:$0xff]  }
 0x12d   : > { %7657 = vmatpush1.bf16.msra.mxu1 %v9092_v23  ;;  %v9149_v61 = vld [vmem:[%s11011_s7 + $0x194] ss:$8 sps:$4 sm:$0xff]   ;;  %v9152_v63 = vld [vmem:[%s11011_s7 + $0x190] ss:$8 sps:$4 sm:$0xff]   ;;  %v9153_v2 = vld [vmem:[%s11011_s7 + $0x84] ss:$8 sps:$4 sm:$0xff]  }
 0x12e   : > { %7658 = vmatprep.subr.bf16.mxu1 %v9095_v25  ;;  %v9155_v3 = vld [vmem:[%s11011_s7 + $0x184] ss:$8 sps:$4 sm:$0xff]   ;;  %v9157_v4 = vld [vmem:[%s11011_s7 + $0x80] ss:$8 sps:$4 sm:$0xff]   ;;  %v9165_v6 = vld [vmem:[%s11011_s7 + $0x274] ss:$8 sps:$4 sm:$0xff]  }
 0x12f   : > { %7618 = vmatpush1.bf16.msra.mxu0 %v9097_v26  ;;  %v9158_v5 = vld [vmem:[%s11011_s7 + $0x180] ss:$8 sps:$4 sm:$0xff]   ;;  %v9168_v7 = vld [vmem:[%s11011_s7 + $0x374] ss:$8 sps:$4 sm:$0xff]   ;;  %v9163_v12 = vld [vmem:[%s11011_s7 + $0x270] ss:$8 sps:$4 sm:$0xff]  }
 0x130   : > { %7619 = vmatprep.subr.bf16.mxu0 %v9099_v28  ;;  %v11082_v8 = vld [vmem:[%s11708_s0 + $0x10] sm:$0xff]  ;;  %v11087_v9 = vld [vmem:[%s11708_s0 + $0x18] sm:$0xff]  ;;  %v9171_v14 = vld [vmem:[%s11011_s7 + $0x264] ss:$8 sps:$4 sm:$0xff]  }
 0x131   : > { %7659 = vmatpush1.bf16.msra.mxu1 %v9098_v27  ;;  %v9166_v13 = vld [vmem:[%s11011_s7 + $0x370] ss:$8 sps:$4 sm:$0xff]   ;;  %v9174_v15 = vld [vmem:[%s11011_s7 + $0x364] ss:$8 sps:$4 sm:$0xff]   ;;  %v8481_v16 = vcombine.high %v11082_v8, %v11082_v8  ;;  %v8483_v0 = vcombine.high %v11087_v9, %v11087_v9  ;;  %v9169_v1 = vld [vmem:[%s11011_s7 + $0x260] ss:$8 sps:$4 sm:$0xff]  }
 0x132   : > { %7660 = vmatprep.subr.bf16.mxu1 %v9101_v29  ;;  %v9172_v17 = vld [vmem:[%s11011_s7 + $0x360] ss:$8 sps:$4 sm:$0xff]   ;;  %v9177_v18 = vld [vmem:[%s11011_s7 + $0x254] ss:$8 sps:$4 sm:$0xff]   ;;  %v9175_v20 = vld [vmem:[%s11011_s7 + $0x250] ss:$8 sps:$4 sm:$0xff]  }
 0x133   : > { %7620 = vmatpush1.bf16.msra.mxu0 %v9103_v30  ;;  %v9180_v19 = vld [vmem:[%s11011_s7 + $0x354] ss:$8 sps:$4 sm:$0xff]   ;;  %v9178_v21 = vld [vmem:[%s11011_s7 + $0x350] ss:$8 sps:$4 sm:$0xff]   ;;  %v9183_v22 = vld [vmem:[%s11011_s7 + $0x244] ss:$8 sps:$4 sm:$0xff]  }
 0x134   : > { %7621 = vmatprep.subr.bf16.mxu0 %v9105_v32  ;;  %v9186_v23 = vld [vmem:[%s11011_s7 + $0x344] ss:$8 sps:$4 sm:$0xff]   ;;  %v9181_v24 = vld [vmem:[%s11011_s7 + $0x240] ss:$8 sps:$4 sm:$0xff]   ;;  %v9189_v26 = vld [vmem:[%s11011_s7 + $0x234] ss:$8 sps:$4 sm:$0xff]  }
 0x135   : > { %7661 = vmatpush1.bf16.msra.mxu1 %v9104_v31  ;;  %v9184_v25 = vld [vmem:[%s11011_s7 + $0x340] ss:$8 sps:$4 sm:$0xff]   ;;  %v9192_v27 = vld [vmem:[%s11011_s7 + $0x334] ss:$8 sps:$4 sm:$0xff]   ;;  %v9187_v28 = vld [vmem:[%s11011_s7 + $0x230] ss:$8 sps:$4 sm:$0xff]  }
 0x136   : > { %7662 = vmatprep.subr.bf16.mxu1 %v9107_v33  ;;  %v9190_v29 = vld [vmem:[%s11011_s7 + $0x330] ss:$8 sps:$4 sm:$0xff]   ;;  %v9195_v30 = vld [vmem:[%s11011_s7 + $0x224] ss:$8 sps:$4 sm:$0xff]   ;;  %v9193_v32 = vld [vmem:[%s11011_s7 + $0x220] ss:$8 sps:$4 sm:$0xff]  }
 0x137   : > { %7622 = vmatpush1.bf16.msra.mxu0 %v9109_v34  ;;  %v9198_v31 = vld [vmem:[%s11011_s7 + $0x324] ss:$8 sps:$4 sm:$0xff]   ;;  %v9196_v33 = vld [vmem:[%s11011_s7 + $0x320] ss:$8 sps:$4 sm:$0xff]   ;;  %v9201_v34 = vld [vmem:[%s11011_s7 + $0x214] ss:$8 sps:$4 sm:$0xff]  }
 0x138   : > { %7623 = vmatprep.subr.bf16.mxu0 %v9111_v36  ;;  %v9199_v36 = vld [vmem:[%s11011_s7 + $0x210] ss:$8 sps:$4 sm:$0xff]  }
 0x139   : > { %7663 = vmatpush1.bf16.msra.mxu1 %v9110_v35  ;;  %v9204_v35 = vld [vmem:[%s11011_s7 + $0x314] ss:$8 sps:$4 sm:$0xff]  }
 0x13a   : > { %7664 = vmatprep.subr.bf16.mxu1 %v9113_v37  ;;  %v9202_v37 = vld [vmem:[%s11011_s7 + $0x310] ss:$8 sps:$4 sm:$0xff]  }
 0x13b   : > { %7624 = vmatpush2.bf16.msra.mxu0 %v9115_v38  ;;  %v9207_v38 = vld [vmem:[%s11011_s7 + $0x204] ss:$8 sps:$4 sm:$0xff]  }
 0x13c   : > { %7625 = vmatprep.subr.bf16.mxu0 %v9117_v40  ;;  %v9205_v40 = vld [vmem:[%s11011_s7 + $0x200] ss:$8 sps:$4 sm:$0xff]  }
 0x13d   : > { %7665 = vmatpush2.bf16.msra.mxu1 %v9116_v39  ;;  %v9210_v39 = vld [vmem:[%s11011_s7 + $0x304] ss:$8 sps:$4 sm:$0xff]  }
 0x13e   : > { %7666 = vmatprep.subr.bf16.mxu1 %v9119_v41  ;;  %v9208_v41 = vld [vmem:[%s11011_s7 + $0x300] ss:$8 sps:$4 sm:$0xff]  }
 0x13f   : > { %7626 = vmatpush2.bf16.msra.mxu0 %v9121_v42  ;;  %v9213_v42 = vld [vmem:[%s11011_s7 + $0x2f4] ss:$8 sps:$4 sm:$0xff]  }
 0x140   : > { %7627 = vmatprep.subr.bf16.mxu0 %v9123_v44  ;;  %v9211_v44 = vld [vmem:[%s11011_s7 + $0x2f0] ss:$8 sps:$4 sm:$0xff]  }
 0x141   : > { %7667 = vmatpush2.bf16.msra.mxu1 %v9122_v43  ;;  %v9216_v43 = vld [vmem:[%s11011_s7 + $0x3f4] ss:$8 sps:$4 sm:$0xff]  }
 0x142   : > { %7668 = vmatprep.subr.bf16.mxu1 %v9125_v45  ;;  %v9214_v45 = vld [vmem:[%s11011_s7 + $0x3f0] ss:$8 sps:$4 sm:$0xff]  }
 0x143   : > { %7628 = vmatpush2.bf16.msra.mxu0 %v9127_v46  ;;  %v9219_v46 = vld [vmem:[%s11011_s7 + $0x2e4] ss:$8 sps:$4 sm:$0xff]  }
 0x144   : > { %7629 = vmatprep.subr.bf16.mxu0 %v9129_v48  ;;  %v9217_v48 = vld [vmem:[%s11011_s7 + $0x2e0] ss:$8 sps:$4 sm:$0xff]  }
 0x145   : > { %7669 = vmatpush2.bf16.msra.mxu1 %v9128_v47  ;;  %v9222_v47 = vld [vmem:[%s11011_s7 + $0x3e4] ss:$8 sps:$4 sm:$0xff]  }
 0x146   : > { %7670 = vmatprep.subr.bf16.mxu1 %v9131_v49  ;;  %v9220_v49 = vld [vmem:[%s11011_s7 + $0x3e0] ss:$8 sps:$4 sm:$0xff]  }
 0x147   : > { %7630 = vmatpush2.bf16.msra.mxu0 %v9133_v50  ;;  %v9225_v50 = vld [vmem:[%s11011_s7 + $0x2d4] ss:$8 sps:$4 sm:$0xff]  }
 0x148   : > { %7631 = vmatprep.subr.bf16.mxu0 %v9135_v52  ;;  %v9223_v52 = vld [vmem:[%s11011_s7 + $0x2d0] ss:$8 sps:$4 sm:$0xff]  }
 0x149   : > { %7671 = vmatpush2.bf16.msra.mxu1 %v9134_v51  ;;  %v9228_v51 = vld [vmem:[%s11011_s7 + $0x3d4] ss:$8 sps:$4 sm:$0xff]  }
 0x14a   : > { %7672 = vmatprep.subr.bf16.mxu1 %v9137_v53  ;;  %v9226_v53 = vld [vmem:[%s11011_s7 + $0x3d0] ss:$8 sps:$4 sm:$0xff]  }
 0x14b   : > { %7632 = vmatpush2.bf16.msra.mxu0 %v9139_v54  ;;  %v9231_v54 = vld [vmem:[%s11011_s7 + $0x2c4] ss:$8 sps:$4 sm:$0xff]  }
 0x14c   : > { %7633 = vmatprep.subr.bf16.mxu0 %v9141_v56  ;;  %v9229_v56 = vld [vmem:[%s11011_s7 + $0x2c0] ss:$8 sps:$4 sm:$0xff]  }
 0x14d   : > { %7673 = vmatpush2.bf16.msra.mxu1 %v9140_v55  ;;  %v9234_v55 = vld [vmem:[%s11011_s7 + $0x3c4] ss:$8 sps:$4 sm:$0xff]  }
 0x14e   : > { %7674 = vmatprep.subr.bf16.mxu1 %v9143_v57  ;;  %v9232_v57 = vld [vmem:[%s11011_s7 + $0x3c0] ss:$8 sps:$4 sm:$0xff]  }
 0x14f   : > { %7634 = vmatpush2.bf16.msra.mxu0 %v9145_v58  ;;  %v9237_v58 = vld [vmem:[%s11011_s7 + $0x2b4] ss:$8 sps:$4 sm:$0xff]  }
 0x150   : > { %7635 = vmatprep.subr.bf16.mxu0 %v9147_v60  ;;  %v9235_v60 = vld [vmem:[%s11011_s7 + $0x2b0] ss:$8 sps:$4 sm:$0xff]  }
 0x151   : > { %7675 = vmatpush2.bf16.msra.mxu1 %v9146_v59  ;;  %v9240_v59 = vld [vmem:[%s11011_s7 + $0x3b4] ss:$8 sps:$4 sm:$0xff]  }
 0x152   : > { %7676 = vmatprep.subr.bf16.mxu1 %v9149_v61  ;;  %v9238_v61 = vld [vmem:[%s11011_s7 + $0x3b0] ss:$8 sps:$4 sm:$0xff]  }
 0x153   : > { %7636 = vmatpush2.bf16.msra.mxu0 %v9151_v62  ;;  %v9243_v62 = vld [vmem:[%s11011_s7 + $0x2a4] ss:$8 sps:$4 sm:$0xff]  }
 0x154   : > { %7637 = vmatprep.subr.bf16.mxu0 %v9153_v2  ;;  %v9241_v2 = vld [vmem:[%s11011_s7 + $0x2a0] ss:$8 sps:$4 sm:$0xff]  }
 0x155   : > { %7677 = vmatpush2.bf16.msra.mxu1 %v9152_v63  ;;  %v9246_v63 = vld [vmem:[%s11011_s7 + $0x3a4] ss:$8 sps:$4 sm:$0xff]  }
 0x156   : > { %7678 = vmatprep.subr.bf16.mxu1 %v9155_v3  ;;  %v9244_v3 = vld [vmem:[%s11011_s7 + $0x3a0] ss:$8 sps:$4 sm:$0xff]  }
 0x157   : > { %7638 = vmatpush2.bf16.msra.mxu0 %v9157_v4  ;;  %v9249_v4 = vld [vmem:[%s11011_s7 + $0x294] ss:$8 sps:$4 sm:$0xff]  }
 0x158   : > { %7689 = vmatprep.subr.bf16.mxu0 %v9165_v6  ;;  %v9247_v6 = vld [vmem:[%s11011_s7 + $0x290] ss:$8 sps:$4 sm:$0xff]  }
 0x159   : > { %7679 = vmatpush2.bf16.msra.mxu1 %v9158_v5  ;;  %v9252_v5 = vld [vmem:[%s11011_s7 + $0x394] ss:$8 sps:$4 sm:$0xff]  }
 0x15a   : > { %7730 = vmatprep.subr.bf16.mxu1 %v9168_v7  ;;  %7640 = vmatmul.mubr.bf16.vlgmr.msra.gmra.mxu0 %v8476_v10  ;;  %v9250_v7 = vld [vmem:[%s11011_s7 + $0x390] ss:$8 sps:$4 sm:$0xff]   ;;  %v9255_v10 = vld [vmem:[%s11011_s7 + $0x284] ss:$8 sps:$4 sm:$0xff]  }
 0x15b   : > { %7690 = vmatpush1.bf16.msra.mxu0 %v9163_v12  ;;  %7721 = vmatprep.mubr.bf16.mxu0 %v8481_v16  ;;  %v9253_v12 = vld [vmem:[%s11011_s7 + $0x280] ss:$8 sps:$4 sm:$0xff]   ;;  %v8480_v16 = vcombine.low %v11082_v8, %v11082_v8  ;;  %v9271_v8 = vld [vmem:[%s11011_s7 + $0x464] ss:$8 sps:$4 sm:$0xff]  }
 0x15c   : > { %7681 = vmatmul.mubr.bf16.vlgmr.msra.gmra.mxu1 %v8478_v11  ;;  %7691 = vmatprep.subr.bf16.mxu0 %v9171_v14  ;;  %v9258_v11 = vld [vmem:[%s11011_s7 + $0x384] ss:$8 sps:$4 sm:$0xff]   ;;  %v9265_v14 = vld [vmem:[%s11011_s7 + $0x474] ss:$8 sps:$4 sm:$0xff]  }
 0x15d   : > { %7731 = vmatpush1.bf16.msra.mxu1 %v9166_v13  ;;  %7762 = vmatprep.mubr.bf16.mxu1 %v8483_v0  ;;  %v9256_v13 = vld [vmem:[%s11011_s7 + $0x380] ss:$8 sps:$4 sm:$0xff]   ;;  %v8482_v0 = vcombine.low %v11087_v9, %v11087_v9  ;;  %v9274_v9 = vld [vmem:[%s11011_s7 + $0x564] ss:$8 sps:$4 sm:$0xff]  }
 0x15e   : > { %7732 = vmatprep.subr.bf16.mxu1 %v9174_v15  ;;  %v9268_v15 = vld [vmem:[%s11011_s7 + $0x574] ss:$8 sps:$4 sm:$0xff]  }
 0x15f   : > { %7692 = vmatpush1.bf16.msra.mxu0 %v9169_v1  ;;  %v9263_v1 = vld [vmem:[%s11011_s7 + $0x470] ss:$8 sps:$4 sm:$0xff]  }
 0x160   : > { %7693 = vmatprep.subr.bf16.mxu0 %v9177_v18  ;;  %v11170_v18 = vld [vmem:[%s11708_s0 + $0x20] sm:$0xff] }
 0x161   : > { %7733 = vmatpush1.bf16.msra.mxu1 %v9172_v17  ;;  %v9266_v17 = vld [vmem:[%s11011_s7 + $0x570] ss:$8 sps:$4 sm:$0xff]  }
 0x162   : > { %7734 = vmatprep.subr.bf16.mxu1 %v9180_v19  ;;  %v11175_v19 = vld [vmem:[%s11708_s0 + $0x28] sm:$0xff] }
 0x163   : > { %7694 = vmatpush1.bf16.msra.mxu0 %v9175_v20  ;;  %v8485_v20 = vcombine.high %v11170_v18, %v11170_v18 }
 0x164   : > { %7695 = vmatprep.subr.bf16.mxu0 %v9183_v22  ;;  %v9269_v22 = vld [vmem:[%s11011_s7 + $0x460] ss:$8 sps:$4 sm:$0xff]  }
 0x165   : > { %7735 = vmatpush1.bf16.msra.mxu1 %v9178_v21  ;;  %v8487_v21 = vcombine.high %v11175_v19, %v11175_v19 }
 0x166   : > { %7736 = vmatprep.subr.bf16.mxu1 %v9186_v23  ;;  %v9272_v23 = vld [vmem:[%s11011_s7 + $0x560] ss:$8 sps:$4 sm:$0xff]  }
 0x167   : > { %7696 = vmatpush1.bf16.msra.mxu0 %v9181_v24  ;;  %v9277_v24 = vld [vmem:[%s11011_s7 + $0x454] ss:$8 sps:$4 sm:$0xff]  }
 0x168   : > { %7697 = vmatprep.subr.bf16.mxu0 %v9189_v26  ;;  %v9275_v26 = vld [vmem:[%s11011_s7 + $0x450] ss:$8 sps:$4 sm:$0xff]  }
 0x169   : > { %7737 = vmatpush1.bf16.msra.mxu1 %v9184_v25  ;;  %v9280_v25 = vld [vmem:[%s11011_s7 + $0x554] ss:$8 sps:$4 sm:$0xff]  }
 0x16a   : > { %7738 = vmatprep.subr.bf16.mxu1 %v9192_v27  ;;  %v9278_v27 = vld [vmem:[%s11011_s7 + $0x550] ss:$8 sps:$4 sm:$0xff]  }
 0x16b   : > { %7698 = vmatpush1.bf16.msra.mxu0 %v9187_v28  ;;  %v9283_v28 = vld [vmem:[%s11011_s7 + $0x444] ss:$8 sps:$4 sm:$0xff]  }
 0x16c   : > { %7699 = vmatprep.subr.bf16.mxu0 %v9195_v30  ;;  %v9281_v30 = vld [vmem:[%s11011_s7 + $0x440] ss:$8 sps:$4 sm:$0xff]  }
 0x16d   : > { %7739 = vmatpush1.bf16.msra.mxu1 %v9190_v29  ;;  %v9286_v29 = vld [vmem:[%s11011_s7 + $0x544] ss:$8 sps:$4 sm:$0xff]  }
 0x16e   : > { %7740 = vmatprep.subr.bf16.mxu1 %v9198_v31  ;;  %v9284_v31 = vld [vmem:[%s11011_s7 + $0x540] ss:$8 sps:$4 sm:$0xff]  }
 0x16f   : > { %7700 = vmatpush1.bf16.msra.mxu0 %v9193_v32  ;;  %v9289_v32 = vld [vmem:[%s11011_s7 + $0x434] ss:$8 sps:$4 sm:$0xff]  }
 0x170   : > { %7701 = vmatprep.subr.bf16.mxu0 %v9201_v34  ;;  %v9287_v34 = vld [vmem:[%s11011_s7 + $0x430] ss:$8 sps:$4 sm:$0xff]  }
 0x171   : > { %7741 = vmatpush1.bf16.msra.mxu1 %v9196_v33  ;;  %v9292_v33 = vld [vmem:[%s11011_s7 + $0x534] ss:$8 sps:$4 sm:$0xff]  }
 0x172   : > { %7742 = vmatprep.subr.bf16.mxu1 %v9204_v35  ;;  %v9290_v35 = vld [vmem:[%s11011_s7 + $0x530] ss:$8 sps:$4 sm:$0xff]  }
 0x173   : > { %7702 = vmatpush1.bf16.msra.mxu0 %v9199_v36  ;;  %v9295_v36 = vld [vmem:[%s11011_s7 + $0x424] ss:$8 sps:$4 sm:$0xff]  }
 0x174   : > { %7703 = vmatprep.subr.bf16.mxu0 %v9207_v38  ;;  %v9293_v38 = vld [vmem:[%s11011_s7 + $0x420] ss:$8 sps:$4 sm:$0xff]  }
 0x175   : > { %7743 = vmatpush1.bf16.msra.mxu1 %v9202_v37  ;;  %v9298_v37 = vld [vmem:[%s11011_s7 + $0x524] ss:$8 sps:$4 sm:$0xff]  }
 0x176   : > { %7744 = vmatprep.subr.bf16.mxu1 %v9210_v39  ;;  %v9296_v39 = vld [vmem:[%s11011_s7 + $0x520] ss:$8 sps:$4 sm:$0xff]  }
 0x177   : > { %7704 = vmatpush1.bf16.msra.mxu0 %v9205_v40  ;;  %v9301_v40 = vld [vmem:[%s11011_s7 + $0x414] ss:$8 sps:$4 sm:$0xff]  }
 0x178   : > { %7705 = vmatprep.subr.bf16.mxu0 %v9213_v42  ;;  %v9299_v42 = vld [vmem:[%s11011_s7 + $0x410] ss:$8 sps:$4 sm:$0xff]  }
 0x179   : > { %7745 = vmatpush1.bf16.msra.mxu1 %v9208_v41  ;;  %v9304_v41 = vld [vmem:[%s11011_s7 + $0x514] ss:$8 sps:$4 sm:$0xff]  }
 0x17a   : > { %7746 = vmatprep.subr.bf16.mxu1 %v9216_v43  ;;  %v9302_v43 = vld [vmem:[%s11011_s7 + $0x510] ss:$8 sps:$4 sm:$0xff]  }
 0x17b   : > { %7706 = vmatpush2.bf16.msra.mxu0 %v9211_v44  ;;  %v9307_v44 = vld [vmem:[%s11011_s7 + $0x404] ss:$8 sps:$4 sm:$0xff]  }
 0x17c   : > { %7707 = vmatprep.subr.bf16.mxu0 %v9219_v46  ;;  %v9305_v46 = vld [vmem:[%s11011_s7 + $0x400] ss:$8 sps:$4 sm:$0xff]  }
 0x17d   : > { %7747 = vmatpush2.bf16.msra.mxu1 %v9214_v45  ;;  %v9310_v45 = vld [vmem:[%s11011_s7 + $0x504] ss:$8 sps:$4 sm:$0xff]  }
 0x17e   : > { %7748 = vmatprep.subr.bf16.mxu1 %v9222_v47  ;;  %v9308_v47 = vld [vmem:[%s11011_s7 + $0x500] ss:$8 sps:$4 sm:$0xff]  }
 0x17f   : > { %7708 = vmatpush2.bf16.msra.mxu0 %v9217_v48  ;;  %v9313_v48 = vld [vmem:[%s11011_s7 + $0x4f4] ss:$8 sps:$4 sm:$0xff]  }
 0x180   : > { %7709 = vmatprep.subr.bf16.mxu0 %v9225_v50  ;;  %v9311_v50 = vld [vmem:[%s11011_s7 + $0x4f0] ss:$8 sps:$4 sm:$0xff]  }
 0x181   : > { %7749 = vmatpush2.bf16.msra.mxu1 %v9220_v49  ;;  %v9316_v49 = vld [vmem:[%s11011_s7 + $0x5f4] ss:$8 sps:$4 sm:$0xff]  }
 0x182   : > { %7750 = vmatprep.subr.bf16.mxu1 %v9228_v51  ;;  %v9314_v51 = vld [vmem:[%s11011_s7 + $0x5f0] ss:$8 sps:$4 sm:$0xff]  }
 0x183   : > { %7710 = vmatpush2.bf16.msra.mxu0 %v9223_v52  ;;  %v9319_v52 = vld [vmem:[%s11011_s7 + $0x4e4] ss:$8 sps:$4 sm:$0xff]  }
 0x184   : > { %7711 = vmatprep.subr.bf16.mxu0 %v9231_v54  ;;  %v9317_v54 = vld [vmem:[%s11011_s7 + $0x4e0] ss:$8 sps:$4 sm:$0xff]  }
 0x185   : > { %7751 = vmatpush2.bf16.msra.mxu1 %v9226_v53  ;;  %v9322_v53 = vld [vmem:[%s11011_s7 + $0x5e4] ss:$8 sps:$4 sm:$0xff]  }
 0x186   : > { %7752 = vmatprep.subr.bf16.mxu1 %v9234_v55  ;;  %v9320_v55 = vld [vmem:[%s11011_s7 + $0x5e0] ss:$8 sps:$4 sm:$0xff]  }
 0x187   : > { %7712 = vmatpush2.bf16.msra.mxu0 %v9229_v56  ;;  %v9325_v56 = vld [vmem:[%s11011_s7 + $0x4d4] ss:$8 sps:$4 sm:$0xff]  }
 0x188   : > { %7713 = vmatprep.subr.bf16.mxu0 %v9237_v58  ;;  %v9323_v58 = vld [vmem:[%s11011_s7 + $0x4d0] ss:$8 sps:$4 sm:$0xff]  }
 0x189   : > { %7753 = vmatpush2.bf16.msra.mxu1 %v9232_v57  ;;  %v9328_v57 = vld [vmem:[%s11011_s7 + $0x5d4] ss:$8 sps:$4 sm:$0xff]  }
 0x18a   : > { %7754 = vmatprep.subr.bf16.mxu1 %v9240_v59  ;;  %v9326_v59 = vld [vmem:[%s11011_s7 + $0x5d0] ss:$8 sps:$4 sm:$0xff]  }
 0x18b   : > { %7714 = vmatpush2.bf16.msra.mxu0 %v9235_v60  ;;  %v9331_v60 = vld [vmem:[%s11011_s7 + $0x4c4] ss:$8 sps:$4 sm:$0xff]  }
 0x18c   : > { %7715 = vmatprep.subr.bf16.mxu0 %v9243_v62  ;;  %v9329_v62 = vld [vmem:[%s11011_s7 + $0x4c0] ss:$8 sps:$4 sm:$0xff]  }
 0x18d   : > { %7755 = vmatpush2.bf16.msra.mxu1 %v9238_v61  ;;  %v9334_v61 = vld [vmem:[%s11011_s7 + $0x5c4] ss:$8 sps:$4 sm:$0xff]  }
 0x18e   : > { %7756 = vmatprep.subr.bf16.mxu1 %v9246_v63  ;;  %v9332_v63 = vld [vmem:[%s11011_s7 + $0x5c0] ss:$8 sps:$4 sm:$0xff]  }
 0x18f   : > { %7716 = vmatpush2.bf16.msra.mxu0 %v9241_v2  ;;  %v9337_v2 = vld [vmem:[%s11011_s7 + $0x4b4] ss:$8 sps:$4 sm:$0xff]  }
 0x190   : > { %7717 = vmatprep.subr.bf16.mxu0 %v9249_v4  ;;  %v9335_v4 = vld [vmem:[%s11011_s7 + $0x4b0] ss:$8 sps:$4 sm:$0xff]  }
 0x191   : > { %7757 = vmatpush2.bf16.msra.mxu1 %v9244_v3  ;;  %v9340_v3 = vld [vmem:[%s11011_s7 + $0x5b4] ss:$8 sps:$4 sm:$0xff]  }
 0x192   : > { %7758 = vmatprep.subr.bf16.mxu1 %v9252_v5  ;;  %v9338_v5 = vld [vmem:[%s11011_s7 + $0x5b0] ss:$8 sps:$4 sm:$0xff]  }
 0x193   : > { %7718 = vmatpush2.bf16.msra.mxu0 %v9247_v6  ;;  %v9343_v6 = vld [vmem:[%s11011_s7 + $0x4a4] ss:$8 sps:$4 sm:$0xff]  }
 0x194   : > { %7719 = vmatprep.subr.bf16.mxu0 %v9255_v10  ;;  %v9341_v10 = vld [vmem:[%s11011_s7 + $0x4a0] ss:$8 sps:$4 sm:$0xff]  }
 0x195   : > { %7759 = vmatpush2.bf16.msra.mxu1 %v9250_v7  ;;  %v9346_v7 = vld [vmem:[%s11011_s7 + $0x5a4] ss:$8 sps:$4 sm:$0xff]  }
 0x196   : > { %7760 = vmatprep.subr.bf16.mxu1 %v9258_v11  ;;  %v9344_v11 = vld [vmem:[%s11011_s7 + $0x5a0] ss:$8 sps:$4 sm:$0xff]  }
 0x197   : > { %7720 = vmatpush2.bf16.msra.mxu0 %v9253_v12  ;;  %v9349_v12 = vld [vmem:[%s11011_s7 + $0x494] ss:$8 sps:$4 sm:$0xff]  }
 0x198   : > { %7771 = vmatprep.subr.bf16.mxu0 %v9265_v14  ;;  %v9347_v14 = vld [vmem:[%s11011_s7 + $0x490] ss:$8 sps:$4 sm:$0xff]  }
 0x199   : > { %7761 = vmatpush2.bf16.msra.mxu1 %v9256_v13  ;;  %v9352_v13 = vld [vmem:[%s11011_s7 + $0x594] ss:$8 sps:$4 sm:$0xff]  }
 0x19a   : > { %7812 = vmatprep.subr.bf16.mxu1 %v9268_v15  ;;  %7722 = vmatmul.mubr.bf16.vlgmr.msra.gmra.mxu0 %v8480_v16  ;;  %v9350_v15 = vld [vmem:[%s11011_s7 + $0x590] ss:$8 sps:$4 sm:$0xff]   ;;  %v9355_v16 = vld [vmem:[%s11011_s7 + $0x484] ss:$8 sps:$4 sm:$0xff]  }
 0x19b   : > { %7772 = vmatpush1.bf16.msra.mxu0 %v9263_v1  ;;  %7803 = vmatprep.mubr.bf16.mxu0 %v8485_v20  ;;  %v9353_v1 = vld [vmem:[%s11011_s7 + $0x480] ss:$8 sps:$4 sm:$0xff]   ;;  %v9363_v20 = vld [vmem:[%s11011_s7 + $0x670] ss:$8 sps:$4 sm:$0xff]  }
 0x19c   : > { %7763 = vmatmul.mubr.bf16.vlgmr.msra.gmra.mxu1 %v8482_v0  ;;  %7773 = vmatprep.subr.bf16.mxu0 %v9271_v8  ;;  %v9358_v0 = vld [vmem:[%s11011_s7 + $0x584] ss:$8 sps:$4 sm:$0xff]   ;;  %v9365_v8 = vld [vmem:[%s11011_s7 + $0x674] ss:$8 sps:$4 sm:$0xff]  }
 0x19d   : > { %7813 = vmatpush1.bf16.msra.mxu1 %v9266_v17  ;;  %7844 = vmatprep.mubr.bf16.mxu1 %v8487_v21  ;;  %v9356_v17 = vld [vmem:[%s11011_s7 + $0x580] ss:$8 sps:$4 sm:$0xff]   ;;  %v9366_v21 = vld [vmem:[%s11011_s7 + $0x770] ss:$8 sps:$4 sm:$0xff]  }
 0x19e   : > { %7814 = vmatprep.subr.bf16.mxu1 %v9274_v9  ;;  %v9368_v9 = vld [vmem:[%s11011_s7 + $0x774] ss:$8 sps:$4 sm:$0xff]  }
 0x19f   : > { %7774 = vmatpush1.bf16.msra.mxu0 %v9269_v22  ;;  %v8484_v22 = vcombine.low %v11170_v18, %v11170_v18  ;;  %v9374_v18 = vld [vmem:[%s11011_s7 + $0x764] ss:$8 sps:$4 sm:$0xff]  }
 0x1a0   : > { %7775 = vmatprep.subr.bf16.mxu0 %v9277_v24  ;;  %v11252_v24 = vld [vmem:[%s11708_s0 + $0x30] sm:$0xff] }
 0x1a1   : > { %7815 = vmatpush1.bf16.msra.mxu1 %v9272_v23  ;;  %v8486_v23 = vcombine.low %v11175_v19, %v11175_v19  ;;  %v8489_v19 = vcombine.high %v11252_v24, %v11252_v24 }
 0x1a2   : > { %7816 = vmatprep.subr.bf16.mxu1 %v9280_v25  ;;  %v11257_v25 = vld [vmem:[%s11708_s0 + $0x38] sm:$0xff] }
 0x1a3   : > { %7776 = vmatpush1.bf16.msra.mxu0 %v9275_v26  ;;  %v9371_v26 = vld [vmem:[%s11011_s7 + $0x664] ss:$8 sps:$4 sm:$0xff]  }
 0x1a4   : > { %7777 = vmatprep.subr.bf16.mxu0 %v9283_v28  ;;  %v9369_v28 = vld [vmem:[%s11011_s7 + $0x660] ss:$8 sps:$4 sm:$0xff]  }
 0x1a5   : > { %7817 = vmatpush1.bf16.msra.mxu1 %v9278_v27  ;;  %v8491_v27 = vcombine.high %v11257_v25, %v11257_v25 }
 0x1a6   : > { %7818 = vmatprep.subr.bf16.mxu1 %v9286_v29  ;;  %v9372_v29 = vld [vmem:[%s11011_s7 + $0x760] ss:$8 sps:$4 sm:$0xff]  }
 0x1a7   : > { %7778 = vmatpush1.bf16.msra.mxu0 %v9281_v30  ;;  %v9377_v30 = vld [vmem:[%s11011_s7 + $0x654] ss:$8 sps:$4 sm:$0xff]  }
 0x1a8   : > { %7779 = vmatprep.subr.bf16.mxu0 %v9289_v32  ;;  %v9375_v32 = vld [vmem:[%s11011_s7 + $0x650] ss:$8 sps:$4 sm:$0xff]  }
 0x1a9   : > { %7819 = vmatpush1.bf16.msra.mxu1 %v9284_v31  ;;  %v9380_v31 = vld [vmem:[%s11011_s7 + $0x754] ss:$8 sps:$4 sm:$0xff]  }
 0x1aa   : > { %7820 = vmatprep.subr.bf16.mxu1 %v9292_v33  ;;  %v9378_v33 = vld [vmem:[%s11011_s7 + $0x750] ss:$8 sps:$4 sm:$0xff]  }
 0x1ab   : > { %7780 = vmatpush1.bf16.msra.mxu0 %v9287_v34  ;;  %v9383_v34 = vld [vmem:[%s11011_s7 + $0x644] ss:$8 sps:$4 sm:$0xff]  }
 0x1ac   : > { %7781 = vmatprep.subr.bf16.mxu0 %v9295_v36  ;;  %v9381_v36 = vld [vmem:[%s11011_s7 + $0x640] ss:$8 sps:$4 sm:$0xff]  }
 0x1ad   : > { %7821 = vmatpush1.bf16.msra.mxu1 %v9290_v35  ;;  %v9386_v35 = vld [vmem:[%s11011_s7 + $0x744] ss:$8 sps:$4 sm:$0xff]  }
 0x1ae   : > { %7822 = vmatprep.subr.bf16.mxu1 %v9298_v37  ;;  %v9384_v37 = vld [vmem:[%s11011_s7 + $0x740] ss:$8 sps:$4 sm:$0xff]  }
 0x1af   : > { %7782 = vmatpush1.bf16.msra.mxu0 %v9293_v38  ;;  %v9389_v38 = vld [vmem:[%s11011_s7 + $0x634] ss:$8 sps:$4 sm:$0xff]  }
 0x1b0   : > { %7783 = vmatprep.subr.bf16.mxu0 %v9301_v40  ;;  %v9387_v40 = vld [vmem:[%s11011_s7 + $0x630] ss:$8 sps:$4 sm:$0xff]  }
 0x1b1   : > { %7823 = vmatpush1.bf16.msra.mxu1 %v9296_v39  ;;  %v9392_v39 = vld [vmem:[%s11011_s7 + $0x734] ss:$8 sps:$4 sm:$0xff]  }
 0x1b2   : > { %7824 = vmatprep.subr.bf16.mxu1 %v9304_v41  ;;  %v9390_v41 = vld [vmem:[%s11011_s7 + $0x730] ss:$8 sps:$4 sm:$0xff]  }
 0x1b3   : > { %7784 = vmatpush1.bf16.msra.mxu0 %v9299_v42  ;;  %v9395_v42 = vld [vmem:[%s11011_s7 + $0x624] ss:$8 sps:$4 sm:$0xff]  }
 0x1b4   : > { %7785 = vmatprep.subr.bf16.mxu0 %v9307_v44  ;;  %v9393_v44 = vld [vmem:[%s11011_s7 + $0x620] ss:$8 sps:$4 sm:$0xff]  }
 0x1b5   : > { %7825 = vmatpush1.bf16.msra.mxu1 %v9302_v43  ;;  %v9398_v43 = vld [vmem:[%s11011_s7 + $0x724] ss:$8 sps:$4 sm:$0xff]  }
 0x1b6   : > { %7826 = vmatprep.subr.bf16.mxu1 %v9310_v45  ;;  %v9396_v45 = vld [vmem:[%s11011_s7 + $0x720] ss:$8 sps:$4 sm:$0xff]  }
 0x1b7   : > { %7786 = vmatpush1.bf16.msra.mxu0 %v9305_v46  ;;  %v9401_v46 = vld [vmem:[%s11011_s7 + $0x614] ss:$8 sps:$4 sm:$0xff]  }
 0x1b8   : > { %7787 = vmatprep.subr.bf16.mxu0 %v9313_v48  ;;  %v9399_v48 = vld [vmem:[%s11011_s7 + $0x610] ss:$8 sps:$4 sm:$0xff]  }
 0x1b9   : > { %7827 = vmatpush1.bf16.msra.mxu1 %v9308_v47  ;;  %v9404_v47 = vld [vmem:[%s11011_s7 + $0x714] ss:$8 sps:$4 sm:$0xff]  }
 0x1ba   : > { %7828 = vmatprep.subr.bf16.mxu1 %v9316_v49  ;;  %v9402_v49 = vld [vmem:[%s11011_s7 + $0x710] ss:$8 sps:$4 sm:$0xff]  }
 0x1bb   : > { %7788 = vmatpush2.bf16.msra.mxu0 %v9311_v50  ;;  %v9407_v50 = vld [vmem:[%s11011_s7 + $0x604] ss:$8 sps:$4 sm:$0xff]  }
 0x1bc   : > { %7789 = vmatprep.subr.bf16.mxu0 %v9319_v52  ;;  %v9405_v52 = vld [vmem:[%s11011_s7 + $0x600] ss:$8 sps:$4 sm:$0xff]  }
 0x1bd   : > { %7829 = vmatpush2.bf16.msra.mxu1 %v9314_v51  ;;  %v9410_v51 = vld [vmem:[%s11011_s7 + $0x704] ss:$8 sps:$4 sm:$0xff]  }
 0x1be   : > { %7830 = vmatprep.subr.bf16.mxu1 %v9322_v53  ;;  %v9408_v53 = vld [vmem:[%s11011_s7 + $0x700] ss:$8 sps:$4 sm:$0xff]  }
 0x1bf   : > { %7790 = vmatpush2.bf16.msra.mxu0 %v9317_v54  ;;  %v9413_v54 = vld [vmem:[%s11011_s7 + $0x6f4] ss:$8 sps:$4 sm:$0xff]  }
 0x1c0   : > { %7791 = vmatprep.subr.bf16.mxu0 %v9325_v56  ;;  %v9411_v56 = vld [vmem:[%s11011_s7 + $0x6f0] ss:$8 sps:$4 sm:$0xff]  }
 0x1c1   : > { %7831 = vmatpush2.bf16.msra.mxu1 %v9320_v55  ;;  %v9416_v55 = vld [vmem:[%s11011_s7 + $0x7f4] ss:$8 sps:$4 sm:$0xff]  }
 0x1c2   : > { %7832 = vmatprep.subr.bf16.mxu1 %v9328_v57  ;;  %v9414_v57 = vld [vmem:[%s11011_s7 + $0x7f0] ss:$8 sps:$4 sm:$0xff]  }
 0x1c3   : > { %7792 = vmatpush2.bf16.msra.mxu0 %v9323_v58  ;;  %v9419_v58 = vld [vmem:[%s11011_s7 + $0x6e4] ss:$8 sps:$4 sm:$0xff]  }
 0x1c4   : > { %7793 = vmatprep.subr.bf16.mxu0 %v9331_v60  ;;  %v9417_v60 = vld [vmem:[%s11011_s7 + $0x6e0] ss:$8 sps:$4 sm:$0xff]  }
 0x1c5   : > { %7833 = vmatpush2.bf16.msra.mxu1 %v9326_v59  ;;  %v9422_v59 = vld [vmem:[%s11011_s7 + $0x7e4] ss:$8 sps:$4 sm:$0xff]  }
 0x1c6   : > { %7834 = vmatprep.subr.bf16.mxu1 %v9334_v61  ;;  %v9420_v61 = vld [vmem:[%s11011_s7 + $0x7e0] ss:$8 sps:$4 sm:$0xff]  }
 0x1c7   : > { %7794 = vmatpush2.bf16.msra.mxu0 %v9329_v62  ;;  %v9425_v62 = vld [vmem:[%s11011_s7 + $0x6d4] ss:$8 sps:$4 sm:$0xff]  }
 0x1c8   : > { %7795 = vmatprep.subr.bf16.mxu0 %v9337_v2  ;;  %v9423_v2 = vld [vmem:[%s11011_s7 + $0x6d0] ss:$8 sps:$4 sm:$0xff]  }
 0x1c9   : > { %7835 = vmatpush2.bf16.msra.mxu1 %v9332_v63  ;;  %v9428_v63 = vld [vmem:[%s11011_s7 + $0x7d4] ss:$8 sps:$4 sm:$0xff]  }
 0x1ca   : > { %7836 = vmatprep.subr.bf16.mxu1 %v9340_v3  ;;  %v9426_v3 = vld [vmem:[%s11011_s7 + $0x7d0] ss:$8 sps:$4 sm:$0xff]  }
 0x1cb   : > { %7796 = vmatpush2.bf16.msra.mxu0 %v9335_v4  ;;  %v9431_v4 = vld [vmem:[%s11011_s7 + $0x6c4] ss:$8 sps:$4 sm:$0xff]  }
 0x1cc   : > { %7797 = vmatprep.subr.bf16.mxu0 %v9343_v6  ;;  %v9429_v6 = vld [vmem:[%s11011_s7 + $0x6c0] ss:$8 sps:$4 sm:$0xff]  }
 0x1cd   : > { %7837 = vmatpush2.bf16.msra.mxu1 %v9338_v5  ;;  %v9434_v5 = vld [vmem:[%s11011_s7 + $0x7c4] ss:$8 sps:$4 sm:$0xff]  }
 0x1ce   : > { %7838 = vmatprep.subr.bf16.mxu1 %v9346_v7  ;;  %v9432_v7 = vld [vmem:[%s11011_s7 + $0x7c0] ss:$8 sps:$4 sm:$0xff]  }
 0x1cf   : > { %7798 = vmatpush2.bf16.msra.mxu0 %v9341_v10  ;;  %v9437_v10 = vld [vmem:[%s11011_s7 + $0x6b4] ss:$8 sps:$4 sm:$0xff]  }
 0x1d0   : > { %7799 = vmatprep.subr.bf16.mxu0 %v9349_v12  ;;  %v9435_v12 = vld [vmem:[%s11011_s7 + $0x6b0] ss:$8 sps:$4 sm:$0xff]  }
 0x1d1   : > { %7839 = vmatpush2.bf16.msra.mxu1 %v9344_v11  ;;  %v9440_v11 = vld [vmem:[%s11011_s7 + $0x7b4] ss:$8 sps:$4 sm:$0xff]  }
 0x1d2   : > { %7840 = vmatprep.subr.bf16.mxu1 %v9352_v13  ;;  %v9438_v13 = vld [vmem:[%s11011_s7 + $0x7b0] ss:$8 sps:$4 sm:$0xff]  }
 0x1d3   : > { %7800 = vmatpush2.bf16.msra.mxu0 %v9347_v14  ;;  %v9443_v14 = vld [vmem:[%s11011_s7 + $0x6a4] ss:$8 sps:$4 sm:$0xff]  }
 0x1d4   : > { %7801 = vmatprep.subr.bf16.mxu0 %v9355_v16  ;;  %v9441_v16 = vld [vmem:[%s11011_s7 + $0x6a0] ss:$8 sps:$4 sm:$0xff]  }
 0x1d5   : > { %7841 = vmatpush2.bf16.msra.mxu1 %v9350_v15  ;;  %v9446_v15 = vld [vmem:[%s11011_s7 + $0x7a4] ss:$8 sps:$4 sm:$0xff]  }
 0x1d6   : > { %7842 = vmatprep.subr.bf16.mxu1 %v9358_v0  ;;  %v9444_v0 = vld [vmem:[%s11011_s7 + $0x7a0] ss:$8 sps:$4 sm:$0xff]  }
 0x1d7   : > { %7802 = vmatpush2.bf16.msra.mxu0 %v9353_v1  ;;  %v9449_v1 = vld [vmem:[%s11011_s7 + $0x694] ss:$8 sps:$4 sm:$0xff]  }
 0x1d8   : > { %7853 = vmatprep.subr.bf16.mxu0 %v9365_v8  ;;  %v9447_v8 = vld [vmem:[%s11011_s7 + $0x690] ss:$8 sps:$4 sm:$0xff]  }
 0x1d9   : > { %7843 = vmatpush2.bf16.msra.mxu1 %v9356_v17  ;;  %v9452_v17 = vld [vmem:[%s11011_s7 + $0x794] ss:$8 sps:$4 sm:$0xff]  }
 0x1da   : > { %7894 = vmatprep.subr.bf16.mxu1 %v9368_v9  ;;  %7804 = vmatmul.mubr.bf16.vlgmr.msra.gmra.mxu0 %v8484_v22  ;;  %v9450_v9 = vld [vmem:[%s11011_s7 + $0x790] ss:$8 sps:$4 sm:$0xff]   ;;  %v9453_v22 = vld [vmem:[%s11011_s7 + $0x680] ss:$8 sps:$4 sm:$0xff]  }
 0x1db   : > { %7854 = vmatpush1.bf16.msra.mxu0 %v9363_v20  ;;  %7885 = vmatprep.mubr.bf16.mxu0 %v8489_v19  ;;  %v9455_v20 = vld [vmem:[%s11011_s7 + $0x684] ss:$8 sps:$4 sm:$0xff]  }
 0x1dc   : > { %7845 = vmatmul.mubr.bf16.vlgmr.msra.gmra.mxu1 %v8486_v23  ;;  %7855 = vmatprep.subr.bf16.mxu0 %v9371_v26  ;;  %v9456_v23 = vld [vmem:[%s11011_s7 + $0x780] ss:$8 sps:$4 sm:$0xff]   ;;  %v9465_v26 = vld [vmem:[%s11011_s7 + $0x874] ss:$8 sps:$4 sm:$0xff]  }
 0x1dd   : > { %7895 = vmatpush1.bf16.msra.mxu1 %v9366_v21  ;;  %7926 = vmatprep.mubr.bf16.mxu1 %v8491_v27  ;;  %v9458_v21 = vld [vmem:[%s11011_s7 + $0x784] ss:$8 sps:$4 sm:$0xff]   ;;  %v8488_v27 = vcombine.low %v11252_v24, %v11252_v24 }
 0x1de   : > { %7896 = vmatprep.subr.bf16.mxu1 %v9374_v18  ;;  %v9468_v18 = vld [vmem:[%s11011_s7 + $0x974] ss:$8 sps:$4 sm:$0xff]   ;;  %v11328_v19 = vld [vmem:[%s11708_s0 + $0x40] sm:$0xff] }
 0x1df   : > { %7856 = vmatpush1.bf16.msra.mxu0 %v9369_v28  ;;  %v8490_v28 = vcombine.low %v11257_v25, %v11257_v25  ;;  %v8493_v24 = vcombine.high %v11328_v19, %v11328_v19 }
 0x1e0   : > { %7857 = vmatprep.subr.bf16.mxu0 %v9377_v30  ;;  %v9463_v30 = vld [vmem:[%s11011_s7 + $0x870] ss:$8 sps:$4 sm:$0xff]  }
 0x1e1   : > { %7897 = vmatpush1.bf16.msra.mxu1 %v9372_v29  ;;  %v11337_v29 = vld [vmem:[%s11708_s0 + $0x48] sm:$0xff] }
 0x1e2   : > { %7898 = vmatprep.subr.bf16.mxu1 %v9380_v31  ;;  %v9466_v31 = vld [vmem:[%s11011_s7 + $0x970] ss:$8 sps:$4 sm:$0xff]   ;;  %v8495_v25 = vcombine.high %v11337_v29, %v11337_v29 }
 0x1e3   : > { %7858 = vmatpush1.bf16.msra.mxu0 %v9375_v32  ;;  %v9471_v32 = vld [vmem:[%s11011_s7 + $0x864] ss:$8 sps:$4 sm:$0xff]  }
 0x1e4   : > { %7859 = vmatprep.subr.bf16.mxu0 %v9383_v34 }
 0x1e5   : > { %7899 = vmatpush1.bf16.msra.mxu1 %v9378_v33  ;;  %v9474_v33 = vld [vmem:[%s11011_s7 + $0x964] ss:$8 sps:$4 sm:$0xff]  }
 0x1e6   : > { %7900 = vmatprep.subr.bf16.mxu1 %v9386_v35 }
 0x1e7   : > { %7860 = vmatpush1.bf16.msra.mxu0 %v9381_v36  ;;  %v9469_v36 = vld [vmem:[%s11011_s7 + $0x860] ss:$8 sps:$4 sm:$0xff]  }
 0x1e8   : > { %7861 = vmatprep.subr.bf16.mxu0 %v9389_v38 }
 0x1e9   : > { %7901 = vmatpush1.bf16.msra.mxu1 %v9384_v37  ;;  %v9472_v37 = vld [vmem:[%s11011_s7 + $0x960] ss:$8 sps:$4 sm:$0xff]  }
 0x1ea   : > { %7902 = vmatprep.subr.bf16.mxu1 %v9392_v39  ;;  %v9477_v39 = vld [vmem:[%s11011_s7 + $0x854] ss:$8 sps:$4 sm:$0xff]  }
 0x1eb   : > { %7862 = vmatpush1.bf16.msra.mxu0 %v9387_v40 }
 0x1ec   : > { %7863 = vmatprep.subr.bf16.mxu0 %v9395_v42  ;;  %v9480_v42 = vld [vmem:[%s11011_s7 + $0x954] ss:$8 sps:$4 sm:$0xff]  }
 0x1ed   : > { %7903 = vmatpush1.bf16.msra.mxu1 %v9390_v41 }
 0x1ee   : > { %7904 = vmatprep.subr.bf16.mxu1 %v9398_v43 }
 0x1ef   : > { %7864 = vmatpush1.bf16.msra.mxu0 %v9393_v44 }
 0x1f0   : > { %7865 = vmatprep.subr.bf16.mxu0 %v9401_v46  ;;  %v9475_v46 = vld [vmem:[%s11011_s7 + $0x850] ss:$8 sps:$4 sm:$0xff]  }
 0x1f1   : > { %7905 = vmatpush1.bf16.msra.mxu1 %v9396_v45 }
 0x1f2   : > { %7906 = vmatprep.subr.bf16.mxu1 %v9404_v47  ;;  %v9478_v47 = vld [vmem:[%s11011_s7 + $0x950] ss:$8 sps:$4 sm:$0xff]  }
 0x1f3   : > { %7866 = vmatpush1.bf16.msra.mxu0 %v9399_v48 }
 0x1f4   : > { %7867 = vmatprep.subr.bf16.mxu0 %v9407_v50  ;;  %v9483_v50 = vld [vmem:[%s11011_s7 + $0x844] ss:$8 sps:$4 sm:$0xff]  }
 0x1f5   : > { %7907 = vmatpush1.bf16.msra.mxu1 %v9402_v49 }
 0x1f6   : > { %7908 = vmatprep.subr.bf16.mxu1 %v9410_v51  ;;  %v9486_v51 = vld [vmem:[%s11011_s7 + $0x944] ss:$8 sps:$4 sm:$0xff]  }
 0x1f7   : > { %7868 = vmatpush1.bf16.msra.mxu0 %v9405_v52  ;;  %v9481_v52 = vld [vmem:[%s11011_s7 + $0x840] ss:$8 sps:$4 sm:$0xff]  }
 0x1f8   : > { %7869 = vmatprep.subr.bf16.mxu0 %v9413_v54  ;;  %v9489_v54 = vld [vmem:[%s11011_s7 + $0x834] ss:$8 sps:$4 sm:$0xff]  }
 0x1f9   : > { %7909 = vmatpush1.bf16.msra.mxu1 %v9408_v53  ;;  %v9484_v53 = vld [vmem:[%s11011_s7 + $0x940] ss:$8 sps:$4 sm:$0xff]  }
 0x1fa   : > { %7910 = vmatprep.subr.bf16.mxu1 %v9416_v55  ;;  %v9492_v55 = vld [vmem:[%s11011_s7 + $0x934] ss:$8 sps:$4 sm:$0xff]  }
 0x1fb   : > { %7870 = vmatpush2.bf16.msra.mxu0 %v9411_v56  ;;  %v9487_v56 = vld [vmem:[%s11011_s7 + $0x830] ss:$8 sps:$4 sm:$0xff]  }
 0x1fc   : > { %7871 = vmatprep.subr.bf16.mxu0 %v9419_v58  ;;  %v9495_v58 = vld [vmem:[%s11011_s7 + $0x824] ss:$8 sps:$4 sm:$0xff]  }
 0x1fd   : > { %7911 = vmatpush2.bf16.msra.mxu1 %v9414_v57  ;;  %v9490_v57 = vld [vmem:[%s11011_s7 + $0x930] ss:$8 sps:$4 sm:$0xff]  }
 0x1fe   : > { %7912 = vmatprep.subr.bf16.mxu1 %v9422_v59  ;;  %v9498_v59 = vld [vmem:[%s11011_s7 + $0x924] ss:$8 sps:$4 sm:$0xff]  }
 0x1ff   : > { %7872 = vmatpush2.bf16.msra.mxu0 %v9417_v60  ;;  %v9493_v60 = vld [vmem:[%s11011_s7 + $0x820] ss:$8 sps:$4 sm:$0xff]  }
 0x200   : > { %7873 = vmatprep.subr.bf16.mxu0 %v9425_v62  ;;  %v9501_v62 = vld [vmem:[%s11011_s7 + $0x814] ss:$8 sps:$4 sm:$0xff]  }
 0x201   : > { %7913 = vmatpush2.bf16.msra.mxu1 %v9420_v61  ;;  %v9496_v61 = vld [vmem:[%s11011_s7 + $0x920] ss:$8 sps:$4 sm:$0xff]  }
 0x202   : > { %7914 = vmatprep.subr.bf16.mxu1 %v9428_v63  ;;  %v9504_v63 = vld [vmem:[%s11011_s7 + $0x914] ss:$8 sps:$4 sm:$0xff]  }
 0x203   : > { %7874 = vmatpush2.bf16.msra.mxu0 %v9423_v2  ;;  %v9499_v2 = vld [vmem:[%s11011_s7 + $0x810] ss:$8 sps:$4 sm:$0xff]  }
 0x204   : > { %7875 = vmatprep.subr.bf16.mxu0 %v9431_v4  ;;  %v9507_v4 = vld [vmem:[%s11011_s7 + $0x804] ss:$8 sps:$4 sm:$0xff]  }
 0x205   : > { %7915 = vmatpush2.bf16.msra.mxu1 %v9426_v3  ;;  %v9502_v3 = vld [vmem:[%s11011_s7 + $0x910] ss:$8 sps:$4 sm:$0xff]  }
 0x206   : > { %7916 = vmatprep.subr.bf16.mxu1 %v9434_v5  ;;  %v9510_v5 = vld [vmem:[%s11011_s7 + $0x904] ss:$8 sps:$4 sm:$0xff]  }
 0x207   : > { %7876 = vmatpush2.bf16.msra.mxu0 %v9429_v6  ;;  %v9505_v6 = vld [vmem:[%s11011_s7 + $0x800] ss:$8 sps:$4 sm:$0xff]  }
 0x208   : > { %7877 = vmatprep.subr.bf16.mxu0 %v9437_v10  ;;  %v9513_v10 = vld [vmem:[%s11011_s7 + $0x8f4] ss:$8 sps:$4 sm:$0xff]  }
 0x209   : > { %7917 = vmatpush2.bf16.msra.mxu1 %v9432_v7  ;;  %v9508_v7 = vld [vmem:[%s11011_s7 + $0x900] ss:$8 sps:$4 sm:$0xff]  }
 0x20a   : > { %7918 = vmatprep.subr.bf16.mxu1 %v9440_v11  ;;  %v9516_v11 = vld [vmem:[%s11011_s7 + $0x9f4] ss:$8 sps:$4 sm:$0xff]  }
 0x20b   : > { %7878 = vmatpush2.bf16.msra.mxu0 %v9435_v12  ;;  %v9511_v12 = vld [vmem:[%s11011_s7 + $0x8f0] ss:$8 sps:$4 sm:$0xff]  }
 0x20c   : > { %7879 = vmatprep.subr.bf16.mxu0 %v9443_v14  ;;  %v9519_v14 = vld [vmem:[%s11011_s7 + $0x8e4] ss:$8 sps:$4 sm:$0xff]  }
 0x20d   : > { %7919 = vmatpush2.bf16.msra.mxu1 %v9438_v13  ;;  %v9514_v13 = vld [vmem:[%s11011_s7 + $0x9f0] ss:$8 sps:$4 sm:$0xff]  }
 0x20e   : > { %7920 = vmatprep.subr.bf16.mxu1 %v9446_v15  ;;  %v9522_v15 = vld [vmem:[%s11011_s7 + $0x9e4] ss:$8 sps:$4 sm:$0xff]  }
 0x20f   : > { %7880 = vmatpush2.bf16.msra.mxu0 %v9441_v16  ;;  %v9517_v16 = vld [vmem:[%s11011_s7 + $0x8e0] ss:$8 sps:$4 sm:$0xff]  }
 0x210   : > { %7881 = vmatprep.subr.bf16.mxu0 %v9449_v1  ;;  %v9525_v1 = vld [vmem:[%s11011_s7 + $0x8d4] ss:$8 sps:$4 sm:$0xff]  }
 0x211   : > { %7921 = vmatpush2.bf16.msra.mxu1 %v9444_v0  ;;  %v9520_v0 = vld [vmem:[%s11011_s7 + $0x9e0] ss:$8 sps:$4 sm:$0xff]  }
 0x212   : > { %7922 = vmatprep.subr.bf16.mxu1 %v9452_v17  ;;  %v9528_v17 = vld [vmem:[%s11011_s7 + $0x9d4] ss:$8 sps:$4 sm:$0xff]  }
 0x213   : > { %7882 = vmatpush2.bf16.msra.mxu0 %v9447_v8  ;;  %v9523_v8 = vld [vmem:[%s11011_s7 + $0x8d0] ss:$8 sps:$4 sm:$0xff]  }
 0x214   : > { %7883 = vmatprep.subr.bf16.mxu0 %v9455_v20  ;;  %v9531_v20 = vld [vmem:[%s11011_s7 + $0x8c4] ss:$8 sps:$4 sm:$0xff]  }
 0x215   : > { %7923 = vmatpush2.bf16.msra.mxu1 %v9450_v9  ;;  %v9526_v9 = vld [vmem:[%s11011_s7 + $0x9d0] ss:$8 sps:$4 sm:$0xff]  }
 0x216   : > { %7924 = vmatprep.subr.bf16.mxu1 %v9458_v21  ;;  %v9534_v21 = vld [vmem:[%s11011_s7 + $0x9c4] ss:$8 sps:$4 sm:$0xff]  }
 0x217   : > { %7884 = vmatpush2.bf16.msra.mxu0 %v9453_v22  ;;  %v9529_v22 = vld [vmem:[%s11011_s7 + $0x8c0] ss:$8 sps:$4 sm:$0xff]  }
 0x218   : > { %7935 = vmatprep.subr.bf16.mxu0 %v9465_v26  ;;  %v9537_v26 = vld [vmem:[%s11011_s7 + $0x8b4] ss:$8 sps:$4 sm:$0xff]  }
 0x219   : > { %7925 = vmatpush2.bf16.msra.mxu1 %v9456_v23  ;;  %v9532_v23 = vld [vmem:[%s11011_s7 + $0x9c0] ss:$8 sps:$4 sm:$0xff]  }
 0x21a   : > { %7976 = vmatprep.subr.bf16.mxu1 %v9468_v18  ;;  %v7641_v34 = vpop.f32.mrf.mxu0  ;;  %7886 = vmatmul.mubr.bf16.vlgmr.msra.gmra.mxu0 %v8488_v27  ;;  %v9540_v18 = vld [vmem:[%s11011_s7 + $0x9b4] ss:$8 sps:$4 sm:$0xff]   ;;  %v9535_v27 = vld [vmem:[%s11011_s7 + $0x8b0] ss:$8 sps:$4 sm:$0xff]  }
 0x21b   : > { %7936 = vmatpush1.bf16.msra.mxu0 %v9463_v30  ;;  %7967 = vmatprep.mubr.bf16.mxu0 %v8493_v24  ;;  %v9543_v30 = vld [vmem:[%s11011_s7 + $0x8a4] ss:$8 sps:$4 sm:$0xff]   ;;  %v9549_v24 = vld [vmem:[%s11011_s7 + $0x894] ss:$8 sps:$4 sm:$0xff]  }
 0x21c   : > { %v7682_v35 = vpop.f32.mrf.mxu1  ;;  %7927 = vmatmul.mubr.bf16.vlgmr.msra.gmra.mxu1 %v8490_v28  ;;  %v7643_v40 = vpop.f32.mrf.mxu0  ;;  %7937 = vmatprep.subr.bf16.mxu0 %v9471_v32  ;;  %v9538_v28 = vld [vmem:[%s11011_s7 + $0x9b0] ss:$8 sps:$4 sm:$0xff]   ;;  %v9541_v32 = vld [vmem:[%s11011_s7 + $0x8a0] ss:$8 sps:$4 sm:$0xff]  }
 0x21d   : > { %v11349_v38 = vadd.f32 %v7682_v35, %v7641_v34  ;;  %7977 = vmatpush1.bf16.msra.mxu1 %v9466_v31  ;;  %8008 = vmatprep.mubr.bf16.mxu1 %v8495_v25  ;;  %v9546_v31 = vld [vmem:[%s11011_s7 + $0x9a4] ss:$8 sps:$4 sm:$0xff]   ;;  %v9552_v25 = vld [vmem:[%s11011_s7 + $0x994] ss:$8 sps:$4 sm:$0xff]   ;;  %v9547_v34 = vld [vmem:[%s11011_s7 + $0x890] ss:$8 sps:$4 sm:$0xff]  }
 0x21e   : > { %v7684_v41 = vpop.f32.mrf.mxu1  ;;  %7978 = vmatprep.subr.bf16.mxu1 %v9474_v33  ;;  %v7645_v44 = vpop.f32.mrf.mxu0  ;;  %v9544_v33 = vld [vmem:[%s11011_s7 + $0x9a0] ss:$8 sps:$4 sm:$0xff]   ;;  %v9550_v35 = vld [vmem:[%s11011_s7 + $0x990] ss:$8 sps:$4 sm:$0xff]  }
 0x21f   : > { %v11353_v43 = vadd.f32 %v7684_v41, %v7643_v40  ;;  %7938 = vmatpush1.bf16.msra.mxu0 %v9469_v36  ;;  %v9555_v36 = vld [vmem:[%s11011_s7 + $0x884] ss:$8 sps:$4 sm:$0xff]   ;;  %v9556_v40 = vld [vmem:[%s11011_s7 + $0x980] ss:$8 sps:$4 sm:$0xff]   ;;  %v9565_v41 = vld [vmem:[%s11011_s7 + $0xa74] ss:$8 sps:$4 sm:$0xff]  }
 0x220   : > { %v7686_v45 = vpop.f32.mrf.mxu1  ;;  %v7646_v48 = vpop.f32.mrf.mxu0  ;;  %7939 = vmatprep.subr.bf16.mxu0 %v9477_v39  ;;  %v9553_v39 = vld [vmem:[%s11011_s7 + $0x880] ss:$8 sps:$4 sm:$0xff]   ;;  %v9563_v44 = vld [vmem:[%s11011_s7 + $0xa70] ss:$8 sps:$4 sm:$0xff]  }
 0x221   : > { %7979 = vmatpush1.bf16.msra.mxu1 %v9472_v37  ;;  %v9558_v37 = vld [vmem:[%s11011_s7 + $0x984] ss:$8 sps:$4 sm:$0xff]   ;;  %v9566_v45 = vld [vmem:[%s11011_s7 + $0xb70] ss:$8 sps:$4 sm:$0xff]  }
 0x222   : > { %v7687_v49 = vpop.f32.mrf.mxu1  ;;  %7980 = vmatprep.subr.bf16.mxu1 %v9480_v42  ;;  %v9568_v42 = vld [vmem:[%s11011_s7 + $0xb74] ss:$8 sps:$4 sm:$0xff]  }
 0x223   : > { %7940 = vmatpush1.bf16.msra.mxu0 %v9475_v46  ;;  %v8492_v46 = vcombine.low %v11328_v19, %v11328_v19  ;;  %v11420_v48 = vld [vmem:[%s11708_s0 + $0x50] sm:$0xff]  ;;  %v11425_v49 = vld [vmem:[%s11708_s0 + $0x58] sm:$0xff]  ;;  %v9574_v19 = vld [vmem:[%s11011_s7 + $0xb64] ss:$8 sps:$4 sm:$0xff]  }
 0x224   : > { %7941 = vmatprep.subr.bf16.mxu0 %v9483_v50  ;;  %v9571_v50 = vld [vmem:[%s11011_s7 + $0xa64] ss:$8 sps:$4 sm:$0xff]  }
 0x225   : > { %7981 = vmatpush1.bf16.msra.mxu1 %v9478_v47  ;;  %v8494_v47 = vcombine.low %v11337_v29, %v11337_v29  ;;  %v8497_v29 = vcombine.high %v11420_v48, %v11420_v48 }
 0x226   : > { %7982 = vmatprep.subr.bf16.mxu1 %v9486_v51  ;;  %v9569_v51 = vld [vmem:[%s11011_s7 + $0xa60] ss:$8 sps:$4 sm:$0xff]  }
 0x227   : > { %7942 = vmatpush1.bf16.msra.mxu0 %v9481_v52  ;;  %v8499_v52 = vcombine.high %v11425_v49, %v11425_v49 }
 0x228   : > { %7943 = vmatprep.subr.bf16.mxu0 %v9489_v54 }
 0x229   : > { %7983 = vmatpush1.bf16.msra.mxu1 %v9484_v53 }
 0x22a   : > { %7984 = vmatprep.subr.bf16.mxu1 %v9492_v55 }
 0x22b   : > { %7944 = vmatpush1.bf16.msra.mxu0 %v9487_v56  ;;  %v9572_v56 = vld [vmem:[%s11011_s7 + $0xb60] ss:$8 sps:$4 sm:$0xff]  }
 0x22c   : > { %7945 = vmatprep.subr.bf16.mxu0 %v9495_v58 }
 0x22d   : > { %7985 = vmatpush1.bf16.msra.mxu1 %v9490_v57 }
 0x22e   : > { %7986 = vmatprep.subr.bf16.mxu1 %v9498_v59  ;;  %v9577_v59 = vld [vmem:[%s11011_s7 + $0xa54] ss:$8 sps:$4 sm:$0xff]  }
 0x22f   : > { %7946 = vmatpush1.bf16.msra.mxu0 %v9493_v60  ;;  %v9580_v60 = vld [vmem:[%s11011_s7 + $0xb54] ss:$8 sps:$4 sm:$0xff]  }
 0x230   : > { %7947 = vmatprep.subr.bf16.mxu0 %v9501_v62 }
 0x231   : > { %7987 = vmatpush1.bf16.msra.mxu1 %v9496_v61 }
 0x232   : > { %7988 = vmatprep.subr.bf16.mxu1 %v9504_v63 }
 0x233   : > { %7948 = vmatpush1.bf16.msra.mxu0 %v9499_v2 }
 0x234   : > { %7949 = vmatprep.subr.bf16.mxu0 %v9507_v4  ;;  %v9578_v4 = vld [vmem:[%s11011_s7 + $0xb50] ss:$8 sps:$4 sm:$0xff]  }
 0x235   : > { %7989 = vmatpush1.bf16.msra.mxu1 %v9502_v3  ;;  %v9575_v3 = vld [vmem:[%s11011_s7 + $0xa50] ss:$8 sps:$4 sm:$0xff]  }
 0x236   : > { %7990 = vmatprep.subr.bf16.mxu1 %v9510_v5 }
 0x237   : > { %7950 = vmatpush1.bf16.msra.mxu0 %v9505_v6 }
 0x238   : > { %7951 = vmatprep.subr.bf16.mxu0 %v9513_v10  ;;  %v9581_v10 = vld [vmem:[%s11011_s7 + $0xa40] ss:$8 sps:$4 sm:$0xff]  }
 0x239   : > { %7991 = vmatpush1.bf16.msra.mxu1 %v9508_v7  ;;  %v9586_v7 = vld [vmem:[%s11011_s7 + $0xb44] ss:$8 sps:$4 sm:$0xff]  }
 0x23a   : > { %7992 = vmatprep.subr.bf16.mxu1 %v9516_v11  ;;  %v9584_v11 = vld [vmem:[%s11011_s7 + $0xb40] ss:$8 sps:$4 sm:$0xff]  }
 0x23b   : > { %7952 = vmatpush2.bf16.msra.mxu0 %v9511_v12  ;;  %v9589_v12 = vld [vmem:[%s11011_s7 + $0xa34] ss:$8 sps:$4 sm:$0xff]  }
 0x23c   : > { %7953 = vmatprep.subr.bf16.mxu0 %v9519_v14  ;;  %v9587_v14 = vld [vmem:[%s11011_s7 + $0xa30] ss:$8 sps:$4 sm:$0xff]  }
 0x23d   : > { %7993 = vmatpush2.bf16.msra.mxu1 %v9514_v13  ;;  %v9592_v13 = vld [vmem:[%s11011_s7 + $0xb34] ss:$8 sps:$4 sm:$0xff]  }
 0x23e   : > { %7994 = vmatprep.subr.bf16.mxu1 %v9522_v15  ;;  %v9590_v15 = vld [vmem:[%s11011_s7 + $0xb30] ss:$8 sps:$4 sm:$0xff]  }
 0x23f   : > { %7954 = vmatpush2.bf16.msra.mxu0 %v9517_v16  ;;  %v9595_v16 = vld [vmem:[%s11011_s7 + $0xa24] ss:$8 sps:$4 sm:$0xff]  }
 0x240   : > { %7955 = vmatprep.subr.bf16.mxu0 %v9525_v1  ;;  %v9593_v1 = vld [vmem:[%s11011_s7 + $0xa20] ss:$8 sps:$4 sm:$0xff]  }
 0x241   : > { %7995 = vmatpush2.bf16.msra.mxu1 %v9520_v0  ;;  %v9598_v0 = vld [vmem:[%s11011_s7 + $0xb24] ss:$8 sps:$4 sm:$0xff]  }
 0x242   : > { %7996 = vmatprep.subr.bf16.mxu1 %v9528_v17  ;;  %v9596_v17 = vld [vmem:[%s11011_s7 + $0xb20] ss:$8 sps:$4 sm:$0xff]  }
 0x243   : > { %7956 = vmatpush2.bf16.msra.mxu0 %v9523_v8  ;;  %v9601_v8 = vld [vmem:[%s11011_s7 + $0xa14] ss:$8 sps:$4 sm:$0xff]  }
 0x244   : > { %7957 = vmatprep.subr.bf16.mxu0 %v9531_v20  ;;  %v9599_v20 = vld [vmem:[%s11011_s7 + $0xa10] ss:$8 sps:$4 sm:$0xff]  }
 0x245   : > { %7997 = vmatpush2.bf16.msra.mxu1 %v9526_v9  ;;  %v9604_v9 = vld [vmem:[%s11011_s7 + $0xb14] ss:$8 sps:$4 sm:$0xff]  }
 0x246   : > { %7998 = vmatprep.subr.bf16.mxu1 %v9534_v21  ;;  %v9602_v21 = vld [vmem:[%s11011_s7 + $0xb10] ss:$8 sps:$4 sm:$0xff]  }
 0x247   : > { %7958 = vmatpush2.bf16.msra.mxu0 %v9529_v22  ;;  %v9607_v22 = vld [vmem:[%s11011_s7 + $0xa04] ss:$8 sps:$4 sm:$0xff]  }
 0x248   : > { %7959 = vmatprep.subr.bf16.mxu0 %v9537_v26  ;;  %v9605_v26 = vld [vmem:[%s11011_s7 + $0xa00] ss:$8 sps:$4 sm:$0xff]  }
 0x249   : > { %7999 = vmatpush2.bf16.msra.mxu1 %v9532_v23  ;;  %v9610_v23 = vld [vmem:[%s11011_s7 + $0xb04] ss:$8 sps:$4 sm:$0xff]  }
 0x24a   : > { %8000 = vmatprep.subr.bf16.mxu1 %v9540_v18  ;;  %v9608_v18 = vld [vmem:[%s11011_s7 + $0xb00] ss:$8 sps:$4 sm:$0xff]  }
 0x24b   : > { %7960 = vmatpush2.bf16.msra.mxu0 %v9535_v27  ;;  %v9613_v27 = vld [vmem:[%s11011_s7 + $0xaf4] ss:$8 sps:$4 sm:$0xff]  }
 0x24c   : > { %7961 = vmatprep.subr.bf16.mxu0 %v9543_v30  ;;  %v9611_v30 = vld [vmem:[%s11011_s7 + $0xaf0] ss:$8 sps:$4 sm:$0xff]  }
 0x24d   : > { %8001 = vmatpush2.bf16.msra.mxu1 %v9538_v28  ;;  %v9616_v28 = vld [vmem:[%s11011_s7 + $0xbf4] ss:$8 sps:$4 sm:$0xff]  }
 0x24e   : > { %8002 = vmatprep.subr.bf16.mxu1 %v9546_v31  ;;  %v9614_v31 = vld [vmem:[%s11011_s7 + $0xbf0] ss:$8 sps:$4 sm:$0xff]  }
 0x24f   : > { %7962 = vmatpush2.bf16.msra.mxu0 %v9541_v32  ;;  %v9619_v32 = vld [vmem:[%s11011_s7 + $0xae4] ss:$8 sps:$4 sm:$0xff]  }
 0x250   : > { %7963 = vmatprep.subr.bf16.mxu0 %v9549_v24  ;;  %v9617_v24 = vld [vmem:[%s11011_s7 + $0xae0] ss:$8 sps:$4 sm:$0xff]  }
 0x251   : > { %8003 = vmatpush2.bf16.msra.mxu1 %v9544_v33  ;;  %v9622_v33 = vld [vmem:[%s11011_s7 + $0xbe4] ss:$8 sps:$4 sm:$0xff]  }
 0x252   : > { %8004 = vmatprep.subr.bf16.mxu1 %v9552_v25  ;;  %v9620_v25 = vld [vmem:[%s11011_s7 + $0xbe0] ss:$8 sps:$4 sm:$0xff]  }
 0x253   : > { %7964 = vmatpush2.bf16.msra.mxu0 %v9547_v34  ;;  %v9625_v34 = vld [vmem:[%s11011_s7 + $0xad4] ss:$8 sps:$4 sm:$0xff]  }
 0x254   : > { %7965 = vmatprep.subr.bf16.mxu0 %v9555_v36  ;;  %v9623_v36 = vld [vmem:[%s11011_s7 + $0xad0] ss:$8 sps:$4 sm:$0xff]  }
 0x255   : > { %8005 = vmatpush2.bf16.msra.mxu1 %v9550_v35  ;;  %v9628_v35 = vld [vmem:[%s11011_s7 + $0xbd4] ss:$8 sps:$4 sm:$0xff]  }
 0x256   : > { %8006 = vmatprep.subr.bf16.mxu1 %v9558_v37  ;;  %v9626_v37 = vld [vmem:[%s11011_s7 + $0xbd0] ss:$8 sps:$4 sm:$0xff]  }
 0x257   : > { %7966 = vmatpush2.bf16.msra.mxu0 %v9553_v39  ;;  %v9631_v39 = vld [vmem:[%s11011_s7 + $0xac4] ss:$8 sps:$4 sm:$0xff]  }
 0x258   : > { %8017 = vmatprep.subr.bf16.mxu0 %v9565_v41  ;;  %v9629_v41 = vld [vmem:[%s11011_s7 + $0xac0] ss:$8 sps:$4 sm:$0xff]  }
 0x259   : > { %8007 = vmatpush2.bf16.msra.mxu1 %v9556_v40  ;;  %v9634_v40 = vld [vmem:[%s11011_s7 + $0xbc4] ss:$8 sps:$4 sm:$0xff]  }
 0x25a   : > { %8058 = vmatprep.subr.bf16.mxu1 %v9568_v42  ;;  %v7723_v53 = vpop.f32.mrf.mxu0  ;;  %7968 = vmatmul.mubr.bf16.vlgmr.msra.gmra.mxu0 %v8492_v46  ;;  %v9632_v42 = vld [vmem:[%s11011_s7 + $0xbc0] ss:$8 sps:$4 sm:$0xff]   ;;  %v9635_v46 = vld [vmem:[%s11011_s7 + $0xab0] ss:$8 sps:$4 sm:$0xff]  }
 0x25b   : > { %v7724_v55 = vadd.f32 %v7723_v53, %v11349_v38  ;;  %8018 = vmatpush1.bf16.msra.mxu0 %v9563_v44  ;;  %8049 = vmatprep.mubr.bf16.mxu0 %v8497_v29  ;;  %v9637_v44 = vld [vmem:[%s11011_s7 + $0xab4] ss:$8 sps:$4 sm:$0xff]   ;;  %v9644_v29 = vld [vmem:[%s11011_s7 + $0xba0] ss:$8 sps:$4 sm:$0xff]  }
 0x25c   : > { %v7764_v54 = vpop.f32.mrf.mxu1  ;;  %8009 = vmatmul.mubr.bf16.vlgmr.msra.gmra.mxu1 %v8494_v47  ;;  %v7725_v57 = vpop.f32.mrf.mxu0  ;;  %8019 = vmatprep.subr.bf16.mxu0 %v9571_v50  ;;  %v9638_v47 = vld [vmem:[%s11011_s7 + $0xbb0] ss:$8 sps:$4 sm:$0xff]   ;;  %v9643_v50 = vld [vmem:[%s11011_s7 + $0xaa4] ss:$8 sps:$4 sm:$0xff]   ;;  %v9652_v53 = vld [vmem:[%s11011_s7 + $0xb94] ss:$8 sps:$4 sm:$0xff]  }
 0x25d   : > { %8059 = vmatpush1.bf16.msra.mxu1 %v9566_v45  ;;  %v11438_v61 = vadd.f32 %v7764_v54, %v7724_v55  ;;  %v7726_v62 = vadd.f32 %v7725_v57, %v11353_v43  ;;  %8090 = vmatprep.mubr.bf16.mxu1 %v8499_v52  ;;  %v9583_v43 = vld [vmem:[%s11011_s7 + $0xa44] ss:$8 sps:$4 sm:$0xff]   ;;  %v9640_v45 = vld [vmem:[%s11011_s7 + $0xbb4] ss:$8 sps:$4 sm:$0xff]   ;;  %v9647_v54 = vld [vmem:[%s11011_s7 + $0xa90] ss:$8 sps:$4 sm:$0xff]  }
 0x25e   : > { %v7766_v58 = vpop.f32.mrf.mxu1  ;;  %8060 = vmatprep.subr.bf16.mxu1 %v9574_v19  ;;  %v7727_v38 = vpop.f32.mrf.mxu0  ;;  %v9646_v19 = vld [vmem:[%s11011_s7 + $0xba4] ss:$8 sps:$4 sm:$0xff]   ;;  %v9649_v52 = vld [vmem:[%s11011_s7 + $0xa94] ss:$8 sps:$4 sm:$0xff]   ;;  %v9650_v55 = vld [vmem:[%s11011_s7 + $0xb90] ss:$8 sps:$4 sm:$0xff]  }
 0x25f   : > { %v11441_v2 = vadd.f32 %v7766_v58, %v7726_v62  ;;  %8020 = vmatpush1.bf16.msra.mxu0 %v9569_v51  ;;  %v9641_v51 = vld [vmem:[%s11011_s7 + $0xaa0] ss:$8 sps:$4 sm:$0xff]   ;;  %v9658_v57 = vld [vmem:[%s11011_s7 + $0xb84] ss:$8 sps:$4 sm:$0xff]   ;;  %v9668_v62 = vld [vmem:[%s11011_s7 + $0xd74] ss:$8 sps:$4 sm:$0xff]   ;;  %v8496_v38 = vcombine.low %v11420_v48, %v11420_v48 }
 0x260   : > { %v7768_v63 = vpop.f32.mrf.mxu1  ;;  %v7728_v5 = vpop.f32.mrf.mxu0  ;;  %8021 = vmatprep.subr.bf16.mxu0 %v9577_v59  ;;  %v9653_v58 = vld [vmem:[%s11011_s7 + $0xa80] ss:$8 sps:$4 sm:$0xff]   ;;  %v9671_v48 = vld [vmem:[%s11011_s7 + $0xc64] ss:$8 sps:$4 sm:$0xff]  }
 0x261   : > { %8061 = vmatpush1.bf16.msra.mxu1 %v9572_v56  ;;  %v9655_v56 = vld [vmem:[%s11011_s7 + $0xa84] ss:$8 sps:$4 sm:$0xff]   ;;  %v9656_v59 = vld [vmem:[%s11011_s7 + $0xb80] ss:$8 sps:$4 sm:$0xff]   ;;  %v8498_v63 = vcombine.low %v11425_v49, %v11425_v49  ;;  %v9663_v5 = vld [vmem:[%s11011_s7 + $0xc70] ss:$8 sps:$4 sm:$0xff]  }
 0x262   : > { %v7769_v6 = vpop.f32.mrf.mxu1  ;;  %8062 = vmatprep.subr.bf16.mxu1 %v9580_v60  ;;  %v9665_v60 = vld [vmem:[%s11011_s7 + $0xc74] ss:$8 sps:$4 sm:$0xff]   ;;  %v9674_v49 = vld [vmem:[%s11011_s7 + $0xd64] ss:$8 sps:$4 sm:$0xff]  }
 0x263   : > { %8022 = vmatpush1.bf16.msra.mxu0 %v9575_v3  ;;  %v11506_v3 = vld [vmem:[%s11708_s0 + $0x60] sm:$0xff]  ;;  %v9666_v6 = vld [vmem:[%s11011_s7 + $0xd70] ss:$8 sps:$4 sm:$0xff]  }
 0x264   : > { %8023 = vmatprep.subr.bf16.mxu0 %v9583_v43  ;;  %v8501_v43 = vcombine.high %v11506_v3, %v11506_v3 }
 0x265   : > { %8063 = vmatpush1.bf16.msra.mxu1 %v9578_v4  ;;  %v11511_v4 = vld [vmem:[%s11708_s0 + $0x68] sm:$0xff] }
 0x266   : > { %8064 = vmatprep.subr.bf16.mxu1 %v9586_v7  ;;  %v8503_v7 = vcombine.high %v11511_v4, %v11511_v4 }
 0x267   : > { %8024 = vmatpush1.bf16.msra.mxu0 %v9581_v10 }
 0x268   : > { %8025 = vmatprep.subr.bf16.mxu0 %v9589_v12 }
 0x269   : > { %8065 = vmatpush1.bf16.msra.mxu1 %v9584_v11 }
 0x26a   : > { %8066 = vmatprep.subr.bf16.mxu1 %v9592_v13  ;;  %v9669_v13 = vld [vmem:[%s11011_s7 + $0xc60] ss:$8 sps:$4 sm:$0xff]  }
 0x26b   : > { %8026 = vmatpush1.bf16.msra.mxu0 %v9587_v14  ;;  %v9672_v14 = vld [vmem:[%s11011_s7 + $0xd60] ss:$8 sps:$4 sm:$0xff]  }
 0x26c   : > { %8027 = vmatprep.subr.bf16.mxu0 %v9595_v16 }
 0x26d   : > { %8067 = vmatpush1.bf16.msra.mxu1 %v9590_v15 }
 0x26e   : > { %8068 = vmatprep.subr.bf16.mxu1 %v9598_v0  ;;  %v9677_v0 = vld [vmem:[%s11011_s7 + $0xc54] ss:$8 sps:$4 sm:$0xff]  }
 0x26f   : > { %8028 = vmatpush1.bf16.msra.mxu0 %v9593_v1  ;;  %v9680_v1 = vld [vmem:[%s11011_s7 + $0xd54] ss:$8 sps:$4 sm:$0xff]  }
 0x270   : > { %8029 = vmatprep.subr.bf16.mxu0 %v9601_v8 }
 0x271   : > { %8069 = vmatpush1.bf16.msra.mxu1 %v9596_v17 }
 0x272   : > { %8070 = vmatprep.subr.bf16.mxu1 %v9604_v9 }
 0x273   : > { %8030 = vmatpush1.bf16.msra.mxu0 %v9599_v20 }
 0x274   : > { %8031 = vmatprep.subr.bf16.mxu0 %v9607_v22  ;;  %v9678_v22 = vld [vmem:[%s11011_s7 + $0xd50] ss:$8 sps:$4 sm:$0xff]  }
 0x275   : > { %8071 = vmatpush1.bf16.msra.mxu1 %v9602_v21  ;;  %v9675_v21 = vld [vmem:[%s11011_s7 + $0xc50] ss:$8 sps:$4 sm:$0xff]  }
 0x276   : > { %8072 = vmatprep.subr.bf16.mxu1 %v9610_v23 }
 0x277   : > { %8032 = vmatpush1.bf16.msra.mxu0 %v9605_v26 }
 0x278   : > { %8033 = vmatprep.subr.bf16.mxu0 %v9613_v27  ;;  %v9681_v27 = vld [vmem:[%s11011_s7 + $0xc40] ss:$8 sps:$4 sm:$0xff]  }
 0x279   : > { %8073 = vmatpush1.bf16.msra.mxu1 %v9608_v18  ;;  %v9686_v18 = vld [vmem:[%s11011_s7 + $0xd44] ss:$8 sps:$4 sm:$0xff]  }
 0x27a   : > { %8074 = vmatprep.subr.bf16.mxu1 %v9616_v28  ;;  %v9684_v28 = vld [vmem:[%s11011_s7 + $0xd40] ss:$8 sps:$4 sm:$0xff]  }
 0x27b   : > { %8034 = vmatpush2.bf16.msra.mxu0 %v9611_v30  ;;  %v9689_v30 = vld [vmem:[%s11011_s7 + $0xc34] ss:$8 sps:$4 sm:$0xff]  }
 0x27c   : > { %8035 = vmatprep.subr.bf16.mxu0 %v9619_v32  ;;  %v9687_v32 = vld [vmem:[%s11011_s7 + $0xc30] ss:$8 sps:$4 sm:$0xff]  }
 0x27d   : > { %8075 = vmatpush2.bf16.msra.mxu1 %v9614_v31  ;;  %v9692_v31 = vld [vmem:[%s11011_s7 + $0xd34] ss:$8 sps:$4 sm:$0xff]  }
 0x27e   : > { %8076 = vmatprep.subr.bf16.mxu1 %v9622_v33  ;;  %v9690_v33 = vld [vmem:[%s11011_s7 + $0xd30] ss:$8 sps:$4 sm:$0xff]  }
 0x27f   : > { %8036 = vmatpush2.bf16.msra.mxu0 %v9617_v24  ;;  %v9695_v24 = vld [vmem:[%s11011_s7 + $0xc24] ss:$8 sps:$4 sm:$0xff]  }
 0x280   : > { %8037 = vmatprep.subr.bf16.mxu0 %v9625_v34  ;;  %v9693_v34 = vld [vmem:[%s11011_s7 + $0xc20] ss:$8 sps:$4 sm:$0xff]  }
 0x281   : > { %8077 = vmatpush2.bf16.msra.mxu1 %v9620_v25  ;;  %v9698_v25 = vld [vmem:[%s11011_s7 + $0xd24] ss:$8 sps:$4 sm:$0xff]  }
 0x282   : > { %8078 = vmatprep.subr.bf16.mxu1 %v9628_v35  ;;  %v9696_v35 = vld [vmem:[%s11011_s7 + $0xd20] ss:$8 sps:$4 sm:$0xff]  }
 0x283   : > { %8038 = vmatpush2.bf16.msra.mxu0 %v9623_v36  ;;  %v9701_v36 = vld [vmem:[%s11011_s7 + $0xc14] ss:$8 sps:$4 sm:$0xff]  }
 0x284   : > { %8039 = vmatprep.subr.bf16.mxu0 %v9631_v39  ;;  %v9699_v39 = vld [vmem:[%s11011_s7 + $0xc10] ss:$8 sps:$4 sm:$0xff]  }
 0x285   : > { %8079 = vmatpush2.bf16.msra.mxu1 %v9626_v37  ;;  %v9704_v37 = vld [vmem:[%s11011_s7 + $0xd14] ss:$8 sps:$4 sm:$0xff]  }
 0x286   : > { %8080 = vmatprep.subr.bf16.mxu1 %v9634_v40  ;;  %v9702_v40 = vld [vmem:[%s11011_s7 + $0xd10] ss:$8 sps:$4 sm:$0xff]  }
 0x287   : > { %8040 = vmatpush2.bf16.msra.mxu0 %v9629_v41  ;;  %v9707_v41 = vld [vmem:[%s11011_s7 + $0xc04] ss:$8 sps:$4 sm:$0xff]  }
 0x288   : > { %8041 = vmatprep.subr.bf16.mxu0 %v9637_v44  ;;  %v9705_v44 = vld [vmem:[%s11011_s7 + $0xc00] ss:$8 sps:$4 sm:$0xff]  }
 0x289   : > { %8081 = vmatpush2.bf16.msra.mxu1 %v9632_v42  ;;  %v9710_v42 = vld [vmem:[%s11011_s7 + $0xd04] ss:$8 sps:$4 sm:$0xff]  }
 0x28a   : > { %8082 = vmatprep.subr.bf16.mxu1 %v9640_v45  ;;  %v9708_v45 = vld [vmem:[%s11011_s7 + $0xd00] ss:$8 sps:$4 sm:$0xff]  }
 0x28b   : > { %8042 = vmatpush2.bf16.msra.mxu0 %v9635_v46  ;;  %v9713_v46 = vld [vmem:[%s11011_s7 + $0xcf4] ss:$8 sps:$4 sm:$0xff]  }
 0x28c   : > { %8043 = vmatprep.subr.bf16.mxu0 %v9643_v50  ;;  %v9711_v50 = vld [vmem:[%s11011_s7 + $0xcf0] ss:$8 sps:$4 sm:$0xff]  }
 0x28d   : > { %8083 = vmatpush2.bf16.msra.mxu1 %v9638_v47  ;;  %v9716_v47 = vld [vmem:[%s11011_s7 + $0xdf4] ss:$8 sps:$4 sm:$0xff]  }
 0x28e   : > { %8084 = vmatprep.subr.bf16.mxu1 %v9646_v19  ;;  %v9714_v19 = vld [vmem:[%s11011_s7 + $0xdf0] ss:$8 sps:$4 sm:$0xff]  }
 0x28f   : > { %8044 = vmatpush2.bf16.msra.mxu0 %v9641_v51  ;;  %v9719_v51 = vld [vmem:[%s11011_s7 + $0xce4] ss:$8 sps:$4 sm:$0xff]  }
 0x290   : > { %8045 = vmatprep.subr.bf16.mxu0 %v9649_v52  ;;  %v9717_v52 = vld [vmem:[%s11011_s7 + $0xce0] ss:$8 sps:$4 sm:$0xff]  }
 0x291   : > { %8085 = vmatpush2.bf16.msra.mxu1 %v9644_v29  ;;  %v9722_v29 = vld [vmem:[%s11011_s7 + $0xde4] ss:$8 sps:$4 sm:$0xff]  }
 0x292   : > { %8086 = vmatprep.subr.bf16.mxu1 %v9652_v53  ;;  %v9720_v53 = vld [vmem:[%s11011_s7 + $0xde0] ss:$8 sps:$4 sm:$0xff]  }
 0x293   : > { %8046 = vmatpush2.bf16.msra.mxu0 %v9647_v54  ;;  %v9725_v54 = vld [vmem:[%s11011_s7 + $0xcd4] ss:$8 sps:$4 sm:$0xff]  }
 0x294   : > { %8047 = vmatprep.subr.bf16.mxu0 %v9655_v56  ;;  %v9723_v56 = vld [vmem:[%s11011_s7 + $0xcd0] ss:$8 sps:$4 sm:$0xff]  }
 0x295   : > { %8087 = vmatpush2.bf16.msra.mxu1 %v9650_v55  ;;  %v9728_v55 = vld [vmem:[%s11011_s7 + $0xdd4] ss:$8 sps:$4 sm:$0xff]  }
 0x296   : > { %8088 = vmatprep.subr.bf16.mxu1 %v9658_v57  ;;  %v9726_v57 = vld [vmem:[%s11011_s7 + $0xdd0] ss:$8 sps:$4 sm:$0xff]  }
 0x297   : > { %8048 = vmatpush2.bf16.msra.mxu0 %v9653_v58  ;;  %v9731_v58 = vld [vmem:[%s11011_s7 + $0xcc4] ss:$8 sps:$4 sm:$0xff]  }
 0x298   : > { %8099 = vmatprep.subr.bf16.mxu0 %v9665_v60  ;;  %v9729_v60 = vld [vmem:[%s11011_s7 + $0xcc0] ss:$8 sps:$4 sm:$0xff]  }
 0x299   : > { %8089 = vmatpush2.bf16.msra.mxu1 %v9656_v59  ;;  %v9734_v59 = vld [vmem:[%s11011_s7 + $0xdc4] ss:$8 sps:$4 sm:$0xff]  }
 0x29a   : > { %8140 = vmatprep.subr.bf16.mxu1 %v9668_v62  ;;  %v7805_v10 = vpop.f32.mrf.mxu0  ;;  %8050 = vmatmul.mubr.bf16.vlgmr.msra.gmra.mxu0 %v8496_v38  ;;  %v9732_v62 = vld [vmem:[%s11011_s7 + $0xdc0] ss:$8 sps:$4 sm:$0xff]   ;;  %v9737_v38 = vld [vmem:[%s11011_s7 + $0xcb4] ss:$8 sps:$4 sm:$0xff]  }
 0x29b   : > { %v7806_v12 = vadd.f32 %v7805_v10, %v11438_v61  ;;  %8100 = vmatpush1.bf16.msra.mxu0 %v9663_v5  ;;  %8131 = vmatprep.mubr.bf16.mxu0 %v8501_v43  ;;  %v9735_v5 = vld [vmem:[%s11011_s7 + $0xcb0] ss:$8 sps:$4 sm:$0xff]   ;;  %v9741_v43 = vld [vmem:[%s11011_s7 + $0xca0] ss:$8 sps:$4 sm:$0xff]   ;;  %v9749_v10 = vld [vmem:[%s11011_s7 + $0xc94] ss:$8 sps:$4 sm:$0xff]  }
 0x29c   : > { %v7846_v11 = vpop.f32.mrf.mxu1  ;;  %8091 = vmatmul.mubr.bf16.vlgmr.msra.gmra.mxu1 %v8498_v63  ;;  %v7807_v15 = vpop.f32.mrf.mxu0  ;;  %8101 = vmatprep.subr.bf16.mxu0 %v9671_v48  ;;  %v9740_v63 = vld [vmem:[%s11011_s7 + $0xdb4] ss:$8 sps:$4 sm:$0xff]   ;;  %v9743_v48 = vld [vmem:[%s11011_s7 + $0xca4] ss:$8 sps:$4 sm:$0xff]  }
 0x29d   : > { %8141 = vmatpush1.bf16.msra.mxu1 %v9666_v6  ;;  %v11526_v17 = vadd.f32 %v7846_v11, %v7806_v12  ;;  %v7808_v8 = vadd.f32 %v7807_v15, %v11441_v2  ;;  %8172 = vmatprep.mubr.bf16.mxu1 %v8503_v7  ;;  %v9683_v2 = vld [vmem:[%s11011_s7 + $0xc44] ss:$8 sps:$4 sm:$0xff]   ;;  %v9738_v6 = vld [vmem:[%s11011_s7 + $0xdb0] ss:$8 sps:$4 sm:$0xff]   ;;  %v9744_v7 = vld [vmem:[%s11011_s7 + $0xda0] ss:$8 sps:$4 sm:$0xff]  }
 0x29e   : > { %v7848_v16 = vpop.f32.mrf.mxu1  ;;  %8142 = vmatprep.subr.bf16.mxu1 %v9674_v49  ;;  %v7809_v61 = vpop.f32.mrf.mxu0  ;;  %v9746_v49 = vld [vmem:[%s11011_s7 + $0xda4] ss:$8 sps:$4 sm:$0xff]   ;;  %v9752_v11 = vld [vmem:[%s11011_s7 + $0xd94] ss:$8 sps:$4 sm:$0xff]   ;;  %v9747_v12 = vld [vmem:[%s11011_s7 + $0xc90] ss:$8 sps:$4 sm:$0xff]  }
 0x29f   : > { %v11529_v20 = vadd.f32 %v7848_v16, %v7808_v8  ;;  %8102 = vmatpush1.bf16.msra.mxu0 %v9669_v13  ;;  %v9750_v13 = vld [vmem:[%s11011_s7 + $0xd90] ss:$8 sps:$4 sm:$0xff]   ;;  %v9758_v15 = vld [vmem:[%s11011_s7 + $0xd84] ss:$8 sps:$4 sm:$0xff]   ;;  %v9753_v16 = vld [vmem:[%s11011_s7 + $0xc80] ss:$8 sps:$4 sm:$0xff]   ;;  %v8500_v61 = vcombine.low %v11506_v3, %v11506_v3 }
 0x2a0   : > { %v7850_v9 = vpop.f32.mrf.mxu1  ;;  %v7810_v23 = vpop.f32.mrf.mxu0  ;;  %8103 = vmatprep.subr.bf16.mxu0 %v9677_v0  ;;  %v9756_v0 = vld [vmem:[%s11011_s7 + $0xd80] ss:$8 sps:$4 sm:$0xff]   ;;  %v9768_v8 = vld [vmem:[%s11011_s7 + $0xf74] ss:$8 sps:$4 sm:$0xff]   ;;  %v9771_v3 = vld [vmem:[%s11011_s7 + $0xe64] ss:$8 sps:$4 sm:$0xff]  }
 0x2a1   : > { %8143 = vmatpush1.bf16.msra.mxu1 %v9672_v14  ;;  %v9755_v14 = vld [vmem:[%s11011_s7 + $0xc84] ss:$8 sps:$4 sm:$0xff]   ;;  %v8502_v9 = vcombine.low %v11511_v4, %v11511_v4  ;;  %v9763_v23 = vld [vmem:[%s11011_s7 + $0xe70] ss:$8 sps:$4 sm:$0xff]  }
 0x2a2   : > { %v7851_v26 = vpop.f32.mrf.mxu1  ;;  %8144 = vmatprep.subr.bf16.mxu1 %v9680_v1  ;;  %v9765_v1 = vld [vmem:[%s11011_s7 + $0xe74] ss:$8 sps:$4 sm:$0xff]   ;;  %v9774_v4 = vld [vmem:[%s11011_s7 + $0xf64] ss:$8 sps:$4 sm:$0xff]  }
 0x2a3   : > { %8104 = vmatpush1.bf16.msra.mxu0 %v9675_v21  ;;  %v11594_v21 = vld [vmem:[%s11708_s0 + $0x70] sm:$0xff] }
 0x2a4   : > { %8105 = vmatprep.subr.bf16.mxu0 %v9683_v2  ;;  %v9766_v26 = vld [vmem:[%s11011_s7 + $0xf70] ss:$8 sps:$4 sm:$0xff]   ;;  %v8505_v2 = vcombine.high %v11594_v21, %v11594_v21 }
 0x2a5   : > { %8145 = vmatpush1.bf16.msra.mxu1 %v9678_v22  ;;  %v11599_v22 = vld [vmem:[%s11708_s0 + $0x78] sm:$0xff] }
 0x2a6   : > { %8146 = vmatprep.subr.bf16.mxu1 %v9686_v18  ;;  %v8507_v18 = vcombine.high %v11599_v22, %v11599_v22 }
 0x2a7   : > { %8106 = vmatpush1.bf16.msra.mxu0 %v9681_v27 }
 0x2a8   : > { %8107 = vmatprep.subr.bf16.mxu0 %v9689_v30 }
 0x2a9   : > { %8147 = vmatpush1.bf16.msra.mxu1 %v9684_v28 }
 0x2aa   : > { %8148 = vmatprep.subr.bf16.mxu1 %v9692_v31  ;;  %v9769_v31 = vld [vmem:[%s11011_s7 + $0xe60] ss:$8 sps:$4 sm:$0xff]  }
 0x2ab   : > { %8108 = vmatpush1.bf16.msra.mxu0 %v9687_v32  ;;  %v9772_v32 = vld [vmem:[%s11011_s7 + $0xf60] ss:$8 sps:$4 sm:$0xff]  }
 0x2ac   : > { %8109 = vmatprep.subr.bf16.mxu0 %v9695_v24 }
 0x2ad   : > { %8149 = vmatpush1.bf16.msra.mxu1 %v9690_v33 }
 0x2ae   : > { %8150 = vmatprep.subr.bf16.mxu1 %v9698_v25  ;;  %v9777_v25 = vld [vmem:[%s11011_s7 + $0xe54] ss:$8 sps:$4 sm:$0xff]  }
 0x2af   : > { %8110 = vmatpush1.bf16.msra.mxu0 %v9693_v34  ;;  %v9780_v34 = vld [vmem:[%s11011_s7 + $0xf54] ss:$8 sps:$4 sm:$0xff]  }
 0x2b0   : > { %8111 = vmatprep.subr.bf16.mxu0 %v9701_v36 }
 0x2b1   : > { %8151 = vmatpush1.bf16.msra.mxu1 %v9696_v35 }
 0x2b2   : > { %8152 = vmatprep.subr.bf16.mxu1 %v9704_v37 }
 0x2b3   : > { %8112 = vmatpush1.bf16.msra.mxu0 %v9699_v39 }
 0x2b4   : > { %8113 = vmatprep.subr.bf16.mxu0 %v9707_v41  ;;  %v9778_v41 = vld [vmem:[%s11011_s7 + $0xf50] ss:$8 sps:$4 sm:$0xff]  }
 0x2b5   : > { %8153 = vmatpush1.bf16.msra.mxu1 %v9702_v40  ;;  %v9775_v40 = vld [vmem:[%s11011_s7 + $0xe50] ss:$8 sps:$4 sm:$0xff]  }
 0x2b6   : > { %8154 = vmatprep.subr.bf16.mxu1 %v9710_v42 }
 0x2b7   : > { %8114 = vmatpush1.bf16.msra.mxu0 %v9705_v44 }
 0x2b8   : > { %8115 = vmatprep.subr.bf16.mxu0 %v9713_v46  ;;  %v9781_v46 = vld [vmem:[%s11011_s7 + $0xe40] ss:$8 sps:$4 sm:$0xff]  }
 0x2b9   : > { %8155 = vmatpush1.bf16.msra.mxu1 %v9708_v45  ;;  %v9786_v45 = vld [vmem:[%s11011_s7 + $0xf44] ss:$8 sps:$4 sm:$0xff]  }
 0x2ba   : > { %8156 = vmatprep.subr.bf16.mxu1 %v9716_v47  ;;  %v9784_v47 = vld [vmem:[%s11011_s7 + $0xf40] ss:$8 sps:$4 sm:$0xff]  }
 0x2bb   : > { %8116 = vmatpush2.bf16.msra.mxu0 %v9711_v50  ;;  %v9789_v50 = vld [vmem:[%s11011_s7 + $0xe34] ss:$8 sps:$4 sm:$0xff]  }
 0x2bc   : > { %8117 = vmatprep.subr.bf16.mxu0 %v9719_v51  ;;  %v9787_v51 = vld [vmem:[%s11011_s7 + $0xe30] ss:$8 sps:$4 sm:$0xff]  }
 0x2bd   : > { %8157 = vmatpush2.bf16.msra.mxu1 %v9714_v19  ;;  %v9792_v19 = vld [vmem:[%s11011_s7 + $0xf34] ss:$8 sps:$4 sm:$0xff]  }
 0x2be   : > { %8158 = vmatprep.subr.bf16.mxu1 %v9722_v29  ;;  %v9790_v29 = vld [vmem:[%s11011_s7 + $0xf30] ss:$8 sps:$4 sm:$0xff]  }
 0x2bf   : > { %8118 = vmatpush2.bf16.msra.mxu0 %v9717_v52  ;;  %v9795_v52 = vld [vmem:[%s11011_s7 + $0xe24] ss:$8 sps:$4 sm:$0xff]  }
 0x2c0   : > { %8119 = vmatprep.subr.bf16.mxu0 %v9725_v54  ;;  %v9793_v54 = vld [vmem:[%s11011_s7 + $0xe20] ss:$8 sps:$4 sm:$0xff]  }
 0x2c1   : > { %8159 = vmatpush2.bf16.msra.mxu1 %v9720_v53  ;;  %v9798_v53 = vld [vmem:[%s11011_s7 + $0xf24] ss:$8 sps:$4 sm:$0xff]  }
 0x2c2   : > { %8160 = vmatprep.subr.bf16.mxu1 %v9728_v55  ;;  %v9796_v55 = vld [vmem:[%s11011_s7 + $0xf20] ss:$8 sps:$4 sm:$0xff]  }
 0x2c3   : > { %8120 = vmatpush2.bf16.msra.mxu0 %v9723_v56  ;;  %v9801_v56 = vld [vmem:[%s11011_s7 + $0xe14] ss:$8 sps:$4 sm:$0xff]  }
 0x2c4   : > { %8121 = vmatprep.subr.bf16.mxu0 %v9731_v58  ;;  %v9799_v58 = vld [vmem:[%s11011_s7 + $0xe10] ss:$8 sps:$4 sm:$0xff]  }
 0x2c5   : > { %8161 = vmatpush2.bf16.msra.mxu1 %v9726_v57  ;;  %v9804_v57 = vld [vmem:[%s11011_s7 + $0xf14] ss:$8 sps:$4 sm:$0xff]  }
 0x2c6   : > { %8162 = vmatprep.subr.bf16.mxu1 %v9734_v59  ;;  %v9802_v59 = vld [vmem:[%s11011_s7 + $0xf10] ss:$8 sps:$4 sm:$0xff]  }
 0x2c7   : > { %8122 = vmatpush2.bf16.msra.mxu0 %v9729_v60  ;;  %v9807_v60 = vld [vmem:[%s11011_s7 + $0xe04] ss:$8 sps:$4 sm:$0xff]  }
 0x2c8   : > { %8123 = vmatprep.subr.bf16.mxu0 %v9737_v38  ;;  %v9805_v38 = vld [vmem:[%s11011_s7 + $0xe00] ss:$8 sps:$4 sm:$0xff]  }
 0x2c9   : > { %8163 = vmatpush2.bf16.msra.mxu1 %v9732_v62  ;;  %v9810_v62 = vld [vmem:[%s11011_s7 + $0xf04] ss:$8 sps:$4 sm:$0xff]  }
 0x2ca   : > { %8164 = vmatprep.subr.bf16.mxu1 %v9740_v63  ;;  %v9808_v63 = vld [vmem:[%s11011_s7 + $0xf00] ss:$8 sps:$4 sm:$0xff]  }
 0x2cb   : > { %8124 = vmatpush2.bf16.msra.mxu0 %v9735_v5  ;;  %v9813_v5 = vld [vmem:[%s11011_s7 + $0xef4] ss:$8 sps:$4 sm:$0xff]  }
 0x2cc   : > { %8125 = vmatprep.subr.bf16.mxu0 %v9743_v48  ;;  %v9811_v48 = vld [vmem:[%s11011_s7 + $0xef0] ss:$8 sps:$4 sm:$0xff]  }
 0x2cd   : > { %8165 = vmatpush2.bf16.msra.mxu1 %v9738_v6  ;;  %v9816_v6 = vld [vmem:[%s11011_s7 + $0xff4] ss:$8 sps:$4 sm:$0xff]  }
 0x2ce   : > { %8166 = vmatprep.subr.bf16.mxu1 %v9746_v49  ;;  %v9814_v49 = vld [vmem:[%s11011_s7 + $0xff0] ss:$8 sps:$4 sm:$0xff]  }
 0x2cf   : > { %8126 = vmatpush2.bf16.msra.mxu0 %v9741_v43  ;;  %v9819_v43 = vld [vmem:[%s11011_s7 + $0xee4] ss:$8 sps:$4 sm:$0xff]  }
 0x2d0   : > { %8127 = vmatprep.subr.bf16.mxu0 %v9749_v10  ;;  %v9817_v10 = vld [vmem:[%s11011_s7 + $0xee0] ss:$8 sps:$4 sm:$0xff]  }
 0x2d1   : > { %8167 = vmatpush2.bf16.msra.mxu1 %v9744_v7  ;;  %v9822_v7 = vld [vmem:[%s11011_s7 + $0xfe4] ss:$8 sps:$4 sm:$0xff]  }
 0x2d2   : > { %8168 = vmatprep.subr.bf16.mxu1 %v9752_v11  ;;  %v9820_v11 = vld [vmem:[%s11011_s7 + $0xfe0] ss:$8 sps:$4 sm:$0xff]  }
 0x2d3   : > { %8128 = vmatpush2.bf16.msra.mxu0 %v9747_v12  ;;  %v9825_v12 = vld [vmem:[%s11011_s7 + $0xed4] ss:$8 sps:$4 sm:$0xff]  }
 0x2d4   : > { %8129 = vmatprep.subr.bf16.mxu0 %v9755_v14  ;;  %v9823_v14 = vld [vmem:[%s11011_s7 + $0xed0] ss:$8 sps:$4 sm:$0xff]  }
 0x2d5   : > { %8169 = vmatpush2.bf16.msra.mxu1 %v9750_v13  ;;  %v9828_v13 = vld [vmem:[%s11011_s7 + $0xfd4] ss:$8 sps:$4 sm:$0xff]  }
 0x2d6   : > { %8170 = vmatprep.subr.bf16.mxu1 %v9758_v15  ;;  %v9826_v15 = vld [vmem:[%s11011_s7 + $0xfd0] ss:$8 sps:$4 sm:$0xff]  }
 0x2d7   : > { %8130 = vmatpush2.bf16.msra.mxu0 %v9753_v16  ;;  %v9831_v16 = vld [vmem:[%s11011_s7 + $0xec4] ss:$8 sps:$4 sm:$0xff]  }
 0x2d8   : > { %8181 = vmatprep.subr.bf16.mxu0 %v9765_v1  ;;  %v9829_v1 = vld [vmem:[%s11011_s7 + $0xec0] ss:$8 sps:$4 sm:$0xff]  }
 0x2d9   : > { %8171 = vmatpush2.bf16.msra.mxu1 %v9756_v0  ;;  %v9834_v0 = vld [vmem:[%s11011_s7 + $0xfc4] ss:$8 sps:$4 sm:$0xff]  }
 0x2da   : > { %8222 = vmatprep.subr.bf16.mxu1 %v9768_v8  ;;  %v7887_v27 = vpop.f32.mrf.mxu0  ;;  %8132 = vmatmul.mubr.bf16.vlgmr.msra.gmra.mxu0 %v8500_v61  ;;  %v9832_v8 = vld [vmem:[%s11011_s7 + $0xfc0] ss:$8 sps:$4 sm:$0xff]   ;;  %v9837_v61 = vld [vmem:[%s11011_s7 + $0xeb4] ss:$8 sps:$4 sm:$0xff]  }
 0x2db   : > { %v7888_v30 = vadd.f32 %v7887_v27, %v11526_v17  ;;  %8182 = vmatpush1.bf16.msra.mxu0 %v9763_v23  ;;  %8213 = vmatprep.mubr.bf16.mxu0 %v8505_v2  ;;  %v9835_v23 = vld [vmem:[%s11011_s7 + $0xeb0] ss:$8 sps:$4 sm:$0xff]   ;;  %v9841_v2 = vld [vmem:[%s11011_s7 + $0xea0] ss:$8 sps:$4 sm:$0xff]   ;;  %v9849_v27 = vld [vmem:[%s11011_s7 + $0xe94] ss:$8 sps:$4 sm:$0xff]  }
 0x2dc   : > { %v7928_v28 = vpop.f32.mrf.mxu1  ;;  %8173 = vmatmul.mubr.bf16.vlgmr.msra.gmra.mxu1 %v8502_v9  ;;  %v7889_v33 = vpop.f32.mrf.mxu0  ;;  %8183 = vmatprep.subr.bf16.mxu0 %v9771_v3  ;;  %v9840_v9 = vld [vmem:[%s11011_s7 + $0xfb4] ss:$8 sps:$4 sm:$0xff]   ;;  %v9843_v3 = vld [vmem:[%s11011_s7 + $0xea4] ss:$8 sps:$4 sm:$0xff]  }
 0x2dd   : > { %8223 = vmatpush1.bf16.msra.mxu1 %v9766_v26  ;;  %v11614_v35 = vadd.f32 %v7928_v28, %v7888_v30  ;;  %v7890_v36 = vadd.f32 %v7889_v33, %v11529_v20  ;;  %8254 = vmatprep.mubr.bf16.mxu1 %v8507_v18  ;;  %v9783_v20 = vld [vmem:[%s11011_s7 + $0xe44] ss:$8 sps:$4 sm:$0xff]   ;;  %v9838_v26 = vld [vmem:[%s11011_s7 + $0xfb0] ss:$8 sps:$4 sm:$0xff]   ;;  %v9844_v18 = vld [vmem:[%s11011_s7 + $0xfa0] ss:$8 sps:$4 sm:$0xff]  }
 0x2de   : > { %v7930_v24 = vpop.f32.mrf.mxu1  ;;  %8224 = vmatprep.subr.bf16.mxu1 %v9774_v4  ;;  %v7891_v17 = vpop.f32.mrf.mxu0  ;;  %v9846_v4 = vld [vmem:[%s11011_s7 + $0xfa4] ss:$8 sps:$4 sm:$0xff]   ;;  %v9852_v28 = vld [vmem:[%s11011_s7 + $0xf94] ss:$8 sps:$4 sm:$0xff]   ;;  %v9847_v30 = vld [vmem:[%s11011_s7 + $0xe90] ss:$8 sps:$4 sm:$0xff]  }
 0x2df   : > { %v11617_v39 = vadd.f32 %v7930_v24, %v7890_v36  ;;  %8184 = vmatpush1.bf16.msra.mxu0 %v9769_v31  ;;  %v9850_v31 = vld [vmem:[%s11011_s7 + $0xf90] ss:$8 sps:$4 sm:$0xff]   ;;  %v9858_v33 = vld [vmem:[%s11011_s7 + $0xf84] ss:$8 sps:$4 sm:$0xff]   ;;  %v9853_v24 = vld [vmem:[%s11011_s7 + $0xe80] ss:$8 sps:$4 sm:$0xff]   ;;  %v8506_v36 = vcombine.low %v11599_v22, %v11599_v22 }
 0x2e0   : > { %v7932_v37 = vpop.f32.mrf.mxu1  ;;  %v7892_v42 = vpop.f32.mrf.mxu0  ;;  %8185 = vmatprep.subr.bf16.mxu0 %v9777_v25  ;;  %v9856_v25 = vld [vmem:[%s11011_s7 + $0xf80] ss:$8 sps:$4 sm:$0xff]  }
 0x2e1   : > { %8225 = vmatpush1.bf16.msra.mxu1 %v9772_v32  ;;  %v9855_v32 = vld [vmem:[%s11011_s7 + $0xe84] ss:$8 sps:$4 sm:$0xff]   ;;  %s8472_s7 = sshll.u32 %s9893_s14, 1 }
 0x2e2   : > { %v7933_v44 = vpop.f32.mrf.mxu1  ;;  %8226 = vmatprep.subr.bf16.mxu1 %v9780_v34  ;;  %v8504_v34 = vcombine.low %v11594_v21, %v11594_v21  ;;  %p4390_p9 = scmp.lt.s32.totalorder %s8472_s7, 3 }
 0x2e3   : > { %8186 = vmatpush1.bf16.msra.mxu0 %v9775_v40 }
 0x2e4   : > { %8187 = vmatprep.subr.bf16.mxu0 %v9783_v20  ;;  %s11719_s7 = smov (!%p4390_p9, %s8472_s7), 3 }
 0x2e5   : > { %8227 = vmatpush1.bf16.msra.mxu1 %v9778_v41  ;;  %s8473_s22 = sshll.u32 %s11719_s7, 3 }
 0x2e6   : > { %8228 = vmatprep.subr.bf16.mxu1 %v9786_v45  ;;  %s4395_s25 = scalar_lea.vmem %s11710_s2, %s8473_s22  ;;  %s4405_s27 = scalar_lea.vmem %s11711_s3, %s8473_s22 }
 0x2e7   : > { %8188 = vmatpush1.bf16.msra.mxu0 %v9781_v46 }
 0x2e8   : > { %8189 = vmatprep.subr.bf16.mxu0 %v9789_v50 }
 0x2e9   : > { %8229 = vmatpush1.bf16.msra.mxu1 %v9784_v47 }
 0x2ea   : > { %8230 = vmatprep.subr.bf16.mxu1 %v9792_v19 }
 0x2eb   : > { %8190 = vmatpush1.bf16.msra.mxu0 %v9787_v51 }
 0x2ec   : > { %8191 = vmatprep.subr.bf16.mxu0 %v9795_v52 }
 0x2ed   : > { %8231 = vmatpush1.bf16.msra.mxu1 %v9790_v29 }
 0x2ee   : > { %8232 = vmatprep.subr.bf16.mxu1 %v9798_v53 }
 0x2ef   : > { %8192 = vmatpush1.bf16.msra.mxu0 %v9793_v54 }
 0x2f0   : > { %8193 = vmatprep.subr.bf16.mxu0 %v9801_v56 }
 0x2f1   : > { %8233 = vmatpush1.bf16.msra.mxu1 %v9796_v55 }
 0x2f2   : > { %8234 = vmatprep.subr.bf16.mxu1 %v9804_v57 }
 0x2f3   : > { %8194 = vmatpush1.bf16.msra.mxu0 %v9799_v58 }
 0x2f4   : > { %8195 = vmatprep.subr.bf16.mxu0 %v9807_v60 }
 0x2f5   : > { %8235 = vmatpush1.bf16.msra.mxu1 %v9802_v59 }
 0x2f6   : > { %8236 = vmatprep.subr.bf16.mxu1 %v9810_v62 }
 0x2f7   : > { %8196 = vmatpush1.bf16.msra.mxu0 %v9805_v38 }
 0x2f8   : > { %8197 = vmatprep.subr.bf16.mxu0 %v9813_v5 }
 0x2f9   : > { %8237 = vmatpush1.bf16.msra.mxu1 %v9808_v63 }
 0x2fa   : > { %8238 = vmatprep.subr.bf16.mxu1 %v9816_v6 }
 0x2fb   : > { %8198 = vmatpush2.bf16.msra.mxu0 %v9811_v48 }
 0x2fc   : > { %8199 = vmatprep.subr.bf16.mxu0 %v9819_v43 }
 0x2fd   : > { %8239 = vmatpush2.bf16.msra.mxu1 %v9814_v49 }
 0x2fe   : > { %8240 = vmatprep.subr.bf16.mxu1 %v9822_v7 }
 0x2ff   : > { %8200 = vmatpush2.bf16.msra.mxu0 %v9817_v10 }
 0x300   : > { %8201 = vmatprep.subr.bf16.mxu0 %v9825_v12 }
 0x301   : > { %8241 = vmatpush2.bf16.msra.mxu1 %v9820_v11 }
 0x302   : > { %8242 = vmatprep.subr.bf16.mxu1 %v9828_v13 }
 0x303   : > { %8202 = vmatpush2.bf16.msra.mxu0 %v9823_v14 }
 0x304   : > { %8203 = vmatprep.subr.bf16.mxu0 %v9831_v16 }
 0x305   : > { %8243 = vmatpush2.bf16.msra.mxu1 %v9826_v15 }
 0x306   : > { %8244 = vmatprep.subr.bf16.mxu1 %v9834_v0 }
 0x307   : > { %8204 = vmatpush2.bf16.msra.mxu0 %v9829_v1 }
 0x308   : > { %8205 = vmatprep.subr.bf16.mxu0 %v9837_v61 }
 0x309   : > { %8245 = vmatpush2.bf16.msra.mxu1 %v9832_v8 }
 0x30a   : > { %8246 = vmatprep.subr.bf16.mxu1 %v9840_v9 }
 0x30b   : > { %8206 = vmatpush2.bf16.msra.mxu0 %v9835_v23 }
 0x30c   : > { %8207 = vmatprep.subr.bf16.mxu0 %v9843_v3 }
 0x30d   : > { %8247 = vmatpush2.bf16.msra.mxu1 %v9838_v26 }
 0x30e   : > { %8248 = vmatprep.subr.bf16.mxu1 %v9846_v4 }
 0x30f   : > { %8208 = vmatpush2.bf16.msra.mxu0 %v9841_v2 }
 0x310   : > { %8209 = vmatprep.subr.bf16.mxu0 %v9849_v27 }
 0x311   : > { %8249 = vmatpush2.bf16.msra.mxu1 %v9844_v18 }
 0x312   : > { %8250 = vmatprep.subr.bf16.mxu1 %v9852_v28 }
 0x313   : > { %8210 = vmatpush2.bf16.msra.mxu0 %v9847_v30 }
 0x314   : > { %8211 = vmatprep.subr.bf16.mxu0 %v9855_v32 }
 0x315   : > { %8251 = vmatpush2.bf16.msra.mxu1 %v9850_v31 }
 0x316   : > { %8252 = vmatprep.subr.bf16.mxu1 %v9858_v33 }
 0x317   : > { %8212 = vmatpush2.bf16.msra.mxu0 %v9853_v24 }
 0x319   : > { %8253 = vmatpush2.bf16.msra.mxu1 %v9856_v25 }
 0x31a   : > { %v7969_v17 = vpop.f32.mrf.mxu0  ;;  %8214 = vmatmul.mubr.bf16.vlgmr.msra.gmra.mxu0 %v8504_v34 }
 0x31b   : > { %v7970_v40 = vadd.f32 %v7969_v17, %v11614_v35 }
 0x31c   : > { %v8010_v37 = vpop.f32.mrf.mxu1  ;;  %8255 = vmatmul.mubr.bf16.vlgmr.msra.gmra.mxu1 %v8506_v36  ;;  %v7971_v41 = vpop.f32.mrf.mxu0 }
 0x31d   : > { %v8011_v44 = vadd.f32 %v8010_v37, %v7970_v40  ;;  %v7972_v20 = vadd.f32 %v7971_v41, %v11617_v39 }
 0x31e   : > { %v8012_v42 = vpop.f32.mrf.mxu1  ;;  %v7973_v45 = vpop.f32.mrf.mxu0 }
 0x31f   : > { %v8013_v47 = vadd.f32 %v8012_v42, %v7972_v20 }
 0x320   : > { %v8014_v46 = vpop.f32.mrf.mxu1  ;;  %v7974_v21 = vpop.f32.mrf.mxu0 }
 0x322   : > { %v8015_v50 = vpop.f32.mrf.mxu1 }
 0x35a   : > { %v8051_v19 = vpop.f32.mrf.mxu0 }
 0x35b   : > { %v8052_v51 = vadd.f32 %v8051_v19, %v8011_v44 }
 0x35c   : > { %v8092_v22 = vpop.f32.mrf.mxu1  ;;  %v8053_v29 = vpop.f32.mrf.mxu0 }
 0x35d   : > { %v8093_v53 = vadd.f32 %v8092_v22, %v8052_v51  ;;  %v8054_v54 = vadd.f32 %v8053_v29, %v8013_v47 }
 0x35e   : > { %v8094_v52 = vpop.f32.mrf.mxu1  ;;  %v8055_v55 = vpop.f32.mrf.mxu0 }
 0x35f   : > { %v8095_v56 = vadd.f32 %v8094_v52, %v8054_v54 }
 0x360   : > { %v8096_v35 = vpop.f32.mrf.mxu1  ;;  %v8056_v57 = vpop.f32.mrf.mxu0 }
 0x362   : > { %v8097_v58 = vpop.f32.mrf.mxu1 }
 0x39a   : > { %v8133_v59 = vpop.f32.mrf.mxu0 }
 0x39b   : > { %v8134_v48 = vadd.f32 %v8133_v59, %v8093_v53 }
 0x39c   : > { %v8174_v39 = vpop.f32.mrf.mxu1  ;;  %v8135_v60 = vpop.f32.mrf.mxu0 }
 0x39d   : > { %v8136_v49 = vadd.f32 %v8135_v60, %v8095_v56  ;;  %v8175_v43 = vadd.f32 %v8174_v39, %v8134_v48 }
 0x39e   : > { %v8176_v62 = vpop.f32.mrf.mxu1  ;;  %v8137_v38 = vpop.f32.mrf.mxu0 }
 0x39f   : > { %v8177_v11 = vadd.f32 %v8176_v62, %v8136_v49 }
 0x3a0   : > { %v8178_v63 = vpop.f32.mrf.mxu1  ;;  %v8138_v5 = vpop.f32.mrf.mxu0 }
 0x3a2   : > { %v8179_v6 = vpop.f32.mrf.mxu1 }
 0x3da   : > { %v8215_v7 = vpop.f32.mrf.mxu0 }
 0x3db   : > { %v8216_v12 = vadd.f32 %v8215_v7, %v8175_v43 }
 0x3dc   : > { %v8256_v10 = vpop.f32.mrf.mxu1  ;;  %v8217_v13 = vpop.f32.mrf.mxu0 }
 0x3dd   : > { %v8257_v15 = vadd.f32 %v8256_v10, %v8216_v12  ;;  %v8218_v16 = vadd.f32 %v8217_v13, %v8177_v11 }
 0x3de   : > { %v8258_v14 = vpop.f32.mrf.mxu1  ;;  %v8219_v0 = vpop.f32.mrf.mxu0 }
 0x3df   : > { %8263 = vst [vmem:[%s4395_s25] sm:$0xff] %v8257_v15  ;;  %v8259_v8 = vadd.f32 %v8258_v14, %v8218_v16 }
 0x3e0   : > { %v8260_v1 = vpop.f32.mrf.mxu1  ;;  %v8220_v61 = vpop.f32.mrf.mxu0 }
 0x3e1   : > { %8264 = vst [vmem:[%s4395_s25 + $0x8] sm:$0xff] %v8259_v8  ;;  %v8273_v23 = vrot.slane %v8259_v8, 4  ;;  %v8280_v26 = vmul.f32 %v8259_v8, %v8259_v8 }
 0x3e2   : > { %v8261_v9 = vpop.f32.mrf.mxu1 }
 0x3e3   : > { %v8287_v3 = vrot.slane %v8280_v26, 4  ;;  %v8274_v4 = vadd.f32 %v8273_v23, %v8259_v8 }
 0x3e5   : > { %v8288_v2 = vadd.f32 %v8287_v3, %v8280_v26  ;;  %v8275_v28 = vrot.slane %v8274_v4, 2 }
 0x3e6   : > { %v8265_v27 = vld [vmem:[%s4395_s25] sm:$0xff] }
 0x3e7   : > { %v8289_v18 = vrot.slane %v8288_v2, 2  ;;  %v8267_v30 = vrot.slane %v8265_v27, 4  ;;  %v8279_v31 = vmul.f32 %v8265_v27, %v8265_v27  ;;  %v8276_v25 = vadd.f32 %v8275_v28, %v8274_v4 }
 0x3e9   : > { %v8290_v32 = vadd.f32 %v8289_v18, %v8288_v2  ;;  %v8268_v33 = vadd.f32 %v8267_v30, %v8265_v27  ;;  %v8281_v24 = vrot.slane %v8279_v31, 4  ;;  %v8277_v41 = vrot.slane %v8276_v25, 1 }
 0x3eb   : > { %v8269_v34 = vrot.slane %v8268_v33, 2  ;;  %v8282_v36 = vadd.f32 %v8281_v24, %v8279_v31  ;;  %v8291_v17 = vrot.slane %v8290_v32, 1  ;;  %v8278_v46 = vadd.f32 %v8277_v41, %v8276_v25 }
 0x3ed   : > { %v8270_v37 = vadd.f32 %v8269_v34, %v8268_v33  ;;  %v8283_v40 = vrot.slane %v8282_v36, 2  ;;  %v8292_v20 = vadd.f32 %v8291_v17, %v8290_v32 }
 0x3ef   : > { %v8271_v42 = vrot.slane %v8270_v37, 1  ;;  %v8284_v44 = vadd.f32 %v8283_v40, %v8282_v36  ;;  %v8295_v50 = vsel %vm8293_vm0, %v8278_v46, %v8292_v20 }
 0x3f0   : > { %v8298_v51 = vsel %vm8296_vm1, %v8295_v50, 0.0 }
 0x3f1   : > { %v8285_v45 = vrot.slane %v8284_v44, 1  ;;  %v8272_v47 = vadd.f32 %v8271_v42, %v8270_v37  ;;  %8300 = vst [vmem:[%s4405_s27 + $0x8] sm:$0xff] %v8298_v51 }
 0x3f3   : > { %v8286_v21 = vadd.f32 %v8285_v45, %v8284_v44 }
 0x3f5   : > { %v8294_v19 = vsel %vm8293_vm0, %v8272_v47, %v8286_v21 }
 0x3f6   : > { %v8297_v22 = vsel %vm8296_vm1, %v8294_v19, 0.0 }
 0x3f7   : > { %8299 = vst [vmem:[%s4405_s27] sm:$0xff] %v8297_v22 }
 0x3f8 PF: > { %s14_s16 = sadd.s32 1, %s9901_s16   ;;  %s11712_s12 = smov %s9889_s13 }
 0x3f9   : > { %p11_p10 = scmp.ge.s32.totalorder %s14_s16, 4   ;;  %s11713_s13 = smov %s9958_s20 }
 0x3fa   : > { %s11714_s14 = smov %s9897_s15  ;;  %s11715_s15 = smov %s11717_s17 }
 0x3fb   :  { %13 = sbr.rel (!%p11_p10) target bundleno = 3 (0x3), region = 136 }

</bundles_post_ra>
